<compile_context>
chip_gen: v6e
topology: v6e:2x2x1
jax: 0.10.0
libtpu: 0.0.40
codegen_flags: <defaults>
</compile_context>

<pallas_src>
import functools
import numpy as np
import jax
import jax.numpy as jnp
from jax.experimental import pallas as pl
from jax.experimental.pallas import tpu as pltpu

T = 4            # spiking time window
DECAY = 0.25
THRESH = 0.5
BN_EPS = 1e-5
LN_EPS = 1e-5
NEG_INF = -1e9   # cross-window mask -> exact zero after softmax (exp underflow)


# ------------------------------------------------------------------
# In-kernel helpers
# ------------------------------------------------------------------

def _lif_flat(drive, t_steps, rows):
    """LIF recurrence on a time-stacked drive.

    drive: (t_steps*rows, ch) f32 membrane drive (time-major row blocks).
    Returns spikes (t_steps*rows, ch) f32 in {0,1}.
    """
    outs = []
    mem = drive[0:rows]
    spk = (mem > THRESH).astype(jnp.float32)
    outs.append(spk)
    for t in range(1, t_steps):
        mem = mem * DECAY * (1.0 - spk) + drive[t * rows:(t + 1) * rows]
        spk = (mem > THRESH).astype(jnp.float32)
        outs.append(spk)
    return jnp.concatenate(outs, axis=0)


def _layernorm(x, w_ref, b_ref):
    mu = jnp.mean(x, axis=-1, keepdims=True)
    xc = x - mu
    var = jnp.mean(xc * xc, axis=-1, keepdims=True)
    return xc * jax.lax.rsqrt(var + LN_EPS) * w_ref[...] + b_ref[...]


def _swin_block_kernel(x_ref, ln1w_ref, ln1b_ref, wqkv_ref, bqkv_ref, bias_ref,
                       wp_ref, bp_ref, ln2w_ref, ln2b_ref, w1_ref, b1_ref,
                       w2_ref, b2_ref, o_ref, *, num_heads, scale):
    """Entire SwinTransformerBlock for one batch element, in window token order.

    x_ref : (1, T, R, C) f32, R = nW * N tokens (window-partitioned, maybe shifted)
    bias  : (nh, R, R) f32 additive attention bias (rel-pos + shift mask + -1e9
            for cross-window pairs).
    o_ref : (1, T, R, C) f32 output of the full block (both residuals applied).
    """
    _, Tt, R, C = x_ref.shape
    nh = num_heads
    hd = C // nh
    rows = Tt * R

    x = x_ref[0].astype(jnp.float32)                 # (T, R, C)
    xf = x.reshape(rows, C)

    # ---- LN1 + fused q/k/v 1x1 conv (+folded BN), hoisted over time ----
    xln = _layernorm(xf, ln1w_ref, ln1b_ref)
    hqkv = jnp.dot(xln.astype(jnp.bfloat16), wqkv_ref[...],
                   preferred_element_type=jnp.float32) + bqkv_ref[...]
    # q/k/v LIF (elementwise; one pass over all 3C channels)
    sqkv = _lif_flat(hqkv, Tt, R)                    # (rows, 3C) spikes, f32

    # ---- window attention (per head, windows packed into lanes) ----
    wp = wp_ref[...]                                 # (C, C) bf16
    proj_in = jnp.zeros((rows, C), jnp.float32)
    for h in range(nh):
        qh = sqkv[:, h * hd:(h + 1) * hd].reshape(Tt, R, hd).astype(jnp.bfloat16)
        kh = sqkv[:, C + h * hd:C + (h + 1) * hd].reshape(Tt, R, hd).astype(jnp.bfloat16)
        vh = sqkv[:, 2 * C + h * hd:2 * C + (h + 1) * hd].reshape(Tt, R, hd)

        # scores over all windows at once; cross-window pairs masked by -1e9
        s = jax.lax.dot_general(qh, kh, (((2,), (2,)), ((0,), (0,))),
                                preferred_element_type=jnp.float32)   # (T, R, R)
        s = s * scale + bias_ref[h][None]
        s = s - jnp.max(s, axis=-1, keepdims=True)
        p = jnp.exp(s)
        p = p / jnp.sum(p, axis=-1, keepdims=True)   # exact division (no approx)

        yh = jax.lax.dot_general(p, vh, (((2,), (1,)), ((0,), (0,))),
                                 preferred_element_type=jnp.float32)  # (T, R, hd)

        # attn LIF (layout-agnostic, per head) + per-head proj contribution:
        # out[:, c] = sum_h spike_h @ Wp[h*hd:(h+1)*hd, :]  (no channel-concat)
        sh = _lif_flat(yh.reshape(rows, hd), Tt, R)
        proj_in = proj_in + jnp.dot(sh.astype(jnp.bfloat16),
                                    wp[h * hd:(h + 1) * hd, :],
                                    preferred_element_type=jnp.float32)
    proj_in = proj_in + bp_ref[...]

    # ---- proj LIF + residual 1 (drop_path = identity) ----
    sp = _lif_flat(proj_in, Tt, R)                   # (rows, C)
    xres = xf + sp

    # ---- LN2 + MLP fc1(+BN)+LIF + fc2(+BN)+LIF + residual 2 ----
    xln2 = _layernorm(xres, ln2w_ref, ln2b_ref)
    h1 = jnp.dot(xln2.astype(jnp.bfloat16), w1_ref[...],
                 preferred_element_type=jnp.float32) + b1_ref[...]
    s1 = _lif_flat(h1, Tt, R)                        # (rows, Hd)
    h2 = jnp.dot(s1.astype(jnp.bfloat16), w2_ref[...],
                 preferred_element_type=jnp.float32) + b2_ref[...]
    s2 = _lif_flat(h2, Tt, R)                        # (rows, C)
    out = xres + s2
    o_ref[0] = out.reshape(Tt, R, C)


# ------------------------------------------------------------------
# pallas_call wrapper (one call per Swin block)
# ------------------------------------------------------------------

def swin_block(x_win, bp, bias, *, num_heads, scale):
    """x_win: (B0, T, R, C) f32 in window token order -> same shape, full block."""
    B0, Tt, R, C = x_win.shape
    Hd = bp['w1'].shape[1]
    nh = num_heads

    def full(shape):
        return pl.BlockSpec(shape, lambda b, _n=len(shape): (0,) * _n)

    kernel = functools.partial(_swin_block_kernel, num_heads=nh, scale=scale)
    return pl.pallas_call(
        kernel,
        out_shape=jax.ShapeDtypeStruct((B0, Tt, R, C), jnp.float32),
        grid=(B0,),
        in_specs=[
            pl.BlockSpec((1, Tt, R, C), lambda b: (b, 0, 0, 0)),   # x
            full((1, C)), full((1, C)),                            # ln1 w, b
            full((C, 3 * C)), full((1, 3 * C)),                    # wqkv, bqkv
            full((nh, R, R)),                                       # attention bias
            full((C, C)), full((1, C)),                             # wproj, bproj
            full((1, C)), full((1, C)),                             # ln2 w, b
            full((C, Hd)), full((1, Hd)),                           # w1, b1
            full((Hd, C)), full((1, C)),                            # w2, b2
        ],
        out_specs=pl.BlockSpec((1, Tt, R, C), lambda b: (b, 0, 0, 0)),
        compiler_params=pltpu.CompilerParams(
            dimension_semantics=("parallel",),
            vmem_limit_bytes=32 * 1024 * 1024),
    )(x_win, bp['ln1_w'], bp['ln1_b'], bp['wqkv'], bp['bqkv'], bias,
      bp['wproj'], bp['bproj'], bp['ln2_w'], bp['ln2_b'],
      bp['w1'], bp['b1'], bp['w2'], bp['b2'])


# ------------------------------------------------------------------
# Window partition / reverse glue (tiny XLA permutations, time-major layout)
# ------------------------------------------------------------------

def window_partition_tm(x5, ws, shift):
    """(T, B0, H, W, C) -> (B0, T, nW*N, C), with optional cyclic shift."""
    Tt, B0, H, W, C = x5.shape
    if shift > 0:
        x5 = jnp.roll(x5, shift=(-shift, -shift), axis=(2, 3))
    Hn, Wn = H // ws, W // ws
    xw = x5.reshape(Tt, B0, Hn, ws, Wn, ws, C)
    xw = xw.transpose(1, 0, 2, 4, 3, 5, 6)           # (B0, T, Hn, Wn, ws, ws, C)
    return xw.reshape(B0, Tt, Hn * Wn * ws * ws, C)


def window_reverse_tm(xw, ws, shift, H, W):
    """(B0, T, nW*N, C) -> (T, B0, H, W, C), undoing shift."""
    B0, Tt, R, C = xw.shape
    Hn, Wn = H // ws, W // ws
    x = xw.reshape(B0, Tt, Hn, Wn, ws, ws, C)
    x = x.transpose(1, 0, 2, 4, 3, 5, 6)             # (T, B0, Hn, ws, Wn, ws, C)
    x = x.reshape(Tt, B0, H, W, C)
    if shift > 0:
        x = jnp.roll(x, shift=(shift, shift), axis=(2, 3))
    return x


# ------------------------------------------------------------------
# Static masks / bias
# ------------------------------------------------------------------

def relative_position_index(ws):
    coords = np.stack(np.meshgrid(np.arange(ws), np.arange(ws), indexing='ij'))
    flat = coords.reshape(2, -1)
    rel = (flat[:, :, None] - flat[:, None, :]).transpose(1, 2, 0).astype(np.int64)
    rel[:, :, 0] += ws - 1
    rel[:, :, 1] += ws - 1
    rel[:, :, 0] *= 2 * ws - 1
    return rel.sum(-1)                               # (N, N)


def create_mask(H, W, ws, shift):
    Hp = int(np.ceil(H / ws)) * ws
    Wp = int(np.ceil(W / ws)) * ws
    img_mask = np.zeros((1, Hp, Wp, 1), np.float32)
    h_slices = (slice(0, -ws), slice(-ws, -shift), slice(-shift, None))
    w_slices = (slice(0, -ws), slice(-ws, -shift), slice(-shift, None))
    cnt = 0
    for h in h_slices:
        for w in w_slices:
            img_mask[:, h, w, :] = cnt
            cnt += 1
    mw = img_mask.reshape(1, Hp // ws, ws, Wp // ws, ws, 1)
    mw = mw.transpose(0, 1, 3, 2, 4, 5).reshape(-1, ws * ws)
    attn_mask = mw[:, None, :] - mw[:, :, None]
    return np.where(attn_mask != 0, -100.0, 0.0).astype(np.float32)   # (nW, N, N)


def build_attention_bias(rel, mask_w, nW, N):
    """rel: (nh, N, N); mask_w: (nW, N, N) -> (nh, nW*N, nW*N) full additive bias.

    Same-window blocks get rel-pos bias + shift mask; cross-window pairs get
    -1e9, which becomes an exact zero after the softmax's max-subtraction.
    """
    block = rel[:, None, :, :] + mask_w[None, :, :, :]        # (nh, nW, N, N)
    same_w = jnp.eye(nW, dtype=bool)[None, :, None, :, None]  # (1, nW, 1, nW, 1)
    full = jnp.where(same_w, block[:, :, :, None, :], NEG_INF)
    return full.reshape(rel.shape[0], nW * N, nW * N).astype(jnp.float32)


# ------------------------------------------------------------------
# Parameters (eval-mode BN folded once at preparation time)
# ------------------------------------------------------------------

def _uniform(key, shape, bound):
    return jax.random.uniform(key, shape, jnp.float32, -bound, bound)


def init_block_params(key, dim, num_heads, window_size, hidden):
    ks = jax.random.split(key, 10)
    inv = 1.0 / np.sqrt(dim)
    invh = 1.0 / np.sqrt(hidden)
    ones = lambda n: jnp.ones((n,), jnp.float32)
    zeros = lambda n: jnp.zeros((n,), jnp.float32)
    return dict(
        ln1_w=ones(dim), ln1_b=zeros(dim),
        ln2_w=ones(dim), ln2_b=zeros(dim),
        rpb_table=0.02 * jax.random.truncated_normal(
            ks[0], -2.0, 2.0, ((2 * window_size - 1) ** 2, num_heads), jnp.float32),
        wq=_uniform(ks[1], (dim, dim), inv),      # Conv1d(dim,dim,1,bias=False): (Cout,Cin)
        wk=_uniform(ks[2], (dim, dim), inv),
        wv=_uniform(ks[3], (dim, dim), inv),
        wproj=_uniform(ks[4], (dim, dim), inv),   # Conv1d(dim,dim,1) with bias
        bproj=_uniform(ks[5], (dim,), inv),
        w1=_uniform(ks[6], (hidden, dim), inv),   # Linear(dim, hidden)
        b1=_uniform(ks[7], (hidden,), inv),
        w2=_uniform(ks[8], (dim, hidden), invh),  # Linear(hidden, dim)
        b2=_uniform(ks[9], (dim,), invh),
        # eval-mode BatchNorm parameters + running statistics
        q_bn_g=ones(dim), q_bn_b=zeros(dim), q_bn_m=zeros(dim), q_bn_v=ones(dim),
        k_bn_g=ones(dim), k_bn_b=zeros(dim), k_bn_m=zeros(dim), k_bn_v=ones(dim),
        v_bn_g=ones(dim), v_bn_b=zeros(dim), v_bn_m=zeros(dim), v_bn_v=ones(dim),
        proj_bn_g=ones(dim), proj_bn_b=zeros(dim), proj_bn_m=zeros(dim), proj_bn_v=ones(dim),
        fc1_bn_g=ones(hidden), fc1_bn_b=zeros(hidden), fc1_bn_m=zeros(hidden), fc1_bn_v=ones(hidden),
        fc2_bn_g=ones(dim), fc2_bn_b=zeros(dim), fc2_bn_m=zeros(dim), fc2_bn_v=ones(dim),
    )


def _fold_bn(w_oc_ic, conv_bias, gamma, beta, mean, var):
    """Fold eval-mode BatchNorm1d into the preceding (Cout, Cin) linear / 1x1 conv."""
    scale = gamma / jnp.sqrt(var + BN_EPS)
    w = w_oc_ic.T * scale[None, :]
    b = (0.0 if conv_bias is None else conv_bias) * scale + (beta - mean * scale)
    return w.astype(jnp.float32), b.astype(jnp.float32)


def prepare_block_params(p):
    """One-time weight prep: transpose + fold BN + concat q/k/v + cast to bf16."""
    wq, bq = _fold_bn(p['wq'], None, p['q_bn_g'], p['q_bn_b'], p['q_bn_m'], p['q_bn_v'])
    wk, bk = _fold_bn(p['wk'], None, p['k_bn_g'], p['k_bn_b'], p['k_bn_m'], p['k_bn_v'])
    wv, bv = _fold_bn(p['wv'], None, p['v_bn_g'], p['v_bn_b'], p['v_bn_m'], p['v_bn_v'])
    wpj, bpj = _fold_bn(p['wproj'], p['bproj'], p['proj_bn_g'], p['proj_bn_b'],
                        p['proj_bn_m'], p['proj_bn_v'])
    w1, b1 = _fold_bn(p['w1'], p['b1'], p['fc1_bn_g'], p['fc1_bn_b'],
                      p['fc1_bn_m'], p['fc1_bn_v'])
    w2, b2 = _fold_bn(p['w2'], p['b2'], p['fc2_bn_g'], p['fc2_bn_b'],
                      p['fc2_bn_m'], p['fc2_bn_v'])
    bf16 = jnp.bfloat16
    return dict(
        ln1_w=p['ln1_w'].reshape(1, -1), ln1_b=p['ln1_b'].reshape(1, -1),
        ln2_w=p['ln2_w'].reshape(1, -1), ln2_b=p['ln2_b'].reshape(1, -1),
        wqkv=jnp.concatenate([wq, wk, wv], axis=1).astype(bf16),   # (C, 3C) bf16
        bqkv=jnp.concatenate([bq, bk, bv]).reshape(1, -1),         # (1, 3C) f32
        wproj=wpj.astype(bf16), bproj=bpj.reshape(1, -1),
        w1=w1.astype(bf16), b1=b1.reshape(1, -1),
        w2=w2.astype(bf16), b2=b2.reshape(1, -1),
        rpb_table=p['rpb_table'],
    )


# ------------------------------------------------------------------
# BasicLayer forward
# ------------------------------------------------------------------

@functools.partial(jax.jit, static_argnums=(2, 3, 4, 5))
def basic_layer_forward(x, prepared_params, H, W, num_heads, window_size):
    """x: (B, L, C) with B = T * B0 (time-major).  Returns (x, H, W, x_ori)."""
    B, L, C = x.shape
    B0 = B // T
    ws = window_size
    shift_size = ws // 2
    nh = num_heads
    hd = C // nh
    N = ws * ws
    # TODO(synk): zero-padding path for H/W not divisible by window_size is not
    #             implemented in the fused kernel (not exercised at these shapes).
    assert H % ws == 0 and W % ws == 0, "padding path not implemented"
    nW = (H // ws) * (W // ws)

    rp_idx = relative_position_index(ws).reshape(-1)                   # static
    mask_np = create_mask(H, W, ws, shift_size)                        # (nW, N, N)
    zero_mask = np.zeros_like(mask_np)

    x5 = x.reshape(T, B0, H, W, C)
    for i, bp in enumerate(prepared_params):
        shift = 0 if i % 2 == 0 else shift_size
        rel = bp['rpb_table'][rp_idx].reshape(N, N, nh).transpose(2, 0, 1)   # (nh,N,N)
        mask_w = jnp.asarray(mask_np if shift > 0 else zero_mask)
        bias = build_attention_bias(rel, mask_w, nW, N)                # (nh, R, R)

        x_win = window_partition_tm(x5, ws, shift)                     # (B0,T,R,C)
        y_win = swin_block(x_win, bp, bias, num_heads=nh, scale=float(hd) ** -0.5)
        x5 = window_reverse_tm(y_win, ws, shift, H, W)                 # (T,B0,H,W,C)

    x_out = x5.reshape(B, L, C)
    x_ori = x_out
    # TODO(synk): downsample (PatchMerging) is None in this configuration.
    return x_out, H, W, x_ori


# ------------------------------------------------------------------
# Main
# ------------------------------------------------------------------

if __name__ == "__main__":
    dim, depth, num_heads, window_size = 32, 2, 4, 4
    mlp_ratio = 4.0
    H = W = 8
    B0 = 2
    B = T * B0                   # batch is time-major: B = T * B0
    L = H * W
    hidden = int(dim * mlp_ratio)

    key = jax.random.PRNGKey(0)
    kx, kp = jax.random.split(key)
    x = jax.random.normal(kx, (B, L, dim), jnp.float32)
    block_keys = jax.random.split(kp, depth)
    raw_params = [init_block_params(block_keys[i], dim, num_heads, window_size, hidden)
                  for i in range(depth)]
    prepared = [prepare_block_params(p) for p in raw_params]   # fold BN / concat once

    out_x, Ho, Wo, x_ori = basic_layer_forward(x, prepared, H, W, num_heads, window_size)
    jax.block_until_ready(out_x)
    jax.block_until_ready(x_ori)
    assert out_x.shape == (B, L, dim) and (Ho, Wo) == (H, W)
    assert bool(jnp.all(jnp.isfinite(out_x)))
    print("KERNEL_OK")
</pallas_src>

<mosaic_0001>
module attributes {stable_mosaic.version = 11 : i64} {
  func.func @_swin_block_kernel(%arg0: i32, %arg1: memref<1x4x64x32xf32, #tpu.memory_space<vmem>>, %arg2: memref<1x32xf32, #tpu.memory_space<vmem>>, %arg3: memref<1x32xf32, #tpu.memory_space<vmem>>, %arg4: memref<32x96xbf16, #tpu.memory_space<vmem>>, %arg5: memref<1x96xf32, #tpu.memory_space<vmem>>, %arg6: memref<4x64x64xf32, #tpu.memory_space<vmem>>, %arg7: memref<32x32xbf16, #tpu.memory_space<vmem>>, %arg8: memref<1x32xf32, #tpu.memory_space<vmem>>, %arg9: memref<1x32xf32, #tpu.memory_space<vmem>>, %arg10: memref<1x32xf32, #tpu.memory_space<vmem>>, %arg11: memref<32x128xbf16, #tpu.memory_space<vmem>>, %arg12: memref<1x128xf32, #tpu.memory_space<vmem>>, %arg13: memref<128x32xbf16, #tpu.memory_space<vmem>>, %arg14: memref<1x32xf32, #tpu.memory_space<vmem>>, %arg15: memref<1x4x64x32xf32, #tpu.memory_space<vmem>>) attributes {dimension_semantics = [#tpu.dimension_semantics<parallel>], iteration_bounds = array<i64: 2>, scalar_prefetch = 0 : i64, scratch_operands = 0 : i64, tpu.core_type = #tpu.core_type<tc>, window_params = [{transform_indices = @transform_0, window_bounds = array<i64: 1, 4, 64, 32>}, {pipeline_mode = #tpu.pipeline_mode<synchronous>, transform_indices = @transform_1, window_bounds = array<i64: 1, 32>}, {pipeline_mode = #tpu.pipeline_mode<synchronous>, transform_indices = @transform_2, window_bounds = array<i64: 1, 32>}, {pipeline_mode = #tpu.pipeline_mode<synchronous>, transform_indices = @transform_3, window_bounds = array<i64: 32, 96>}, {pipeline_mode = #tpu.pipeline_mode<synchronous>, transform_indices = @transform_4, window_bounds = array<i64: 1, 96>}, {pipeline_mode = #tpu.pipeline_mode<synchronous>, transform_indices = @transform_5, window_bounds = array<i64: 4, 64, 64>}, {pipeline_mode = #tpu.pipeline_mode<synchronous>, transform_indices = @transform_6, window_bounds = array<i64: 32, 32>}, {pipeline_mode = #tpu.pipeline_mode<synchronous>, transform_indices = @transform_7, window_bounds = array<i64: 1, 32>}, {pipeline_mode = #tpu.pipeline_mode<synchronous>, transform_indices = @transform_8, window_bounds = array<i64: 1, 32>}, {pipeline_mode = #tpu.pipeline_mode<synchronous>, transform_indices = @transform_9, window_bounds = array<i64: 1, 32>}, {pipeline_mode = #tpu.pipeline_mode<synchronous>, transform_indices = @transform_10, window_bounds = array<i64: 32, 128>}, {pipeline_mode = #tpu.pipeline_mode<synchronous>, transform_indices = @transform_11, window_bounds = array<i64: 1, 128>}, {pipeline_mode = #tpu.pipeline_mode<synchronous>, transform_indices = @transform_12, window_bounds = array<i64: 128, 32>}, {pipeline_mode = #tpu.pipeline_mode<synchronous>, transform_indices = @transform_13, window_bounds = array<i64: 1, 32>}, {transform_indices = @transform_14, window_bounds = array<i64: 1, 4, 64, 32>}]} {
    %c0 = arith.constant 0 : index
    %c0_0 = arith.constant 0 : index
    %c0_1 = arith.constant 0 : index
    %c0_2 = arith.constant 0 : index
    %0 = vector.load %arg1[%c0, %c0_0, %c0_1, %c0_2] : memref<1x4x64x32xf32, #tpu.memory_space<vmem>>, vector<1x4x64x32xf32>
    %1 = vector.shape_cast %0 : vector<1x4x64x32xf32> to vector<4x64x32xf32>
    %2 = vector.shape_cast %1 : vector<4x64x32xf32> to vector<256x32xf32>
    %cst = arith.constant dense<0.000000e+00> : vector<256xf32>
    %3 = vector.multi_reduction <add>, %2, %cst [1] : vector<256x32xf32> to vector<256xf32>
    %4 = vector.shape_cast %3 : vector<256xf32> to vector<256x1xf32>
    %cst_3 = arith.constant 3.200000e+01 : f32
    %5 = vector.broadcast %cst_3 : f32 to vector<256x1xf32>
    %6 = arith.divf %4, %5 : vector<256x1xf32>
    %7 = vector.broadcast %6 : vector<256x1xf32> to vector<256x32xf32>
    %8 = arith.subf %2, %7 : vector<256x32xf32>
    %9 = arith.mulf %8, %8 : vector<256x32xf32>
    %cst_4 = arith.constant dense<0.000000e+00> : vector<256xf32>
    %10 = vector.multi_reduction <add>, %9, %cst_4 [1] : vector<256x32xf32> to vector<256xf32>
    %11 = vector.shape_cast %10 : vector<256xf32> to vector<256x1xf32>
    %cst_5 = arith.constant 3.200000e+01 : f32
    %12 = vector.broadcast %cst_5 : f32 to vector<256x1xf32>
    %13 = arith.divf %11, %12 : vector<256x1xf32>
    %cst_6 = arith.constant 9.99999974E-6 : f32
    %14 = vector.broadcast %cst_6 : f32 to vector<256x1xf32>
    %15 = arith.addf %13, %14 : vector<256x1xf32>
    %16 = math.rsqrt %15 : vector<256x1xf32>
    %17 = vector.broadcast %16 : vector<256x1xf32> to vector<256x32xf32>
    %18 = arith.mulf %8, %17 : vector<256x32xf32>
    %c0_7 = arith.constant 0 : index
    %c0_8 = arith.constant 0 : index
    %19 = vector.load %arg2[%c0_7, %c0_8] : memref<1x32xf32, #tpu.memory_space<vmem>>, vector<1x32xf32>
    %20 = vector.broadcast %19 : vector<1x32xf32> to vector<256x32xf32>
    %21 = arith.mulf %18, %20 : vector<256x32xf32>
    %c0_9 = arith.constant 0 : index
    %c0_10 = arith.constant 0 : index
    %22 = vector.load %arg3[%c0_9, %c0_10] : memref<1x32xf32, #tpu.memory_space<vmem>>, vector<1x32xf32>
    %23 = vector.broadcast %22 : vector<1x32xf32> to vector<256x32xf32>
    %24 = arith.addf %21, %23 : vector<256x32xf32>
    %25 = arith.truncf %24 : vector<256x32xf32> to vector<256x32xbf16>
    %c0_11 = arith.constant 0 : index
    %c0_12 = arith.constant 0 : index
    %26 = vector.load %arg4[%c0_11, %c0_12] : memref<32x96xbf16, #tpu.memory_space<vmem>>, vector<32x96xbf16>
    %cst_13 = arith.constant dense<0.000000e+00> : vector<256x96xf32>
    %27 = tpu.matmul %25, %26, %cst_13 {dimension_numbers = #tpu.dot_dimension_numbers<[1], [0], [0], [1], [0, 0, 1, 1], [], []>} : vector<256x32xbf16>, vector<32x96xbf16>, vector<256x96xf32> -> vector<256x96xf32>
    %c0_14 = arith.constant 0 : index
    %c0_15 = arith.constant 0 : index
    %28 = vector.load %arg5[%c0_14, %c0_15] : memref<1x96xf32, #tpu.memory_space<vmem>>, vector<1x96xf32>
    %29 = vector.broadcast %28 : vector<1x96xf32> to vector<256x96xf32>
    %30 = arith.addf %27, %29 : vector<256x96xf32>
    %31 = vector.extract_strided_slice %30 {offsets = [0, 0], sizes = [64, 96], strides = [1, 1]} : vector<256x96xf32> to vector<64x96xf32>
    %cst_16 = arith.constant 5.000000e-01 : f32
    %32 = vector.broadcast %cst_16 : f32 to vector<64x96xf32>
    %33 = arith.cmpf ogt, %31, %32 : vector<64x96xf32>
    %34 = arith.extui %33 : vector<64x96xi1> to vector<64x96xi32>
    %35 = arith.sitofp %34 : vector<64x96xi32> to vector<64x96xf32>
    %cst_17 = arith.constant 2.500000e-01 : f32
    %36 = vector.broadcast %cst_17 : f32 to vector<64x96xf32>
    %37 = arith.mulf %31, %36 : vector<64x96xf32>
    %cst_18 = arith.constant 1.000000e+00 : f32
    %38 = vector.broadcast %cst_18 : f32 to vector<64x96xf32>
    %39 = arith.subf %38, %35 : vector<64x96xf32>
    %40 = arith.mulf %37, %39 : vector<64x96xf32>
    %41 = vector.extract_strided_slice %30 {offsets = [64, 0], sizes = [64, 96], strides = [1, 1]} : vector<256x96xf32> to vector<64x96xf32>
    %42 = arith.addf %40, %41 : vector<64x96xf32>
    %cst_19 = arith.constant 5.000000e-01 : f32
    %43 = vector.broadcast %cst_19 : f32 to vector<64x96xf32>
    %44 = arith.cmpf ogt, %42, %43 : vector<64x96xf32>
    %45 = arith.extui %44 : vector<64x96xi1> to vector<64x96xi32>
    %46 = arith.sitofp %45 : vector<64x96xi32> to vector<64x96xf32>
    %cst_20 = arith.constant 2.500000e-01 : f32
    %47 = vector.broadcast %cst_20 : f32 to vector<64x96xf32>
    %48 = arith.mulf %42, %47 : vector<64x96xf32>
    %cst_21 = arith.constant 1.000000e+00 : f32
    %49 = vector.broadcast %cst_21 : f32 to vector<64x96xf32>
    %50 = arith.subf %49, %46 : vector<64x96xf32>
    %51 = arith.mulf %48, %50 : vector<64x96xf32>
    %52 = vector.extract_strided_slice %30 {offsets = [128, 0], sizes = [64, 96], strides = [1, 1]} : vector<256x96xf32> to vector<64x96xf32>
    %53 = arith.addf %51, %52 : vector<64x96xf32>
    %cst_22 = arith.constant 5.000000e-01 : f32
    %54 = vector.broadcast %cst_22 : f32 to vector<64x96xf32>
    %55 = arith.cmpf ogt, %53, %54 : vector<64x96xf32>
    %56 = arith.extui %55 : vector<64x96xi1> to vector<64x96xi32>
    %57 = arith.sitofp %56 : vector<64x96xi32> to vector<64x96xf32>
    %cst_23 = arith.constant 2.500000e-01 : f32
    %58 = vector.broadcast %cst_23 : f32 to vector<64x96xf32>
    %59 = arith.mulf %53, %58 : vector<64x96xf32>
    %cst_24 = arith.constant 1.000000e+00 : f32
    %60 = vector.broadcast %cst_24 : f32 to vector<64x96xf32>
    %61 = arith.subf %60, %57 : vector<64x96xf32>
    %62 = arith.mulf %59, %61 : vector<64x96xf32>
    %63 = vector.extract_strided_slice %30 {offsets = [192, 0], sizes = [64, 96], strides = [1, 1]} : vector<256x96xf32> to vector<64x96xf32>
    %64 = arith.addf %62, %63 : vector<64x96xf32>
    %cst_25 = arith.constant 5.000000e-01 : f32
    %65 = vector.broadcast %cst_25 : f32 to vector<64x96xf32>
    %66 = arith.cmpf ogt, %64, %65 : vector<64x96xf32>
    %67 = arith.extui %66 : vector<64x96xi1> to vector<64x96xi32>
    %68 = arith.sitofp %67 : vector<64x96xi32> to vector<64x96xf32>
    %69 = tpu.concatenate %35, %46, %57, %68 in 0 : vector<64x96xf32>, vector<64x96xf32>, vector<64x96xf32>, vector<64x96xf32> -> vector<256x96xf32>
    %c0_26 = arith.constant 0 : index
    %c0_27 = arith.constant 0 : index
    %70 = vector.load %arg7[%c0_26, %c0_27] : memref<32x32xbf16, #tpu.memory_space<vmem>>, vector<32x32xbf16>
    %cst_28 = arith.constant 0.000000e+00 : f32
    %71 = vector.broadcast %cst_28 : f32 to vector<256x32xf32>
    %72 = vector.extract_strided_slice %69 {offsets = [0, 0], sizes = [256, 8], strides = [1, 1]} : vector<256x96xf32> to vector<256x8xf32>
    %73 = vector.shape_cast %72 : vector<256x8xf32> to vector<4x64x8xf32>
    %74 = arith.truncf %73 : vector<4x64x8xf32> to vector<4x64x8xbf16>
    %75 = vector.extract_strided_slice %69 {offsets = [0, 32], sizes = [256, 8], strides = [1, 1]} : vector<256x96xf32> to vector<256x8xf32>
    %76 = vector.shape_cast %75 : vector<256x8xf32> to vector<4x64x8xf32>
    %77 = arith.truncf %76 : vector<4x64x8xf32> to vector<4x64x8xbf16>
    %78 = vector.extract_strided_slice %69 {offsets = [0, 64], sizes = [256, 8], strides = [1, 1]} : vector<256x96xf32> to vector<256x8xf32>
    %79 = vector.shape_cast %78 : vector<256x8xf32> to vector<4x64x8xf32>
    %cst_29 = arith.constant dense<0.000000e+00> : vector<4x64x64xf32>
    %80 = tpu.matmul %74, %77, %cst_29 {dimension_numbers = #tpu.dot_dimension_numbers<[2], [2], [1], [1], [0, 0, 0, 1, 1, 1], [0], [0]>} : vector<4x64x8xbf16>, vector<4x64x8xbf16>, vector<4x64x64xf32> -> vector<4x64x64xf32>
    %cst_30 = arith.constant 0.353553385 : f32
    %81 = vector.broadcast %cst_30 : f32 to vector<4x64x64xf32>
    %82 = arith.mulf %80, %81 : vector<4x64x64xf32>
    %c0_31 = arith.constant 0 : index
    %c0_32 = arith.constant 0 : index
    %c0_33 = arith.constant 0 : index
    %83 = vector.load %arg6[%c0_31, %c0_32, %c0_33] : memref<4x64x64xf32, #tpu.memory_space<vmem>>, vector<1x64x64xf32>
    %84 = vector.shape_cast %83 : vector<1x64x64xf32> to vector<64x64xf32>
    %85 = vector.shape_cast %84 : vector<64x64xf32> to vector<1x64x64xf32>
    %86 = vector.broadcast %85 : vector<1x64x64xf32> to vector<4x64x64xf32>
    %87 = arith.addf %82, %86 : vector<4x64x64xf32>
    %cst_34 = arith.constant dense<0xFF800000> : vector<4x64xf32>
    %88 = vector.multi_reduction <maximumf>, %87, %cst_34 [2] : vector<4x64x64xf32> to vector<4x64xf32>
    %89 = vector.shape_cast %88 : vector<4x64xf32> to vector<4x64x1xf32>
    %90 = vector.broadcast %89 : vector<4x64x1xf32> to vector<4x64x64xf32>
    %91 = arith.subf %87, %90 : vector<4x64x64xf32>
    %92 = math.exp %91 : vector<4x64x64xf32>
    %cst_35 = arith.constant dense<0.000000e+00> : vector<4x64xf32>
    %93 = vector.multi_reduction <add>, %92, %cst_35 [2] : vector<4x64x64xf32> to vector<4x64xf32>
    %94 = vector.shape_cast %93 : vector<4x64xf32> to vector<4x64x1xf32>
    %95 = vector.broadcast %94 : vector<4x64x1xf32> to vector<4x64x64xf32>
    %96 = arith.divf %92, %95 : vector<4x64x64xf32>
    %cst_36 = arith.constant dense<0.000000e+00> : vector<4x64x8xf32>
    %97 = tpu.matmul %96, %79, %cst_36 {dimension_numbers = #tpu.dot_dimension_numbers<[2], [1], [1], [2], [0, 0, 0, 1, 1, 2], [0], [0]>} : vector<4x64x64xf32>, vector<4x64x8xf32>, vector<4x64x8xf32> -> vector<4x64x8xf32>
    %98 = vector.shape_cast %97 : vector<4x64x8xf32> to vector<256x8xf32>
    %99 = vector.extract_strided_slice %98 {offsets = [0, 0], sizes = [64, 8], strides = [1, 1]} : vector<256x8xf32> to vector<64x8xf32>
    %cst_37 = arith.constant 5.000000e-01 : f32
    %100 = vector.broadcast %cst_37 : f32 to vector<64x8xf32>
    %101 = arith.cmpf ogt, %99, %100 : vector<64x8xf32>
    %102 = arith.extui %101 : vector<64x8xi1> to vector<64x8xi32>
    %103 = arith.sitofp %102 : vector<64x8xi32> to vector<64x8xf32>
    %cst_38 = arith.constant 2.500000e-01 : f32
    %104 = vector.broadcast %cst_38 : f32 to vector<64x8xf32>
    %105 = arith.mulf %99, %104 : vector<64x8xf32>
    %cst_39 = arith.constant 1.000000e+00 : f32
    %106 = vector.broadcast %cst_39 : f32 to vector<64x8xf32>
    %107 = arith.subf %106, %103 : vector<64x8xf32>
    %108 = arith.mulf %105, %107 : vector<64x8xf32>
    %109 = vector.extract_strided_slice %98 {offsets = [64, 0], sizes = [64, 8], strides = [1, 1]} : vector<256x8xf32> to vector<64x8xf32>
    %110 = arith.addf %108, %109 : vector<64x8xf32>
    %cst_40 = arith.constant 5.000000e-01 : f32
    %111 = vector.broadcast %cst_40 : f32 to vector<64x8xf32>
    %112 = arith.cmpf ogt, %110, %111 : vector<64x8xf32>
    %113 = arith.extui %112 : vector<64x8xi1> to vector<64x8xi32>
    %114 = arith.sitofp %113 : vector<64x8xi32> to vector<64x8xf32>
    %cst_41 = arith.constant 2.500000e-01 : f32
    %115 = vector.broadcast %cst_41 : f32 to vector<64x8xf32>
    %116 = arith.mulf %110, %115 : vector<64x8xf32>
    %cst_42 = arith.constant 1.000000e+00 : f32
    %117 = vector.broadcast %cst_42 : f32 to vector<64x8xf32>
    %118 = arith.subf %117, %114 : vector<64x8xf32>
    %119 = arith.mulf %116, %118 : vector<64x8xf32>
    %120 = vector.extract_strided_slice %98 {offsets = [128, 0], sizes = [64, 8], strides = [1, 1]} : vector<256x8xf32> to vector<64x8xf32>
    %121 = arith.addf %119, %120 : vector<64x8xf32>
    %cst_43 = arith.constant 5.000000e-01 : f32
    %122 = vector.broadcast %cst_43 : f32 to vector<64x8xf32>
    %123 = arith.cmpf ogt, %121, %122 : vector<64x8xf32>
    %124 = arith.extui %123 : vector<64x8xi1> to vector<64x8xi32>
    %125 = arith.sitofp %124 : vector<64x8xi32> to vector<64x8xf32>
    %cst_44 = arith.constant 2.500000e-01 : f32
    %126 = vector.broadcast %cst_44 : f32 to vector<64x8xf32>
    %127 = arith.mulf %121, %126 : vector<64x8xf32>
    %cst_45 = arith.constant 1.000000e+00 : f32
    %128 = vector.broadcast %cst_45 : f32 to vector<64x8xf32>
    %129 = arith.subf %128, %125 : vector<64x8xf32>
    %130 = arith.mulf %127, %129 : vector<64x8xf32>
    %131 = vector.extract_strided_slice %98 {offsets = [192, 0], sizes = [64, 8], strides = [1, 1]} : vector<256x8xf32> to vector<64x8xf32>
    %132 = arith.addf %130, %131 : vector<64x8xf32>
    %cst_46 = arith.constant 5.000000e-01 : f32
    %133 = vector.broadcast %cst_46 : f32 to vector<64x8xf32>
    %134 = arith.cmpf ogt, %132, %133 : vector<64x8xf32>
    %135 = arith.extui %134 : vector<64x8xi1> to vector<64x8xi32>
    %136 = arith.sitofp %135 : vector<64x8xi32> to vector<64x8xf32>
    %137 = tpu.concatenate %103, %114, %125, %136 in 0 : vector<64x8xf32>, vector<64x8xf32>, vector<64x8xf32>, vector<64x8xf32> -> vector<256x8xf32>
    %138 = arith.truncf %137 : vector<256x8xf32> to vector<256x8xbf16>
    %139 = vector.extract_strided_slice %70 {offsets = [0, 0], sizes = [8, 32], strides = [1, 1]} : vector<32x32xbf16> to vector<8x32xbf16>
    %cst_47 = arith.constant dense<0.000000e+00> : vector<256x32xf32>
    %140 = tpu.matmul %138, %139, %cst_47 {dimension_numbers = #tpu.dot_dimension_numbers<[1], [0], [0], [1], [0, 0, 1, 1], [], []>} : vector<256x8xbf16>, vector<8x32xbf16>, vector<256x32xf32> -> vector<256x32xf32>
    %141 = arith.addf %71, %140 : vector<256x32xf32>
    %142 = vector.extract_strided_slice %69 {offsets = [0, 8], sizes = [256, 8], strides = [1, 1]} : vector<256x96xf32> to vector<256x8xf32>
    %143 = vector.shape_cast %142 : vector<256x8xf32> to vector<4x64x8xf32>
    %144 = arith.truncf %143 : vector<4x64x8xf32> to vector<4x64x8xbf16>
    %145 = vector.extract_strided_slice %69 {offsets = [0, 40], sizes = [256, 8], strides = [1, 1]} : vector<256x96xf32> to vector<256x8xf32>
    %146 = vector.shape_cast %145 : vector<256x8xf32> to vector<4x64x8xf32>
    %147 = arith.truncf %146 : vector<4x64x8xf32> to vector<4x64x8xbf16>
    %148 = vector.extract_strided_slice %69 {offsets = [0, 72], sizes = [256, 8], strides = [1, 1]} : vector<256x96xf32> to vector<256x8xf32>
    %149 = vector.shape_cast %148 : vector<256x8xf32> to vector<4x64x8xf32>
    %cst_48 = arith.constant dense<0.000000e+00> : vector<4x64x64xf32>
    %150 = tpu.matmul %144, %147, %cst_48 {dimension_numbers = #tpu.dot_dimension_numbers<[2], [2], [1], [1], [0, 0, 0, 1, 1, 1], [0], [0]>} : vector<4x64x8xbf16>, vector<4x64x8xbf16>, vector<4x64x64xf32> -> vector<4x64x64xf32>
    %cst_49 = arith.constant 0.353553385 : f32
    %151 = vector.broadcast %cst_49 : f32 to vector<4x64x64xf32>
    %152 = arith.mulf %150, %151 : vector<4x64x64xf32>
    %c1 = arith.constant 1 : index
    %c0_50 = arith.constant 0 : index
    %c0_51 = arith.constant 0 : index
    %153 = vector.load %arg6[%c1, %c0_50, %c0_51] : memref<4x64x64xf32, #tpu.memory_space<vmem>>, vector<1x64x64xf32>
    %154 = vector.shape_cast %153 : vector<1x64x64xf32> to vector<64x64xf32>
    %155 = vector.shape_cast %154 : vector<64x64xf32> to vector<1x64x64xf32>
    %156 = vector.broadcast %155 : vector<1x64x64xf32> to vector<4x64x64xf32>
    %157 = arith.addf %152, %156 : vector<4x64x64xf32>
    %cst_52 = arith.constant dense<0xFF800000> : vector<4x64xf32>
    %158 = vector.multi_reduction <maximumf>, %157, %cst_52 [2] : vector<4x64x64xf32> to vector<4x64xf32>
    %159 = vector.shape_cast %158 : vector<4x64xf32> to vector<4x64x1xf32>
    %160 = vector.broadcast %159 : vector<4x64x1xf32> to vector<4x64x64xf32>
    %161 = arith.subf %157, %160 : vector<4x64x64xf32>
    %162 = math.exp %161 : vector<4x64x64xf32>
    %cst_53 = arith.constant dense<0.000000e+00> : vector<4x64xf32>
    %163 = vector.multi_reduction <add>, %162, %cst_53 [2] : vector<4x64x64xf32> to vector<4x64xf32>
    %164 = vector.shape_cast %163 : vector<4x64xf32> to vector<4x64x1xf32>
    %165 = vector.broadcast %164 : vector<4x64x1xf32> to vector<4x64x64xf32>
    %166 = arith.divf %162, %165 : vector<4x64x64xf32>
    %cst_54 = arith.constant dense<0.000000e+00> : vector<4x64x8xf32>
    %167 = tpu.matmul %166, %149, %cst_54 {dimension_numbers = #tpu.dot_dimension_numbers<[2], [1], [1], [2], [0, 0, 0, 1, 1, 2], [0], [0]>} : vector<4x64x64xf32>, vector<4x64x8xf32>, vector<4x64x8xf32> -> vector<4x64x8xf32>
    %168 = vector.shape_cast %167 : vector<4x64x8xf32> to vector<256x8xf32>
    %169 = vector.extract_strided_slice %168 {offsets = [0, 0], sizes = [64, 8], strides = [1, 1]} : vector<256x8xf32> to vector<64x8xf32>
    %cst_55 = arith.constant 5.000000e-01 : f32
    %170 = vector.broadcast %cst_55 : f32 to vector<64x8xf32>
    %171 = arith.cmpf ogt, %169, %170 : vector<64x8xf32>
    %172 = arith.extui %171 : vector<64x8xi1> to vector<64x8xi32>
    %173 = arith.sitofp %172 : vector<64x8xi32> to vector<64x8xf32>
    %cst_56 = arith.constant 2.500000e-01 : f32
    %174 = vector.broadcast %cst_56 : f32 to vector<64x8xf32>
    %175 = arith.mulf %169, %174 : vector<64x8xf32>
    %cst_57 = arith.constant 1.000000e+00 : f32
    %176 = vector.broadcast %cst_57 : f32 to vector<64x8xf32>
    %177 = arith.subf %176, %173 : vector<64x8xf32>
    %178 = arith.mulf %175, %177 : vector<64x8xf32>
    %179 = vector.extract_strided_slice %168 {offsets = [64, 0], sizes = [64, 8], strides = [1, 1]} : vector<256x8xf32> to vector<64x8xf32>
    %180 = arith.addf %178, %179 : vector<64x8xf32>
    %cst_58 = arith.constant 5.000000e-01 : f32
    %181 = vector.broadcast %cst_58 : f32 to vector<64x8xf32>
    %182 = arith.cmpf ogt, %180, %181 : vector<64x8xf32>
    %183 = arith.extui %182 : vector<64x8xi1> to vector<64x8xi32>
    %184 = arith.sitofp %183 : vector<64x8xi32> to vector<64x8xf32>
    %cst_59 = arith.constant 2.500000e-01 : f32
    %185 = vector.broadcast %cst_59 : f32 to vector<64x8xf32>
    %186 = arith.mulf %180, %185 : vector<64x8xf32>
    %cst_60 = arith.constant 1.000000e+00 : f32
    %187 = vector.broadcast %cst_60 : f32 to vector<64x8xf32>
    %188 = arith.subf %187, %184 : vector<64x8xf32>
    %189 = arith.mulf %186, %188 : vector<64x8xf32>
    %190 = vector.extract_strided_slice %168 {offsets = [128, 0], sizes = [64, 8], strides = [1, 1]} : vector<256x8xf32> to vector<64x8xf32>
    %191 = arith.addf %189, %190 : vector<64x8xf32>
    %cst_61 = arith.constant 5.000000e-01 : f32
    %192 = vector.broadcast %cst_61 : f32 to vector<64x8xf32>
    %193 = arith.cmpf ogt, %191, %192 : vector<64x8xf32>
    %194 = arith.extui %193 : vector<64x8xi1> to vector<64x8xi32>
    %195 = arith.sitofp %194 : vector<64x8xi32> to vector<64x8xf32>
    %cst_62 = arith.constant 2.500000e-01 : f32
    %196 = vector.broadcast %cst_62 : f32 to vector<64x8xf32>
    %197 = arith.mulf %191, %196 : vector<64x8xf32>
    %cst_63 = arith.constant 1.000000e+00 : f32
    %198 = vector.broadcast %cst_63 : f32 to vector<64x8xf32>
    %199 = arith.subf %198, %195 : vector<64x8xf32>
    %200 = arith.mulf %197, %199 : vector<64x8xf32>
    %201 = vector.extract_strided_slice %168 {offsets = [192, 0], sizes = [64, 8], strides = [1, 1]} : vector<256x8xf32> to vector<64x8xf32>
    %202 = arith.addf %200, %201 : vector<64x8xf32>
    %cst_64 = arith.constant 5.000000e-01 : f32
    %203 = vector.broadcast %cst_64 : f32 to vector<64x8xf32>
    %204 = arith.cmpf ogt, %202, %203 : vector<64x8xf32>
    %205 = arith.extui %204 : vector<64x8xi1> to vector<64x8xi32>
    %206 = arith.sitofp %205 : vector<64x8xi32> to vector<64x8xf32>
    %207 = tpu.concatenate %173, %184, %195, %206 in 0 : vector<64x8xf32>, vector<64x8xf32>, vector<64x8xf32>, vector<64x8xf32> -> vector<256x8xf32>
    %208 = arith.truncf %207 : vector<256x8xf32> to vector<256x8xbf16>
    %209 = vector.extract_strided_slice %70 {offsets = [8, 0], sizes = [8, 32], strides = [1, 1]} : vector<32x32xbf16> to vector<8x32xbf16>
    %cst_65 = arith.constant dense<0.000000e+00> : vector<256x32xf32>
    %210 = tpu.matmul %208, %209, %cst_65 {dimension_numbers = #tpu.dot_dimension_numbers<[1], [0], [0], [1], [0, 0, 1, 1], [], []>} : vector<256x8xbf16>, vector<8x32xbf16>, vector<256x32xf32> -> vector<256x32xf32>
    %211 = arith.addf %141, %210 : vector<256x32xf32>
    %212 = vector.extract_strided_slice %69 {offsets = [0, 16], sizes = [256, 8], strides = [1, 1]} : vector<256x96xf32> to vector<256x8xf32>
    %213 = vector.shape_cast %212 : vector<256x8xf32> to vector<4x64x8xf32>
    %214 = arith.truncf %213 : vector<4x64x8xf32> to vector<4x64x8xbf16>
    %215 = vector.extract_strided_slice %69 {offsets = [0, 48], sizes = [256, 8], strides = [1, 1]} : vector<256x96xf32> to vector<256x8xf32>
    %216 = vector.shape_cast %215 : vector<256x8xf32> to vector<4x64x8xf32>
    %217 = arith.truncf %216 : vector<4x64x8xf32> to vector<4x64x8xbf16>
    %218 = vector.extract_strided_slice %69 {offsets = [0, 80], sizes = [256, 8], strides = [1, 1]} : vector<256x96xf32> to vector<256x8xf32>
    %219 = vector.shape_cast %218 : vector<256x8xf32> to vector<4x64x8xf32>
    %cst_66 = arith.constant dense<0.000000e+00> : vector<4x64x64xf32>
    %220 = tpu.matmul %214, %217, %cst_66 {dimension_numbers = #tpu.dot_dimension_numbers<[2], [2], [1], [1], [0, 0, 0, 1, 1, 1], [0], [0]>} : vector<4x64x8xbf16>, vector<4x64x8xbf16>, vector<4x64x64xf32> -> vector<4x64x64xf32>
    %cst_67 = arith.constant 0.353553385 : f32
    %221 = vector.broadcast %cst_67 : f32 to vector<4x64x64xf32>
    %222 = arith.mulf %220, %221 : vector<4x64x64xf32>
    %c2 = arith.constant 2 : index
    %c0_68 = arith.constant 0 : index
    %c0_69 = arith.constant 0 : index
    %223 = vector.load %arg6[%c2, %c0_68, %c0_69] : memref<4x64x64xf32, #tpu.memory_space<vmem>>, vector<1x64x64xf32>
    %224 = vector.shape_cast %223 : vector<1x64x64xf32> to vector<64x64xf32>
    %225 = vector.shape_cast %224 : vector<64x64xf32> to vector<1x64x64xf32>
    %226 = vector.broadcast %225 : vector<1x64x64xf32> to vector<4x64x64xf32>
    %227 = arith.addf %222, %226 : vector<4x64x64xf32>
    %cst_70 = arith.constant dense<0xFF800000> : vector<4x64xf32>
    %228 = vector.multi_reduction <maximumf>, %227, %cst_70 [2] : vector<4x64x64xf32> to vector<4x64xf32>
    %229 = vector.shape_cast %228 : vector<4x64xf32> to vector<4x64x1xf32>
    %230 = vector.broadcast %229 : vector<4x64x1xf32> to vector<4x64x64xf32>
    %231 = arith.subf %227, %230 : vector<4x64x64xf32>
    %232 = math.exp %231 : vector<4x64x64xf32>
    %cst_71 = arith.constant dense<0.000000e+00> : vector<4x64xf32>
    %233 = vector.multi_reduction <add>, %232, %cst_71 [2] : vector<4x64x64xf32> to vector<4x64xf32>
    %234 = vector.shape_cast %233 : vector<4x64xf32> to vector<4x64x1xf32>
    %235 = vector.broadcast %234 : vector<4x64x1xf32> to vector<4x64x64xf32>
    %236 = arith.divf %232, %235 : vector<4x64x64xf32>
    %cst_72 = arith.constant dense<0.000000e+00> : vector<4x64x8xf32>
    %237 = tpu.matmul %236, %219, %cst_72 {dimension_numbers = #tpu.dot_dimension_numbers<[2], [1], [1], [2], [0, 0, 0, 1, 1, 2], [0], [0]>} : vector<4x64x64xf32>, vector<4x64x8xf32>, vector<4x64x8xf32> -> vector<4x64x8xf32>
    %238 = vector.shape_cast %237 : vector<4x64x8xf32> to vector<256x8xf32>
    %239 = vector.extract_strided_slice %238 {offsets = [0, 0], sizes = [64, 8], strides = [1, 1]} : vector<256x8xf32> to vector<64x8xf32>
    %cst_73 = arith.constant 5.000000e-01 : f32
    %240 = vector.broadcast %cst_73 : f32 to vector<64x8xf32>
    %241 = arith.cmpf ogt, %239, %240 : vector<64x8xf32>
    %242 = arith.extui %241 : vector<64x8xi1> to vector<64x8xi32>
    %243 = arith.sitofp %242 : vector<64x8xi32> to vector<64x8xf32>
    %cst_74 = arith.constant 2.500000e-01 : f32
    %244 = vector.broadcast %cst_74 : f32 to vector<64x8xf32>
    %245 = arith.mulf %239, %244 : vector<64x8xf32>
    %cst_75 = arith.constant 1.000000e+00 : f32
    %246 = vector.broadcast %cst_75 : f32 to vector<64x8xf32>
    %247 = arith.subf %246, %243 : vector<64x8xf32>
    %248 = arith.mulf %245, %247 : vector<64x8xf32>
    %249 = vector.extract_strided_slice %238 {offsets = [64, 0], sizes = [64, 8], strides = [1, 1]} : vector<256x8xf32> to vector<64x8xf32>
    %250 = arith.addf %248, %249 : vector<64x8xf32>
    %cst_76 = arith.constant 5.000000e-01 : f32
    %251 = vector.broadcast %cst_76 : f32 to vector<64x8xf32>
    %252 = arith.cmpf ogt, %250, %251 : vector<64x8xf32>
    %253 = arith.extui %252 : vector<64x8xi1> to vector<64x8xi32>
    %254 = arith.sitofp %253 : vector<64x8xi32> to vector<64x8xf32>
    %cst_77 = arith.constant 2.500000e-01 : f32
    %255 = vector.broadcast %cst_77 : f32 to vector<64x8xf32>
    %256 = arith.mulf %250, %255 : vector<64x8xf32>
    %cst_78 = arith.constant 1.000000e+00 : f32
    %257 = vector.broadcast %cst_78 : f32 to vector<64x8xf32>
    %258 = arith.subf %257, %254 : vector<64x8xf32>
    %259 = arith.mulf %256, %258 : vector<64x8xf32>
    %260 = vector.extract_strided_slice %238 {offsets = [128, 0], sizes = [64, 8], strides = [1, 1]} : vector<256x8xf32> to vector<64x8xf32>
    %261 = arith.addf %259, %260 : vector<64x8xf32>
    %cst_79 = arith.constant 5.000000e-01 : f32
    %262 = vector.broadcast %cst_79 : f32 to vector<64x8xf32>
    %263 = arith.cmpf ogt, %261, %262 : vector<64x8xf32>
    %264 = arith.extui %263 : vector<64x8xi1> to vector<64x8xi32>
    %265 = arith.sitofp %264 : vector<64x8xi32> to vector<64x8xf32>
    %cst_80 = arith.constant 2.500000e-01 : f32
    %266 = vector.broadcast %cst_80 : f32 to vector<64x8xf32>
    %267 = arith.mulf %261, %266 : vector<64x8xf32>
    %cst_81 = arith.constant 1.000000e+00 : f32
    %268 = vector.broadcast %cst_81 : f32 to vector<64x8xf32>
    %269 = arith.subf %268, %265 : vector<64x8xf32>
    %270 = arith.mulf %267, %269 : vector<64x8xf32>
    %271 = vector.extract_strided_slice %238 {offsets = [192, 0], sizes = [64, 8], strides = [1, 1]} : vector<256x8xf32> to vector<64x8xf32>
    %272 = arith.addf %270, %271 : vector<64x8xf32>
    %cst_82 = arith.constant 5.000000e-01 : f32
    %273 = vector.broadcast %cst_82 : f32 to vector<64x8xf32>
    %274 = arith.cmpf ogt, %272, %273 : vector<64x8xf32>
    %275 = arith.extui %274 : vector<64x8xi1> to vector<64x8xi32>
    %276 = arith.sitofp %275 : vector<64x8xi32> to vector<64x8xf32>
    %277 = tpu.concatenate %243, %254, %265, %276 in 0 : vector<64x8xf32>, vector<64x8xf32>, vector<64x8xf32>, vector<64x8xf32> -> vector<256x8xf32>
    %278 = arith.truncf %277 : vector<256x8xf32> to vector<256x8xbf16>
    %279 = vector.extract_strided_slice %70 {offsets = [16, 0], sizes = [8, 32], strides = [1, 1]} : vector<32x32xbf16> to vector<8x32xbf16>
    %cst_83 = arith.constant dense<0.000000e+00> : vector<256x32xf32>
    %280 = tpu.matmul %278, %279, %cst_83 {dimension_numbers = #tpu.dot_dimension_numbers<[1], [0], [0], [1], [0, 0, 1, 1], [], []>} : vector<256x8xbf16>, vector<8x32xbf16>, vector<256x32xf32> -> vector<256x32xf32>
    %281 = arith.addf %211, %280 : vector<256x32xf32>
    %282 = vector.extract_strided_slice %69 {offsets = [0, 24], sizes = [256, 8], strides = [1, 1]} : vector<256x96xf32> to vector<256x8xf32>
    %283 = vector.shape_cast %282 : vector<256x8xf32> to vector<4x64x8xf32>
    %284 = arith.truncf %283 : vector<4x64x8xf32> to vector<4x64x8xbf16>
    %285 = vector.extract_strided_slice %69 {offsets = [0, 56], sizes = [256, 8], strides = [1, 1]} : vector<256x96xf32> to vector<256x8xf32>
    %286 = vector.shape_cast %285 : vector<256x8xf32> to vector<4x64x8xf32>
    %287 = arith.truncf %286 : vector<4x64x8xf32> to vector<4x64x8xbf16>
    %288 = vector.extract_strided_slice %69 {offsets = [0, 88], sizes = [256, 8], strides = [1, 1]} : vector<256x96xf32> to vector<256x8xf32>
    %289 = vector.shape_cast %288 : vector<256x8xf32> to vector<4x64x8xf32>
    %cst_84 = arith.constant dense<0.000000e+00> : vector<4x64x64xf32>
    %290 = tpu.matmul %284, %287, %cst_84 {dimension_numbers = #tpu.dot_dimension_numbers<[2], [2], [1], [1], [0, 0, 0, 1, 1, 1], [0], [0]>} : vector<4x64x8xbf16>, vector<4x64x8xbf16>, vector<4x64x64xf32> -> vector<4x64x64xf32>
    %cst_85 = arith.constant 0.353553385 : f32
    %291 = vector.broadcast %cst_85 : f32 to vector<4x64x64xf32>
    %292 = arith.mulf %290, %291 : vector<4x64x64xf32>
    %c3 = arith.constant 3 : index
    %c0_86 = arith.constant 0 : index
    %c0_87 = arith.constant 0 : index
    %293 = vector.load %arg6[%c3, %c0_86, %c0_87] : memref<4x64x64xf32, #tpu.memory_space<vmem>>, vector<1x64x64xf32>
    %294 = vector.shape_cast %293 : vector<1x64x64xf32> to vector<64x64xf32>
    %295 = vector.shape_cast %294 : vector<64x64xf32> to vector<1x64x64xf32>
    %296 = vector.broadcast %295 : vector<1x64x64xf32> to vector<4x64x64xf32>
    %297 = arith.addf %292, %296 : vector<4x64x64xf32>
    %cst_88 = arith.constant dense<0xFF800000> : vector<4x64xf32>
    %298 = vector.multi_reduction <maximumf>, %297, %cst_88 [2] : vector<4x64x64xf32> to vector<4x64xf32>
    %299 = vector.shape_cast %298 : vector<4x64xf32> to vector<4x64x1xf32>
    %300 = vector.broadcast %299 : vector<4x64x1xf32> to vector<4x64x64xf32>
    %301 = arith.subf %297, %300 : vector<4x64x64xf32>
    %302 = math.exp %301 : vector<4x64x64xf32>
    %cst_89 = arith.constant dense<0.000000e+00> : vector<4x64xf32>
    %303 = vector.multi_reduction <add>, %302, %cst_89 [2] : vector<4x64x64xf32> to vector<4x64xf32>
    %304 = vector.shape_cast %303 : vector<4x64xf32> to vector<4x64x1xf32>
    %305 = vector.broadcast %304 : vector<4x64x1xf32> to vector<4x64x64xf32>
    %306 = arith.divf %302, %305 : vector<4x64x64xf32>
    %cst_90 = arith.constant dense<0.000000e+00> : vector<4x64x8xf32>
    %307 = tpu.matmul %306, %289, %cst_90 {dimension_numbers = #tpu.dot_dimension_numbers<[2], [1], [1], [2], [0, 0, 0, 1, 1, 2], [0], [0]>} : vector<4x64x64xf32>, vector<4x64x8xf32>, vector<4x64x8xf32> -> vector<4x64x8xf32>
    %308 = vector.shape_cast %307 : vector<4x64x8xf32> to vector<256x8xf32>
    %309 = vector.extract_strided_slice %308 {offsets = [0, 0], sizes = [64, 8], strides = [1, 1]} : vector<256x8xf32> to vector<64x8xf32>
    %cst_91 = arith.constant 5.000000e-01 : f32
    %310 = vector.broadcast %cst_91 : f32 to vector<64x8xf32>
    %311 = arith.cmpf ogt, %309, %310 : vector<64x8xf32>
    %312 = arith.extui %311 : vector<64x8xi1> to vector<64x8xi32>
    %313 = arith.sitofp %312 : vector<64x8xi32> to vector<64x8xf32>
    %cst_92 = arith.constant 2.500000e-01 : f32
    %314 = vector.broadcast %cst_92 : f32 to vector<64x8xf32>
    %315 = arith.mulf %309, %314 : vector<64x8xf32>
    %cst_93 = arith.constant 1.000000e+00 : f32
    %316 = vector.broadcast %cst_93 : f32 to vector<64x8xf32>
    %317 = arith.subf %316, %313 : vector<64x8xf32>
    %318 = arith.mulf %315, %317 : vector<64x8xf32>
    %319 = vector.extract_strided_slice %308 {offsets = [64, 0], sizes = [64, 8], strides = [1, 1]} : vector<256x8xf32> to vector<64x8xf32>
    %320 = arith.addf %318, %319 : vector<64x8xf32>
    %cst_94 = arith.constant 5.000000e-01 : f32
    %321 = vector.broadcast %cst_94 : f32 to vector<64x8xf32>
    %322 = arith.cmpf ogt, %320, %321 : vector<64x8xf32>
    %323 = arith.extui %322 : vector<64x8xi1> to vector<64x8xi32>
    %324 = arith.sitofp %323 : vector<64x8xi32> to vector<64x8xf32>
    %cst_95 = arith.constant 2.500000e-01 : f32
    %325 = vector.broadcast %cst_95 : f32 to vector<64x8xf32>
    %326 = arith.mulf %320, %325 : vector<64x8xf32>
    %cst_96 = arith.constant 1.000000e+00 : f32
    %327 = vector.broadcast %cst_96 : f32 to vector<64x8xf32>
    %328 = arith.subf %327, %324 : vector<64x8xf32>
    %329 = arith.mulf %326, %328 : vector<64x8xf32>
    %330 = vector.extract_strided_slice %308 {offsets = [128, 0], sizes = [64, 8], strides = [1, 1]} : vector<256x8xf32> to vector<64x8xf32>
    %331 = arith.addf %329, %330 : vector<64x8xf32>
    %cst_97 = arith.constant 5.000000e-01 : f32
    %332 = vector.broadcast %cst_97 : f32 to vector<64x8xf32>
    %333 = arith.cmpf ogt, %331, %332 : vector<64x8xf32>
    %334 = arith.extui %333 : vector<64x8xi1> to vector<64x8xi32>
    %335 = arith.sitofp %334 : vector<64x8xi32> to vector<64x8xf32>
    %cst_98 = arith.constant 2.500000e-01 : f32
    %336 = vector.broadcast %cst_98 : f32 to vector<64x8xf32>
    %337 = arith.mulf %331, %336 : vector<64x8xf32>
    %cst_99 = arith.constant 1.000000e+00 : f32
    %338 = vector.broadcast %cst_99 : f32 to vector<64x8xf32>
    %339 = arith.subf %338, %335 : vector<64x8xf32>
    %340 = arith.mulf %337, %339 : vector<64x8xf32>
    %341 = vector.extract_strided_slice %308 {offsets = [192, 0], sizes = [64, 8], strides = [1, 1]} : vector<256x8xf32> to vector<64x8xf32>
    %342 = arith.addf %340, %341 : vector<64x8xf32>
    %cst_100 = arith.constant 5.000000e-01 : f32
    %343 = vector.broadcast %cst_100 : f32 to vector<64x8xf32>
    %344 = arith.cmpf ogt, %342, %343 : vector<64x8xf32>
    %345 = arith.extui %344 : vector<64x8xi1> to vector<64x8xi32>
    %346 = arith.sitofp %345 : vector<64x8xi32> to vector<64x8xf32>
    %347 = tpu.concatenate %313, %324, %335, %346 in 0 : vector<64x8xf32>, vector<64x8xf32>, vector<64x8xf32>, vector<64x8xf32> -> vector<256x8xf32>
    %348 = arith.truncf %347 : vector<256x8xf32> to vector<256x8xbf16>
    %349 = vector.extract_strided_slice %70 {offsets = [24, 0], sizes = [8, 32], strides = [1, 1]} : vector<32x32xbf16> to vector<8x32xbf16>
    %cst_101 = arith.constant dense<0.000000e+00> : vector<256x32xf32>
    %350 = tpu.matmul %348, %349, %cst_101 {dimension_numbers = #tpu.dot_dimension_numbers<[1], [0], [0], [1], [0, 0, 1, 1], [], []>} : vector<256x8xbf16>, vector<8x32xbf16>, vector<256x32xf32> -> vector<256x32xf32>
    %351 = arith.addf %281, %350 : vector<256x32xf32>
    %c0_102 = arith.constant 0 : index
    %c0_103 = arith.constant 0 : index
    %352 = vector.load %arg8[%c0_102, %c0_103] : memref<1x32xf32, #tpu.memory_space<vmem>>, vector<1x32xf32>
    %353 = vector.broadcast %352 : vector<1x32xf32> to vector<256x32xf32>
    %354 = arith.addf %351, %353 : vector<256x32xf32>
    %355 = vector.extract_strided_slice %354 {offsets = [0, 0], sizes = [64, 32], strides = [1, 1]} : vector<256x32xf32> to vector<64x32xf32>
    %cst_104 = arith.constant 5.000000e-01 : f32
    %356 = vector.broadcast %cst_104 : f32 to vector<64x32xf32>
    %357 = arith.cmpf ogt, %355, %356 : vector<64x32xf32>
    %358 = arith.extui %357 : vector<64x32xi1> to vector<64x32xi32>
    %359 = arith.sitofp %358 : vector<64x32xi32> to vector<64x32xf32>
    %cst_105 = arith.constant 2.500000e-01 : f32
    %360 = vector.broadcast %cst_105 : f32 to vector<64x32xf32>
    %361 = arith.mulf %355, %360 : vector<64x32xf32>
    %cst_106 = arith.constant 1.000000e+00 : f32
    %362 = vector.broadcast %cst_106 : f32 to vector<64x32xf32>
    %363 = arith.subf %362, %359 : vector<64x32xf32>
    %364 = arith.mulf %361, %363 : vector<64x32xf32>
    %365 = vector.extract_strided_slice %354 {offsets = [64, 0], sizes = [64, 32], strides = [1, 1]} : vector<256x32xf32> to vector<64x32xf32>
    %366 = arith.addf %364, %365 : vector<64x32xf32>
    %cst_107 = arith.constant 5.000000e-01 : f32
    %367 = vector.broadcast %cst_107 : f32 to vector<64x32xf32>
    %368 = arith.cmpf ogt, %366, %367 : vector<64x32xf32>
    %369 = arith.extui %368 : vector<64x32xi1> to vector<64x32xi32>
    %370 = arith.sitofp %369 : vector<64x32xi32> to vector<64x32xf32>
    %cst_108 = arith.constant 2.500000e-01 : f32
    %371 = vector.broadcast %cst_108 : f32 to vector<64x32xf32>
    %372 = arith.mulf %366, %371 : vector<64x32xf32>
    %cst_109 = arith.constant 1.000000e+00 : f32
    %373 = vector.broadcast %cst_109 : f32 to vector<64x32xf32>
    %374 = arith.subf %373, %370 : vector<64x32xf32>
    %375 = arith.mulf %372, %374 : vector<64x32xf32>
    %376 = vector.extract_strided_slice %354 {offsets = [128, 0], sizes = [64, 32], strides = [1, 1]} : vector<256x32xf32> to vector<64x32xf32>
    %377 = arith.addf %375, %376 : vector<64x32xf32>
    %cst_110 = arith.constant 5.000000e-01 : f32
    %378 = vector.broadcast %cst_110 : f32 to vector<64x32xf32>
    %379 = arith.cmpf ogt, %377, %378 : vector<64x32xf32>
    %380 = arith.extui %379 : vector<64x32xi1> to vector<64x32xi32>
    %381 = arith.sitofp %380 : vector<64x32xi32> to vector<64x32xf32>
    %cst_111 = arith.constant 2.500000e-01 : f32
    %382 = vector.broadcast %cst_111 : f32 to vector<64x32xf32>
    %383 = arith.mulf %377, %382 : vector<64x32xf32>
    %cst_112 = arith.constant 1.000000e+00 : f32
    %384 = vector.broadcast %cst_112 : f32 to vector<64x32xf32>
    %385 = arith.subf %384, %381 : vector<64x32xf32>
    %386 = arith.mulf %383, %385 : vector<64x32xf32>
    %387 = vector.extract_strided_slice %354 {offsets = [192, 0], sizes = [64, 32], strides = [1, 1]} : vector<256x32xf32> to vector<64x32xf32>
    %388 = arith.addf %386, %387 : vector<64x32xf32>
    %cst_113 = arith.constant 5.000000e-01 : f32
    %389 = vector.broadcast %cst_113 : f32 to vector<64x32xf32>
    %390 = arith.cmpf ogt, %388, %389 : vector<64x32xf32>
    %391 = arith.extui %390 : vector<64x32xi1> to vector<64x32xi32>
    %392 = arith.sitofp %391 : vector<64x32xi32> to vector<64x32xf32>
    %393 = tpu.concatenate %359, %370, %381, %392 in 0 : vector<64x32xf32>, vector<64x32xf32>, vector<64x32xf32>, vector<64x32xf32> -> vector<256x32xf32>
    %394 = arith.addf %2, %393 : vector<256x32xf32>
    %cst_114 = arith.constant dense<0.000000e+00> : vector<256xf32>
    %395 = vector.multi_reduction <add>, %394, %cst_114 [1] : vector<256x32xf32> to vector<256xf32>
    %396 = vector.shape_cast %395 : vector<256xf32> to vector<256x1xf32>
    %cst_115 = arith.constant 3.200000e+01 : f32
    %397 = vector.broadcast %cst_115 : f32 to vector<256x1xf32>
    %398 = arith.divf %396, %397 : vector<256x1xf32>
    %399 = vector.broadcast %398 : vector<256x1xf32> to vector<256x32xf32>
    %400 = arith.subf %394, %399 : vector<256x32xf32>
    %401 = arith.mulf %400, %400 : vector<256x32xf32>
    %cst_116 = arith.constant dense<0.000000e+00> : vector<256xf32>
    %402 = vector.multi_reduction <add>, %401, %cst_116 [1] : vector<256x32xf32> to vector<256xf32>
    %403 = vector.shape_cast %402 : vector<256xf32> to vector<256x1xf32>
    %cst_117 = arith.constant 3.200000e+01 : f32
    %404 = vector.broadcast %cst_117 : f32 to vector<256x1xf32>
    %405 = arith.divf %403, %404 : vector<256x1xf32>
    %cst_118 = arith.constant 9.99999974E-6 : f32
    %406 = vector.broadcast %cst_118 : f32 to vector<256x1xf32>
    %407 = arith.addf %405, %406 : vector<256x1xf32>
    %408 = math.rsqrt %407 : vector<256x1xf32>
    %409 = vector.broadcast %408 : vector<256x1xf32> to vector<256x32xf32>
    %410 = arith.mulf %400, %409 : vector<256x32xf32>
    %c0_119 = arith.constant 0 : index
    %c0_120 = arith.constant 0 : index
    %411 = vector.load %arg9[%c0_119, %c0_120] : memref<1x32xf32, #tpu.memory_space<vmem>>, vector<1x32xf32>
    %412 = vector.broadcast %411 : vector<1x32xf32> to vector<256x32xf32>
    %413 = arith.mulf %410, %412 : vector<256x32xf32>
    %c0_121 = arith.constant 0 : index
    %c0_122 = arith.constant 0 : index
    %414 = vector.load %arg10[%c0_121, %c0_122] : memref<1x32xf32, #tpu.memory_space<vmem>>, vector<1x32xf32>
    %415 = vector.broadcast %414 : vector<1x32xf32> to vector<256x32xf32>
    %416 = arith.addf %413, %415 : vector<256x32xf32>
    %417 = arith.truncf %416 : vector<256x32xf32> to vector<256x32xbf16>
    %c0_123 = arith.constant 0 : index
    %c0_124 = arith.constant 0 : index
    %418 = vector.load %arg11[%c0_123, %c0_124] : memref<32x128xbf16, #tpu.memory_space<vmem>>, vector<32x128xbf16>
    %cst_125 = arith.constant dense<0.000000e+00> : vector<256x128xf32>
    %419 = tpu.matmul %417, %418, %cst_125 {dimension_numbers = #tpu.dot_dimension_numbers<[1], [0], [0], [1], [0, 0, 1, 1], [], []>} : vector<256x32xbf16>, vector<32x128xbf16>, vector<256x128xf32> -> vector<256x128xf32>
    %c0_126 = arith.constant 0 : index
    %c0_127 = arith.constant 0 : index
    %420 = vector.load %arg12[%c0_126, %c0_127] : memref<1x128xf32, #tpu.memory_space<vmem>>, vector<1x128xf32>
    %421 = vector.broadcast %420 : vector<1x128xf32> to vector<256x128xf32>
    %422 = arith.addf %419, %421 : vector<256x128xf32>
    %423 = vector.extract_strided_slice %422 {offsets = [0, 0], sizes = [64, 128], strides = [1, 1]} : vector<256x128xf32> to vector<64x128xf32>
    %cst_128 = arith.constant 5.000000e-01 : f32
    %424 = vector.broadcast %cst_128 : f32 to vector<64x128xf32>
    %425 = arith.cmpf ogt, %423, %424 : vector<64x128xf32>
    %426 = arith.extui %425 : vector<64x128xi1> to vector<64x128xi32>
    %427 = arith.sitofp %426 : vector<64x128xi32> to vector<64x128xf32>
    %cst_129 = arith.constant 2.500000e-01 : f32
    %428 = vector.broadcast %cst_129 : f32 to vector<64x128xf32>
    %429 = arith.mulf %423, %428 : vector<64x128xf32>
    %cst_130 = arith.constant 1.000000e+00 : f32
    %430 = vector.broadcast %cst_130 : f32 to vector<64x128xf32>
    %431 = arith.subf %430, %427 : vector<64x128xf32>
    %432 = arith.mulf %429, %431 : vector<64x128xf32>
    %433 = vector.extract_strided_slice %422 {offsets = [64, 0], sizes = [64, 128], strides = [1, 1]} : vector<256x128xf32> to vector<64x128xf32>
    %434 = arith.addf %432, %433 : vector<64x128xf32>
    %cst_131 = arith.constant 5.000000e-01 : f32
    %435 = vector.broadcast %cst_131 : f32 to vector<64x128xf32>
    %436 = arith.cmpf ogt, %434, %435 : vector<64x128xf32>
    %437 = arith.extui %436 : vector<64x128xi1> to vector<64x128xi32>
    %438 = arith.sitofp %437 : vector<64x128xi32> to vector<64x128xf32>
    %cst_132 = arith.constant 2.500000e-01 : f32
    %439 = vector.broadcast %cst_132 : f32 to vector<64x128xf32>
    %440 = arith.mulf %434, %439 : vector<64x128xf32>
    %cst_133 = arith.constant 1.000000e+00 : f32
    %441 = vector.broadcast %cst_133 : f32 to vector<64x128xf32>
    %442 = arith.subf %441, %438 : vector<64x128xf32>
    %443 = arith.mulf %440, %442 : vector<64x128xf32>
    %444 = vector.extract_strided_slice %422 {offsets = [128, 0], sizes = [64, 128], strides = [1, 1]} : vector<256x128xf32> to vector<64x128xf32>
    %445 = arith.addf %443, %444 : vector<64x128xf32>
    %cst_134 = arith.constant 5.000000e-01 : f32
    %446 = vector.broadcast %cst_134 : f32 to vector<64x128xf32>
    %447 = arith.cmpf ogt, %445, %446 : vector<64x128xf32>
    %448 = arith.extui %447 : vector<64x128xi1> to vector<64x128xi32>
    %449 = arith.sitofp %448 : vector<64x128xi32> to vector<64x128xf32>
    %cst_135 = arith.constant 2.500000e-01 : f32
    %450 = vector.broadcast %cst_135 : f32 to vector<64x128xf32>
    %451 = arith.mulf %445, %450 : vector<64x128xf32>
    %cst_136 = arith.constant 1.000000e+00 : f32
    %452 = vector.broadcast %cst_136 : f32 to vector<64x128xf32>
    %453 = arith.subf %452, %449 : vector<64x128xf32>
    %454 = arith.mulf %451, %453 : vector<64x128xf32>
    %455 = vector.extract_strided_slice %422 {offsets = [192, 0], sizes = [64, 128], strides = [1, 1]} : vector<256x128xf32> to vector<64x128xf32>
    %456 = arith.addf %454, %455 : vector<64x128xf32>
    %cst_137 = arith.constant 5.000000e-01 : f32
    %457 = vector.broadcast %cst_137 : f32 to vector<64x128xf32>
    %458 = arith.cmpf ogt, %456, %457 : vector<64x128xf32>
    %459 = arith.extui %458 : vector<64x128xi1> to vector<64x128xi32>
    %460 = arith.sitofp %459 : vector<64x128xi32> to vector<64x128xf32>
    %461 = tpu.concatenate %427, %438, %449, %460 in 0 : vector<64x128xf32>, vector<64x128xf32>, vector<64x128xf32>, vector<64x128xf32> -> vector<256x128xf32>
    %462 = arith.truncf %461 : vector<256x128xf32> to vector<256x128xbf16>
    %c0_138 = arith.constant 0 : index
    %c0_139 = arith.constant 0 : index
    %463 = vector.load %arg13[%c0_138, %c0_139] : memref<128x32xbf16, #tpu.memory_space<vmem>>, vector<128x32xbf16>
    %cst_140 = arith.constant dense<0.000000e+00> : vector<256x32xf32>
    %464 = tpu.matmul %462, %463, %cst_140 {dimension_numbers = #tpu.dot_dimension_numbers<[1], [0], [0], [1], [0, 0, 1, 1], [], []>} : vector<256x128xbf16>, vector<128x32xbf16>, vector<256x32xf32> -> vector<256x32xf32>
    %c0_141 = arith.constant 0 : index
    %c0_142 = arith.constant 0 : index
    %465 = vector.load %arg14[%c0_141, %c0_142] : memref<1x32xf32, #tpu.memory_space<vmem>>, vector<1x32xf32>
    %466 = vector.broadcast %465 : vector<1x32xf32> to vector<256x32xf32>
    %467 = arith.addf %464, %466 : vector<256x32xf32>
    %468 = vector.extract_strided_slice %467 {offsets = [0, 0], sizes = [64, 32], strides = [1, 1]} : vector<256x32xf32> to vector<64x32xf32>
    %cst_143 = arith.constant 5.000000e-01 : f32
    %469 = vector.broadcast %cst_143 : f32 to vector<64x32xf32>
    %470 = arith.cmpf ogt, %468, %469 : vector<64x32xf32>
    %471 = arith.extui %470 : vector<64x32xi1> to vector<64x32xi32>
    %472 = arith.sitofp %471 : vector<64x32xi32> to vector<64x32xf32>
    %cst_144 = arith.constant 2.500000e-01 : f32
    %473 = vector.broadcast %cst_144 : f32 to vector<64x32xf32>
    %474 = arith.mulf %468, %473 : vector<64x32xf32>
    %cst_145 = arith.constant 1.000000e+00 : f32
    %475 = vector.broadcast %cst_145 : f32 to vector<64x32xf32>
    %476 = arith.subf %475, %472 : vector<64x32xf32>
    %477 = arith.mulf %474, %476 : vector<64x32xf32>
    %478 = vector.extract_strided_slice %467 {offsets = [64, 0], sizes = [64, 32], strides = [1, 1]} : vector<256x32xf32> to vector<64x32xf32>
    %479 = arith.addf %477, %478 : vector<64x32xf32>
    %cst_146 = arith.constant 5.000000e-01 : f32
    %480 = vector.broadcast %cst_146 : f32 to vector<64x32xf32>
    %481 = arith.cmpf ogt, %479, %480 : vector<64x32xf32>
    %482 = arith.extui %481 : vector<64x32xi1> to vector<64x32xi32>
    %483 = arith.sitofp %482 : vector<64x32xi32> to vector<64x32xf32>
    %cst_147 = arith.constant 2.500000e-01 : f32
    %484 = vector.broadcast %cst_147 : f32 to vector<64x32xf32>
    %485 = arith.mulf %479, %484 : vector<64x32xf32>
    %cst_148 = arith.constant 1.000000e+00 : f32
    %486 = vector.broadcast %cst_148 : f32 to vector<64x32xf32>
    %487 = arith.subf %486, %483 : vector<64x32xf32>
    %488 = arith.mulf %485, %487 : vector<64x32xf32>
    %489 = vector.extract_strided_slice %467 {offsets = [128, 0], sizes = [64, 32], strides = [1, 1]} : vector<256x32xf32> to vector<64x32xf32>
    %490 = arith.addf %488, %489 : vector<64x32xf32>
    %cst_149 = arith.constant 5.000000e-01 : f32
    %491 = vector.broadcast %cst_149 : f32 to vector<64x32xf32>
    %492 = arith.cmpf ogt, %490, %491 : vector<64x32xf32>
    %493 = arith.extui %492 : vector<64x32xi1> to vector<64x32xi32>
    %494 = arith.sitofp %493 : vector<64x32xi32> to vector<64x32xf32>
    %cst_150 = arith.constant 2.500000e-01 : f32
    %495 = vector.broadcast %cst_150 : f32 to vector<64x32xf32>
    %496 = arith.mulf %490, %495 : vector<64x32xf32>
    %cst_151 = arith.constant 1.000000e+00 : f32
    %497 = vector.broadcast %cst_151 : f32 to vector<64x32xf32>
    %498 = arith.subf %497, %494 : vector<64x32xf32>
    %499 = arith.mulf %496, %498 : vector<64x32xf32>
    %500 = vector.extract_strided_slice %467 {offsets = [192, 0], sizes = [64, 32], strides = [1, 1]} : vector<256x32xf32> to vector<64x32xf32>
    %501 = arith.addf %499, %500 : vector<64x32xf32>
    %cst_152 = arith.constant 5.000000e-01 : f32
    %502 = vector.broadcast %cst_152 : f32 to vector<64x32xf32>
    %503 = arith.cmpf ogt, %501, %502 : vector<64x32xf32>
    %504 = arith.extui %503 : vector<64x32xi1> to vector<64x32xi32>
    %505 = arith.sitofp %504 : vector<64x32xi32> to vector<64x32xf32>
    %506 = tpu.concatenate %472, %483, %494, %505 in 0 : vector<64x32xf32>, vector<64x32xf32>, vector<64x32xf32>, vector<64x32xf32> -> vector<256x32xf32>
    %507 = arith.addf %394, %506 : vector<256x32xf32>
    %508 = vector.shape_cast %507 : vector<256x32xf32> to vector<4x64x32xf32>
    %c0_153 = arith.constant 0 : index
    %c0_154 = arith.constant 0 : index
    %c0_155 = arith.constant 0 : index
    %c0_156 = arith.constant 0 : index
    %509 = vector.load %arg15[%c0_153, %c0_154, %c0_155, %c0_156] : memref<1x4x64x32xf32, #tpu.memory_space<vmem>>, vector<1x4x64x32xf32>
    %510 = vector.shape_cast %509 : vector<1x4x64x32xf32> to vector<4x64x32xf32>
    %511 = vector.shape_cast %508 : vector<4x64x32xf32> to vector<1x4x64x32xf32>
    tpu.vector_store %arg15[%c0_153, %c0_154, %c0_155, %c0_156], %511 {strides = array<i32>} : memref<1x4x64x32xf32, #tpu.memory_space<vmem>>, vector<1x4x64x32xf32>,
    return
  }
  func.func @transform_0(%arg0: i32) -> (i32, i32, i32, i32) {
    %c0_i32 = arith.constant 0 : i32
    %c0_i32_0 = arith.constant 0 : i32
    %c0_i32_1 = arith.constant 0 : i32
    %c0_i32_2 = arith.constant 0 : i32
    return %arg0, %c0_i32, %c0_i32_0, %c0_i32_1 : i32, i32, i32, i32
  }
  func.func @transform_1(%arg0: i32) -> (i32, i32) {
    %c0_i32 = arith.constant 0 : i32
    %c0_i32_0 = arith.constant 0 : i32
    %c0_i32_1 = arith.constant 0 : i32
    return %c0_i32, %c0_i32_0 : i32, i32
  }
  func.func @transform_2(%arg0: i32) -> (i32, i32) {
    %c0_i32 = arith.constant 0 : i32
    %c0_i32_0 = arith.constant 0 : i32
    %c0_i32_1 = arith.constant 0 : i32
    return %c0_i32, %c0_i32_0 : i32, i32
  }
  func.func @transform_3(%arg0: i32) -> (i32, i32) {
    %c0_i32 = arith.constant 0 : i32
    %c0_i32_0 = arith.constant 0 : i32
    %c0_i32_1 = arith.constant 0 : i32
    return %c0_i32, %c0_i32_0 : i32, i32
  }
  func.func @transform_4(%arg0: i32) -> (i32, i32) {
    %c0_i32 = arith.constant 0 : i32
    %c0_i32_0 = arith.constant 0 : i32
    %c0_i32_1 = arith.constant 0 : i32
    return %c0_i32, %c0_i32_0 : i32, i32
  }
  func.func @transform_5(%arg0: i32) -> (i32, i32, i32) {
    %c0_i32 = arith.constant 0 : i32
    %c0_i32_0 = arith.constant 0 : i32
    %c0_i32_1 = arith.constant 0 : i32
    %c0_i32_2 = arith.constant 0 : i32
    return %c0_i32, %c0_i32_0, %c0_i32_1 : i32, i32, i32
  }
  func.func @transform_6(%arg0: i32) -> (i32, i32) {
    %c0_i32 = arith.constant 0 : i32
    %c0_i32_0 = arith.constant 0 : i32
    %c0_i32_1 = arith.constant 0 : i32
    return %c0_i32, %c0_i32_0 : i32, i32
  }
  func.func @transform_7(%arg0: i32) -> (i32, i32) {
    %c0_i32 = arith.constant 0 : i32
    %c0_i32_0 = arith.constant 0 : i32
    %c0_i32_1 = arith.constant 0 : i32
    return %c0_i32, %c0_i32_0 : i32, i32
  }
  func.func @transform_8(%arg0: i32) -> (i32, i32) {
    %c0_i32 = arith.constant 0 : i32
    %c0_i32_0 = arith.constant 0 : i32
    %c0_i32_1 = arith.constant 0 : i32
    return %c0_i32, %c0_i32_0 : i32, i32
  }
  func.func @transform_9(%arg0: i32) -> (i32, i32) {
    %c0_i32 = arith.constant 0 : i32
    %c0_i32_0 = arith.constant 0 : i32
    %c0_i32_1 = arith.constant 0 : i32
    return %c0_i32, %c0_i32_0 : i32, i32
  }
  func.func @transform_10(%arg0: i32) -> (i32, i32) {
    %c0_i32 = arith.constant 0 : i32
    %c0_i32_0 = arith.constant 0 : i32
    %c0_i32_1 = arith.constant 0 : i32
    return %c0_i32, %c0_i32_0 : i32, i32
  }
  func.func @transform_11(%arg0: i32) -> (i32, i32) {
    %c0_i32 = arith.constant 0 : i32
    %c0_i32_0 = arith.constant 0 : i32
    %c0_i32_1 = arith.constant 0 : i32
    return %c0_i32, %c0_i32_0 : i32, i32
  }
  func.func @transform_12(%arg0: i32) -> (i32, i32) {
    %c0_i32 = arith.constant 0 : i32
    %c0_i32_0 = arith.constant 0 : i32
    %c0_i32_1 = arith.constant 0 : i32
    return %c0_i32, %c0_i32_0 : i32, i32
  }
  func.func @transform_13(%arg0: i32) -> (i32, i32) {
    %c0_i32 = arith.constant 0 : i32
    %c0_i32_0 = arith.constant 0 : i32
    %c0_i32_1 = arith.constant 0 : i32
    return %c0_i32, %c0_i32_0 : i32, i32
  }
  func.func @transform_14(%arg0: i32) -> (i32, i32, i32, i32) {
    %c0_i32 = arith.constant 0 : i32
    %c0_i32_0 = arith.constant 0 : i32
    %c0_i32_1 = arith.constant 0 : i32
    %c0_i32_2 = arith.constant 0 : i32
    return %arg0, %c0_i32, %c0_i32_0, %c0_i32_1 : i32, i32, i32, i32
  }
}

</mosaic_0001>

<bundles_post_ra>
// kernel: basic_layer_forward.2
= control target key start
LH: loop header
LB: loop body
LE: loop exit
PB: predicated region body
PF: predicated region fallthrough
CT: control target
= control target key end

     0   :  { %s14057_s29 = smov 0   ;;  %s19293_s0 = inlined_call_operand.vmem [shape: f32[2,4,64,32], index: 0, kind: input, shape index: {}]   ;;  %s19294_s1 = inlined_call_operand.vmem [shape: f32[1,32], index: 1, kind: input, shape index: {}]   ;;  %s19295_s2 = inlined_call_operand.vmem [shape: f32[1,32], index: 2, kind: input, shape index: {}]   ;;  %s19296_s3 = inlined_call_operand.vmem [shape: bf16[32,96], index: 3, kind: input, shape index: {}]   ;;  %s19297_s4 = inlined_call_operand.vmem [shape: f32[1,96], index: 4, kind: input, shape index: {}]   ;;  %s19298_s5 = inlined_call_operand.vmem [shape: f32[4,64,64], index: 5, kind: input, shape index: {}]   ;;  %s19299_s6 = inlined_call_operand.vmem [shape: bf16[32,32], index: 6, kind: input, shape index: {}]   ;;  %s19300_s7 = inlined_call_operand.vmem [shape: f32[1,32], index: 7, kind: input, shape index: {}]   ;;  %s19301_s8 = inlined_call_operand.vmem [shape: f32[1,32], index: 8, kind: input, shape index: {}]   ;;  %s19302_s9 = inlined_call_operand.vmem [shape: f32[1,32], index: 9, kind: input, shape index: {}]   ;;  %s19303_s10 = inlined_call_operand.vmem [shape: bf16[32,128], index: 10, kind: input, shape index: {}]   ;;  %s19304_s11 = inlined_call_operand.vmem [shape: f32[1,128], index: 11, kind: input, shape index: {}]   ;;  %s19305_s12 = inlined_call_operand.vmem [shape: bf16[128,32], index: 12, kind: input, shape index: {}]   ;;  %s19306_s13 = inlined_call_operand.vmem [shape: f32[1,32], index: 13, kind: input, shape index: {}]   ;;  %s19307_s14 = inlined_call_operand.vmem [shape: f32[2,4,64,32], index: 14, kind: output, shape index: {}]  }
   0x1 LB: > { %s10803_s30 = sadd.s32 4294967295, %s13967_s29   ;;  %p10807_p0 = scmp.ge.s32.totalorder %s13967_s29, 1  ;;  %s13967_s29 = sphi %s14057_s29, %s24_s29  }
   0x2   : > { %p412_p1 = scmp.lt.s32.totalorder %s13967_s29, 3 }
   0x4   : > { %p413_p2 = pnand %p10807_p0, %p412_p1 }
   0x6   : > { %416 = sbr.rel (%p413_p2) target bundleno = 4733 (0x127d), region = 76 }
   0xb   : > { %p458_p3 = scmp.lt.s32.totalorder %s10803_s30, 1  ;;  %vm501_vm0 = vcmask 261120   ;;  %vm1469_vm5 = vcmask 64512   ;;  %s13970_s16 = smov 96  }
   0xc   : > { %s13971_s17 = smov 64   ;;  %s13972_s19 = smov 88  }
   0xd   : > { %s19856_s30 = smov (!%p458_p3, %s10803_s30), 1  ;;  %s13973_s20 = smov 120  }
   0xe   : > { %s11434_s15 = sshll.u32 %s19856_s30, 8  ;;  %s13974_s27 = smov 56  }
   0xf   : > { %s14073_s18 = scalar_lea.vmem %s19293_s0, %s11434_s15  ;;  %s13975_s21 = smov 80  }
  0x10   : > { %v14076_v0 = vld [vmem:[%s14073_s18] sm:$0xff]  ;;  %v14079_v1 = vld [vmem:[%s14073_s18 + $0x10] sm:$0xff]  ;;  %v14082_v2 = vld [vmem:[%s14073_s18 + $0x8] sm:$0xff]  ;;  %s13976_s22 = smov 112   ;;  %s19130_s25 = scalar_lea.vmem %s19307_s14, %s11434_s15 }
  0x11   : > { %v502_v3 = vsel %vm501_vm0, %v14076_v0, 0.0  ;;  %v508_v4 = vsel %vm501_vm0, %v14079_v1, 0.0  ;;  %v14089_v5 = vld [vmem:[%s14073_s18 + $0x18] sm:$0xff]  ;;  %v505_v6 = vsel %vm501_vm0, %v14082_v2, 0.0  ;;  %v14096_v8 = vld [vmem:[%s14073_s18 + $0x20] sm:$0xff]  ;;  %v14099_v9 = vld [vmem:[%s14073_s18 + $0x28] sm:$0xff] }
  0x12   : > { %503 = vadd.xlane.f32.xlu0 %v502_v3  ;;  %509 = vadd.xlane.f32.xlu1 %v508_v4  ;;  %v511_v7 = vsel %vm501_vm0, %v14089_v5, 0.0  ;;  %v514_v10 = vsel %vm501_vm0, %v14096_v8, 0.0  ;;  %v517_v11 = vsel %vm501_vm0, %v14099_v9, 0.0  ;;  %v14106_v12 = vld [vmem:[%s14073_s18 + $0x30] sm:$0xff]  ;;  %v14109_v13 = vld [vmem:[%s14073_s18 + $0x38] sm:$0xff]  ;;  %v14114_v15 = vld [vmem:[%s14073_s18 + $0x40] sm:$0xff] }
  0x13   : > { %v520_v14 = vsel %vm501_vm0, %v14106_v12, 0.0  ;;  %v523_v16 = vsel %vm501_vm0, %v14109_v13, 0.0  ;;  %v14119_v17 = vld [vmem:[%s14073_s18 + $0x48] sm:$0xff]  ;;  %v526_v18 = vsel %vm501_vm0, %v14114_v15, 0.0  ;;  %v14126_v20 = vld [vmem:[%s14073_s18 + $0x50] sm:$0xff]  ;;  %v14129_v21 = vld [vmem:[%s14073_s18 + $0x58] sm:$0xff] }
  0x14   : > { %v529_v19 = vsel %vm501_vm0, %v14119_v17, 0.0  ;;  %v532_v22 = vsel %vm501_vm0, %v14126_v20, 0.0  ;;  %v535_v23 = vsel %vm501_vm0, %v14129_v21, 0.0  ;;  %v14136_v24 = vld [vmem:[%s14073_s18 + $0x60] sm:$0xff]  ;;  %v14139_v25 = vld [vmem:[%s14073_s18 + $0x68] sm:$0xff]  ;;  %v14146_v28 = vld [vmem:[%s14073_s18 + $0x70] sm:$0xff] }
  0x15   : > { %v538_v26 = vsel %vm501_vm0, %v14136_v24, 0.0  ;;  %v541_v27 = vsel %vm501_vm0, %v14139_v25, 0.0  ;;  %v14149_v29 = vld [vmem:[%s14073_s18 + $0x78] sm:$0xff]  ;;  %v544_v30 = vsel %vm501_vm0, %v14146_v28, 0.0  ;;  %v14156_v32 = vld [vmem:[%s14073_s18 + $0x80] sm:$0xff]  ;;  %v14159_v33 = vld [vmem:[%s14073_s18 + $0x88] sm:$0xff] }
  0x16   : > { %506 = vadd.xlane.f32.xlu0 %v505_v6  ;;  %512 = vadd.xlane.f32.xlu1 %v511_v7  ;;  %v547_v31 = vsel %vm501_vm0, %v14149_v29, 0.0  ;;  %v550_v34 = vsel %vm501_vm0, %v14156_v32, 0.0  ;;  %v553_v35 = vsel %vm501_vm0, %v14159_v33, 0.0  ;;  %v14166_v36 = vld [vmem:[%s14073_s18 + $0x90] sm:$0xff]  ;;  %v14169_v37 = vld [vmem:[%s14073_s18 + $0x98] sm:$0xff]  ;;  %v14176_v40 = vld [vmem:[%s14073_s18 + $0xa0] sm:$0xff] }
  0x17   : > { %v556_v38 = vsel %vm501_vm0, %v14166_v36, 0.0  ;;  %v559_v39 = vsel %vm501_vm0, %v14169_v37, 0.0  ;;  %v14179_v41 = vld [vmem:[%s14073_s18 + $0xa8] sm:$0xff]  ;;  %v562_v42 = vsel %vm501_vm0, %v14176_v40, 0.0  ;;  %v14186_v44 = vld [vmem:[%s14073_s18 + $0xb0] sm:$0xff]  ;;  %v14189_v45 = vld [vmem:[%s14073_s18 + $0xb8] sm:$0xff] }
  0x18   : > { %v565_v43 = vsel %vm501_vm0, %v14179_v41, 0.0  ;;  %v568_v46 = vsel %vm501_vm0, %v14186_v44, 0.0  ;;  %v571_v47 = vsel %vm501_vm0, %v14189_v45, 0.0  ;;  %v14196_v48 = vld [vmem:[%s14073_s18 + $0xc0] sm:$0xff]  ;;  %v14199_v49 = vld [vmem:[%s14073_s18 + $0xc8] sm:$0xff]  ;;  %v14206_v52 = vld [vmem:[%s14073_s18 + $0xd0] sm:$0xff] }
  0x19   : > { %v574_v50 = vsel %vm501_vm0, %v14196_v48, 0.0  ;;  %v577_v51 = vsel %vm501_vm0, %v14199_v49, 0.0  ;;  %v14209_v53 = vld [vmem:[%s14073_s18 + $0xd8] sm:$0xff]  ;;  %v580_v54 = vsel %vm501_vm0, %v14206_v52, 0.0  ;;  %v14216_v56 = vld [vmem:[%s14073_s18 + $0xe0] sm:$0xff]  ;;  %v14219_v57 = vld [vmem:[%s14073_s18 + $0xe8] sm:$0xff] }
  0x1a   : > { %515 = vadd.xlane.f32.xlu0 %v514_v10  ;;  %518 = vadd.xlane.f32.xlu1 %v517_v11  ;;  %v583_v55 = vsel %vm501_vm0, %v14209_v53, 0.0  ;;  %v586_v58 = vsel %vm501_vm0, %v14216_v56, 0.0  ;;  %v589_v59 = vsel %vm501_vm0, %v14219_v57, 0.0  ;;  %v14226_v60 = vld [vmem:[%s14073_s18 + $0xf0] sm:$0xff]  ;;  %v14229_v61 = vld [vmem:[%s14073_s18 + $0xf8] sm:$0xff] }
  0x1b   : > { %v592_v62 = vsel %vm501_vm0, %v14226_v60, 0.0  ;;  %v595_v63 = vsel %vm501_vm0, %v14229_v61, 0.0 }
  0x1e   : > { %521 = vadd.xlane.f32.xlu0 %v520_v14  ;;  %524 = vadd.xlane.f32.xlu1 %v523_v16 }
  0x22   : > { %527 = vadd.xlane.f32.xlu0 %v526_v18  ;;  %530 = vadd.xlane.f32.xlu1 %v529_v19 }
  0x26   : > { %533 = vadd.xlane.f32.xlu0 %v532_v22  ;;  %536 = vadd.xlane.f32.xlu1 %v535_v23 }
  0x2a   : > { %539 = vadd.xlane.f32.xlu0 %v538_v26  ;;  %542 = vadd.xlane.f32.xlu1 %v541_v27 }
  0x2e   : > { %545 = vadd.xlane.f32.xlu0 %v544_v30  ;;  %548 = vadd.xlane.f32.xlu1 %v547_v31 }
  0x32   : > { %551 = vadd.xlane.f32.xlu0 %v550_v34  ;;  %554 = vadd.xlane.f32.xlu1 %v553_v35 }
  0x36   : > { %557 = vadd.xlane.f32.xlu0 %v556_v38  ;;  %560 = vadd.xlane.f32.xlu1 %v559_v39 }
  0x3a   : > { %563 = vadd.xlane.f32.xlu0 %v562_v42  ;;  %566 = vadd.xlane.f32.xlu1 %v565_v43 }
  0x3e   : > { %569 = vadd.xlane.f32.xlu0 %v568_v46  ;;  %572 = vadd.xlane.f32.xlu1 %v571_v47 }
  0x42   : > { %575 = vadd.xlane.f32.xlu0 %v574_v50  ;;  %578 = vadd.xlane.f32.xlu1 %v577_v51 }
  0x46   : > { %581 = vadd.xlane.f32.xlu0 %v580_v54  ;;  %584 = vadd.xlane.f32.xlu1 %v583_v55 }
  0x4a   : > { %587 = vadd.xlane.f32.xlu0 %v586_v58  ;;  %590 = vadd.xlane.f32.xlu1 %v589_v59 }
  0x4e   : > { %593 = vadd.xlane.f32.xlu0 %v592_v62  ;;  %596 = vadd.xlane.f32.xlu1 %v595_v63 }
  0x9b   : > { %v504_v3 = vpop.xlane.xlu0 %503  ;;  %v510_v4 = vpop.xlane.xlu1 %509 }
  0x9c   : > { %v599_v6 = vmul.f32 0.03125, %v504_v3  ;;  %v601_v7 = vmul.f32 0.03125, %v510_v4 }
  0x9e   : > { %v14236_v10 = vsub.f32 %v14076_v0, %v599_v6  ;;  %v14239_v11 = vsub.f32 %v14079_v1, %v601_v7 }
  0x9f   : > { %v507_v14 = vpop.xlane.xlu0 %506  ;;  %v513_v16 = vpop.xlane.xlu1 %512 }
  0xa0   : > { %v600_v18 = vmul.f32 0.03125, %v507_v14  ;;  %v602_v19 = vmul.f32 0.03125, %v513_v16  ;;  %v663_v22 = vmul.f32 %v14236_v10, %v14236_v10  ;;  %v665_v23 = vmul.f32 %v14239_v11, %v14239_v11 }
  0xa2   : > { %v14246_v26 = vsub.f32 %v14082_v2, %v600_v18  ;;  %v14249_v27 = vsub.f32 %v14089_v5, %v602_v19  ;;  %v695_v0 = vsel %vm501_vm0, %v663_v22, 0.0  ;;  %v701_v31 = vsel %vm501_vm0, %v665_v23, 0.0 }
  0xa3   : > { %696 = vadd.xlane.f32.xlu0 %v695_v0  ;;  %v516_v1 = vpop.xlane.xlu0 %515  ;;  %v519_v30 = vpop.xlane.xlu1 %518 }
  0xa4   : > { %v603_v34 = vmul.f32 0.03125, %v516_v1  ;;  %v604_v35 = vmul.f32 0.03125, %v519_v30  ;;  %v664_v38 = vmul.f32 %v14246_v26, %v14246_v26  ;;  %v666_v39 = vmul.f32 %v14249_v27, %v14249_v27 }
  0xa6   : > { %v14258_v2 = vsub.f32 %v14096_v8, %v603_v34  ;;  %v14261_v5 = vsub.f32 %v14099_v9, %v604_v35  ;;  %v698_v42 = vsel %vm501_vm0, %v664_v38, 0.0  ;;  %v704_v47 = vsel %vm501_vm0, %v666_v39, 0.0 }
  0xa7   : > { %702 = vadd.xlane.f32.xlu0 %v701_v31  ;;  %699 = vadd.xlane.f32.xlu1 %v698_v42  ;;  %v522_v43 = vpop.xlane.xlu0 %521  ;;  %v525_v46 = vpop.xlane.xlu1 %524 }
  0xa8   : > { %v605_v50 = vmul.f32 0.03125, %v522_v43  ;;  %v606_v51 = vmul.f32 0.03125, %v525_v46  ;;  %v667_v54 = vmul.f32 %v14258_v2, %v14258_v2  ;;  %v668_v8 = vmul.f32 %v14261_v5, %v14261_v5 }
  0xaa   : > { %v14270_v55 = vsub.f32 %v14106_v12, %v605_v50  ;;  %v14273_v9 = vsub.f32 %v14109_v13, %v606_v51  ;;  %v707_v58 = vsel %vm501_vm0, %v667_v54, 0.0  ;;  %v710_v63 = vsel %vm501_vm0, %v668_v8, 0.0 }
  0xab   : > { %705 = vadd.xlane.f32.xlu1 %v704_v47  ;;  %708 = vadd.xlane.f32.xlu0 %v707_v58  ;;  %v528_v59 = vpop.xlane.xlu0 %527  ;;  %v531_v62 = vpop.xlane.xlu1 %530 }
  0xac   : > { %v607_v3 = vmul.f32 0.03125, %v528_v59  ;;  %v608_v4 = vmul.f32 0.03125, %v531_v62  ;;  %v669_v6 = vmul.f32 %v14270_v55, %v14270_v55  ;;  %v670_v12 = vmul.f32 %v14273_v9, %v14273_v9 }
  0xae   : > { %v14282_v7 = vsub.f32 %v14114_v15, %v607_v3  ;;  %v14285_v13 = vsub.f32 %v14119_v17, %v608_v4  ;;  %v713_v14 = vsel %vm501_vm0, %v669_v6, 0.0  ;;  %v716_v19 = vsel %vm501_vm0, %v670_v12, 0.0 }
  0xaf   : > { %711 = vadd.xlane.f32.xlu1 %v710_v63  ;;  %714 = vadd.xlane.f32.xlu0 %v713_v14  ;;  %v534_v16 = vpop.xlane.xlu0 %533  ;;  %v537_v18 = vpop.xlane.xlu1 %536 }
  0xb0   : > { %v609_v22 = vmul.f32 0.03125, %v534_v16  ;;  %v610_v23 = vmul.f32 0.03125, %v537_v18  ;;  %v671_v0 = vmul.f32 %v14282_v7, %v14282_v7  ;;  %v672_v15 = vmul.f32 %v14285_v13, %v14285_v13 }
  0xb2   : > { %v14294_v1 = vsub.f32 %v14126_v20, %v609_v22  ;;  %v14297_v17 = vsub.f32 %v14129_v21, %v610_v23  ;;  %v719_v30 = vsel %vm501_vm0, %v671_v0, 0.0  ;;  %v722_v35 = vsel %vm501_vm0, %v672_v15, 0.0 }
  0xb3   : > { %717 = vadd.xlane.f32.xlu1 %v716_v19  ;;  %720 = vadd.xlane.f32.xlu0 %v719_v30  ;;  %v540_v31 = vpop.xlane.xlu0 %539  ;;  %v543_v34 = vpop.xlane.xlu1 %542 }
  0xb4   : > { %v611_v38 = vmul.f32 0.03125, %v540_v31  ;;  %v612_v39 = vmul.f32 0.03125, %v543_v34  ;;  %v673_v42 = vmul.f32 %v14294_v1, %v14294_v1  ;;  %v674_v20 = vmul.f32 %v14297_v17, %v14297_v17 }
  0xb6   : > { %v14306_v43 = vsub.f32 %v14136_v24, %v611_v38  ;;  %v14309_v21 = vsub.f32 %v14139_v25, %v612_v39  ;;  %v725_v46 = vsel %vm501_vm0, %v673_v42, 0.0  ;;  %v728_v51 = vsel %vm501_vm0, %v674_v20, 0.0 }
  0xb7   : > { %723 = vadd.xlane.f32.xlu1 %v722_v35  ;;  %726 = vadd.xlane.f32.xlu0 %v725_v46  ;;  %v546_v47 = vpop.xlane.xlu0 %545  ;;  %v549_v50 = vpop.xlane.xlu1 %548 }
  0xb8   : > { %v613_v54 = vmul.f32 0.03125, %v546_v47  ;;  %v614_v8 = vmul.f32 0.03125, %v549_v50  ;;  %v675_v58 = vmul.f32 %v14306_v43, %v14306_v43  ;;  %v676_v24 = vmul.f32 %v14309_v21, %v14309_v21 }
  0xba   : > { %v14318_v59 = vsub.f32 %v14146_v28, %v613_v54  ;;  %v14321_v25 = vsub.f32 %v14149_v29, %v614_v8  ;;  %v731_v62 = vsel %vm501_vm0, %v675_v58, 0.0  ;;  %v734_v4 = vsel %vm501_vm0, %v676_v24, 0.0 }
  0xbb   : > { %729 = vadd.xlane.f32.xlu1 %v728_v51  ;;  %732 = vadd.xlane.f32.xlu0 %v731_v62  ;;  %v552_v63 = vpop.xlane.xlu0 %551  ;;  %v555_v3 = vpop.xlane.xlu1 %554  ;;  %v13277_v51 = vld [vmem:[%s19296_s3 + $0x8] sm:$0xff]  }
  0xbc   : > { %v615_v6 = vmul.f32 0.03125, %v552_v63  ;;  %v616_v12 = vmul.f32 0.03125, %v555_v3  ;;  %v677_v14 = vmul.f32 %v14318_v59, %v14318_v59  ;;  %v678_v28 = vmul.f32 %v14321_v25, %v14321_v25  ;;  %11948 = vmatprep.subr.bf16.mxu0 %v13277_v51  ;;  %12908 = vmatprep.subr.bf16.mxu1 %v13277_v51 }
  0xbd   : > { %11949 = vmatpush3.bf16.msra.mxu0 %v13277_v51  ;;  %12910 = vmatpush3.bf16.msra.mxu1 %v13277_v51 }
  0xbe   : > { %v14330_v16 = vsub.f32 %v14156_v32, %v615_v6  ;;  %v14333_v29 = vsub.f32 %v14159_v33, %v616_v12  ;;  %v737_v18 = vsel %vm501_vm0, %v677_v14, 0.0  ;;  %v740_v23 = vsel %vm501_vm0, %v678_v28, 0.0  ;;  %v13278_v6 = vld [vmem:[%s19296_s3] sm:$0xff]  }
  0xbf   : > { %735 = vadd.xlane.f32.xlu1 %v734_v4  ;;  %738 = vadd.xlane.f32.xlu0 %v737_v18  ;;  %v558_v19 = vpop.xlane.xlu0 %557  ;;  %v561_v22 = vpop.xlane.xlu1 %560 }
  0xc0   : > { %v617_v0 = vmul.f32 0.03125, %v558_v19  ;;  %v618_v15 = vmul.f32 0.03125, %v561_v22  ;;  %v679_v30 = vmul.f32 %v14330_v16, %v14330_v16  ;;  %v680_v32 = vmul.f32 %v14333_v29, %v14333_v29  ;;  %11950 = vmatprep.subr.bf16.mxu0 %v13278_v6  ;;  %12909 = vmatprep.subr.bf16.mxu1 %v13278_v6 }
  0xc1   : > { %11951 = vmatpush3.bf16.msra.mxu0 %v13278_v6  ;;  %12911 = vmatpush3.bf16.msra.mxu1 %v13278_v6 }
  0xc2   : > { %v14342_v31 = vsub.f32 %v14166_v36, %v617_v0  ;;  %v14345_v33 = vsub.f32 %v14169_v37, %v618_v15  ;;  %v743_v34 = vsel %vm501_vm0, %v679_v30, 0.0  ;;  %v746_v39 = vsel %vm501_vm0, %v680_v32, 0.0 }
  0xc3   : > { %741 = vadd.xlane.f32.xlu1 %v740_v23  ;;  %744 = vadd.xlane.f32.xlu0 %v743_v34  ;;  %v564_v35 = vpop.xlane.xlu0 %563  ;;  %v567_v38 = vpop.xlane.xlu1 %566 }
  0xc4   : > { %v619_v42 = vmul.f32 0.03125, %v564_v35  ;;  %v620_v20 = vmul.f32 0.03125, %v567_v38  ;;  %v681_v46 = vmul.f32 %v14342_v31, %v14342_v31  ;;  %v682_v36 = vmul.f32 %v14345_v33, %v14345_v33 }
  0xc6   : > { %v14354_v47 = vsub.f32 %v14176_v40, %v619_v42  ;;  %v14357_v37 = vsub.f32 %v14179_v41, %v620_v20  ;;  %v749_v50 = vsel %vm501_vm0, %v681_v46, 0.0  ;;  %v752_v58 = vsel %vm501_vm0, %v682_v36, 0.0 }
  0xc7   : > { %747 = vadd.xlane.f32.xlu1 %v746_v39  ;;  %750 = vadd.xlane.f32.xlu0 %v749_v50  ;;  %v570_v54 = vpop.xlane.xlu0 %569  ;;  %v573_v8 = vpop.xlane.xlu1 %572 }
  0xc8   : > { %v621_v24 = vmul.f32 0.03125, %v570_v54  ;;  %v622_v62 = vmul.f32 0.03125, %v573_v8  ;;  %v683_v40 = vmul.f32 %v14354_v47, %v14354_v47  ;;  %v684_v41 = vmul.f32 %v14357_v37, %v14357_v37 }
  0xca   : > { %v14369_v63 = vsub.f32 %v14186_v44, %v621_v24  ;;  %v14372_v3 = vsub.f32 %v14189_v45, %v622_v62  ;;  %v755_v4 = vsel %vm501_vm0, %v683_v40, 0.0  ;;  %v758_v28 = vsel %vm501_vm0, %v684_v41, 0.0 }
  0xcb   : > { %753 = vadd.xlane.f32.xlu1 %v752_v58  ;;  %756 = vadd.xlane.f32.xlu0 %v755_v4  ;;  %v576_v12 = vpop.xlane.xlu0 %575  ;;  %v579_v14 = vpop.xlane.xlu1 %578 }
  0xcc   : > { %v623_v18 = vmul.f32 0.03125, %v576_v12  ;;  %v624_v19 = vmul.f32 0.03125, %v579_v14  ;;  %v685_v44 = vmul.f32 %v14369_v63, %v14369_v63  ;;  %v686_v45 = vmul.f32 %v14372_v3, %v14372_v3 }
  0xce   : > { %v14384_v22 = vsub.f32 %v14196_v48, %v623_v18  ;;  %v14387_v23 = vsub.f32 %v14199_v49, %v624_v19  ;;  %v761_v0 = vsel %vm501_vm0, %v685_v44, 0.0  ;;  %v764_v32 = vsel %vm501_vm0, %v686_v45, 0.0 }
  0xcf   : > { %759 = vadd.xlane.f32.xlu1 %v758_v28  ;;  %762 = vadd.xlane.f32.xlu0 %v761_v0  ;;  %v582_v15 = vpop.xlane.xlu0 %581  ;;  %v585_v30 = vpop.xlane.xlu1 %584 }
  0xd0   : > { %v625_v34 = vmul.f32 0.03125, %v582_v15  ;;  %v626_v35 = vmul.f32 0.03125, %v585_v30  ;;  %v687_v38 = vmul.f32 %v14384_v22, %v14384_v22  ;;  %v688_v48 = vmul.f32 %v14387_v23, %v14387_v23 }
  0xd2   : > { %v14396_v39 = vsub.f32 %v14206_v52, %v625_v34  ;;  %v14399_v49 = vsub.f32 %v14209_v53, %v626_v35  ;;  %v767_v42 = vsel %vm501_vm0, %v687_v38, 0.0  ;;  %v770_v36 = vsel %vm501_vm0, %v688_v48, 0.0 }
  0xd3   : > { %765 = vadd.xlane.f32.xlu1 %v764_v32  ;;  %768 = vadd.xlane.f32.xlu0 %v767_v42  ;;  %v588_v20 = vpop.xlane.xlu0 %587  ;;  %v591_v46 = vpop.xlane.xlu1 %590 }
  0xd4   : > { %v627_v50 = vmul.f32 0.03125, %v588_v20  ;;  %v628_v51 = vmul.f32 0.03125, %v591_v46  ;;  %v689_v54 = vmul.f32 %v14396_v39, %v14396_v39  ;;  %v690_v52 = vmul.f32 %v14399_v49, %v14399_v49 }
  0xd6   : > { %v14408_v8 = vsub.f32 %v14216_v56, %v627_v50  ;;  %v14411_v53 = vsub.f32 %v14219_v57, %v628_v51  ;;  %v773_v58 = vsel %vm501_vm0, %v689_v54, 0.0  ;;  %v776_v40 = vsel %vm501_vm0, %v690_v52, 0.0 }
  0xd7   : > { %771 = vadd.xlane.f32.xlu1 %v770_v36  ;;  %774 = vadd.xlane.f32.xlu0 %v773_v58  ;;  %v594_v24 = vpop.xlane.xlu0 %593  ;;  %v597_v62 = vpop.xlane.xlu1 %596 }
  0xd8   : > { %v629_v41 = vmul.f32 0.03125, %v594_v24  ;;  %v630_v4 = vmul.f32 0.03125, %v597_v62  ;;  %v691_v6 = vmul.f32 %v14408_v8, %v14408_v8  ;;  %v692_v56 = vmul.f32 %v14411_v53, %v14411_v53 }
  0xda   : > { %v14420_v12 = vsub.f32 %v14226_v60, %v629_v41  ;;  %v14423_v57 = vsub.f32 %v14229_v61, %v630_v4  ;;  %v779_v14 = vsel %vm501_vm0, %v691_v6, 0.0  ;;  %v782_v28 = vsel %vm501_vm0, %v692_v56, 0.0 }
  0xdb   : > { %777 = vadd.xlane.f32.xlu1 %v776_v40  ;;  %780 = vadd.xlane.f32.xlu0 %v779_v14 }
  0xdc   : > { %v693_v18 = vmul.f32 %v14420_v12, %v14420_v12  ;;  %v694_v19 = vmul.f32 %v14423_v57, %v14423_v57 }
  0xde   : > { %v785_v44 = vsel %vm501_vm0, %v693_v18, 0.0  ;;  %v788_v60 = vsel %vm501_vm0, %v694_v19, 0.0  ;;  %v14437_v19 = vld [vmem:[%s19294_s1] ss:$0 sm:$0xff] }
  0xdf   : > { %783 = vadd.xlane.f32.xlu1 %v782_v28  ;;  %786 = vadd.xlane.f32.xlu0 %v785_v44 }
  0xe3   : > { %789 = vadd.xlane.f32.xlu1 %v788_v60 }
 0x12c   : > { %v697_v61 = vpop.xlane.xlu0 %696 }
 0x12d   : > { %v791_v45 = vmul.f32 0.03125, %v697_v61 }
 0x12f   : > { %v823_v0 = vadd.f32 1e-05, %v791_v45 }
 0x130   : > { %v700_v15 = vpop.xlane.xlu1 %699  ;;  %v703_v30 = vpop.xlane.xlu0 %702 }
 0x131   : > { %13289 = vrsqrt.f32 %v823_v0  ;;  %v792_v32 = vmul.f32 0.03125, %v700_v15  ;;  %v793_v34 = vmul.f32 0.03125, %v703_v30 }
 0x133   : > { %v824_v35 = vadd.f32 1e-05, %v792_v32  ;;  %v825_v38 = vadd.f32 1e-05, %v793_v34 }
 0x134   : > { %v706_v48 = vpop.xlane.xlu1 %705  ;;  %v709_v42 = vpop.xlane.xlu0 %708 }
 0x135   : > { %13291 = vrsqrt.f32 %v824_v35  ;;  %v794_v20 = vmul.f32 0.03125, %v706_v48  ;;  %v795_v46 = vmul.f32 0.03125, %v709_v42 }
 0x136   : > { %13293 = vrsqrt.f32 %v825_v38 }
 0x137   : > { %v826_v36 = vadd.f32 1e-05, %v794_v20  ;;  %v827_v50 = vadd.f32 1e-05, %v795_v46 }
 0x138   : > { %v712_v51 = vpop.xlane.xlu1 %711  ;;  %v715_v54 = vpop.xlane.xlu0 %714 }
 0x139   : > { %13295 = vrsqrt.f32 %v826_v36  ;;  %v796_v52 = vmul.f32 0.03125, %v712_v51  ;;  %v797_v58 = vmul.f32 0.03125, %v715_v54 }
 0x13a   : > { %13297 = vrsqrt.f32 %v827_v50 }
 0x13b   : > { %v828_v24 = vadd.f32 1e-05, %v796_v52  ;;  %v829_v62 = vadd.f32 1e-05, %v797_v58 }
 0x13c   : > { %v718_v40 = vpop.xlane.xlu1 %717  ;;  %v721_v41 = vpop.xlane.xlu0 %720 }
 0x13d   : > { %13299 = vrsqrt.f32 %v828_v24  ;;  %v798_v4 = vmul.f32 0.03125, %v718_v40  ;;  %v799_v6 = vmul.f32 0.03125, %v721_v41 }
 0x13e   : > { %v13290_v56 = vpop.eup %13289  ;;  %13301 = vrsqrt.f32 %v829_v62 }
 0x13f   : > { %v830_v14 = vadd.f32 1e-05, %v798_v4  ;;  %v831_v28 = vadd.f32 1e-05, %v799_v6  ;;  %v887_v18 = vmul.f32 %v13290_v56, %v14236_v10  ;;  %v14444_v10 = vld [vmem:[%s19295_s2] ss:$0 sm:$0xff] }
 0x140   : > { %v724_v44 = vpop.xlane.xlu1 %723  ;;  %v727_v60 = vpop.xlane.xlu0 %726 }
 0x141   : > { %13303 = vrsqrt.f32 %v830_v14  ;;  %v800_v61 = vmul.f32 0.03125, %v724_v44  ;;  %v801_v45 = vmul.f32 0.03125, %v727_v60  ;;  %v926_v15 = vmul.f32 %v14437_v19, %v887_v18 }
 0x142   : > { %v13292_v0 = vpop.eup %13291  ;;  %13305 = vrsqrt.f32 %v831_v28 }
 0x143   : > { %v13294_v30 = vpop.eup %13293  ;;  %v832_v32 = vadd.f32 1e-05, %v800_v61  ;;  %v833_v34 = vadd.f32 1e-05, %v801_v45  ;;  %v888_v35 = vmul.f32 %v13292_v0, %v14246_v26  ;;  %v965_v51 = vadd.f32 %v14444_v10, %v926_v15 }
 0x144   : > { %v730_v38 = vpop.xlane.xlu1 %729  ;;  %v733_v48 = vpop.xlane.xlu0 %732  ;;  %v889_v42 = vmul.f32 %v13294_v30, %v14239_v11 }
 0x145   : > { %13307 = vrsqrt.f32 %v832_v32  ;;  %v802_v20 = vmul.f32 0.03125, %v730_v38  ;;  %v803_v46 = vmul.f32 0.03125, %v733_v48  ;;  %v927_v36 = vmul.f32 %v14437_v19, %v888_v35 }
 0x146   : > { %v13296_v50 = vpop.eup %13295  ;;  %13309 = vrsqrt.f32 %v833_v34  ;;  %v928_v11 = vmul.f32 %v14437_v19, %v889_v42 }
 0x147   : > { %v13298_v54 = vpop.eup %13297  ;;  %v834_v26 = vadd.f32 1e-05, %v802_v20  ;;  %v835_v52 = vadd.f32 1e-05, %v803_v46  ;;  %v966_v58 = vadd.f32 %v14444_v10, %v927_v36  ;;  %v890_v24 = vmul.f32 %v13296_v50, %v14249_v27 }
 0x148   : > { %v736_v62 = vpop.xlane.xlu1 %735  ;;  %v739_v40 = vpop.xlane.xlu0 %738  ;;  %v891_v41 = vmul.f32 %v13298_v54, %v14258_v2  ;;  %v967_v2 = vadd.f32 %v14444_v10, %v928_v11 }
 0x149   : > { %13311 = vrsqrt.f32 %v834_v26  ;;  %v804_v4 = vmul.f32 0.03125, %v736_v62  ;;  %v805_v6 = vmul.f32 0.03125, %v739_v40  ;;  %v997_v56 = vpack.c.bf16 %v966_v58, %v965_v51 }
 0x14a   : > { %v13300_v14 = vpop.eup %13299  ;;  %13313 = vrsqrt.f32 %v835_v52  ;;  %v929_v28 = vmul.f32 %v14437_v19, %v890_v24  ;;  %v930_v18 = vmul.f32 %v14437_v19, %v891_v41 }
 0x14b   : > { %v13302_v44 = vpop.eup %13301  ;;  %v836_v60 = vadd.f32 1e-05, %v804_v4  ;;  %v837_v61 = vadd.f32 1e-05, %v805_v6  ;;  %11952 = vmatprep.mubr.msk.bf16.mxu0 %vm501_vm0, %v997_v56  ;;  %v892_v27 = vmul.f32 %v13300_v14, %v14261_v5 }
 0x14c   : > { %v742_v45 = vpop.xlane.xlu1 %741  ;;  %v745_v0 = vpop.xlane.xlu0 %744  ;;  %v968_v15 = vadd.f32 %v14444_v10, %v929_v28  ;;  %v893_v30 = vmul.f32 %v13302_v44, %v14270_v55  ;;  %v969_v42 = vadd.f32 %v14444_v10, %v930_v18 }
 0x14d   : > { %13315 = vrsqrt.f32 %v836_v60  ;;  %v806_v32 = vmul.f32 0.03125, %v742_v45  ;;  %v807_v34 = vmul.f32 0.03125, %v745_v0  ;;  %v931_v35 = vmul.f32 %v14437_v19, %v892_v27 }
 0x14e   : > { %v13304_v38 = vpop.eup %13303  ;;  %13317 = vrsqrt.f32 %v837_v61  ;;  %v998_v48 = vpack.c.bf16 %v968_v15, %v967_v2  ;;  %v932_v54 = vmul.f32 %v14437_v19, %v893_v30 }
 0x14f   : > { %v13306_v20 = vpop.eup %13305  ;;  %v838_v5 = vadd.f32 1e-05, %v806_v32  ;;  %v839_v46 = vadd.f32 1e-05, %v807_v34  ;;  %v970_v36 = vadd.f32 %v14444_v10, %v931_v35  ;;  %v894_v50 = vmul.f32 %v13304_v38, %v14273_v9 }
 0x150   : > { %11953 = vmatmul.mubr.msk.bf16.vlgmr.msra.gmra.mxu0 %vm501_vm0, %v998_v48  ;;  %v748_v55 = vpop.xlane.xlu1 %747  ;;  %v751_v51 = vpop.xlane.xlu0 %750  ;;  %v895_v26 = vmul.f32 %v13306_v20, %v14282_v7  ;;  %v971_v7 = vadd.f32 %v14444_v10, %v932_v54 }
 0x151   : > { %13319 = vrsqrt.f32 %v838_v5  ;;  %v808_v52 = vmul.f32 0.03125, %v748_v55  ;;  %v809_v58 = vmul.f32 0.03125, %v751_v51  ;;  %v999_v24 = vpack.c.bf16 %v970_v36, %v969_v42 }
 0x152   : > { %v13308_v62 = vpop.eup %13307  ;;  %13321 = vrsqrt.f32 %v839_v46  ;;  %v933_v40 = vmul.f32 %v14437_v19, %v894_v50  ;;  %v934_v11 = vmul.f32 %v14437_v19, %v895_v26 }
 0x153   : > { %v13310_v41 = vpop.eup %13309  ;;  %v840_v9 = vadd.f32 1e-05, %v808_v52  ;;  %v841_v4 = vadd.f32 1e-05, %v809_v58  ;;  %11956 = vmatprep.mubr.msk.bf16.mxu0 %vm501_vm0, %v999_v24  ;;  %v896_v6 = vmul.f32 %v13308_v62, %v14285_v13 }
 0x154   : > { %v754_v56 = vpop.xlane.xlu1 %753  ;;  %v757_v14 = vpop.xlane.xlu0 %756  ;;  %v972_v28 = vadd.f32 %v14444_v10, %v933_v40  ;;  %v897_v18 = vmul.f32 %v13310_v41, %v14294_v1  ;;  %v973_v0 = vadd.f32 %v14444_v10, %v934_v11 }
 0x155   : > { %13323 = vrsqrt.f32 %v840_v9  ;;  %v810_v44 = vmul.f32 0.03125, %v754_v56  ;;  %v811_v60 = vmul.f32 0.03125, %v757_v14  ;;  %v935_v61 = vmul.f32 %v14437_v19, %v896_v6 }
 0x156   : > { %v13312_v27 = vpop.eup %13311  ;;  %13325 = vrsqrt.f32 %v841_v4  ;;  %v1000_v45 = vpack.c.bf16 %v972_v28, %v971_v7  ;;  %v936_v35 = vmul.f32 %v14437_v19, %v897_v18 }
 0x157   : > { %v13314_v2 = vpop.eup %13313  ;;  %v842_v13 = vadd.f32 1e-05, %v810_v44  ;;  %v843_v15 = vadd.f32 1e-05, %v811_v60  ;;  %v974_v30 = vadd.f32 %v14444_v10, %v935_v61  ;;  %v898_v32 = vmul.f32 %v13312_v27, %v14297_v17 }
 0x158   : > { %11957 = vmatmul.mubr.msk.bf16.gmra.mxu0 %vm501_vm0, %v1000_v45  ;;  %v760_v1 = vpop.xlane.xlu1 %759  ;;  %v763_v34 = vpop.xlane.xlu0 %762  ;;  %v899_v38 = vmul.f32 %v13314_v2, %v14306_v43  ;;  %v975_v43 = vadd.f32 %v14444_v10, %v936_v35 }
 0x159   : > { %13327 = vrsqrt.f32 %v842_v13  ;;  %v812_v48 = vmul.f32 0.03125, %v760_v1  ;;  %v813_v42 = vmul.f32 0.03125, %v763_v34  ;;  %v1001_v20 = vpack.c.bf16 %v974_v30, %v973_v0 }
 0x15a   : > { %v13316_v5 = vpop.eup %13315  ;;  %13329 = vrsqrt.f32 %v843_v15  ;;  %v937_v46 = vmul.f32 %v14437_v19, %v898_v32  ;;  %v938_v36 = vmul.f32 %v14437_v19, %v899_v38 }
 0x15b   : > { %v13318_v50 = vpop.eup %13317  ;;  %v844_v17 = vadd.f32 1e-05, %v812_v48  ;;  %v845_v55 = vadd.f32 1e-05, %v813_v42  ;;  %11960 = vmatprep.mubr.msk.bf16.mxu0 %vm501_vm0, %v1001_v20  ;;  %v900_v51 = vmul.f32 %v13316_v5, %v14309_v21 }
 0x15c   : > { %v766_v54 = vpop.xlane.xlu1 %765  ;;  %v769_v26 = vpop.xlane.xlu0 %768  ;;  %v976_v52 = vadd.f32 %v14444_v10, %v937_v46  ;;  %v901_v58 = vmul.f32 %v13318_v50, %v14318_v59  ;;  %v977_v9 = vadd.f32 %v14444_v10, %v938_v36 }
 0x15d   : > { %13331 = vrsqrt.f32 %v844_v17  ;;  %v814_v24 = vmul.f32 0.03125, %v766_v54  ;;  %v815_v62 = vmul.f32 0.03125, %v769_v26  ;;  %v939_v40 = vmul.f32 %v14437_v19, %v900_v51 }
 0x15e   : > { %v13320_v11 = vpop.eup %13319  ;;  %13333 = vrsqrt.f32 %v845_v55  ;;  %v1002_v41 = vpack.c.bf16 %v976_v52, %v975_v43  ;;  %v940_v28 = vmul.f32 %v14437_v19, %v901_v58 }
 0x15f   : > { %v13322_v4 = vpop.eup %13321  ;;  %v846_v21 = vadd.f32 1e-05, %v814_v24  ;;  %v847_v6 = vadd.f32 1e-05, %v815_v62  ;;  %v978_v56 = vadd.f32 %v14444_v10, %v939_v40  ;;  %v902_v14 = vmul.f32 %v13320_v11, %v14321_v25 }
 0x160   : > { %11961 = vmatmul.mubr.msk.bf16.gmra.mxu0 %vm501_vm0, %v1002_v41  ;;  %v772_v59 = vpop.xlane.xlu1 %771  ;;  %v775_v7 = vpop.xlane.xlu0 %774  ;;  %v903_v18 = vmul.f32 %v13322_v4, %v14330_v16  ;;  %v979_v16 = vadd.f32 %v14444_v10, %v940_v28 }
 0x161   : > { %13335 = vrsqrt.f32 %v846_v21  ;;  %v816_v44 = vmul.f32 0.03125, %v772_v59  ;;  %v817_v60 = vmul.f32 0.03125, %v775_v7  ;;  %v1003_v61 = vpack.c.bf16 %v978_v56, %v977_v9 }
 0x162   : > { %v13324_v27 = vpop.eup %13323  ;;  %13337 = vrsqrt.f32 %v847_v6  ;;  %v941_v45 = vmul.f32 %v14437_v19, %v902_v14  ;;  %v942_v0 = vmul.f32 %v14437_v19, %v903_v18 }
 0x163   : > { %v13326_v2 = vpop.eup %13325  ;;  %v848_v25 = vadd.f32 1e-05, %v816_v44  ;;  %v849_v13 = vadd.f32 1e-05, %v817_v60  ;;  %11964 = vmatprep.mubr.msk.bf16.mxu0 %vm501_vm0, %v1003_v61  ;;  %v904_v15 = vmul.f32 %v13324_v27, %v14333_v29 }
 0x164   : > { %v778_v30 = vpop.xlane.xlu1 %777  ;;  %v781_v32 = vpop.xlane.xlu0 %780  ;;  %v980_v1 = vadd.f32 %v14444_v10, %v941_v45  ;;  %v905_v34 = vmul.f32 %v13326_v2, %v14342_v31  ;;  %v981_v5 = vadd.f32 %v14444_v10, %v942_v0 }
 0x165   : > { %13339 = vrsqrt.f32 %v848_v25  ;;  %v818_v35 = vmul.f32 0.03125, %v778_v30  ;;  %v819_v38 = vmul.f32 0.03125, %v781_v32  ;;  %v943_v48 = vmul.f32 %v14437_v19, %v904_v15 }
 0x166   : > { %v13328_v42 = vpop.eup %13327  ;;  %13341 = vrsqrt.f32 %v849_v13  ;;  %v1004_v20 = vpack.c.bf16 %v980_v1, %v979_v16  ;;  %v944_v51 = vmul.f32 %v14437_v19, %v905_v34 }
 0x167   : > { %v13330_v46 = vpop.eup %13329  ;;  %v850_v29 = vadd.f32 1e-05, %v818_v35  ;;  %v851_v36 = vadd.f32 1e-05, %v819_v38  ;;  %v982_v50 = vadd.f32 %v14444_v10, %v943_v48  ;;  %v906_v17 = vmul.f32 %v13328_v42, %v14345_v33 }
 0x168   : > { %11965 = vmatmul.mubr.msk.bf16.gmra.mxu0 %vm501_vm0, %v1004_v20  ;;  %v784_v31 = vpop.xlane.xlu1 %783  ;;  %v787_v55 = vpop.xlane.xlu0 %786  ;;  %v907_v54 = vmul.f32 %v13330_v46, %v14354_v47  ;;  %v983_v47 = vadd.f32 %v14444_v10, %v944_v51 }
 0x169   : > { %13343 = vrsqrt.f32 %v850_v29  ;;  %v820_v26 = vmul.f32 0.03125, %v784_v31  ;;  %v821_v43 = vmul.f32 0.03125, %v787_v55  ;;  %v1005_v52 = vpack.c.bf16 %v982_v50, %v981_v5 }
 0x16a   : > { %v13332_v58 = vpop.eup %13331  ;;  %13345 = vrsqrt.f32 %v851_v36  ;;  %v945_v24 = vmul.f32 %v14437_v19, %v906_v17  ;;  %v946_v62 = vmul.f32 %v14437_v19, %v907_v54 }
 0x16b   : > { %v13334_v40 = vpop.eup %13333  ;;  %v852_v33 = vadd.f32 1e-05, %v820_v26  ;;  %v853_v11 = vadd.f32 1e-05, %v821_v43  ;;  %11968 = vmatprep.mubr.msk.bf16.mxu1 %vm501_vm0, %v1005_v52  ;;  %v908_v41 = vmul.f32 %v13332_v58, %v14357_v37 }
 0x16c   : > { %v790_v9 = vpop.xlane.xlu1 %789  ;;  %v984_v4 = vadd.f32 %v14444_v10, %v945_v24  ;;  %v909_v21 = vmul.f32 %v13334_v40, %v14369_v63  ;;  %v985_v7 = vadd.f32 %v14444_v10, %v946_v62 }
 0x16d   : > { %13347 = vrsqrt.f32 %v852_v33  ;;  %v822_v6 = vmul.f32 0.03125, %v790_v9  ;;  %v947_v56 = vmul.f32 %v14437_v19, %v908_v41 }
 0x16e   : > { %v13336_v14 = vpop.eup %13335  ;;  %13349 = vrsqrt.f32 %v853_v11  ;;  %v1006_v59 = vpack.c.bf16 %v984_v4, %v983_v47  ;;  %v948_v60 = vmul.f32 %v14437_v19, %v909_v21 }
 0x16f   : > { %v13338_v28 = vpop.eup %13337  ;;  %v854_v18 = vadd.f32 1e-05, %v822_v6  ;;  %v986_v37 = vadd.f32 %v14444_v10, %v947_v56  ;;  %v910_v44 = vmul.f32 %v13336_v14, %v14372_v3 }
 0x170   : > { %11969 = vmatmul.mubr.msk.bf16.vlgmr.msra.gmra.mxu1 %vm501_vm0, %v1006_v59  ;;  %v911_v63 = vmul.f32 %v13338_v28, %v14384_v22  ;;  %v987_v2 = vadd.f32 %v14444_v10, %v948_v60 }
 0x171   : > { %13351 = vrsqrt.f32 %v854_v18  ;;  %v1007_v61 = vpack.c.bf16 %v986_v37, %v985_v7  ;;  %v949_v27 = vmul.f32 %v14437_v19, %v910_v44 }
 0x172   : > { %v13340_v45 = vpop.eup %13339  ;;  %v950_v13 = vmul.f32 %v14437_v19, %v911_v63 }
 0x173   : > { %v13342_v0 = vpop.eup %13341  ;;  %11972 = vmatprep.mubr.msk.bf16.mxu1 %vm501_vm0, %v1007_v61  ;;  %v988_v25 = vadd.f32 %v14444_v10, %v949_v27  ;;  %v912_v3 = vmul.f32 %v13340_v45, %v14387_v23 }
 0x174   : > { %v913_v15 = vmul.f32 %v13342_v0, %v14396_v39  ;;  %v989_v1 = vadd.f32 %v14444_v10, %v950_v13 }
 0x175   : > { %v1008_v30 = vpack.c.bf16 %v988_v25, %v987_v2  ;;  %v951_v22 = vmul.f32 %v14437_v19, %v912_v3 }
 0x176   : > { %v13344_v32 = vpop.eup %13343  ;;  %v952_v38 = vmul.f32 %v14437_v19, %v913_v15 }
 0x177   : > { %v13346_v16 = vpop.eup %13345  ;;  %v990_v34 = vadd.f32 %v14444_v10, %v951_v22  ;;  %v914_v35 = vmul.f32 %v13344_v32, %v14399_v49 }
 0x178   : > { %11973 = vmatmul.mubr.msk.bf16.gmra.mxu1 %vm501_vm0, %v1008_v30  ;;  %v915_v23 = vmul.f32 %v13346_v16, %v14408_v8  ;;  %v991_v5 = vadd.f32 %v14444_v10, %v952_v38 }
 0x179   : > { %v1009_v48 = vpack.c.bf16 %v990_v34, %v989_v1  ;;  %v953_v39 = vmul.f32 %v14437_v19, %v914_v35 }
 0x17a   : > { %v13348_v42 = vpop.eup %13347  ;;  %v954_v49 = vmul.f32 %v14437_v19, %v915_v23 }
 0x17b   : > { %v13350_v20 = vpop.eup %13349  ;;  %11976 = vmatprep.mubr.msk.bf16.mxu1 %vm501_vm0, %v1009_v48  ;;  %v992_v46 = vadd.f32 %v14444_v10, %v953_v39  ;;  %v916_v29 = vmul.f32 %v13348_v42, %v14411_v53 }
 0x17c   : > { %v917_v36 = vmul.f32 %v13350_v20, %v14420_v12  ;;  %v993_v31 = vadd.f32 %v14444_v10, %v954_v49 }
 0x17d   : > { %v1010_v50 = vpack.c.bf16 %v992_v46, %v991_v5  ;;  %v955_v8 = vmul.f32 %v14437_v19, %v916_v29 }
 0x17e   : > { %v13352_v17 = vpop.eup %13351  ;;  %v956_v54 = vmul.f32 %v14437_v19, %v917_v36 }
 0x17f   : > { %v994_v55 = vadd.f32 %v14444_v10, %v955_v8  ;;  %v918_v51 = vmul.f32 %v13352_v17, %v14423_v57  ;;  %v14558_v57 = vld [vmem:[%s19297_s4] ss:$0 sm:$0xff] }
 0x180   : > { %11977 = vmatmul.mubr.msk.bf16.gmra.mxu1 %vm501_vm0, %v1010_v50  ;;  %v995_v12 = vadd.f32 %v14444_v10, %v956_v54 }
 0x181   : > { %v1011_v26 = vpack.c.bf16 %v994_v55, %v993_v31  ;;  %v957_v53 = vmul.f32 %v14437_v19, %v918_v51 }
 0x183   : > { %11980 = vmatprep.mubr.msk.bf16.mxu1 %vm501_vm0, %v1011_v26  ;;  %v996_v43 = vadd.f32 %v14444_v10, %v957_v53  ;;  %v19308_v10 = vmov 0.0  }
 0x185   : > { %v1012_v52 = vpack.c.bf16 %v996_v43, %v995_v12 }
 0x188   : > { %11981 = vmatmul.mubr.msk.bf16.gmra.mxu1 %vm501_vm0, %v1012_v52 }
 0x210   : > { %v11954_v58 = vpop.f32.mrf.mxu0 }
 0x211   : > { %v1127_v24 = vadd.f32 %v11954_v58, %v14558_v57 }
 0x212   : > { %v1118_v62 = vpop.f32.mrf.mxu0 }
 0x213   : > { %v1119_v19 = vadd.f32 %v14558_v57, %v1118_v62  ;;  %vm1247_vm1 = vcmp.gt.f32.partialorder %v1127_v24, 0.5  ;;  %v1271_v18 = vmul.f32 0.25, %v1127_v24 }
 0x214   : > { %v11955_v40 = vpop.f32.mrf.mxu0  ;;  %v10835_v41 = vsel %vm1247_vm1, 1.0, %v19308_v10 }
 0x215   : > { %v1130_v33 = vadd.f32 %v11955_v40, %v14558_v57  ;;  %vm1245_vm2 = vcmp.gt.f32.partialorder %v1119_v19, 0.5  ;;  %v1279_v14 = vsub.f32 1.0, %v10835_v41  ;;  %v1269_v60 = vmul.f32 0.25, %v1119_v19 }
 0x216   : > { %v1121_v11 = vpop.f32.mrf.mxu0  ;;  %v10833_v21 = vsel %vm1245_vm2, 1.0, %v19308_v10 }
 0x217   : > { %v1122_v9 = vadd.f32 %v14558_v57, %v1121_v11  ;;  %vm1248_vm3 = vcmp.gt.f32.partialorder %v1130_v33, 0.5  ;;  %v1272_v63 = vmul.f32 0.25, %v1130_v33  ;;  %v1287_v45 = vmul.f32 %v1279_v14, %v1271_v18 }
 0x218   : > { %v11958_v47 = vpop.f32.mrf.mxu0  ;;  %v10836_v59 = vsel %vm1248_vm3, 1.0, %v19308_v10  ;;  %v1277_v0 = vsub.f32 1.0, %v10833_v21 }
 0x219   : > { %vm1246_vm4 = vcmp.gt.f32.partialorder %v1122_v9, 0.5  ;;  %v1143_v4 = vadd.f32 %v11958_v47, %v14558_v57  ;;  %v14577_v2 = vpack.i.bf16 %v10835_v41, %v10836_v59  ;;  %v14579_v25 = vpack.c.bf16 %v10836_v59, %v10835_v41 }
 0x21a   : > { %v10834_v6 = vsel %vm1246_vm4, 1.0, %v19308_v10  ;;  %v1134_v56 = vpop.f32.mrf.mxu0  ;;  %v1270_v22 = vmul.f32 0.25, %v1122_v9  ;;  %v1280_v16 = vsub.f32 1.0, %v10836_v59  ;;  %v1285_v23 = vmul.f32 %v1277_v0, %v1269_v60 }
 0x21b   : > { %v14569_v7 = vpack.c.bf16 %v10834_v6, %v10833_v21  ;;  %v1135_v28 = vadd.f32 %v14558_v57, %v1134_v56  ;;  %v14572_v44 = vpack.i.bf16 %v10833_v21, %v10834_v6  ;;  %vm1251_vm6 = vcmp.gt.f32.partialorder %v1143_v4, 0.5  ;;  %19433 = vst [vmem:[#allocation4_spill] sm:$0xff] %v14577_v2  ;;  %19434 = vst [vmem:[#allocation5_spill] sm:$0xff] %v14579_v25 }
 0x21c   : > { %v11959_v37 = vpop.f32.mrf.mxu0  ;;  %v10839_v13 = vsel %vm1251_vm6, 1.0, %v19308_v10  ;;  %v1275_v48 = vmul.f32 0.25, %v1143_v4  ;;  %v1278_v20 = vsub.f32 1.0, %v10834_v6  ;;  %v1288_v17 = vmul.f32 %v1280_v16, %v1272_v63 }
 0x21d   : > { %19431 = vst [vmem:[#allocation2_spill] sm:$0xff] %v14569_v7  ;;  %19432 = vst [vmem:[#allocation3_spill] sm:$0xff] %v14572_v44  ;;  %v1146_v61 = vadd.f32 %v11959_v37, %v14558_v57  ;;  %11992 = vmatprep.mubr.msk.bf16.mxu1 %vm1469_vm5, %v14569_v7  ;;  %vm1249_vm7 = vcmp.gt.f32.partialorder %v1135_v28, 0.5  ;;  %v1283_v29 = vsub.f32 1.0, %v10839_v13  ;;  %v1273_v31 = vmul.f32 0.25, %v1135_v28 }
 0x21e   : > { %v1137_v27 = vpop.f32.mrf.mxu0  ;;  %v10837_v1 = vsel %vm1249_vm7, 1.0, %v19308_v10  ;;  %v1286_v26 = vmul.f32 %v1278_v20, %v1270_v22 }
 0x21f   : > { %vm1252_vm8 = vcmp.gt.f32.partialorder %v1146_v61, 0.5  ;;  %v1138_v3 = vadd.f32 %v14558_v57, %v1137_v27  ;;  %v1281_v51 = vsub.f32 1.0, %v10837_v1  ;;  %v1291_v52 = vmul.f32 %v1283_v29, %v1275_v48 }
 0x220   : > { %v14584_v15 = vsel %vm1252_vm8, 1.0, %v19308_v10  ;;  %v11962_v30 = vpop.f32.mrf.mxu0  ;;  %v1276_v21 = vmul.f32 0.25, %v1146_v61 }
 0x221   : > { %v14587_v32 = vpack.c.bf16 %v14584_v15, %v10839_v13  ;;  %vm1250_vm9 = vcmp.gt.f32.partialorder %v1138_v3, 0.5  ;;  %v1159_v35 = vadd.f32 %v11962_v30, %v14558_v57  ;;  %v14598_v49 = vpack.i.bf16 %v10839_v13, %v14584_v15 }
 0x222   : > { %v10838_v34 = vsel %vm1250_vm9, 1.0, %v19308_v10  ;;  %v1150_v38 = vpop.f32.mrf.mxu0  ;;  %v1284_v24 = vsub.f32 1.0, %v14584_v15  ;;  %v1289_v41 = vmul.f32 %v1281_v51, %v1273_v31  ;;  %v1274_v6 = vmul.f32 0.25, %v1138_v3 }
 0x223   : > { %v14592_v39 = vpack.c.bf16 %v10838_v34, %v10837_v1  ;;  %v1151_v42 = vadd.f32 %v14558_v57, %v1150_v38  ;;  %1467 = vrot.lane.b32.xlu0 %v14587_v32, %s13970_s16  ;;  %v1295_v5 = vadd.f32 %v1287_v45, %v1159_v35  ;;  %19435 = vst [vmem:[#allocation6_spill] sm:$0xff] %v14598_v49  ;;  %v1282_v62 = vsub.f32 1.0, %v10838_v34 }
 0x224   : > { %v11963_v46 = vpop.f32.mrf.mxu0  ;;  %v14600_v36 = vpack.i.bf16 %v10837_v1, %v10838_v34  ;;  %v1292_v61 = vmul.f32 %v1284_v24, %v1276_v21 }
 0x225   : > { %v1293_v50 = vadd.f32 %v1285_v23, %v1151_v42  ;;  %v1162_v8 = vadd.f32 %v11963_v46, %v14558_v57  ;;  %1465 = vrot.lane.b32.xlu1 %v14592_v39, %s13970_s16  ;;  %vm1303_vm10 = vcmp.gt.f32.partialorder %v1295_v5, 0.5  ;;  %v1327_v59 = vmul.f32 0.25, %v1295_v5 }
 0x226   : > { %19436 = vst [vmem:[#allocation7_spill] sm:$0xff] %v14600_v36  ;;  %v1153_v55 = vpop.f32.mrf.mxu0  ;;  %v14606_v53 = vsel %vm1303_vm10, 1.0, %v19308_v10  ;;  %v1290_v45 = vmul.f32 %v1282_v62, %v1274_v6 }
 0x227   : > { %vm1301_vm11 = vcmp.gt.f32.partialorder %v1293_v50, 0.5  ;;  %v1296_v54 = vadd.f32 %v1288_v17, %v1162_v8  ;;  %v1154_v12 = vadd.f32 %v14558_v57, %v1153_v55  ;;  %v1335_v4 = vsub.f32 1.0, %v14606_v53 }
 0x228   : > { %v11966_v43 = vpop.f32.mrf.mxu0  ;;  %v14614_v19 = vsel %vm1301_vm11, 1.0, %v19308_v10  ;;  %v1325_v60 = vmul.f32 0.25, %v1293_v50 }
 0x229   : > { %vm1304_vm12 = vcmp.gt.f32.partialorder %v1296_v54, 0.5  ;;  %v1175_v58 = vadd.f32 %v11966_v43, %v14558_v57  ;;  %1463 = vrot.lane.b32.xlu1 %v14579_v25, %s13970_s16  ;;  %v1294_v33 = vadd.f32 %v1286_v26, %v1154_v12  ;;  %v1333_v37 = vsub.f32 1.0, %v14614_v19 }
 0x22a   : > { %v14617_v40 = vsel %vm1304_vm12, 1.0, %v19308_v10  ;;  %v1166_v11 = vpop.f32.mrf.mxu0  ;;  %v1328_v0 = vmul.f32 0.25, %v1296_v54  ;;  %v1343_v13 = vmul.f32 %v1335_v4, %v1327_v59 }
 0x22b   : > { %v1299_v9 = vadd.f32 %v1291_v52, %v1175_v58  ;;  %v1167_v47 = vadd.f32 %v14558_v57, %v1166_v11  ;;  %vm1302_vm13 = vcmp.gt.f32.partialorder %v1294_v33, 0.5  ;;  %v14623_v14 = vpack.i.bf16 %v14606_v53, %v14617_v40 }
 0x22c   : > { %v11967_v56 = vpop.f32.mrf.mxu0  ;;  %v14626_v28 = vsel %vm1302_vm13, 1.0, %v19308_v10  ;;  %v1336_v22 = vsub.f32 1.0, %v14617_v40  ;;  %v1326_v1 = vmul.f32 0.25, %v1294_v33  ;;  %v1341_v38 = vmul.f32 %v1333_v37, %v1325_v60 }
 0x22d   : > { %19437 = vst [vmem:[#allocation8_spill] sm:$0xff] %v14623_v14  ;;  %v1297_v18 = vadd.f32 %v1289_v41, %v1167_v47  ;;  %1461 = vrot.lane.b32.xlu1 %v14569_v7, %s13970_s16  ;;  %v1178_v63 = vadd.f32 %v11967_v56, %v14558_v57  ;;  %vm1307_vm14 = vcmp.gt.f32.partialorder %v1299_v9, 0.5  ;;  %v14636_v16 = vpack.i.bf16 %v14614_v19, %v14626_v28 }
 0x22e   : > { %v1169_v27 = vpop.f32.mrf.mxu0  ;;  %v14640_v23 = vsel %vm1307_vm14, 1.0, %v19308_v10  ;;  %v1334_v42 = vsub.f32 1.0, %v14626_v28  ;;  %v1344_v31 = vmul.f32 %v1336_v22, %v1328_v0  ;;  %v14665_v26 = vpack.c.bf16 %v14617_v40, %v14606_v53 }
 0x22f   : > { %v1170_v3 = vadd.f32 %v14558_v57, %v1169_v27  ;;  %vm1305_vm15 = vcmp.gt.f32.partialorder %v1297_v18, 0.5  ;;  %v1300_v15 = vadd.f32 %v1292_v61, %v1178_v63  ;;  %19438 = vst [vmem:[#allocation9_spill] sm:$0xff] %v14636_v16  ;;  %v1339_v54 = vsub.f32 1.0, %v14640_v23 }
 0x230   : > { %v11970_v30 = vpop.f32.mrf.mxu1  ;;  %v14644_v20 = vsel %vm1305_vm15, 1.0, %v19308_v10  ;;  %v1331_v58 = vmul.f32 0.25, %v1299_v9  ;;  %v1342_v33 = vmul.f32 %v1334_v42, %v1326_v1  ;;  %v14675_v11 = vpack.c.bf16 %v14626_v28, %v14614_v19 }
 0x231   : > { %v1298_v34 = vadd.f32 %v1290_v45, %v1170_v3  ;;  %v1191_v35 = vadd.f32 %v11970_v30, %v14558_v57  ;;  %vm1308_vm1 = vcmp.gt.f32.partialorder %v1300_v15, 0.5  ;;  %v1337_v52 = vsub.f32 1.0, %v14644_v20 }
 0x232   : > { %v1182_v48 = vpop.f32.mrf.mxu1  ;;  %v14647_v5 = vsel %vm1308_vm1, 1.0, %v19308_v10  ;;  %v1329_v41 = vmul.f32 0.25, %v1297_v18  ;;  %v1332_v6 = vmul.f32 0.25, %v1300_v15  ;;  %v1347_v56 = vmul.f32 %v1339_v54, %v1331_v58 }
 0x233   : > { %vm1306_vm2 = vcmp.gt.f32.partialorder %v1298_v34, 0.5  ;;  %v1351_v46 = vadd.f32 %v1343_v13, %v1191_v35  ;;  %v14651_v29 = vpack.c.bf16 %v14647_v5, %v14640_v23  ;;  %v1183_v8 = vadd.f32 %v14558_v57, %v1182_v48 }
 0x234   : > { %v14654_v50 = vsel %vm1306_vm2, 1.0, %v19308_v10  ;;  %v11971_v17 = vpop.f32.mrf.mxu1  ;;  %v1340_v21 = vsub.f32 1.0, %v14647_v5  ;;  %v1330_v59 = vmul.f32 0.25, %v1298_v34  ;;  %v1345_v63 = vmul.f32 %v1337_v52, %v1329_v41 }
 0x235   : > { %v14659_v55 = vpack.c.bf16 %v14654_v50, %v14644_v20  ;;  %vm1359_vm3 = vcmp.gt.f32.partialorder %v1351_v46, 0.5  ;;  %v1194_v51 = vadd.f32 %v11971_v17, %v14558_v57  ;;  %v1349_v12 = vadd.f32 %v1341_v38, %v1183_v8  ;;  %1569 = vrot.lane.b32.xlu0 %v14651_v29, %s13970_s16 }
 0x236   : > { %v1185_v43 = vpop.f32.mrf.mxu1  ;;  %v14678_v47 = vsel %vm1359_vm3, 1.0, %v19308_v10  ;;  %v1338_v61 = vsub.f32 1.0, %v14654_v50  ;;  %v1348_v15 = vmul.f32 %v1340_v21, %v1332_v6  ;;  %v1383_v35 = vmul.f32 0.25, %v1351_v46 }
 0x237   : > { %v1352_v24 = vadd.f32 %v1344_v31, %v1194_v51  ;;  %v1186_v62 = vadd.f32 %v14558_v57, %v1185_v43  ;;  %1567 = vrot.lane.b32.xlu1 %v14659_v55, %s13970_s16  ;;  %vm1357_vm4 = vcmp.gt.f32.partialorder %v1349_v12, 0.5  ;;  %v1391_v27 = vsub.f32 1.0, %v14678_v47 }
 0x238   : > { %v11974_v4 = vpop.f32.mrf.mxu1  ;;  %v14688_v45 = vsel %vm1357_vm4, 1.0, %v19308_v10  ;;  %v1346_v42 = vmul.f32 %v1338_v61, %v1330_v59 }
 0x239   : > { %v1350_v9 = vadd.f32 %v1342_v33, %v1186_v62  ;;  %vm1360_vm6 = vcmp.gt.f32.partialorder %v1352_v24, 0.5  ;;  %v1207_v37 = vadd.f32 %v11974_v4, %v14558_v57  ;;  %1565 = vrot.lane.b32.xlu0 %v14665_v26, %s13970_s16  ;;  %v1399_v51 = vmul.f32 %v1391_v27, %v1383_v35 }
 0x23a   : > { %v1198_v60 = vpop.f32.mrf.mxu1  ;;  %v14694_v30 = vsel %vm1360_vm6, 1.0, %v19308_v10  ;;  %v1389_v33 = vsub.f32 1.0, %v14688_v45  ;;  %v1381_v4 = vmul.f32 0.25, %v1349_v12  ;;  %v1384_v21 = vmul.f32 0.25, %v1352_v24 }
 0x23b   : > { %vm1358_vm7 = vcmp.gt.f32.partialorder %v1350_v9, 0.5  ;;  %v1199_v18 = vadd.f32 %v14558_v57, %v1198_v60  ;;  %v1355_v3 = vadd.f32 %v1347_v56, %v1207_v37  ;;  %v14707_v8 = vpack.c.bf16 %v14694_v30, %v14678_v47 }
 0x23c   : > { %v14691_v0 = vsel %vm1358_vm7, 1.0, %v19308_v10  ;;  %v11975_v13 = vpop.f32.mrf.mxu1  ;;  %v1392_v46 = vsub.f32 1.0, %v14694_v30  ;;  %v1382_v59 = vmul.f32 0.25, %v1350_v9  ;;  %v1397_v9 = vmul.f32 %v1389_v33, %v1381_v4 }
 0x23d   : > { %v14698_v22 = vpack.c.bf16 %v14691_v0, %v14688_v45  ;;  %v1353_v1 = vadd.f32 %v1345_v63, %v1199_v18  ;;  %v1210_v34 = vadd.f32 %v11975_v13, %v14558_v57  ;;  %vm1363_vm8 = vcmp.gt.f32.partialorder %v1355_v3, 0.5  ;;  %1563 = vrot.lane.b32.xlu0 %v14675_v11, %s13970_s16 }
 0x23e   : > { %v1201_v38 = vpop.f32.mrf.mxu1  ;;  %v14712_v54 = vsel %vm1363_vm8, 1.0, %v19308_v10  ;;  %v1390_v41 = vsub.f32 1.0, %v14691_v0  ;;  %v1400_v24 = vmul.f32 %v1392_v46, %v1384_v21  ;;  %v1387_v61 = vmul.f32 0.25, %v1355_v3 }
 0x23f   : > { %19439 = vst [vmem:[#allocation10_spill] sm:$0xff] %v14698_v22  ;;  %v1356_v48 = vadd.f32 %v1348_v15, %v1210_v34  ;;  %12024 = vmatprep.mubr.msk.bf16.mxu0 %vm1469_vm5, %v14698_v22  ;;  %v1202_v17 = vadd.f32 %v14558_v57, %v1201_v38  ;;  %vm1361_vm9 = vcmp.gt.f32.partialorder %v1353_v1, 0.5  ;;  %v1395_v63 = vsub.f32 1.0, %v14712_v54 }
 0x240   : > { %v11978_v31 = vpop.f32.mrf.mxu1  ;;  %v14727_v37 = vsel %vm1361_vm9, 1.0, %v19308_v10  ;;  %v1385_v27 = vmul.f32 0.25, %v1353_v1  ;;  %v1398_v15 = vmul.f32 %v1390_v41, %v1382_v59  ;;  %v14762_v4 = vpack.i.bf16 %v14640_v23, %v14647_v5 }
 0x241   : > { %vm1364_vm10 = vcmp.gt.f32.partialorder %v1356_v48, 0.5  ;;  %v1223_v43 = vadd.f32 %v11978_v31, %v14558_v57  ;;  %v1354_v58 = vadd.f32 %v1346_v42, %v1202_v17  ;;  %1666 = vrot.lane.b32.xlu0 %v14707_v8, %s13970_s16  ;;  %v1388_v34 = vmul.f32 0.25, %v1356_v48 }
 0x242   : > { %v14716_v52 = vsel %vm1364_vm10, 1.0, %v19308_v10  ;;  %v1214_v62 = vpop.f32.mrf.mxu1  ;;  %v1393_v42 = vsub.f32 1.0, %v14727_v37  ;;  %v1403_v31 = vmul.f32 %v1395_v63, %v1387_v61  ;;  %19445 = vst [vmem:[#allocation16_spill] sm:$0xff] %v14762_v4  ;;  %vm1934_vm6 = vcmask 523264  }
 0x243   : > { %v14724_v6 = vpack.c.bf16 %v14716_v52, %v14712_v54  ;;  %v1407_v56 = vadd.f32 %v1399_v51, %v1223_v43  ;;  %vm1362_vm11 = vcmp.gt.f32.partialorder %v1354_v58, 0.5  ;;  %v1215_v3 = vadd.f32 %v14558_v57, %v1214_v62 }
 0x244   : > { %v11979_v60 = vpop.f32.mrf.mxu1  ;;  %v14731_v18 = vsel %vm1362_vm11, 1.0, %v19308_v10  ;;  %v1396_v51 = vsub.f32 1.0, %v14716_v52  ;;  %v14758_v62 = vpack.i.bf16 %v14644_v20, %v14654_v50  ;;  %v1401_v63 = vmul.f32 %v1393_v42, %v1385_v27 }
 0x245   : > { %19440 = vst [vmem:[#allocation11_spill] sm:$0xff] %v14724_v6  ;;  %vm1415_vm12 = vcmp.gt.f32.partialorder %v1407_v56, 0.5  ;;  %v1226_v12 = vadd.f32 %v11979_v60, %v14558_v57  ;;  %1670 = vrot.lane.b32.xlu1 %v14724_v6, %s13970_s16  ;;  %1664 = vrot.lane.b32.xlu0 %v14698_v22, %s13970_s16  ;;  %v14740_v35 = vpack.c.bf16 %v14731_v18, %v14727_v37  ;;  %v1394_v43 = vsub.f32 1.0, %v14731_v18 }
 0x246   : > { %v1217_v13 = vpop.f32.mrf.mxu1  ;;  %v14744_v17 = vsel %vm1415_vm12, 1.0, %v19308_v10  ;;  %19444 = vst [vmem:[#allocation15_spill] sm:$0xff] %v14758_v62  ;;  %v14766_v21 = vpack.i.bf16 %v14727_v37, %v14731_v18  ;;  %v13037_v61 = vpack.i.bf16 %v14716_v52, %v14647_v5  ;;  %v14788_v5 = vpack.i.bf16 %v14688_v45, %v14691_v0 }
 0x247   : > { %19441 = vst [vmem:[#allocation12_spill] sm:$0xff] %v14740_v35  ;;  %v1408_v38 = vadd.f32 %v1400_v24, %v1226_v12  ;;  %19442 = vst [vmem:[#allocation13_spill] sm:$0xff] %v14744_v17  ;;  %v1218_v46 = vadd.f32 %v14558_v57, %v1217_v13  ;;  %v1386_v12 = vmul.f32 0.25, %v1354_v58  ;;  %v14777_v13 = vpack.i.bf16 %v14712_v54, %v14716_v52 }
 0x248   : > { %v11982_v1 = vpop.f32.mrf.mxu1  ;;  %19446 = vst [vmem:[#allocation17_spill] sm:$0xff] %v14766_v21  ;;  %19450 = vst [vmem:[#allocation21_spill] sm:$0xff] %v14788_v5 }
 0x249   : > { %vm1416_vm13 = vcmp.gt.f32.partialorder %v1408_v38, 0.5  ;;  %v1239_v48 = vadd.f32 %v11982_v1, %v14558_v57  ;;  %1668 = vrot.lane.b32.xlu1 %v14740_v35, %s13970_s16  ;;  %19448 = vst [vmem:[#allocation19_spill] sm:$0xff] %v14777_v13  ;;  %v14781_v38 = vpack.i.bf16 %v14678_v47, %v14694_v30  ;;  %v1405_v1 = vadd.f32 %v1397_v9, %v1215_v3 }
 0x24a   : > { %v14754_v33 = vsel %vm1416_vm13, 1.0, %v19308_v10  ;;  %v1230_v41 = vpop.f32.mrf.mxu1  ;;  %v1406_v58 = vadd.f32 %v1398_v15, %v1218_v46  ;;  %v1402_v42 = vmul.f32 %v1394_v43, %v1386_v12  ;;  %v13047_v46 = vpack.i.bf16 %v14731_v18, %v14654_v50 }
 0x24b   : > { %19443 = vst [vmem:[#allocation14_spill] sm:$0xff] %v14754_v33  ;;  %v14770_v56 = vpack.c.bf16 %v14754_v33, %v14744_v17  ;;  %v1411_v59 = vadd.f32 %v1403_v31, %v1239_v48  ;;  %v1231_v60 = vadd.f32 %v14558_v57, %v1230_v41  ;;  %19449 = vst [vmem:[#allocation20_spill] sm:$0xff] %v14781_v38  ;;  %v19451_v38 = vmov 0.0  }
 0x24c   : > { %v11983_v24 = vpop.f32.mrf.mxu1  ;;  %v1404_v48 = vmul.f32 %v1396_v51, %v1388_v34  ;;  %vm1414_vm3 = vcmp.gt.f32.partialorder %v1406_v58, 0.5  ;;  %vm1413_vm4 = vcmp.gt.f32.partialorder %v1405_v1, 0.5  ;;  %v13067_v50 = vpack.i.bf16 %v14691_v0, %v14626_v28 }
 0x24d   : > { %19447 = vst [vmem:[#allocation18_spill] sm:$0xff] %v14770_v56  ;;  %vm1419_vm14 = vcmp.gt.f32.partialorder %v1411_v59, 0.5  ;;  %v1242_v31 = vadd.f32 %v11983_v24, %v14558_v57  ;;  %1767 = vrot.lane.b32.xlu0 %v14770_v56, %s13970_s16  ;;  %v1409_v52 = vadd.f32 %v1401_v63, %v1231_v60  ;;  %v14819_v43 = vsel %vm1414_vm3, 1.0, %v19451_v38 }
 0x24e   : > { %v1233_v27 = vpop.f32.mrf.mxu1  ;;  %v14792_v9 = vsel %vm1419_vm14, 1.0, %v19451_v38  ;;  %19458 = vst [vmem:[#allocation28_spill] sm:$0xff] %v14819_v43  ;;  %v14825_v59 = vsel %vm1413_vm4, 1.0, %v19451_v38  ;;  %v13057_v63 = vpack.i.bf16 %v14694_v30, %v14617_v40  ;;  %v13087_v40 = vpack.i.bf16 %v14744_v17, %v14754_v33  ;;  %v15043_v17 = vld [vmem:[%s19298_s5 + $0x28] sm:$0xff] }
 0x24f   : > { %v1412_v41 = vadd.f32 %v1404_v48, %v1242_v31  ;;  %v1234_v10 = vadd.f32 %v14558_v57, %v1233_v27  ;;  %19452 = vst [vmem:[#allocation22_spill] sm:$0xff] %v14792_v9  ;;  %vm1417_vm1 = vcmp.gt.f32.partialorder %v1409_v52, 0.5  ;;  %19459 = vst [vmem:[#allocation29_spill] sm:$0xff] %v14825_v59  ;;  %v14829_v60 = vpack.c.bf16 %v14819_v43, %v14825_v59 }
 0x250   : > { %v13042_v28 = vpack.i.bf16 %v14712_v54, %v14640_v23  ;;  %v13052_v0 = vpack.i.bf16 %v14727_v37, %v14644_v20  ;;  %v13062_v30 = vpack.i.bf16 %v14678_v47, %v14606_v53  ;;  %v13072_v23 = vpack.i.bf16 %v14688_v45, %v14614_v19 }
 0x251   : > { %vm1420_vm15 = vcmp.gt.f32.partialorder %v1412_v41, 0.5  ;;  %v1410_v3 = vadd.f32 %v1402_v42, %v1234_v10  ;;  %13023 = vrot.lane.b32.xlu0 %v14600_v36, %s13971_s17  ;;  %v14810_v10 = vsel %vm1417_vm1, 1.0, %v19451_v38  ;;  %19460 = vst [vmem:[#allocation30_spill] sm:$0xff] %v14829_v60  ;;  %v13092_v53 = vpack.i.bf16 %v14825_v59, %v14819_v43 }
 0x252   : > { %v14797_v15 = vsel %vm1420_vm15, 1.0, %v19451_v38  ;;  %19456 = vst [vmem:[#allocation26_spill] sm:$0xff] %v14810_v10 }
 0x253   : > { %19453 = vst [vmem:[#allocation23_spill] sm:$0xff] %v14797_v15  ;;  %v14801_v34 = vpack.c.bf16 %v14797_v15, %v14792_v9  ;;  %vm1418_vm2 = vcmp.gt.f32.partialorder %v1410_v3, 0.5  ;;  %v13077_v18 = vpack.i.bf16 %v14792_v9, %v14797_v15 }
 0x254   : > { %v14804_v57 = vsel %vm1418_vm2, 1.0, %v19451_v38 }
 0x255   : > { %19454 = vst [vmem:[#allocation24_spill] sm:$0xff] %v14801_v34  ;;  %19455 = vst [vmem:[#allocation25_spill] sm:$0xff] %v14804_v57  ;;  %13038 = vrot.lane.b32.xlu0 %v13037_v61, %s13971_s17  ;;  %1771 = vrot.lane.b32.xlu1 %v14801_v34, %s13970_s16  ;;  %v14814_v51 = vpack.c.bf16 %v14804_v57, %v14810_v10  ;;  %v13082_v20 = vpack.i.bf16 %v14810_v10, %v14804_v57 }
 0x257   : > { %19457 = vst [vmem:[#allocation27_spill] sm:$0xff] %v14814_v51 }
 0x259   : > { %13048 = vrot.lane.b32.xlu0 %v13047_v46, %s13971_s17  ;;  %1769 = vrot.lane.b32.xlu1 %v14814_v51, %s13970_s16 }
 0x25d   : > { %13058 = vrot.lane.b32.xlu0 %v13057_v63, %s13971_s17  ;;  %1765 = vrot.lane.b32.xlu1 %v14829_v60, %s13970_s16 }
 0x261   : > { %13068 = vrot.lane.b32.xlu0 %v13067_v50, %s13971_s17  ;;  %13018 = vrot.lane.b32.xlu1 %v14598_v49, %s13971_s17 }
 0x265   : > { %13078 = vrot.lane.b32.xlu0 %v13077_v18, %s13971_s17  ;;  %13028 = vrot.lane.b32.xlu1 %v14577_v2, %s13971_s17 }
 0x269   : > { %3153 = vrot.lane.b32.xlu0 %v14587_v32, %s13972_s19  ;;  %13033 = vrot.lane.b32.xlu1 %v14572_v44, %s13971_s17 }
 0x26d   : > { %13088 = vrot.lane.b32.xlu0 %v13087_v40, %s13971_s17  ;;  %13043 = vrot.lane.b32.xlu1 %v13042_v28, %s13971_s17 }
 0x271   : > { %3151 = vrot.lane.b32.xlu0 %v14592_v39, %s13972_s19  ;;  %13053 = vrot.lane.b32.xlu1 %v13052_v0, %s13971_s17 }
 0x275   : > { %3149 = vrot.lane.b32.xlu0 %v14579_v25, %s13972_s19  ;;  %13063 = vrot.lane.b32.xlu1 %v13062_v30, %s13971_s17 }
 0x279   : > { %3147 = vrot.lane.b32.xlu0 %v14569_v7, %s13972_s19  ;;  %13073 = vrot.lane.b32.xlu1 %v13072_v23, %s13971_s17 }
 0x27d   : > { %3256 = vrot.lane.b32.xlu0 %v14659_v55, %s13972_s19  ;;  %13083 = vrot.lane.b32.xlu1 %v13082_v20, %s13971_s17 }
 0x281   : > { %3139 = vrot.lane.b32.xlu0 %v14569_v7, %s13973_s20  ;;  %13093 = vrot.lane.b32.xlu1 %v13092_v53, %s13971_s17 }
 0x285   : > { %3254 = vrot.lane.b32.xlu0 %v14665_v26, %s13972_s19  ;;  %3258 = vrot.lane.b32.xlu1 %v14651_v29, %s13972_s19 }
 0x289   : > { %3363 = vrot.lane.b32.xlu0 %v14724_v6, %s13972_s19  ;;  %3141 = vrot.lane.b32.xlu1 %v14579_v25, %s13973_s20 }
 0x295   : > { %v1468_v19 = vpop.permute.xlu0 %1467 }
 0x296   : > { %12928 = vmatprep.subr.msk.bf16.mxu1 %vm1469_vm5, %v1468_v19  ;;  %v1492_v47 = vsel %vm1469_vm5, %v1468_v19, 0 }
 0x297   : > { %v1466_v45 = vpop.permute.xlu1 %1465  ;;  %11985 = vmatpush3.bf16.xpose.msra.mxu1 %v1492_v47 }
 0x298   : > { %12929 = vmatprep.subr.msk.bf16.mxu1 %vm1469_vm5, %v1466_v45  ;;  %v1489_v54 = vsel %vm1469_vm5, %v1466_v45, 0 }
 0x29b   : > { %v1464_v37 = vpop.permute.xlu1 %1463 }
 0x29c   : > { %v1486_v12 = vsel %vm1469_vm5, %v1464_v37, 0 }
 0x29f   : > { %11987 = vmatpush3.bf16.xpose.msra.mxu1 %v1489_v54  ;;  %v1462_v24 = vpop.permute.xlu1 %1461 }
 0x2a0   : > { %12930 = vmatprep.subr.msk.bf16.mxu1 %vm1469_vm5, %v1464_v37  ;;  %v1483_v61 = vsel %vm1469_vm5, %v1462_v24, 0 }
 0x2a7   : > { %11989 = vmatpush3.bf16.xpose.msra.mxu1 %v1486_v12  ;;  %v1570_v1 = vpop.permute.xlu0 %1569 }
 0x2a8   : > { %12931 = vmatprep.subr.msk.bf16.mxu1 %vm1469_vm5, %v1462_v24  ;;  %v1593_v58 = vsel %vm1469_vm5, %v1570_v1, 0 }
 0x2a9   : > { %v1568_v31 = vpop.permute.xlu1 %1567 }
 0x2aa   : > { %v1590_v3 = vsel %vm1469_vm5, %v1568_v31, 0 }
 0x2ab   : > { %v1566_v48 = vpop.permute.xlu0 %1565 }
 0x2ac   : > { %v1587_v50 = vsel %vm1469_vm5, %v1566_v48, 0 }
 0x2af   : > { %11991 = vmatpush3.bf16.xpose.msra.mxu1 %v1483_v61  ;;  %v1564_v52 = vpop.permute.xlu0 %1563 }
 0x2b0   : > { %12932 = vmatprep.subr.msk.bf16.mxu1 %vm1469_vm5, %v1570_v1  ;;  %v1584_v30 = vsel %vm1469_vm5, %v1564_v52, 0 }
 0x2b3   : > { %v1667_v63 = vpop.permute.xlu0 %1666 }
 0x2b4   : > { %v1688_v40 = vsel %vm1469_vm5, %v1667_v63, 0 }
 0x2b6   : > { %11993 = vmatmul.mubr.msk.bf16.vlgmr.msra.gmra.mxu1 %vm1469_vm5, %v14579_v25 }
 0x2b7   : > { %v1671_v27 = vpop.permute.xlu1 %1670  ;;  %11996 = vmatprep.mubr.msk.bf16.mxu1 %vm1469_vm5, %v14592_v39  ;;  %12001 = vmatpush3.bf16.xpose.msra.mxu1 %v1593_v58  ;;  %v1665_v28 = vpop.permute.xlu0 %1664 }
 0x2b8   : > { %12933 = vmatprep.subr.msk.bf16.mxu1 %vm1469_vm5, %v1568_v31  ;;  %12936 = vmatprep.subr.msk.bf16.mxu0 %vm1469_vm5, %v1671_v27  ;;  %v1694_v42 = vsel %vm1469_vm5, %v1671_v27, 0  ;;  %v1685_v20 = vsel %vm1469_vm5, %v1665_v28, 0 }
 0x2b9   : > { %12017 = vmatpush3.bf16.xpose.msra.mxu0 %v1694_v42 }
 0x2bb   : > { %v1669_v41 = vpop.permute.xlu1 %1668 }
 0x2bc   : > { %12937 = vmatprep.subr.msk.bf16.mxu0 %vm1469_vm5, %v1669_v41  ;;  %v1691_v46 = vsel %vm1469_vm5, %v1669_v41, 0 }
 0x2be   : > { %11997 = vmatmul.mubr.msk.bf16.gmra.mxu1 %vm1469_vm5, %v14587_v32 }
 0x2bf   : > { %12003 = vmatpush3.bf16.xpose.msra.mxu1 %v1590_v3  ;;  %12008 = vmatprep.mubr.msk.bf16.mxu1 %vm1469_vm5, %v14675_v11  ;;  %v1768_v53 = vpop.permute.xlu0 %1767 }
 0x2c0   : > { %12934 = vmatprep.subr.msk.bf16.mxu1 %vm1469_vm5, %v1566_v48  ;;  %v1789_v41 = vsel %vm1469_vm5, %v1768_v53, 0 }
 0x2c1   : > { %12019 = vmatpush3.bf16.xpose.msra.mxu0 %v1691_v46 }
 0x2c2   : > { %12938 = vmatprep.subr.msk.bf16.mxu0 %vm1469_vm5, %v1667_v63 }
 0x2c3   : > { %v13024_v54 = vpop.permute.xlu0 %13023 }
 0x2c4   : > { %v13025_v12 = vunpack.i.l.bf16 %v13024_v54  ;;  %v13026_v61 = vunpack.i.h.bf16 %v13024_v54 }
 0x2c7   : > { %v1772_v18 = vpop.permute.xlu1 %1771  ;;  %12005 = vmatpush3.bf16.xpose.msra.mxu1 %v1587_v50  ;;  %v14940_v42 = vpop.permute.xlu0 %13038 }
 0x2c8   : > { %12935 = vmatprep.subr.msk.bf16.mxu1 %vm1469_vm5, %v1564_v52  ;;  %v1795_v45 = vsel %vm1469_vm5, %v1772_v18, 0  ;;  %v19311_v3 = vunpack.i.l.bf16 %v14940_v42  ;;  %v13041_v50 = vunpack.i.h.bf16 %v14940_v42 }
 0x2c9   : > { %12021 = vmatpush3.bf16.xpose.msra.mxu0 %v1688_v40 }
 0x2ca   : > { %12939 = vmatprep.subr.msk.bf16.mxu0 %vm1469_vm5, %v1665_v28 }
 0x2cb   : > { %v1770_v0 = vpop.permute.xlu1 %1769  ;;  %v14947_v46 = vpop.permute.xlu0 %13048 }
 0x2cc   : > { %v1792_v1 = vsel %vm1469_vm5, %v1770_v0, 0 }
 0x2cf   : > { %v1766_v23 = vpop.permute.xlu1 %1765  ;;  %12007 = vmatpush3.bf16.xpose.msra.mxu1 %v1584_v30  ;;  %v14953_v40 = vpop.permute.xlu0 %13058  ;;  %v13051_v30 = vunpack.i.h.bf16 %v14947_v46 }
 0x2d0   : > { %12940 = vmatprep.subr.msk.bf16.mxu1 %vm1469_vm5, %v1772_v18  ;;  %v1786_v18 = vsel %vm1469_vm5, %v1766_v23, 0 }
 0x2d1   : > { %12023 = vmatpush3.bf16.xpose.msra.mxu0 %v1685_v20 }
 0x2d3   : > { %v13019_v19 = vpop.permute.xlu1 %13018  ;;  %v14963_v20 = vpop.permute.xlu0 %13068 }
 0x2d4   : > { %v13020_v47 = vunpack.i.l.bf16 %v13019_v19  ;;  %v13021_v37 = vunpack.i.h.bf16 %v13019_v19  ;;  %19461 = vst [vmem:[#allocation31_spill] sm:$0xff] %v14963_v20  ;;  %v13061_v19 = vunpack.i.h.bf16 %v14953_v40 }
 0x2d6   : > { %12009 = vmatmul.mubr.msk.bf16.vlgmr.msra.gmra.mxu1 %vm1469_vm5, %v14665_v26  ;;  %12048 = vmatprep.subr.mxu0 %v13020_v47 }
 0x2d7   : > { %12012 = vmatprep.mubr.msk.bf16.mxu1 %vm1469_vm5, %v14659_v55  ;;  %12033 = vmatpush3.bf16.xpose.msra.mxu1 %v1795_v45  ;;  %v13029_v24 = vpop.permute.xlu1 %13028  ;;  %v14972_v45 = vpop.permute.xlu0 %13078 }
 0x2d8   : > { %12025 = vmatmul.mubr.msk.bf16.vlgmr.msra.gmra.mxu0 %vm1469_vm5, %v14707_v8  ;;  %12941 = vmatprep.subr.msk.bf16.mxu1 %vm1469_vm5, %v1770_v0  ;;  %v13030_v31 = vunpack.i.l.bf16 %v13029_v24  ;;  %v13031_v58 = vunpack.i.h.bf16 %v13029_v24  ;;  %19462 = vst [vmem:[#allocation32_spill] sm:$0xff] %v14972_v45 }
 0x2d9   : > { %12028 = vmatprep.mubr.msk.bf16.mxu0 %vm1469_vm5, %v14740_v35  ;;  %12049 = vmatpush3.msra.mxu0 %v13020_v47 }
 0x2da   : > { %12050 = vmatprep.subr.mxu0 %v13021_v37 }
 0x2db   : > { %12051 = vmatpush3.msra.mxu0 %v13021_v37  ;;  %v13034_v48 = vpop.permute.xlu1 %13033  ;;  %v13071_v37 = vunpack.i.h.bf16 %v14963_v20  ;;  %v14978_v24 = vpop.permute.xlu0 %3153 }
 0x2dc   : > { %12052 = vmatprep.subr.mxu0 %v13025_v12  ;;  %v13035_v27 = vunpack.i.l.bf16 %v13034_v48  ;;  %v13036_v52 = vunpack.i.h.bf16 %v13034_v48  ;;  %19464 = vst [vmem:[#allocation34_spill] sm:$0xff] %v14978_v24 }
 0x2dd   : > { %12053 = vmatpush3.msra.mxu0 %v13025_v12 }
 0x2de   : > { %12013 = vmatmul.mubr.msk.bf16.gmra.mxu1 %vm1469_vm5, %v14651_v29  ;;  %12054 = vmatprep.subr.mxu0 %v13026_v61 }
 0x2df   : > { %12035 = vmatpush3.bf16.xpose.msra.mxu1 %v1792_v1  ;;  %12040 = vmatprep.mubr.msk.bf16.mxu1 %vm1469_vm5, %v14829_v60  ;;  %v14949_v63 = vpop.permute.xlu1 %13043  ;;  %v14985_v1 = vld [vmem:[%s19298_s5 + $0x10] sm:$0xff] }
 0x2e0   : > { %12055 = vmatpush3.msra.mxu0 %v13026_v61  ;;  %12942 = vmatprep.subr.msk.bf16.mxu1 %vm1469_vm5, %v1768_v53  ;;  %v13046_v0 = vunpack.i.h.bf16 %v14949_v63 }
 0x2e1   : > { %12029 = vmatmul.mubr.msk.bf16.gmra.mxu0 %vm1469_vm5, %v14724_v6  ;;  %12056 = vmatprep.subr.mxu0 %v13030_v31 }
 0x2e2   : > { %12057 = vmatpush3.msra.mxu0 %v13030_v31 }
 0x2e3   : > { %12058 = vmatprep.subr.mxu0 %v13031_v58  ;;  %v14955_v28 = vpop.permute.xlu1 %13053 }
 0x2e4   : > { %12059 = vmatpush3.msra.mxu0 %v13031_v58  ;;  %v13056_v53 = vunpack.i.h.bf16 %v14955_v28  ;;  %v14990_v58 = vld [vmem:[%s19298_s5] sm:$0xff] }
 0x2e5   : > { %12060 = vmatprep.subr.mxu0 %v13035_v27 }
 0x2e6   : > { %12061 = vmatpush3.msra.mxu0 %v13035_v27 }
 0x2e7   : > { %12062 = vmatprep.subr.mxu0 %v13036_v52  ;;  %12037 = vmatpush3.bf16.xpose.msra.mxu1 %v1789_v41 }
 0x2e8   : > { %12063 = vmatpush3.msra.mxu0 %v13036_v52  ;;  %12943 = vmatprep.subr.msk.bf16.mxu1 %vm1469_vm5, %v1766_v23  ;;  %v14965_v23 = vpop.permute.xlu1 %13063 }
 0x2e9   : > { %12076 = vmatprep.subr.mxu0 %v19311_v3  ;;  %v13066_v47 = vunpack.i.h.bf16 %v14965_v23 }
 0x2ec   : > { %v14974_v54 = vpop.permute.xlu1 %13073 }
 0x2ed   : > { %19463 = vst [vmem:[#allocation33_spill] sm:$0xff] %v14974_v54  ;;  %v13076_v12 = vunpack.i.h.bf16 %v14974_v54 }
 0x2ef   : > { %12039 = vmatpush3.bf16.xpose.msra.mxu1 %v1786_v18 }
 0x2f0   : > { %12104 = vmatprep.subr.mxu1 %v13041_v50 }
 0x2f6   : > { %12041 = vmatmul.mubr.msk.bf16.vlgmr.msra.gmra.mxu1 %vm1469_vm5, %v14770_v56 }
 0x2f7   : > { %12044 = vmatprep.mubr.msk.bf16.mxu1 %vm1469_vm5, %v14814_v51  ;;  %12105 = vmatpush3.msra.mxu1 %v13041_v50 }
 0x2f8   : > { %12106 = vmatprep.subr.mxu1 %v13046_v0 }
 0x2f9   : > { %12107 = vmatpush3.msra.mxu1 %v13046_v0 }
 0x2fa   : > { %12108 = vmatprep.subr.mxu1 %v13051_v30 }
 0x2fb   : > { %12109 = vmatpush3.msra.mxu1 %v13051_v30  ;;  %v15003_v30 = vld [vmem:[%s19298_s5 + $0x18] sm:$0xff] }
 0x2fc   : > { %12110 = vmatprep.subr.mxu1 %v13056_v53 }
 0x2fd   : > { %12111 = vmatpush3.msra.mxu1 %v13056_v53 }
 0x2fe   : > { %12045 = vmatmul.mubr.msk.bf16.gmra.mxu1 %vm1469_vm5, %v14801_v34  ;;  %12112 = vmatprep.subr.mxu1 %v13061_v19 }
 0x2ff   : > { %12113 = vmatpush3.msra.mxu1 %v13061_v19  ;;  %v15008_v19 = vld [vmem:[%s19298_s5 + $0x8] sm:$0xff] }
 0x300   : > { %12114 = vmatprep.subr.mxu1 %v13066_v47 }
 0x301   : > { %12115 = vmatpush3.msra.mxu1 %v13066_v47 }
 0x302   : > { %12116 = vmatprep.subr.mxu1 %v13071_v37 }
 0x303   : > { %12117 = vmatpush3.msra.mxu1 %v13071_v37 }
 0x304   : > { %12118 = vmatprep.subr.mxu1 %v13076_v12 }
 0x305   : > { %12119 = vmatpush3.msra.mxu1 %v13076_v12 }
 0x306   : > { %12944 = vmatprep.subr.msk.bf16.mxu1 %vm1469_vm5, %v14978_v24 }
 0x376   : > { %v11994_v61 = vpop.f32.mrf.mxu1 }
 0x377   : > { %v1864_v31 = vmul.f32 0.35355338, %v11994_v61 }
 0x378   : > { %v1528_v48 = vpop.f32.mrf.mxu1 }
 0x379   : > { %v14993_v27 = vadd.f32 %v14985_v1, %v1864_v31  ;;  %v1862_v52 = vmul.f32 0.35355338, %v1528_v48 }
 0x37a   : > { %v11995_v41 = vpop.f32.mrf.mxu1 }
 0x37b   : > { %v14996_v50 = vadd.f32 %v14990_v58, %v1862_v52  ;;  %v1865_v18 = vmul.f32 0.35355338, %v11995_v41  ;;  %v1941_v0 = vsel %vm1934_vm6, %v14993_v27, -inf  ;;  %v15021_v52 = vld [vmem:[%s19298_s5 + $0x30] sm:$0xff] }
 0x37c   : > { %1942 = vmax.xlane.f32.xlu0 %v1941_v0  ;;  %v1531_v53 = vpop.f32.mrf.mxu1 }
 0x37d   : > { %v1863_v47 = vmul.f32 0.35355338, %v1531_v53  ;;  %v15011_v12 = vadd.f32 %v15003_v30, %v1865_v18  ;;  %v1935_v31 = vsel %vm1934_vm6, %v14996_v50, -inf  ;;  %v15028_v53 = vld [vmem:[%s19298_s5 + $0x38] sm:$0xff] }
 0x37e   : > { %v11998_v37 = vpop.f32.mrf.mxu1 }
 0x37f   : > { %v1868_v61 = vmul.f32 0.35355338, %v11998_v37  ;;  %v15016_v48 = vadd.f32 %v15008_v19, %v1863_v47  ;;  %v1944_v7 = vsel %vm1934_vm6, %v15011_v12, -inf }
 0x380   : > { %1936 = vmax.xlane.f32.xlu0 %v1935_v31  ;;  %v1544_v41 = vpop.f32.mrf.mxu1 }
 0x381   : > { %v1938_v0 = vsel %vm1934_vm6, %v15016_v48, -inf  ;;  %v15031_v47 = vadd.f32 %v15021_v52, %v1868_v61  ;;  %v1866_v37 = vmul.f32 0.35355338, %v1544_v41 }
 0x382   : > { %1939 = vmax.xlane.f32.xlu1 %v1938_v0  ;;  %v11999_v18 = vpop.f32.mrf.mxu1  ;;  %v15038_v0 = vld [vmem:[%s19298_s5 + $0x20] sm:$0xff] }
 0x383   : > { %v1869_v3 = vmul.f32 0.35355338, %v11999_v18  ;;  %v1953_v18 = vsel %vm1934_vm6, %v15031_v47, -inf  ;;  %v15053_v25 = vadd.f32 %v15038_v0, %v1866_v37 }
 0x384   : > { %1945 = vmax.xlane.f32.xlu0 %v1944_v7  ;;  %v1547_v31 = vpop.f32.mrf.mxu1 }
 0x385   : > { %v15046_v61 = vadd.f32 %v15028_v53, %v1869_v3  ;;  %v1867_v41 = vmul.f32 0.35355338, %v1547_v31  ;;  %v1947_v43 = vsel %vm1934_vm6, %v15053_v25, -inf }
 0x387   : > { %v1956_v7 = vsel %vm1934_vm6, %v15046_v61, -inf  ;;  %v15056_v59 = vadd.f32 %v15043_v17, %v1867_v41 }
 0x388   : > { %1954 = vmax.xlane.f32.xlu0 %v1953_v18  ;;  %1957 = vmax.xlane.f32.xlu1 %v1956_v7 }
 0x389   : > { %v1950_v3 = vsel %vm1934_vm6, %v15056_v59, -inf }
 0x38c   : > { %1948 = vmax.xlane.f32.xlu0 %v1947_v43  ;;  %1951 = vmax.xlane.f32.xlu1 %v1950_v3 }
 0x396   : > { %v12010_v31 = vpop.f32.mrf.mxu1 }
 0x397   : > { %v1872_v10 = vmul.f32 0.35355338, %v12010_v31 }
 0x398   : > { %v12026_v33 = vpop.f32.mrf.mxu0  ;;  %v1629_v57 = vpop.f32.mrf.mxu1 }
 0x399   : > { %v1880_v9 = vmul.f32 0.35355338, %v12026_v33  ;;  %v15066_v7 = vadd.f32 %v14985_v1, %v1872_v10  ;;  %v1870_v5 = vmul.f32 0.35355338, %v1629_v57 }
 0x39a   : > { %v1730_v37 = vpop.f32.mrf.mxu0  ;;  %v12011_v38 = vpop.f32.mrf.mxu1 }
 0x39b   : > { %v15063_v15 = vadd.f32 %v14985_v1, %v1880_v9  ;;  %v1878_v41 = vmul.f32 0.35355338, %v1730_v37  ;;  %v15081_v14 = vadd.f32 %v14990_v58, %v1870_v5  ;;  %v1873_v21 = vmul.f32 0.35355338, %v12011_v38 }
 0x39c   : > { %v12027_v18 = vpop.f32.mrf.mxu0  ;;  %v1632_v10 = vpop.f32.mrf.mxu1 }
 0x39d   : > { %v1881_v13 = vmul.f32 0.35355338, %v12027_v18  ;;  %v1989_v43 = vsel %vm1934_vm6, %v15063_v15, -inf  ;;  %v15071_v31 = vadd.f32 %v14990_v58, %v1878_v41  ;;  %v1965_v18 = vsel %vm1934_vm6, %v15066_v7, -inf }
 0x39e   : > { %1990 = vmax.xlane.f32.xlu0 %v1989_v43  ;;  %v1733_v3 = vpop.f32.mrf.mxu0  ;;  %v12014_v4 = vpop.f32.mrf.mxu1  ;;  %v1959_v5 = vsel %vm1934_vm6, %v15081_v14, -inf }
 0x39f   : > { %v15074_v33 = vadd.f32 %v15003_v30, %v1881_v13  ;;  %v1879_v9 = vmul.f32 0.35355338, %v1733_v3  ;;  %v1983_v37 = vsel %vm1934_vm6, %v15071_v31, -inf }
 0x3a0   : > { %1984 = vmax.xlane.f32.xlu1 %v1983_v37  ;;  %v1645_v24 = vpop.f32.mrf.mxu1 }
 0x3a1   : > { %v12030_v57 = vpop.f32.mrf.mxu0  ;;  %v1992_v13 = vsel %vm1934_vm6, %v15074_v33, -inf  ;;  %v15086_v3 = vadd.f32 %v15008_v19, %v1879_v9  ;;  %v1871_v9 = vmul.f32 0.35355338, %v1632_v10 }
 0x3a2   : > { %v1884_v43 = vmul.f32 0.35355338, %v12030_v57  ;;  %1966 = vmax.xlane.f32.xlu0 %v1965_v18  ;;  %v15094_v57 = vadd.f32 %v15003_v30, %v1873_v21  ;;  %v12015_v44 = vpop.f32.mrf.mxu1 }
 0x3a3   : > { %v1746_v41 = vpop.f32.mrf.mxu0  ;;  %v1986_v18 = vsel %vm1934_vm6, %v15086_v3, -inf }
 0x3a4   : > { %v15089_v37 = vadd.f32 %v15021_v52, %v1884_v43  ;;  %v1882_v16 = vmul.f32 0.35355338, %v1746_v41  ;;  %1993 = vmax.xlane.f32.xlu1 %v1992_v13  ;;  %v1648_v2 = vpop.f32.mrf.mxu1 }
 0x3a5   : > { %v12031_v36 = vpop.f32.mrf.mxu0 }
 0x3a6   : > { %1960 = vmax.xlane.f32.xlu0 %v1959_v5  ;;  %v1885_v38 = vmul.f32 0.35355338, %v12031_v36  ;;  %v2001_v43 = vsel %vm1934_vm6, %v15089_v37, -inf  ;;  %v15101_v41 = vadd.f32 %v15038_v0, %v1882_v16  ;;  %v1968_v36 = vsel %vm1934_vm6, %v15094_v57, -inf }
 0x3a7   : > { %v1749_v62 = vpop.f32.mrf.mxu0  ;;  %v1876_v5 = vmul.f32 0.35355338, %v12014_v4  ;;  %v1877_v16 = vmul.f32 0.35355338, %v12015_v44  ;;  %v1874_v4 = vmul.f32 0.35355338, %v1645_v24 }
 0x3a8   : > { %1987 = vmax.xlane.f32.xlu1 %v1986_v18  ;;  %v15104_v13 = vadd.f32 %v15028_v53, %v1885_v38  ;;  %v1883_v21 = vmul.f32 0.35355338, %v1749_v62  ;;  %v1995_v10 = vsel %vm1934_vm6, %v15101_v41, -inf  ;;  %v15111_v18 = vadd.f32 %v15008_v19, %v1871_v9 }
 0x3a9   : > { %v15119_v62 = vadd.f32 %v15021_v52, %v1876_v5  ;;  %v15124_v9 = vadd.f32 %v15028_v53, %v1877_v16  ;;  %v1875_v44 = vmul.f32 0.35355338, %v1648_v2  ;;  %v15131_v5 = vadd.f32 %v15038_v0, %v1874_v4 }
 0x3aa   : > { %2002 = vmax.xlane.f32.xlu0 %v2001_v43  ;;  %v2004_v43 = vsel %vm1934_vm6, %v15104_v13, -inf  ;;  %v15116_v38 = vadd.f32 %v15043_v17, %v1883_v21 }
 0x3ab   : > { %v1977_v21 = vsel %vm1934_vm6, %v15119_v62, -inf  ;;  %v15136_v16 = vadd.f32 %v15043_v17, %v1875_v44  ;;  %v1971_v49 = vsel %vm1934_vm6, %v15131_v5, -inf }
 0x3ac   : > { %1969 = vmax.xlane.f32.xlu1 %v1968_v36  ;;  %v1962_v36 = vsel %vm1934_vm6, %v15111_v18, -inf }
 0x3ae   : > { %1996 = vmax.xlane.f32.xlu0 %v1995_v10  ;;  %v1998_v10 = vsel %vm1934_vm6, %v15116_v38, -inf }
 0x3b0   : > { %2005 = vmax.xlane.f32.xlu1 %v2004_v43 }
 0x3b2   : > { %1963 = vmax.xlane.f32.xlu0 %v1962_v36  ;;  %v1980_v36 = vsel %vm1934_vm6, %v15124_v9, -inf }
 0x3b4   : > { %1999 = vmax.xlane.f32.xlu1 %v1998_v10 }
 0x3b6   : > { %1978 = vmax.xlane.f32.xlu0 %v1977_v21  ;;  %v12042_v24 = vpop.f32.mrf.mxu1 }
 0x3b7   : > { %v1888_v43 = vmul.f32 0.35355338, %v12042_v24  ;;  %v1974_v24 = vsel %vm1934_vm6, %v15136_v16, -inf }
 0x3b8   : > { %v1831_v6 = vpop.f32.mrf.mxu1  ;;  %1981 = vmax.xlane.f32.xlu1 %v1980_v36 }
 0x3b9   : > { %v15139_v2 = vadd.f32 %v14985_v1, %v1888_v43  ;;  %v1886_v10 = vmul.f32 0.35355338, %v1831_v6 }
 0x3ba   : > { %1972 = vmax.xlane.f32.xlu0 %v1971_v49  ;;  %v12043_v4 = vpop.f32.mrf.mxu1 }
 0x3bb   : > { %v1889_v21 = vmul.f32 0.35355338, %v12043_v4  ;;  %v2013_v1 = vsel %vm1934_vm6, %v15139_v2, -inf  ;;  %v15151_v6 = vadd.f32 %v14990_v58, %v1886_v10 }
 0x3bc   : > { %v1834_v45 = vpop.f32.mrf.mxu1  ;;  %1975 = vmax.xlane.f32.xlu1 %v1974_v24 }
 0x3bd   : > { %v15146_v54 = vadd.f32 %v15003_v30, %v1889_v21  ;;  %v1887_v44 = vmul.f32 0.35355338, %v1834_v45  ;;  %v2007_v21 = vsel %vm1934_vm6, %v15151_v6, -inf }
 0x3be   : > { %2014 = vmax.xlane.f32.xlu0 %v2013_v1  ;;  %v12046_v43 = vpop.f32.mrf.mxu1 }
 0x3bf   : > { %v1892_v49 = vmul.f32 0.35355338, %v12046_v43  ;;  %v2016_v36 = vsel %vm1934_vm6, %v15146_v54, -inf  ;;  %v15156_v56 = vadd.f32 %v15008_v19, %v1887_v44 }
 0x3c0   : > { %v1847_v4 = vpop.f32.mrf.mxu1  ;;  %2017 = vmax.xlane.f32.xlu1 %v2016_v36 }
 0x3c1   : > { %v15159_v30 = vadd.f32 %v15021_v52, %v1892_v49  ;;  %v1890_v45 = vmul.f32 0.35355338, %v1847_v4  ;;  %v2010_v24 = vsel %vm1934_vm6, %v15156_v56, -inf  ;;  %v15182_v4 = vpop.permute.xlu0 %13088 }
 0x3c2   : > { %2008 = vmax.xlane.f32.xlu0 %v2007_v21  ;;  %v12047_v58 = vpop.f32.mrf.mxu1  ;;  %19465 = vst [vmem:[#allocation35_spill] sm:$0xff] %v15182_v4 }
 0x3c3   : > { %v1893_v10 = vmul.f32 0.35355338, %v12047_v58  ;;  %v15166_v43 = vadd.f32 %v15038_v0, %v1890_v45  ;;  %v2025_v44 = vsel %vm1934_vm6, %v15159_v30, -inf }
 0x3c4   : > { %v1850_v1 = vpop.f32.mrf.mxu1  ;;  %2011 = vmax.xlane.f32.xlu1 %v2010_v24 }
 0x3c5   : > { %v15169_v19 = vadd.f32 %v15028_v53, %v1893_v10  ;;  %v1891_v52 = vmul.f32 0.35355338, %v1850_v1  ;;  %v2019_v0 = vsel %vm1934_vm6, %v15166_v43, -inf  ;;  %v15184_v45 = vpop.permute.xlu0 %3151 }
 0x3c6   : > { %2026 = vmax.xlane.f32.xlu0 %v2025_v44  ;;  %19466 = vst [vmem:[#allocation36_spill] sm:$0xff] %v15184_v45 }
 0x3c7   : > { %v2028_v49 = vsel %vm1934_vm6, %v15169_v19, -inf  ;;  %v15176_v36 = vadd.f32 %v15043_v17, %v1891_v52  ;;  %v15192_v17 = vpop.permute.xlu1 %13083 }
 0x3c8   : > { %2029 = vmax.xlane.f32.xlu1 %v2028_v49  ;;  %19470 = vst [vmem:[#allocation40_spill] sm:$0xff] %v15192_v17 }
 0x3c9   : > { %v2022_v53 = vsel %vm1934_vm6, %v15176_v36, -inf  ;;  %v15186_v21 = vpop.permute.xlu0 %3149 }
 0x3ca   : > { %2020 = vmax.xlane.f32.xlu0 %v2019_v0  ;;  %19467 = vst [vmem:[#allocation37_spill] sm:$0xff] %v15186_v21 }
 0x3cb   : > { %v15196_v1 = vpop.permute.xlu1 %13093 }
 0x3cc   : > { %2023 = vmax.xlane.f32.xlu1 %v2022_v53  ;;  %19472 = vst [vmem:[#allocation42_spill] sm:$0xff] %v15196_v1 }
 0x3cd   : > { %v15188_v58 = vpop.permute.xlu0 %3147 }
 0x3ce   : > { %19468 = vst [vmem:[#allocation38_spill] sm:$0xff] %v15188_v58 }
 0x3cf   : > { %v15200_v44 = vpop.permute.xlu1 %3258 }
 0x3d0   : > { %19474 = vst [vmem:[#allocation44_spill] sm:$0xff] %v15200_v44 }
 0x3d1   : > { %v15190_v10 = vpop.permute.xlu0 %3256 }
 0x3d2   : > { %19469 = vst [vmem:[#allocation39_spill] sm:$0xff] %v15190_v10 }
 0x3d3   : > { %v15205_v4 = vpop.permute.xlu1 %3141 }
 0x3d5   : > { %v15194_v24 = vpop.permute.xlu0 %3139 }
 0x3d6   : > { %19471 = vst [vmem:[#allocation41_spill] sm:$0xff] %v15194_v24 }
 0x3d9   : > { %v15198_v52 = vpop.permute.xlu0 %3254 }
 0x3da   : > { %19473 = vst [vmem:[#allocation43_spill] sm:$0xff] %v15198_v52 }
 0x3dd   : > { %v15202_v49 = vpop.permute.xlu0 %3363 }
 0x3de   : > { %19475 = vst [vmem:[#allocation45_spill] sm:$0xff] %v15202_v49 }
 0x405   : > { %v1943_v0 = vpop.xlane.xlu0 %1942 }
 0x406   : > { %v2033_v53 = vsub.f32 %v14993_v27, %v1943_v0 }
 0x408   : > { %v2067_v58 = vmul.f32 1.442695, %v2033_v53 }
 0x409   : > { %v1937_v21 = vpop.xlane.xlu0 %1936 }
 0x40a   : > { %13353 = vpow2.f32 %v2067_v58  ;;  %v2031_v10 = vsub.f32 %v14996_v50, %v1937_v21 }
 0x40b   : > { %v1940_v17 = vpop.xlane.xlu1 %1939 }
 0x40c   : > { %v2063_v24 = vmul.f32 1.442695, %v2031_v10  ;;  %v2032_v1 = vsub.f32 %v15016_v48, %v1940_v17 }
 0x40d   : > { %v1946_v45 = vpop.xlane.xlu0 %1945 }
 0x40e   : > { %13355 = vpow2.f32 %v2063_v24  ;;  %v2034_v52 = vsub.f32 %v15011_v12, %v1946_v45  ;;  %v2065_v44 = vmul.f32 1.442695, %v2032_v1 }
 0x410   : > { %v2069_v49 = vmul.f32 1.442695, %v2034_v52 }
 0x411   : > { %v1958_v22 = vpop.xlane.xlu1 %1957  ;;  %v1955_v20 = vpop.xlane.xlu0 %1954 }
 0x412   : > { %13357 = vpow2.f32 %v2069_v49  ;;  %v2037_v27 = vsub.f32 %v15031_v47, %v1955_v20  ;;  %v2038_v58 = vsub.f32 %v15046_v61, %v1958_v22 }
 0x413   : > { %13359 = vpow2.f32 %v2065_v44 }
 0x414   : > { %v2075_v0 = vmul.f32 1.442695, %v2037_v27  ;;  %v2077_v1 = vmul.f32 1.442695, %v2038_v58 }
 0x415   : > { %v1952_v50 = vpop.xlane.xlu1 %1951  ;;  %v1949_v21 = vpop.xlane.xlu0 %1948 }
 0x416   : > { %v2036_v10 = vsub.f32 %v15056_v59, %v1952_v50  ;;  %v2035_v48 = vsub.f32 %v15053_v25, %v1949_v21  ;;  %13361 = vpow2.f32 %v2075_v0 }
 0x417   : > { %v15214_v17 = vpop.eup %13353 }
 0x418   : > { %v2073_v12 = vmul.f32 1.442695, %v2036_v10  ;;  %v2071_v45 = vmul.f32 1.442695, %v2035_v48  ;;  %v2133_v24 = vsel %vm1934_vm6, %v15214_v17, 0.0 }
 0x419   : > { %2134 = vadd.xlane.f32.xlu0 %v2133_v24 }
 0x41a   : > { %13363 = vpow2.f32 %v2073_v12 }
 0x41b   : > { %v15218_v20 = vpop.eup %13355  ;;  %13365 = vpow2.f32 %v2071_v45 }
 0x41c   : > { %v2127_v22 = vsel %vm1934_vm6, %v15218_v20, 0.0  ;;  %13367 = vpow2.f32 %v2077_v1 }
 0x41d   : > { %2128 = vadd.xlane.f32.xlu0 %v2127_v22 }
 0x41f   : > { %v15222_v25 = vpop.eup %13357 }
 0x420   : > { %v2136_v59 = vsel %vm1934_vm6, %v15222_v25, 0.0  ;;  %v15226_v47 = vpop.eup %13359 }
 0x421   : > { %2137 = vadd.xlane.f32.xlu1 %v2136_v59  ;;  %v2130_v52 = vsel %vm1934_vm6, %v15226_v47, 0.0 }
 0x423   : > { %v15228_v61 = vpop.eup %13361 }
 0x424   : > { %v2145_v44 = vsel %vm1934_vm6, %v15228_v61, 0.0 }
 0x425   : > { %2131 = vadd.xlane.f32.xlu1 %v2130_v52  ;;  %2146 = vadd.xlane.f32.xlu0 %v2145_v44 }
 0x427   : > { %v15234_v49 = vpop.eup %13363  ;;  %v1991_v53 = vpop.xlane.xlu0 %1990 }
 0x428   : > { %v15236_v27 = vpop.eup %13365  ;;  %v2049_v0 = vsub.f32 %v15063_v15, %v1991_v53  ;;  %v2142_v58 = vsel %vm1934_vm6, %v15234_v49, 0.0 }
 0x429   : > { %2143 = vadd.xlane.f32.xlu1 %v2142_v58  ;;  %v2139_v50 = vsel %vm1934_vm6, %v15236_v27, 0.0  ;;  %v15243_v21 = vpop.eup %13367  ;;  %v1985_v48 = vpop.xlane.xlu1 %1984 }
 0x42a   : > { %v2099_v10 = vmul.f32 1.442695, %v2049_v0  ;;  %2140 = vadd.xlane.f32.xlu0 %v2139_v50  ;;  %v2047_v12 = vsub.f32 %v15071_v31, %v1985_v48  ;;  %v2148_v15 = vsel %vm1934_vm6, %v15243_v21, 0.0 }
 0x42b   : > { %v1967_v45 = vpop.xlane.xlu0 %1966 }
 0x42c   : > { %13369 = vpow2.f32 %v2099_v10  ;;  %v2041_v24 = vsub.f32 %v15066_v7, %v1967_v45  ;;  %v2095_v1 = vmul.f32 1.442695, %v2047_v12 }
 0x42d   : > { %v1994_v59 = vpop.xlane.xlu1 %1993 }
 0x42e   : > { %v2083_v22 = vmul.f32 1.442695, %v2041_v24  ;;  %2149 = vadd.xlane.f32.xlu0 %v2148_v15  ;;  %13371 = vpow2.f32 %v2095_v1  ;;  %v2050_v52 = vsub.f32 %v15074_v33, %v1994_v59 }
 0x42f   : > { %v1961_v44 = vpop.xlane.xlu0 %1960 }
 0x430   : > { %13373 = vpow2.f32 %v2083_v22  ;;  %v2101_v53 = vmul.f32 1.442695, %v2050_v52  ;;  %v2039_v0 = vsub.f32 %v15081_v14, %v1961_v44 }
 0x431   : > { %v1988_v31 = vpop.xlane.xlu1 %1987 }
 0x432   : > { %13375 = vpow2.f32 %v2101_v53  ;;  %v2048_v58 = vsub.f32 %v15086_v3, %v1988_v31  ;;  %v2079_v10 = vmul.f32 1.442695, %v2039_v0 }
 0x433   : > { %v2003_v7 = vpop.xlane.xlu0 %2002 }
 0x434   : > { %v2053_v50 = vsub.f32 %v15089_v37, %v2003_v7  ;;  %v2097_v48 = vmul.f32 1.442695, %v2048_v58 }
 0x435   : > { %v1970_v45 = vpop.xlane.xlu1 %1969 }
 0x436   : > { %v2107_v12 = vmul.f32 1.442695, %v2053_v50  ;;  %13377 = vpow2.f32 %v2097_v48  ;;  %v2042_v24 = vsub.f32 %v15094_v57, %v1970_v45 }
 0x437   : > { %v1997_v33 = vpop.xlane.xlu0 %1996 }
 0x438   : > { %13379 = vpow2.f32 %v2107_v12  ;;  %v2051_v1 = vsub.f32 %v15101_v41, %v1997_v33  ;;  %v2085_v14 = vmul.f32 1.442695, %v2042_v24 }
 0x439   : > { %v15255_v15 = vpop.eup %13369  ;;  %13381 = vpow2.f32 %v2079_v10  ;;  %v2006_v3 = vpop.xlane.xlu1 %2005 }
 0x43a   : > { %v2103_v22 = vmul.f32 1.442695, %v2051_v1  ;;  %v2181_v37 = vsel %vm1934_vm6, %v15255_v15, 0.0  ;;  %v2054_v59 = vsub.f32 %v15104_v13, %v2006_v3 }
 0x43b   : > { %2182 = vadd.xlane.f32.xlu1 %v2181_v37  ;;  %v1964_v52 = vpop.xlane.xlu0 %1963  ;;  %v15260_v44 = vpop.eup %13371 }
 0x43c   : > { %13383 = vpow2.f32 %v2103_v22  ;;  %v2040_v57 = vsub.f32 %v15111_v18, %v1964_v52  ;;  %v2109_v41 = vmul.f32 1.442695, %v2054_v59  ;;  %v2175_v0 = vsel %vm1934_vm6, %v15260_v44, 0.0 }
 0x43d   : > { %v15263_v53 = vpop.eup %13373  ;;  %13385 = vpow2.f32 %v2085_v14  ;;  %v2000_v58 = vpop.xlane.xlu1 %1999  ;;  %2176 = vadd.xlane.f32.xlu0 %v2175_v0 }
 0x43e   : > { %v2081_v31 = vmul.f32 1.442695, %v2040_v57  ;;  %v2157_v13 = vsel %vm1934_vm6, %v15263_v53, 0.0  ;;  %v2052_v7 = vsub.f32 %v15116_v38, %v2000_v58 }
 0x43f   : > { %2158 = vadd.xlane.f32.xlu1 %v2157_v13  ;;  %v1979_v50 = vpop.xlane.xlu0 %1978  ;;  %v15270_v10 = vpop.eup %13375 }
 0x440   : > { %13387 = vpow2.f32 %v2081_v31  ;;  %v2045_v18 = vsub.f32 %v15119_v62, %v1979_v50  ;;  %v2105_v48 = vmul.f32 1.442695, %v2052_v7  ;;  %v2184_v12 = vsel %vm1934_vm6, %v15270_v10, 0.0 }
 0x441   : > { %13389 = vpow2.f32 %v2109_v41  ;;  %v1982_v24 = vpop.xlane.xlu1 %1981  ;;  %2185 = vadd.xlane.f32.xlu0 %v2184_v12 }
 0x442   : > { %v2091_v45 = vmul.f32 1.442695, %v2045_v18  ;;  %v2046_v22 = vsub.f32 %v15124_v9, %v1982_v24 }
 0x443   : > { %v1973_v33 = vpop.xlane.xlu0 %1972  ;;  %v15275_v1 = vpop.eup %13377 }
 0x444   : > { %13391 = vpow2.f32 %v2091_v45  ;;  %v2043_v38 = vsub.f32 %v15131_v5, %v1973_v33  ;;  %v2178_v62 = vsel %vm1934_vm6, %v15275_v1, 0.0  ;;  %v2093_v0 = vmul.f32 1.442695, %v2046_v22 }
 0x445   : > { %v15278_v14 = vpop.eup %13379  ;;  %13393 = vpow2.f32 %v2105_v48  ;;  %v1976_v59 = vpop.xlane.xlu1 %1975  ;;  %2179 = vadd.xlane.f32.xlu0 %v2178_v62 }
 0x446   : > { %v15283_v3 = vpop.eup %13381  ;;  %v2087_v37 = vmul.f32 1.442695, %v2043_v38  ;;  %v2193_v52 = vsel %vm1934_vm6, %v15278_v14, 0.0  ;;  %v2044_v9 = vsub.f32 %v15136_v16, %v1976_v59 }
 0x447   : > { %2194 = vadd.xlane.f32.xlu1 %v2193_v52  ;;  %v2015_v57 = vpop.xlane.xlu0 %2014  ;;  %v2151_v31 = vsel %vm1934_vm6, %v15283_v3, 0.0 }
 0x448   : > { %v2057_v5 = vsub.f32 %v15139_v2, %v2015_v57  ;;  %13395 = vpow2.f32 %v2087_v37  ;;  %v2089_v16 = vmul.f32 1.442695, %v2044_v9 }
 0x449   : > { %v15288_v41 = vpop.eup %13383  ;;  %v2018_v7 = vpop.xlane.xlu1 %2017  ;;  %2152 = vadd.xlane.f32.xlu0 %v2151_v31 }
 0x44a   : > { %v15293_v58 = vpop.eup %13385  ;;  %v2115_v13 = vmul.f32 1.442695, %v2057_v5  ;;  %v2187_v50 = vsel %vm1934_vm6, %v15288_v41, 0.0  ;;  %v2058_v12 = vsub.f32 %v15146_v54, %v2018_v7 }
 0x44b   : > { %2188 = vadd.xlane.f32.xlu1 %v2187_v50  ;;  %v2009_v18 = vpop.xlane.xlu0 %2008  ;;  %v2160_v45 = vsel %vm1934_vm6, %v15293_v58, 0.0 }
 0x44c   : > { %13397 = vpow2.f32 %v2115_v13  ;;  %v2055_v2 = vsub.f32 %v15151_v6, %v2009_v18  ;;  %v2117_v62 = vmul.f32 1.442695, %v2058_v12 }
 0x44d   : > { %v15298_v48 = vpop.eup %13387  ;;  %13399 = vpow2.f32 %v2093_v0  ;;  %v2012_v38 = vpop.xlane.xlu1 %2011  ;;  %2161 = vadd.xlane.f32.xlu0 %v2160_v45 }
 0x44e   : > { %v15303_v24 = vpop.eup %13389  ;;  %v2111_v33 = vmul.f32 1.442695, %v2055_v2  ;;  %v2154_v22 = vsel %vm1934_vm6, %v15298_v48, 0.0  ;;  %v2056_v37 = vsub.f32 %v15156_v56, %v2012_v38 }
 0x44f   : > { %2155 = vadd.xlane.f32.xlu1 %v2154_v22  ;;  %v2196_v54 = vsel %vm1934_vm6, %v15303_v24, 0.0  ;;  %v2027_v22 = vpop.xlane.xlu0 %2026 }
 0x450   : > { %13401 = vpow2.f32 %v2111_v33  ;;  %v2113_v57 = vmul.f32 1.442695, %v2056_v37 }
 0x451   : > { %v15307_v6 = vpop.eup %13391  ;;  %13403 = vpow2.f32 %v2089_v16  ;;  %2197 = vadd.xlane.f32.xlu0 %v2196_v54 }
 0x452   : > { %v15312_v59 = vpop.eup %13393  ;;  %v2169_v52 = vsel %vm1934_vm6, %v15307_v6, 0.0  ;;  %13405 = vpow2.f32 %v2117_v62  ;;  %v2061_v62 = vsub.f32 %v15159_v30, %v2027_v22 }
 0x453   : > { %2170 = vadd.xlane.f32.xlu1 %v2169_v52  ;;  %v2190_v5 = vsel %vm1934_vm6, %v15312_v59, 0.0  ;;  %13407 = vpow2.f32 %v2113_v57  ;;  %v2021_v37 = vpop.xlane.xlu0 %2020  ;;  %v2030_v57 = vpop.xlane.xlu1 %2029 }
 0x454   : > { %v2123_v54 = vmul.f32 1.442695, %v2061_v62  ;;  %v2059_v52 = vsub.f32 %v15166_v43, %v2021_v37 }
 0x455   : > { %v15318_v0 = vpop.eup %13395  ;;  %2191 = vadd.xlane.f32.xlu0 %v2190_v5 }
 0x456   : > { %v2163_v56 = vsel %vm1934_vm6, %v15318_v0, 0.0  ;;  %13409 = vpow2.f32 %v2123_v54  ;;  %v2119_v5 = vmul.f32 1.442695, %v2059_v52 }
 0x458   : > { %13411 = vpow2.f32 %v2119_v5 }
 0x459   : > { %v15320_v9 = vpop.eup %13397  ;;  %2164 = vadd.xlane.f32.xlu0 %v2163_v56  ;;  %v2062_v56 = vsub.f32 %v15169_v19, %v2030_v57 }
 0x45a   : > { %v15324_v31 = vpop.eup %13399  ;;  %v2205_v13 = vsel %vm1934_vm6, %v15320_v9, 0.0 }
 0x45b   : > { %2206 = vadd.xlane.f32.xlu1 %v2205_v13  ;;  %v2172_v50 = vsel %vm1934_vm6, %v15324_v31, 0.0  ;;  %v2024_v13 = vpop.xlane.xlu1 %2023 }
 0x45d   : > { %v15328_v7 = vpop.eup %13401  ;;  %2173 = vadd.xlane.f32.xlu0 %v2172_v50  ;;  %v2125_v50 = vmul.f32 1.442695, %v2062_v56 }
 0x45e   : > { %v15332_v18 = vpop.eup %13403  ;;  %v2199_v2 = vsel %vm1934_vm6, %v15328_v7, 0.0 }
 0x45f   : > { %2200 = vadd.xlane.f32.xlu1 %v2199_v2  ;;  %v2166_v16 = vsel %vm1934_vm6, %v15332_v18, 0.0  ;;  %v15338_v12 = vpop.eup %13405  ;;  %v2060_v2 = vsub.f32 %v15176_v36, %v2024_v13  ;;  %13413 = vpow2.f32 %v2125_v50 }
 0x460   : > { %v2208_v45 = vsel %vm1934_vm6, %v15338_v12, 0.0  ;;  %v15342_v33 = vpop.eup %13407 }
 0x461   : > { %2167 = vadd.xlane.f32.xlu0 %v2166_v16  ;;  %v2202_v38 = vsel %vm1934_vm6, %v15342_v33, 0.0  ;;  %v2121_v16 = vmul.f32 1.442695, %v2060_v2 }
 0x463   : > { %v15354_v30 = vpop.eup %13409  ;;  %13415 = vpow2.f32 %v2121_v16 }
 0x464   : > { %v2217_v43 = vsel %vm1934_vm6, %v15354_v30, 0.0 }
 0x465   : > { %2209 = vadd.xlane.f32.xlu0 %v2208_v45  ;;  %v15358_v45 = vpop.eup %13411 }
 0x469   : > { %2203 = vadd.xlane.f32.xlu0 %v2202_v38  ;;  %v2211_v38 = vsel %vm1934_vm6, %v15358_v45, 0.0 }
 0x46c   : > { %v15362_v19 = vpop.eup %13413 }
 0x46d   : > { %v2220_v36 = vsel %vm1934_vm6, %v15362_v19, 0.0 }
 0x470   : > { %3361 = vrot.lane.b32.xlu1 %v14740_v35, %s13972_s19  ;;  %v15366_v22 = vpop.eup %13415 }
 0x471   : > { %v2214_v62 = vsel %vm1934_vm6, %v15366_v22, 0.0 }
 0x47f   : > { %3252 = vrot.lane.b32.xlu0 %v14675_v11, %s13972_s19 }
 0x494   : > { %2218 = vadd.xlane.f32.xlu1 %v2217_v43 }
 0x498   : > { %2212 = vadd.xlane.f32.xlu1 %v2211_v38 }
 0x49e   : > { %2221 = vadd.xlane.f32.xlu0 %v2220_v36 }
 0x4a2   : > { %v2135_v37 = vpop.xlane.xlu0 %2134  ;;  %2215 = vadd.xlane.f32.xlu0 %v2214_v62 }
 0x4a6   : > { %v2129_v54 = vpop.xlane.xlu0 %2128 }
 0x4a7   : > { %13417 = vrcp.f32 %v2129_v54  ;;  %v19476_v54 = vunpack.i.l.bf16 %v14940_v42 }
 0x4a8   : > { %13419 = vrcp.f32 %v2135_v37  ;;  %v13045_v37 = vunpack.i.l.bf16 %v14949_v63 }
 0x4a9   : > { %3145 = vrot.lane.b32.xlu1 %v14587_v32, %s13973_s20 }
 0x4aa   : > { %v2138_v52 = vpop.xlane.xlu1 %2137 }
 0x4ad   : > { %3246 = vrot.lane.b32.xlu1 %v14665_v26, %s13973_s20 }
 0x4ae   : > { %v2132_v57 = vpop.xlane.xlu1 %2131  ;;  %v2147_v5 = vpop.xlane.xlu0 %2146 }
 0x4af   : > { %13421 = vrcp.f32 %v2132_v57 }
 0x4b0   : > { %13423 = vrcp.f32 %v2138_v52 }
 0x4b1   : > { %3468 = vrot.lane.b32.xlu1 %v14801_v34, %s13972_s19 }
 0x4b2   : > { %v2144_v56 = vpop.xlane.xlu1 %2143 }
 0x4b3   : > { %v2141_v13 = vpop.xlane.xlu0 %2140 }
 0x4b4   : > { %v13418_v50 = vpop.eup %13417  ;;  %13425 = vrcp.f32 %v2141_v13 }
 0x4b5   : > { %13427 = vrcp.f32 %v2144_v56  ;;  %3250 = vrot.lane.b32.xlu1 %v14651_v29, %s13973_s20  ;;  %v2224_v2 = vmul.f32 %v13418_v50, %v15218_v20  ;;  %v13420_v43 = vpop.eup %13419 }
 0x4b6   : > { %13429 = vrcp.f32 %v2147_v5  ;;  %v2228_v62 = vmul.f32 %v13420_v43, %v15214_v17  ;;  %v13055_v17 = vunpack.i.l.bf16 %v14955_v28 }
 0x4b7   : > { %v2150_v16 = vpop.xlane.xlu0 %2149  ;;  %12064 = vmatprep.mubr.msk.f32.mxu0 %vm1934_vm6, %v2224_v2  ;;  %v19478_v2 = vld [vmem:[#allocation10_spill] sm:$0xff] }
 0x4b8   : > { %13431 = vrcp.f32 %v2150_v16  ;;  %3143 = vrot.lane.b32.xlu0 %v14592_v39, %s13973_s20 }
 0x4b9   : > { %3466 = vrot.lane.b32.xlu1 %v14814_v51, %s13972_s19 }
 0x4bc   : > { %v13422_v38 = vpop.eup %13421  ;;  %3244 = vrot.lane.b32.xlu0 %v14675_v11, %s13973_s20 }
 0x4bd   : > { %v2226_v36 = vmul.f32 %v13422_v38, %v15226_v47  ;;  %3351 = vrot.lane.b32.xlu1 %v14707_v8, %s13973_s20  ;;  %v13424_v20 = vpop.eup %13423  ;;  %v13050_v47 = vunpack.i.l.bf16 %v14947_v46  ;;  %v13060_v46 = vunpack.i.l.bf16 %v14953_v40  ;;  %v19477_v40 = vld [vmem:[#allocation31_spill] sm:$0xff] }
 0x4be   : > { %v2230_v57 = vmul.f32 %v13424_v20, %v15222_v25  ;;  %v19481_v20 = vld [vmem:[#allocation32_spill] sm:$0xff] }
 0x4bf   : > { %12065 = vmatmul.mubr.msk.f32.vlgmr.msra.gmra.mxu0 %vm1934_vm6, %v2226_v36 }
 0x4c0   : > { %12077 = vmatpush3.msra.mxu0 %v19476_v54  ;;  %12067 = vmatprep.mubr.msk.f32.mxu0 %vm1934_vm6, %v2228_v62  ;;  %v13080_v62 = vunpack.i.l.bf16 %v19481_v20  ;;  %v19482_v54 = vld [vmem:[#allocation6_spill] sm:$0xff] }
 0x4c1   : > { %v13426_v52 = vpop.eup %13425  ;;  %3359 = vrot.lane.b32.xlu0 %v14707_v8, %s13972_s19  ;;  %12078 = vmatprep.subr.mxu0 %v13045_v37 }
 0x4c2   : > { %v13428_v5 = vpop.eup %13427  ;;  %3353 = vrot.lane.b32.xlu1 %v14740_v35, %s13973_s20  ;;  %12079 = vmatpush3.msra.mxu0 %v13045_v37  ;;  %v2232_v63 = vmul.f32 %v13426_v52, %v15236_v27  ;;  %v13065_v27 = vunpack.i.l.bf16 %v14965_v23  ;;  %v19480_v23 = vld [vmem:[#allocation33_spill] sm:$0xff] }
 0x4c3   : > { %v13430_v42 = vpop.eup %13429  ;;  %12080 = vmatprep.subr.mxu0 %v13050_v47  ;;  %12068 = vmatmul.mubr.msk.f32.gmra.mxu0 %vm1934_vm6, %v2230_v57  ;;  %v2234_v25 = vmul.f32 %v13428_v5, %v15234_v49  ;;  %v13070_v49 = vunpack.i.l.bf16 %v19477_v40  ;;  %v13075_v43 = vunpack.i.l.bf16 %v19480_v23  ;;  %v19483_v5 = vld [vmem:[#allocation11_spill] sm:$0xff] }
 0x4c4   : > { %12081 = vmatpush3.msra.mxu0 %v13050_v47  ;;  %12070 = vmatprep.mubr.msk.f32.mxu0 %vm1934_vm6, %v2232_v63  ;;  %v2183_v13 = vpop.xlane.xlu1 %2182  ;;  %v2236_v28 = vmul.f32 %v13430_v42, %v15228_v61  ;;  %v19479_v61 = vld [vmem:[#allocation18_spill] sm:$0xff]  ;;  %v19484_v63 = vld [vmem:[#allocation4_spill] sm:$0xff] }
 0x4c5   : > { %3248 = vrot.lane.b32.xlu0 %v14659_v55, %s13973_s20  ;;  %12082 = vmatprep.subr.mxu0 %v13055_v17  ;;  %v13432_v56 = vpop.eup %13431 }
 0x4c6   : > { %3462 = vrot.lane.b32.xlu1 %v14829_v60, %s13972_s19  ;;  %12083 = vmatpush3.msra.mxu0 %v13055_v17  ;;  %v2177_v50 = vpop.xlane.xlu0 %2176  ;;  %v2238_v16 = vmul.f32 %v13432_v56, %v15243_v21 }
 0x4c7   : > { %12084 = vmatprep.subr.mxu0 %v13060_v46  ;;  %12071 = vmatmul.mubr.msk.f32.gmra.mxu0 %vm1934_vm6, %v2234_v25  ;;  %13433 = vrcp.f32 %v2177_v50  ;;  %v19485_v25 = vld [vmem:[#allocation3_spill] sm:$0xff] }
 0x4c8   : > { %12085 = vmatpush3.msra.mxu0 %v13060_v46  ;;  %12073 = vmatprep.mubr.msk.f32.mxu0 %vm1934_vm6, %v2236_v28  ;;  %v2159_v36 = vpop.xlane.xlu1 %2158  ;;  %13435 = vrcp.f32 %v2183_v13 }
 0x4c9   : > { %3357 = vrot.lane.b32.xlu0 %v19478_v2, %s13972_s19  ;;  %12086 = vmatprep.subr.mxu0 %v13065_v27 }
 0x4ca   : > { %3456 = vrot.lane.b32.xlu1 %v19479_v61, %s13973_s20  ;;  %12087 = vmatpush3.msra.mxu0 %v13065_v27  ;;  %v2186_v38 = vpop.xlane.xlu0 %2185  ;;  %v19486_v27 = vld [vmem:[#allocation15_spill] sm:$0xff] }
 0x4cb   : > { %12088 = vmatprep.subr.mxu0 %v13070_v49  ;;  %12074 = vmatmul.mubr.msk.f32.gmra.mxu0 %vm1934_vm6, %v2238_v16 }
 0x4cc   : > { %12089 = vmatpush3.msra.mxu0 %v13070_v49  ;;  %v19487_v49 = vld [vmem:[#allocation34_spill] sm:$0xff] }
 0x4cd   : > { %3349 = vrot.lane.b32.xlu0 %v19478_v2, %s13973_s20  ;;  %12090 = vmatprep.subr.mxu0 %v13075_v43  ;;  %v3177_v16 = vsel %vm1469_vm5, %v19487_v49, 0  ;;  %v19494_v49 = vld [vmem:[#allocation37_spill] sm:$0xff] }
 0x4ce   : > { %3460 = vrot.lane.b32.xlu1 %v14801_v34, %s13973_s20  ;;  %12091 = vmatpush3.msra.mxu0 %v13075_v43  ;;  %v2180_v21 = vpop.xlane.xlu0 %2179 }
 0x4cf   : > { %12132 = vmatprep.subr.mxu0 %v13080_v62  ;;  %13437 = vrcp.f32 %v2180_v21  ;;  %v19489_v21 = vld [vmem:[#allocation36_spill] sm:$0xff] }
 0x4d0   : > { %v2195_v37 = vpop.xlane.xlu1 %2194  ;;  %13439 = vrcp.f32 %v2186_v38  ;;  %v19488_v38 = vld [vmem:[#allocation7_spill] sm:$0xff] }
 0x4d1   : > { %3464 = vrot.lane.b32.xlu0 %v19479_v61, %s13972_s19 }
 0x4d2   : > { %13098 = vrot.lane.b32.xlu1 %v19482_v54, %s13974_s27  ;;  %v2153_v52 = vpop.xlane.xlu0 %2152 }
 0x4d3   : > { %13441 = vrcp.f32 %v2153_v52 }
 0x4d4   : > { %v2189_v47 = vpop.xlane.xlu1 %2188  ;;  %v13434_v57 = vpop.eup %13433 }
 0x4d5   : > { %13443 = vrcp.f32 %v2189_v47  ;;  %3355 = vrot.lane.b32.xlu0 %v19483_v5, %s13973_s20  ;;  %v2256_v42 = vmul.f32 %v13434_v57, %v15260_v44  ;;  %v13436_v13 = vpop.eup %13435  ;;  %v19490_v47 = vld [vmem:[#allocation9_spill] sm:$0xff] }
 0x4d6   : > { %13108 = vrot.lane.b32.xlu1 %v19484_v63, %s13974_s27  ;;  %v2162_v17 = vpop.xlane.xlu0 %2161  ;;  %13445 = vrcp.f32 %v2159_v36  ;;  %v2260_v23 = vmul.f32 %v13436_v13, %v15255_v15 }
 0x4d7   : > { %12120 = vmatprep.mubr.msk.f32.mxu1 %vm1934_vm6, %v2256_v42 }
 0x4d8   : > { %v2156_v46 = vpop.xlane.xlu1 %2155 }
 0x4d9   : > { %13447 = vrcp.f32 %v2156_v46  ;;  %3454 = vrot.lane.b32.xlu0 %v14829_v60, %s13973_s20 }
 0x4da   : > { %13113 = vrot.lane.b32.xlu1 %v19485_v25, %s13974_s27  ;;  %v2198_v56 = vpop.xlane.xlu0 %2197  ;;  %13449 = vrcp.f32 %v2162_v17  ;;  %v19491_v17 = vld [vmem:[#allocation16_spill] sm:$0xff] }
 0x4db   : > { %13451 = vrcp.f32 %v2195_v37 }
 0x4dc   : > { %v13438_v28 = vpop.eup %13437  ;;  %v2171_v36 = vpop.xlane.xlu1 %2170 }
 0x4dd   : > { %3458 = vrot.lane.b32.xlu0 %v14814_v51, %s13973_s20  ;;  %v2258_v44 = vmul.f32 %v13438_v28, %v15275_v1  ;;  %v13440_v50 = vpop.eup %13439 }
 0x4de   : > { %13123 = vrot.lane.b32.xlu1 %v19486_v27, %s13974_s27  ;;  %v2192_v40 = vpop.xlane.xlu0 %2191  ;;  %v2262_v52 = vmul.f32 %v13440_v50, %v15270_v10 }
 0x4df   : > { %13453 = vrcp.f32 %v2192_v40  ;;  %12121 = vmatmul.mubr.msk.f32.vlgmr.msra.gmra.mxu1 %vm1934_vm6, %v2258_v44  ;;  %v19493_v44 = vld [vmem:[#allocation8_spill] sm:$0xff]  ;;  %v13081_v40 = vunpack.i.h.bf16 %v19481_v20 }
 0x4e0   : > { %v13442_v43 = vpop.eup %13441  ;;  %12161 = vmatpush3.bf16.xpose.msra.mxu1 %v3177_v16  ;;  %12123 = vmatprep.mubr.msk.f32.mxu1 %vm1934_vm6, %v2260_v23  ;;  %13455 = vrcp.f32 %v2198_v56  ;;  %v19492_v56 = vld [vmem:[#allocation17_spill] sm:$0xff]  ;;  %v19495_v23 = vld [vmem:[#allocation40_spill] sm:$0xff] }
 0x4e1   : > { %13103 = vrot.lane.b32.xlu0 %v19488_v38, %s13974_s27  ;;  %12945 = vmatprep.subr.msk.bf16.mxu1 %vm1469_vm5, %v19489_v21  ;;  %v2240_v37 = vmul.f32 %v13442_v43, %v15283_v3  ;;  %v13085_v43 = vunpack.i.l.bf16 %v19495_v23 }
 0x4e2   : > { %v13444_v1 = vpop.eup %13443  ;;  %13133 = vrot.lane.b32.xlu1 %v19490_v47, %s13974_s27  ;;  %v2165_v15 = vpop.xlane.xlu0 %2164 }
 0x4e3   : > { %v2264_v57 = vmul.f32 %v13444_v1, %v15288_v41  ;;  %13457 = vrcp.f32 %v2165_v15  ;;  %12092 = vmatprep.mubr.msk.f32.mxu0 %vm1934_vm6, %v2240_v37  ;;  %12124 = vmatmul.mubr.msk.f32.gmra.mxu1 %vm1934_vm6, %v2262_v52  ;;  %v13446_v42 = vpop.eup %13445  ;;  %v3174_v41 = vsel %vm1469_vm5, %v19489_v21, 0  ;;  %v19496_v37 = vld [vmem:[#allocation19_spill] sm:$0xff] }
 0x4e4   : > { %v2207_v10 = vpop.xlane.xlu1 %2206  ;;  %v2244_v50 = vmul.f32 %v13446_v42, %v15263_v53  ;;  %13459 = vrcp.f32 %v2171_v36  ;;  %v13086_v36 = vunpack.i.h.bf16 %v19495_v23  ;;  %v19497_v42 = vld [vmem:[#allocation35_spill] sm:$0xff] }
 0x4e5   : > { %13118 = vrot.lane.b32.xlu0 %v19491_v17, %s13974_s27  ;;  %12126 = vmatprep.mubr.msk.f32.mxu1 %vm1934_vm6, %v2264_v57 }
 0x4e6   : > { %v13448_v3 = vpop.eup %13447  ;;  %13143 = vrot.lane.b32.xlu1 %v19492_v56, %s13974_s27  ;;  %v2174_v13 = vpop.xlane.xlu0 %2173 }
 0x4e7   : > { %v2242_v46 = vmul.f32 %v13448_v3, %v15298_v48  ;;  %v13450_v28 = vpop.eup %13449  ;;  %v13090_v3 = vunpack.i.l.bf16 %v19497_v42 }
 0x4e8   : > { %12163 = vmatpush3.bf16.xpose.msra.mxu1 %v3174_v41  ;;  %v13452_v16 = vpop.eup %13451  ;;  %v2201_v1 = vpop.xlane.xlu1 %2200  ;;  %v2246_v53 = vmul.f32 %v13450_v28, %v15293_v58  ;;  %v3171_v58 = vsel %vm1469_vm5, %v19494_v49, 0  ;;  %v19499_v41 = vld [vmem:[#allocation38_spill] sm:$0xff] }
 0x4e9   : > { %13128 = vrot.lane.b32.xlu0 %v19493_v44, %s13974_s27  ;;  %12946 = vmatprep.subr.msk.bf16.mxu1 %vm1469_vm5, %v19494_v49  ;;  %v2268_v15 = vmul.f32 %v13452_v16, %v15278_v14  ;;  %v19502_v16 = vld [vmem:[#allocation45_spill] sm:$0xff] }
 0x4ea   : > { %12093 = vmatmul.mubr.msk.f32.vlgmr.msra.gmra.mxu0 %vm1934_vm6, %v2242_v46  ;;  %v2168_v48 = vpop.xlane.xlu0 %2167  ;;  %v19498_v46 = vld [vmem:[#allocation20_spill] sm:$0xff] }
 0x4eb   : > { %12133 = vmatpush3.msra.mxu0 %v13080_v62  ;;  %12095 = vmatprep.mubr.msk.f32.mxu0 %vm1934_vm6, %v2244_v50  ;;  %13461 = vrcp.f32 %v2168_v48  ;;  %v19500_v50 = vld [vmem:[#allocation42_spill] sm:$0xff] }
 0x4ec   : > { %12134 = vmatprep.subr.mxu0 %v13081_v40  ;;  %v13454_v21 = vpop.eup %13453  ;;  %13463 = vrcp.f32 %v2174_v13  ;;  %v13091_v13 = vunpack.i.h.bf16 %v19497_v42  ;;  %v19505_v42 = vld [vmem:[#allocation43_spill] sm:$0xff] }
 0x4ed   : > { %12135 = vmatpush3.msra.mxu0 %v13081_v40  ;;  %13138 = vrot.lane.b32.xlu0 %v19496_v37, %s13974_s27  ;;  %v2266_v20 = vmul.f32 %v13454_v21, %v15312_v59  ;;  %13465 = vrcp.f32 %v2201_v1  ;;  %v13456_v52 = vpop.eup %13455  ;;  %v13095_v40 = vunpack.i.l.bf16 %v19500_v50  ;;  %v19503_v1 = vld [vmem:[#allocation44_spill] sm:$0xff] }
 0x4ee   : > { %12136 = vmatprep.subr.mxu0 %v13085_v43  ;;  %12096 = vmatmul.mubr.msk.f32.gmra.mxu0 %vm1934_vm6, %v2246_v53  ;;  %v2210_v62 = vpop.xlane.xlu0 %2209  ;;  %13467 = vrcp.f32 %v2207_v10  ;;  %v2270_v28 = vmul.f32 %v13456_v52, %v15303_v24  ;;  %v13096_v10 = vunpack.i.h.bf16 %v19500_v50  ;;  %v3168_v24 = vsel %vm1469_vm5, %v19499_v41, 0 }
 0x4ef   : > { %12137 = vmatpush3.msra.mxu0 %v13085_v43  ;;  %12127 = vmatmul.mubr.msk.f32.gmra.mxu1 %vm1934_vm6, %v2266_v20 }
 0x4f0   : > { %12138 = vmatprep.subr.mxu0 %v13086_v36  ;;  %v13458_v57 = vpop.eup %13457  ;;  %12165 = vmatpush3.bf16.xpose.msra.mxu1 %v3171_v58 }
 0x4f1   : > { %12139 = vmatpush3.msra.mxu0 %v13086_v36  ;;  %13148 = vrot.lane.b32.xlu0 %v19498_v46, %s13974_s27  ;;  %v2248_v59 = vmul.f32 %v13458_v57, %v15318_v0  ;;  %v19501_v0 = vld [vmem:[#allocation41_spill] sm:$0xff]  ;;  %v13460_v49 = vpop.eup %13459 }
 0x4f2   : > { %12129 = vmatprep.mubr.msk.f32.mxu1 %vm1934_vm6, %v2268_v15  ;;  %12140 = vmatprep.subr.mxu0 %v13090_v3  ;;  %v2204_v14 = vpop.xlane.xlu0 %2203  ;;  %v2252_v53 = vmul.f32 %v13460_v49, %v15307_v6  ;;  %v3362_v6 = vpop.permute.xlu1 %3361  ;;  %v19504_v15 = vld [vmem:[#allocation39_spill] sm:$0xff] }
 0x4f3   : > { %12947 = vmatprep.subr.msk.bf16.mxu1 %vm1469_vm5, %v19499_v41  ;;  %12141 = vmatpush3.msra.mxu0 %v13090_v3  ;;  %13469 = vrcp.f32 %v2204_v14  ;;  %v3276_v3 = vsel %vm1469_vm5, %v19505_v42, 0 }
 0x4f4   : > { %12098 = vmatprep.mubr.msk.f32.mxu0 %vm1934_vm6, %v2248_v59  ;;  %12142 = vmatprep.subr.mxu0 %v13091_v13  ;;  %13471 = vrcp.f32 %v2210_v62 }
 0x4f5   : > { %12130 = vmatmul.mubr.msk.f32.gmra.mxu1 %vm1934_vm6, %v2270_v28  ;;  %12143 = vmatpush3.msra.mxu0 %v13091_v13 }
 0x4f6   : > { %12168 = vmatprep.mubr.msk.bf16.mxu1 %vm1469_vm5, %v19501_v0  ;;  %12144 = vmatprep.subr.mxu0 %v13095_v40  ;;  %v3253_v59 = vpop.permute.xlu0 %3252 }
 0x4f7   : > { %12145 = vmatpush3.msra.mxu0 %v13095_v40 }
 0x4f8   : > { %v13462_v48 = vpop.eup %13461  ;;  %12146 = vmatprep.subr.mxu0 %v13096_v10  ;;  %12167 = vmatpush3.bf16.xpose.msra.mxu1 %v3168_v24 }
 0x4f9   : > { %12147 = vmatpush3.msra.mxu0 %v13096_v10  ;;  %12952 = vmatprep.subr.msk.bf16.mxu1 %vm1469_vm5, %v19502_v16  ;;  %v2250_v23 = vmul.f32 %v13462_v48, %v15332_v18  ;;  %v13464_v43 = vpop.eup %13463  ;;  %v3387_v18 = vsel %vm1469_vm5, %v19502_v16, 0 }
 0x4fa   : > { %12948 = vmatprep.subr.msk.bf16.mxu0 %vm1469_vm5, %v19503_v1  ;;  %v13466_v21 = vpop.eup %13465  ;;  %v2254_v36 = vmul.f32 %v13464_v43, %v15324_v31 }
 0x4fb   : > { %12099 = vmatmul.mubr.msk.f32.gmra.mxu0 %vm1934_vm6, %v2250_v23  ;;  %v2272_v20 = vmul.f32 %v13466_v21, %v15328_v7  ;;  %v13468_v62 = vpop.eup %13467 }
 0x4fc   : > { %12101 = vmatprep.mubr.msk.f32.mxu0 %vm1934_vm6, %v2252_v53  ;;  %v2276_v7 = vmul.f32 %v13468_v62, %v15320_v9  ;;  %v3279_v9 = vsel %vm1469_vm5, %v19504_v15, 0 }
 0x4ff   : > { %12169 = vmatmul.mubr.msk.bf16.vlgmr.msra.gmra.mxu1 %vm1469_vm5, %v15205_v4  ;;  %12102 = vmatmul.mubr.msk.f32.gmra.mxu0 %vm1934_vm6, %v2254_v36  ;;  %v3282_v4 = vsel %vm1469_vm5, %v19503_v1, 0 }
 0x500   : > { %v13470_v52 = vpop.eup %13469  ;;  %12193 = vmatpush3.bf16.xpose.msra.mxu1 %v3387_v18  ;;  %12148 = vmatprep.mubr.msk.f32.mxu0 %vm1934_vm6, %v2272_v20 }
 0x501   : > { %v2274_v58 = vmul.f32 %v13470_v52, %v15342_v33  ;;  %12953 = vmatprep.subr.msk.bf16.mxu1 %vm1469_vm5, %v3362_v6  ;;  %v13472_v31 = vpop.eup %13471  ;;  %v3384_v33 = vsel %vm1469_vm5, %v3362_v6, 0 }
 0x502   : > { %v2278_v57 = vmul.f32 %v13472_v31, %v15338_v12  ;;  %v3273_v12 = vsel %vm1469_vm5, %v3253_v59, 0 }
 0x503   : > { %12149 = vmatmul.mubr.msk.f32.vlgmr.msra.gmra.mxu0 %vm1934_vm6, %v2274_v58 }
 0x504   : > { %12177 = vmatpush3.bf16.xpose.msra.mxu0 %v3282_v4  ;;  %12151 = vmatprep.mubr.msk.f32.mxu0 %vm1934_vm6, %v2276_v7 }
 0x505   : > { %12949 = vmatprep.subr.msk.bf16.mxu0 %vm1469_vm5, %v19504_v15 }
 0x507   : > { %12152 = vmatmul.mubr.msk.f32.gmra.mxu0 %vm1934_vm6, %v2278_v57 }
 0x508   : > { %12195 = vmatpush3.bf16.xpose.msra.mxu1 %v3384_v33 }
 0x50c   : > { %12179 = vmatpush3.bf16.xpose.msra.mxu0 %v3279_v9 }
 0x50d   : > { %12950 = vmatprep.subr.msk.bf16.mxu0 %vm1469_vm5, %v19505_v42 }
 0x514   : > { %12181 = vmatpush3.bf16.xpose.msra.mxu0 %v3276_v3 }
 0x515   : > { %12951 = vmatprep.subr.msk.bf16.mxu0 %vm1469_vm5, %v3253_v59 }
 0x51c   : > { %12183 = vmatpush3.bf16.xpose.msra.mxu0 %v3273_v12 }
 0x51d   : > { %v2219_v13 = vpop.xlane.xlu1 %2218 }
 0x521   : > { %v2213_v41 = vpop.xlane.xlu1 %2212 }
 0x522   : > { %13473 = vrcp.f32 %v2213_v41 }
 0x523   : > { %13475 = vrcp.f32 %v2219_v13 }
 0x525   : > { %v3146_v14 = vpop.permute.xlu1 %3145 }
 0x527   : > { %v2222_v28 = vpop.xlane.xlu0 %2221 }
 0x529   : > { %v3247_v50 = vpop.permute.xlu1 %3246 }
 0x52b   : > { %v2216_v40 = vpop.xlane.xlu0 %2215 }
 0x52c   : > { %13477 = vrcp.f32 %v2216_v40 }
 0x52d   : > { %v3469_v0 = vpop.permute.xlu1 %3468  ;;  %13479 = vrcp.f32 %v2222_v28 }
 0x52e   : > { %12956 = vmatprep.subr.msk.bf16.mxu0 %vm1469_vm5, %v3469_v0 }
 0x52f   : > { %v13474_v10 = vpop.eup %13473  ;;  %v3144_v49 = vpop.permute.xlu0 %3143 }
 0x530   : > { %v2280_v24 = vmul.f32 %v13474_v10, %v15358_v45  ;;  %12172 = vmatprep.mubr.msk.bf16.mxu1 %vm1469_vm5, %v3144_v49  ;;  %v13476_v1 = vpop.eup %13475 }
 0x531   : > { %v3251_v48 = vpop.permute.xlu1 %3250  ;;  %12173 = vmatmul.mubr.msk.bf16.gmra.mxu1 %vm1469_vm5, %v3146_v14  ;;  %v2284_v18 = vmul.f32 %v13476_v1, %v15354_v30  ;;  %v3492_v30 = vsel %vm1469_vm5, %v3469_v0, 0 }
 0x532   : > { %12154 = vmatprep.mubr.msk.f32.mxu0 %vm1934_vm6, %v2280_v24 }
 0x533   : > { %v3245_v16 = vpop.permute.xlu0 %3244 }
 0x535   : > { %v3467_v23 = vpop.permute.xlu1 %3466 }
 0x536   : > { %v3489_v33 = vsel %vm1469_vm5, %v3467_v23, 0 }
 0x537   : > { %v3360_v43 = vpop.permute.xlu0 %3359 }
 0x538   : > { %12954 = vmatprep.subr.msk.bf16.mxu1 %vm1469_vm5, %v3360_v43  ;;  %v3381_v21 = vsel %vm1469_vm5, %v3360_v43, 0 }
 0x539   : > { %v3352_v53 = vpop.permute.xlu1 %3351  ;;  %v13478_v36 = vpop.eup %13477  ;;  %12197 = vmatpush3.bf16.xpose.msra.mxu1 %v3381_v21 }
 0x53a   : > { %v2282_v45 = vmul.f32 %v13478_v36, %v15366_v22  ;;  %v13480_v20 = vpop.eup %13479 }
 0x53b   : > { %v3249_v62 = vpop.permute.xlu0 %3248  ;;  %v2286_v6 = vmul.f32 %v13480_v20, %v15362_v19 }
 0x53c   : > { %12155 = vmatmul.mubr.msk.f32.gmra.mxu0 %vm1934_vm6, %v2282_v45 }
 0x53d   : > { %v3354_v52 = vpop.permute.xlu1 %3353  ;;  %12157 = vmatprep.mubr.msk.f32.mxu0 %vm1934_vm6, %v2284_v18 }
 0x53f   : > { %v3358_v58 = vpop.permute.xlu0 %3357 }
 0x540   : > { %12158 = vmatmul.mubr.msk.f32.gmra.mxu0 %vm1934_vm6, %v2286_v6  ;;  %12955 = vmatprep.subr.msk.bf16.mxu1 %vm1469_vm5, %v3358_v58  ;;  %v3378_v7 = vsel %vm1469_vm5, %v3358_v58, 0 }
 0x541   : > { %v3463_v31 = vpop.permute.xlu1 %3462  ;;  %12184 = vmatprep.mubr.msk.bf16.mxu0 %vm1469_vm5, %v3245_v16  ;;  %12199 = vmatpush3.bf16.xpose.msra.mxu1 %v3378_v7 }
 0x542   : > { %v3483_v49 = vsel %vm1469_vm5, %v3463_v31, 0 }
 0x543   : > { %v3350_v22 = vpop.permute.xlu0 %3349 }
 0x544   : > { %12185 = vmatmul.mubr.msk.bf16.vlgmr.msra.gmra.mxu0 %vm1469_vm5, %v3247_v50  ;;  %12200 = vmatprep.mubr.msk.bf16.mxu1 %vm1469_vm5, %v3350_v22 }
 0x545   : > { %v3457_v4 = vpop.permute.xlu1 %3456  ;;  %12209 = vmatpush3.bf16.xpose.msra.mxu0 %v3492_v30  ;;  %12188 = vmatprep.mubr.msk.bf16.mxu0 %vm1469_vm5, %v3249_v62 }
 0x546   : > { %12957 = vmatprep.subr.msk.bf16.mxu0 %vm1469_vm5, %v3467_v23 }
 0x547   : > { %v3465_v19 = vpop.permute.xlu0 %3464 }
 0x548   : > { %12201 = vmatmul.mubr.msk.bf16.vlgmr.msra.gmra.mxu1 %vm1469_vm5, %v3352_v53  ;;  %v3486_v13 = vsel %vm1469_vm5, %v3465_v19, 0 }
 0x549   : > { %v15569_v15 = vpop.permute.xlu1 %3460  ;;  %12204 = vmatprep.mubr.msk.bf16.mxu1 %vm1469_vm5, %v3354_v52 }
 0x54b   : > { %v3356_v57 = vpop.permute.xlu0 %3355 }
 0x54c   : > { %12189 = vmatmul.mubr.msk.bf16.gmra.mxu0 %vm1469_vm5, %v3251_v48 }
 0x54d   : > { %v13099_v9 = vpop.permute.xlu1 %13098  ;;  %12211 = vmatpush3.bf16.xpose.msra.mxu0 %v3489_v33 }
 0x54e   : > { %v13100_v42 = vunpack.i.l.bf16 %v13099_v9  ;;  %12958 = vmatprep.subr.msk.bf16.mxu0 %vm1469_vm5, %v3465_v19  ;;  %v13101_v59 = vunpack.i.h.bf16 %v13099_v9 }
 0x54f   : > { %v3455_v3 = vpop.permute.xlu0 %3454 }
 0x550   : > { %12224 = vmatprep.subr.mxu1 %v13100_v42  ;;  %12205 = vmatmul.mubr.msk.bf16.gmra.mxu1 %vm1469_vm5, %v3356_v57 }
 0x551   : > { %12216 = vmatprep.mubr.msk.bf16.mxu0 %vm1469_vm5, %v3455_v3  ;;  %12225 = vmatpush3.msra.mxu1 %v13100_v42  ;;  %v13109_v41 = vpop.permute.xlu1 %13108 }
 0x552   : > { %12226 = vmatprep.subr.mxu1 %v13101_v59  ;;  %v13110_v0 = vunpack.i.l.bf16 %v13109_v41  ;;  %v13111_v48 = vunpack.i.h.bf16 %v13109_v41 }
 0x553   : > { %v3459_v12 = vpop.permute.xlu0 %3458  ;;  %12227 = vmatpush3.msra.mxu1 %v13101_v59 }
 0x555   : > { %12213 = vmatpush3.bf16.xpose.msra.mxu0 %v3486_v13  ;;  %v13114_v24 = vpop.permute.xlu1 %13113 }
 0x556   : > { %12959 = vmatprep.subr.msk.bf16.mxu0 %vm1469_vm5, %v3463_v31  ;;  %v13115_v23 = vunpack.i.l.bf16 %v13114_v24  ;;  %v13116_v43 = vunpack.i.h.bf16 %v13114_v24 }
 0x557   : > { %v13104_v14 = vpop.permute.xlu0 %13103 }
 0x558   : > { %v13105_v28 = vunpack.i.l.bf16 %v13104_v14  ;;  %v13106_v50 = vunpack.i.h.bf16 %v13104_v14 }
 0x559   : > { %v13124_v1 = vpop.permute.xlu1 %13123 }
 0x55a   : > { %12228 = vmatprep.subr.mxu1 %v13105_v28  ;;  %v13125_v45 = vunpack.i.l.bf16 %v13124_v1  ;;  %v13126_v20 = vunpack.i.h.bf16 %v13124_v1 }
 0x55b   : > { %v13119_v40 = vpop.permute.xlu0 %13118  ;;  %12229 = vmatpush3.msra.mxu1 %v13105_v28 }
 0x55c   : > { %v13120_v10 = vunpack.i.l.bf16 %v13119_v40  ;;  %12230 = vmatprep.subr.mxu1 %v13106_v50  ;;  %v13121_v21 = vunpack.i.h.bf16 %v13119_v40 }
 0x55d   : > { %12215 = vmatpush3.bf16.xpose.msra.mxu0 %v3483_v49  ;;  %12231 = vmatpush3.msra.mxu1 %v13106_v50  ;;  %v13134_v18 = vpop.permute.xlu1 %13133 }
 0x55e   : > { %12232 = vmatprep.subr.mxu1 %v13110_v0  ;;  %12252 = vmatprep.subr.mxu0 %v13120_v10  ;;  %v13135_v6 = vunpack.i.l.bf16 %v13134_v18  ;;  %v13136_v58 = vunpack.i.h.bf16 %v13134_v18 }
 0x55f   : > { %v13129_v16 = vpop.permute.xlu0 %13128  ;;  %12233 = vmatpush3.msra.mxu1 %v13110_v0 }
 0x560   : > { %12234 = vmatprep.subr.mxu1 %v13111_v48  ;;  %v13130_v62 = vunpack.i.l.bf16 %v13129_v16  ;;  %v13131_v52 = vunpack.i.h.bf16 %v13129_v16 }
 0x561   : > { %12235 = vmatpush3.msra.mxu1 %v13111_v48 }
 0x562   : > { %12236 = vmatprep.subr.mxu1 %v13115_v23 }
 0x563   : > { %v15580_v53 = vpop.permute.xlu0 %13138  ;;  %12237 = vmatpush3.msra.mxu1 %v13115_v23 }
 0x564   : > { %v19368_v36 = vunpack.i.l.bf16 %v15580_v53  ;;  %12217 = vmatmul.mubr.msk.bf16.vlgmr.msra.gmra.mxu0 %vm1469_vm5, %v3457_v4  ;;  %12238 = vmatprep.subr.mxu1 %v13116_v43 }
 0x565   : > { %12220 = vmatprep.mubr.msk.bf16.mxu0 %vm1469_vm5, %v3459_v12  ;;  %12253 = vmatpush3.msra.mxu0 %v13120_v10 }
 0x566   : > { %12239 = vmatpush3.msra.mxu1 %v13116_v43  ;;  %12254 = vmatprep.subr.mxu0 %v13121_v21 }
 0x567   : > { %12255 = vmatpush3.msra.mxu0 %v13121_v21  ;;  %12280 = vmatprep.subr.mxu1 %v19368_v36 }
 0x568   : > { %12256 = vmatprep.subr.mxu0 %v13125_v45 }
 0x569   : > { %12257 = vmatpush3.msra.mxu0 %v13125_v45 }
 0x56a   : > { %12258 = vmatprep.subr.mxu0 %v13126_v20 }
 0x56b   : > { %12259 = vmatpush3.msra.mxu0 %v13126_v20 }
 0x56c   : > { %12221 = vmatmul.mubr.msk.bf16.gmra.mxu0 %vm1469_vm5, %v15569_v15  ;;  %12260 = vmatprep.subr.mxu0 %v13130_v62  ;;  %v19507_v15 = vmov 0.0  }
 0x56d   : > { %12261 = vmatpush3.msra.mxu0 %v13130_v62 }
 0x56e   : > { %12262 = vmatprep.subr.mxu0 %v13131_v52 }
 0x56f   : > { %12263 = vmatpush3.msra.mxu0 %v13131_v52 }
 0x570   : > { %12264 = vmatprep.subr.mxu0 %v13135_v6 }
 0x571   : > { %12265 = vmatpush3.msra.mxu0 %v13135_v6 }
 0x572   : > { %12266 = vmatprep.subr.mxu0 %v13136_v58 }
 0x573   : > { %12267 = vmatpush3.msra.mxu0 %v13136_v58 }
 0x57f   : > { %v12066_v31 = vpop.f32.mrf.mxu0 }
 0x580   : > { %vm2932_vm9 = vcmp.gt.f32.partialorder %v12066_v31, 0.5  ;;  %v2956_v14 = vmul.f32 0.25, %v12066_v31 }
 0x581   : > { %v2409_v7 = vpop.f32.mrf.mxu0  ;;  %v15603_v42 = vsel %vm2932_vm9, 1.0, %v19507_v15 }
 0x582   : > { %vm2931_vm10 = vcmp.gt.f32.partialorder %v2409_v7, 0.5  ;;  %19510 = vst [vmem:[#allocation11_spill] sm:$0xff] %v15603_v42  ;;  %v2964_v13 = vsub.f32 1.0, %v15603_v42  ;;  %v2955_v0 = vmul.f32 0.25, %v2409_v7 }
 0x583   : > { %v12069_v22 = vpop.f32.mrf.mxu0  ;;  %v15606_v3 = vsel %vm2931_vm10, 1.0, %v19507_v15 }
 0x584   : > { %vm2934_vm11 = vcmp.gt.f32.partialorder %v12069_v22, 0.5  ;;  %19511 = vst [vmem:[#allocation34_spill] sm:$0xff] %v15606_v3  ;;  %v2963_v28 = vsub.f32 1.0, %v15606_v3  ;;  %v2972_v49 = vmul.f32 %v2964_v13, %v2956_v14  ;;  %v2958_v48 = vmul.f32 0.25, %v12069_v22 }
 0x585   : > { %v15589_v30 = vpop.f32.mrf.mxu0  ;;  %v15610_v41 = vsel %vm2934_vm11, 1.0, %v19507_v15 }
 0x586   : > { %19506 = vst [vmem:[#allocation31_spill] sm:$0xff] %v15589_v30  ;;  %19512 = vst [vmem:[#allocation36_spill] sm:$0xff] %v15610_v41  ;;  %v2966_v10 = vsub.f32 1.0, %v15610_v41  ;;  %v2971_v23 = vmul.f32 %v2963_v28, %v2955_v0 }
 0x587   : > { %v12072_v4 = vpop.f32.mrf.mxu0 }
 0x588   : > { %vm2936_vm7 = vcmp.gt.f32.partialorder %v12072_v4, 0.5  ;;  %v2974_v45 = vmul.f32 %v2966_v10, %v2958_v48 }
 0x589   : > { %v15591_v19 = vpop.f32.mrf.mxu0  ;;  %v15595_v57 = vsel %vm2936_vm7, 1.0, %v19507_v15 }
 0x58a   : > { %vm2935_vm8 = vcmp.gt.f32.partialorder %v15591_v19, 0.5  ;;  %19508 = vst [vmem:[#allocation33_spill] sm:$0xff] %v15595_v57 }
 0x58b   : > { %v15598_v33 = vsel %vm2935_vm8, 1.0, %v19507_v15  ;;  %v12075_v59 = vpop.f32.mrf.mxu0 }
 0x58c   : > { %19509 = vst [vmem:[#allocation32_spill] sm:$0xff] %v15598_v33  ;;  %vm2938_vm15 = vcmp.gt.f32.partialorder %v12075_v59, 0.5  ;;  %v2962_v14 = vmul.f32 0.25, %v12075_v59 }
 0x58d   : > { %v15613_v50 = vpop.f32.mrf.mxu0 }
 0x58e   : > { %19513 = vst [vmem:[#allocation37_spill] sm:$0xff] %v15613_v50 }
 0x59f   : > { %v12122_v12 = vpop.f32.mrf.mxu1 }
 0x5a1   : > { %v2731_v40 = vpop.f32.mrf.mxu1 }
 0x5a3   : > { %v12125_v43 = vpop.f32.mrf.mxu1 }
 0x5a5   : > { %v15620_v58 = vpop.f32.mrf.mxu1 }
 0x5a6   : > { %19515 = vst [vmem:[#allocation35_spill] sm:$0xff] %v15620_v58 }
 0x5aa   : > { %v12094_v24 = vpop.f32.mrf.mxu0 }
 0x5ab   : > { %v2980_v16 = vadd.f32 %v12094_v24, %v2972_v49 }
 0x5ac   : > { %v2570_v1 = vpop.f32.mrf.mxu0 }
 0x5ad   : > { %vm2988_vm12 = vcmp.gt.f32.partialorder %v2980_v16, 0.5  ;;  %v2979_v21 = vadd.f32 %v2971_v23, %v2570_v1  ;;  %v3012_v18 = vmul.f32 0.25, %v2980_v16 }
 0x5ae   : > { %v15617_v20 = vsel %vm2988_vm12, 1.0, %v19507_v15  ;;  %v12097_v62 = vpop.f32.mrf.mxu0 }
 0x5af   : > { %19514 = vst [vmem:[#allocation40_spill] sm:$0xff] %v15617_v20  ;;  %v3020_v52 = vsub.f32 1.0, %v15617_v20  ;;  %vm2987_vm13 = vcmp.gt.f32.partialorder %v2979_v21, 0.5  ;;  %v2982_v6 = vadd.f32 %v12097_v62, %v2974_v45  ;;  %v3011_v7 = vmul.f32 0.25, %v2979_v21  ;;  %v15631_v0 = vpop.f32.mrf.mxu1 }
 0x5b0   : > { %v15623_v31 = vsel %vm2987_vm13, 1.0, %v19507_v15  ;;  %v2968_v21 = vsub.f32 1.0, %v15595_v57  ;;  %v2960_v62 = vmul.f32 0.25, %v12072_v4  ;;  %v2959_v4 = vmul.f32 0.25, %v15591_v19 }
 0x5b1   : > { %19516 = vst [vmem:[#allocation38_spill] sm:$0xff] %v15623_v31  ;;  %v3028_v22 = vmul.f32 %v3020_v52, %v3012_v18  ;;  %v3019_v13 = vsub.f32 1.0, %v15623_v31  ;;  %vm2990_vm14 = vcmp.gt.f32.partialorder %v2982_v6, 0.5  ;;  %v3014_v49 = vmul.f32 0.25, %v2982_v6  ;;  %v15634_v23 = vpop.f32.mrf.mxu1 }
 0x5b2   : > { %v15629_v28 = vsel %vm2990_vm14, 1.0, %v19507_v15  ;;  %v2967_v18 = vsub.f32 1.0, %v15598_v33  ;;  %v15639_v52 = vsel %vm2938_vm15, 1.0, %v19507_v15  ;;  %v15698_v33 = vld [vmem:[%s19298_s5 + $0x58] sm:$0xff] }
 0x5b3   : > { %19517 = vst [vmem:[#allocation42_spill] sm:$0xff] %v15629_v28  ;;  %v3027_v10 = vmul.f32 %v3019_v13, %v3011_v7  ;;  %v3022_v24 = vsub.f32 1.0, %v15629_v28  ;;  %v3036_v48 = vadd.f32 %v12122_v12, %v3028_v22  ;;  %19518 = vst [vmem:[#allocation41_spill] sm:$0xff] %v15639_v52  ;;  %v15647_v7 = vpop.f32.mrf.mxu0  ;;  %v2970_v13 = vsub.f32 1.0, %v15639_v52 }
 0x5b4   : > { %19521 = vst [vmem:[#allocation39_spill] sm:$0xff] %v15647_v7 }
 0x5b5   : > { %v3030_v16 = vmul.f32 %v3022_v24, %v3014_v49  ;;  %vm3044_vm1 = vcmp.gt.f32.partialorder %v3036_v48, 0.5  ;;  %v3035_v1 = vadd.f32 %v3027_v10, %v2731_v40  ;;  %v15649_v22 = vpop.f32.mrf.mxu1  ;;  %v2975_v24 = vmul.f32 %v2967_v18, %v2959_v4 }
 0x5b6   : > { %v15642_v6 = vsel %vm3044_vm1, 1.0, %v19507_v15  ;;  %v3068_v28 = vmul.f32 0.25, %v3036_v48  ;;  %v2978_v18 = vmul.f32 %v2970_v13, %v2962_v14  ;;  %vm4852_vm1 = vcmask 1043456  }
 0x5b7   : > { %v3038_v45 = vadd.f32 %v12125_v43, %v3030_v16  ;;  %vm3043_vm2 = vcmp.gt.f32.partialorder %v3035_v1, 0.5  ;;  %19519 = vst [vmem:[#allocation45_spill] sm:$0xff] %v15642_v6  ;;  %v2976_v43 = vmul.f32 %v2968_v21, %v2960_v62  ;;  %v3076_v16 = vsub.f32 1.0, %v15642_v6  ;;  %v15656_v9 = vpop.f32.mrf.mxu1  ;;  %v15664_v21 = vld [vmem:[%s19298_s5 + $0x50] sm:$0xff] }
 0x5b8   : > { %v15645_v12 = vsel %vm3043_vm2, 1.0, %v19507_v15  ;;  %19522 = vst [vmem:[#allocation43_spill] sm:$0xff] %v15656_v9 }
 0x5b9   : > { %19520 = vst [vmem:[#allocation44_spill] sm:$0xff] %v15645_v12  ;;  %vm3046_vm3 = vcmp.gt.f32.partialorder %v3038_v45, 0.5  ;;  %v3075_v31 = vsub.f32 1.0, %v15645_v12 }
 0x5ba   : > { %v15667_v4 = vsel %vm3046_vm3, 1.0, %v19507_v15 }
 0x5bb   : > { %v12100_v10 = vpop.f32.mrf.mxu0  ;;  %19524 = vst [vmem:[#allocation47_spill] sm:$0xff] %v15667_v4 }
 0x5bc   : > { %v2984_v49 = vadd.f32 %v12100_v10, %v2976_v43  ;;  %v3084_v43 = vmul.f32 %v3076_v16, %v3068_v28  ;;  %v3067_v10 = vmul.f32 0.25, %v3035_v1  ;;  %v3078_v28 = vsub.f32 1.0, %v15667_v4 }
 0x5bd   : > { %v2590_v36 = vpop.f32.mrf.mxu0 }
 0x5be   : > { %vm2992_vm4 = vcmp.gt.f32.partialorder %v2984_v49, 0.5  ;;  %v2983_v58 = vadd.f32 %v2975_v24, %v2590_v36  ;;  %v3016_v1 = vmul.f32 0.25, %v2984_v49 }
 0x5bf   : > { %v15659_v40 = vsel %vm2992_vm4, 1.0, %v19507_v15  ;;  %v12170_v19 = vpop.f32.mrf.mxu1  ;;  %v12103_v62 = vpop.f32.mrf.mxu0 }
 0x5c0   : > { %19523 = vst [vmem:[#allocation46_spill] sm:$0xff] %v15659_v40  ;;  %vm2991_vm7 = vcmp.gt.f32.partialorder %v2983_v58, 0.5  ;;  %v3561_v59 = vmul.f32 0.35355338, %v12170_v19  ;;  %v3024_v36 = vsub.f32 1.0, %v15659_v40  ;;  %v2986_v24 = vadd.f32 %v12103_v62, %v2978_v18  ;;  %v15686_v62 = vld [vmem:[%s19298_s5 + $0x40] sm:$0xff] }
 0x5c1   : > { %v15671_v48 = vsel %vm2991_vm7, 1.0, %v19507_v15  ;;  %v3213_v9 = vpop.f32.mrf.mxu1  ;;  %v15673_v6 = vpop.f32.mrf.mxu0  ;;  %v3015_v16 = vmul.f32 0.25, %v2983_v58  ;;  %v3083_v58 = vmul.f32 %v3075_v31, %v3067_v10  ;;  %v15705_v31 = vld [vmem:[%s19298_s5 + $0x48] sm:$0xff] }
 0x5c2   : > { %19525 = vst [vmem:[#allocation48_spill] sm:$0xff] %v15671_v48  ;;  %19526 = vst [vmem:[#allocation49_spill] sm:$0xff] %v15673_v6  ;;  %v3023_v14 = vsub.f32 1.0, %v15671_v48  ;;  %v15680_v19 = vadd.f32 %v15664_v21, %v3561_v59  ;;  %vm2994_vm8 = vcmp.gt.f32.partialorder %v2986_v24, 0.5  ;;  %v3559_v20 = vmul.f32 0.35355338, %v3213_v9 }
 0x5c3   : > { %v12171_v18 = vpop.f32.mrf.mxu1  ;;  %v12150_v12 = vpop.f32.mrf.mxu0  ;;  %v15689_v6 = vsel %vm2994_vm8, 1.0, %v19507_v15  ;;  %v3070_v48 = vmul.f32 0.25, %v3038_v45  ;;  %v3032_v59 = vmul.f32 %v3024_v36, %v3016_v1 }
 0x5c4   : > { %19527 = vst [vmem:[#allocation50_spill] sm:$0xff] %v15689_v6  ;;  %v3092_v13 = vadd.f32 %v12150_v12, %v3084_v43  ;;  %v3031_v40 = vmul.f32 %v3023_v14, %v3015_v16  ;;  %v3562_v52 = vmul.f32 0.35355338, %v12171_v18  ;;  %v3026_v9 = vsub.f32 1.0, %v15689_v6 }
 0x5c5   : > { %v3216_v4 = vpop.f32.mrf.mxu1  ;;  %v2892_v49 = vpop.f32.mrf.mxu0  ;;  %v15693_v7 = vadd.f32 %v15686_v62, %v3559_v20  ;;  %v3638_v12 = vsel %vm1934_vm6, %v15680_v19, -inf  ;;  %v3086_v45 = vmul.f32 %v3078_v28, %v3070_v48  ;;  %v3018_v43 = vmul.f32 0.25, %v2986_v24 }
 0x5c6   : > { %3639 = vmax.xlane.f32.xlu0 %v3638_v12  ;;  %vm3100_vm9 = vcmp.gt.f32.partialorder %v3092_v13, 0.5  ;;  %v3560_v20 = vmul.f32 0.35355338, %v3216_v4  ;;  %v3091_v10 = vadd.f32 %v3083_v58, %v2892_v49  ;;  %v15710_v1 = vadd.f32 %v15698_v33, %v3562_v52  ;;  %v15743_v12 = vld [vmem:[%s19298_s5 + $0x70] sm:$0xff] }
 0x5c7   : > { %v12153_v36 = vpop.f32.mrf.mxu0  ;;  %v3040_v16 = vadd.f32 %v15631_v0, %v3032_v59  ;;  %v3039_v48 = vadd.f32 %v3031_v40, %v15634_v23  ;;  %v3034_v24 = vmul.f32 %v3026_v9, %v3018_v43  ;;  %v3632_v28 = vsel %vm1934_vm6, %v15693_v7, -inf }
 0x5c8   : > { %v15707_v14 = vadd.f32 %v12153_v36, %v3086_v45  ;;  %vm3099_vm10 = vcmp.gt.f32.partialorder %v3091_v10, 0.5  ;;  %v15717_v18 = vadd.f32 %v15705_v31, %v3560_v20  ;;  %v15720_v4 = vsel %vm3100_vm9, 1.0, %v19507_v15  ;;  %v15748_v36 = vld [vmem:[%s19298_s5 + $0x60] sm:$0xff] }
 0x5c9   : > { %19529 = vst [vmem:[#allocation52_spill] sm:$0xff] %v15720_v4  ;;  %v15723_v13 = vsel %vm3099_vm10, 1.0, %v19507_v15  ;;  %vm3048_vm11 = vcmp.gt.f32.partialorder %v3040_v16, 0.5  ;;  %vm3047_vm12 = vcmp.gt.f32.partialorder %v3039_v48, 0.5  ;;  %v3641_v52 = vsel %vm1934_vm6, %v15710_v1, -inf }
 0x5ca   : > { %19528 = vst [vmem:[#allocation51_spill] sm:$0xff] %v15707_v14  ;;  %19530 = vst [vmem:[#allocation53_spill] sm:$0xff] %v15723_v13  ;;  %3633 = vmax.xlane.f32.xlu0 %v3632_v28  ;;  %v3635_v23 = vsel %vm1934_vm6, %v15717_v18, -inf  ;;  %v15732_v40 = vsel %vm3048_vm11, 1.0, %v19507_v15  ;;  %v15735_v59 = vsel %vm3047_vm12, 1.0, %v19507_v15  ;;  %v3042_v49 = vadd.f32 %v15649_v22, %v3034_v24  ;;  %v15756_v24 = vld [vmem:[%s19298_s5 + $0x78] sm:$0xff]  ;;  %v15776_v13 = vpop.f32.mrf.mxu0 }
 0x5cb   : > { %3636 = vmax.xlane.f32.xlu1 %v3635_v23  ;;  %19531 = vst [vmem:[#allocation54_spill] sm:$0xff] %v15732_v40  ;;  %19532 = vst [vmem:[#allocation55_spill] sm:$0xff] %v15735_v59  ;;  %v3079_v14 = vsub.f32 1.0, %v15735_v59 }
 0x5cc   : > { %vm3050_vm13 = vcmp.gt.f32.partialorder %v3042_v49, 0.5  ;;  %19534 = vst [vmem:[#allocation57_spill] sm:$0xff] %v15776_v13  ;;  %v3074_v50 = vmul.f32 0.25, %v3042_v49 }
 0x5ce   : > { %3642 = vmax.xlane.f32.xlu0 %v3641_v52 }
 0x5f1   : > { %v12174_v9 = vpop.f32.mrf.mxu1 }
 0x5f2   : > { %v3565_v45 = vmul.f32 0.35355338, %v12174_v9 }
 0x5f3   : > { %v3229_v43 = vpop.f32.mrf.mxu1 }
 0x5f4   : > { %v15751_v20 = vadd.f32 %v15743_v12, %v3565_v45  ;;  %v3563_v22 = vmul.f32 0.35355338, %v3229_v43  ;;  %v3080_v45 = vsub.f32 1.0, %v15732_v40  ;;  %v15767_v43 = vld [vmem:[%s19298_s5 + $0x68] sm:$0xff] }
 0x5f5   : > { %v12175_v10 = vpop.f32.mrf.mxu1 }
 0x5f6   : > { %v15759_v28 = vadd.f32 %v15748_v36, %v3563_v22  ;;  %v3566_v23 = vmul.f32 0.35355338, %v12175_v10  ;;  %v3650_v52 = vsel %vm1934_vm6, %v15751_v20, -inf  ;;  %v15773_v22 = vsel %vm3050_vm13, 1.0, %v19507_v15 }
 0x5f7   : > { %3651 = vmax.xlane.f32.xlu1 %v3650_v52  ;;  %v3232_v9 = vpop.f32.mrf.mxu1  ;;  %19533 = vst [vmem:[#allocation56_spill] sm:$0xff] %v15773_v22  ;;  %v3072_v10 = vmul.f32 0.25, %v3040_v16  ;;  %v3082_v6 = vsub.f32 1.0, %v15773_v22 }
 0x5f8   : > { %v15770_v0 = vadd.f32 %v15756_v24, %v3566_v23  ;;  %v3564_v58 = vmul.f32 0.35355338, %v3232_v9  ;;  %v3644_v52 = vsel %vm1934_vm6, %v15759_v28, -inf  ;;  %v3071_v9 = vmul.f32 0.25, %v3039_v48 }
 0x5f9   : > { %v3088_v23 = vmul.f32 %v3080_v45, %v3072_v10  ;;  %v3090_v3 = vmul.f32 %v3082_v6, %v3074_v50 }
 0x5fa   : > { %v3653_v4 = vsel %vm1934_vm6, %v15770_v0, -inf  ;;  %v15783_v40 = vadd.f32 %v15767_v43, %v3564_v58  ;;  %v3087_v59 = vmul.f32 %v3079_v14, %v3071_v9 }
 0x5fb   : > { %3645 = vmax.xlane.f32.xlu1 %v3644_v52  ;;  %3654 = vmax.xlane.f32.xlu0 %v3653_v4 }
 0x5fc   : > { %v12156_v16 = vpop.f32.mrf.mxu0  ;;  %v3647_v41 = vsel %vm1934_vm6, %v15783_v40, -inf }
 0x5fd   : > { %v3096_v57 = vadd.f32 %v12156_v16, %v3088_v23 }
 0x5fe   : > { %v2912_v13 = vpop.f32.mrf.mxu0 }
 0x5ff   : > { %vm3104_vm14 = vcmp.gt.f32.partialorder %v3096_v57, 0.5  ;;  %v3095_v42 = vadd.f32 %v3087_v59, %v2912_v13  ;;  %3648 = vmax.xlane.f32.xlu0 %v3647_v41 }
 0x600   : > { %v12159_v58 = vpop.f32.mrf.mxu0  ;;  %v15791_v48 = vsel %vm3104_vm14, 1.0, %v19507_v15 }
 0x601   : > { %vm3103_vm15 = vcmp.gt.f32.partialorder %v3095_v42, 0.5  ;;  %v15788_v52 = vadd.f32 %v12159_v58, %v3090_v3  ;;  %19536 = vst [vmem:[#allocation59_spill] sm:$0xff] %v15791_v48 }
 0x602   : > { %v15794_v4 = vsel %vm3103_vm15, 1.0, %v19507_v15  ;;  %v15796_v14 = vpop.f32.mrf.mxu0 }
 0x603   : > { %19535 = vst [vmem:[#allocation58_spill] sm:$0xff] %v15788_v52  ;;  %19537 = vst [vmem:[#allocation60_spill] sm:$0xff] %v15794_v4 }
 0x604   : > { %19538 = vst [vmem:[#allocation61_spill] sm:$0xff] %v15796_v14  ;;  %v12186_v45 = vpop.f32.mrf.mxu0 }
 0x605   : > { %v3569_v6 = vmul.f32 0.35355338, %v12186_v45 }
 0x606   : > { %v3318_v13 = vpop.f32.mrf.mxu0 }
 0x608   : > { %v12202_v57 = vpop.f32.mrf.mxu1  ;;  %v12187_v10 = vpop.f32.mrf.mxu0 }
 0x609   : > { %v3577_v41 = vmul.f32 0.35355338, %v12202_v57  ;;  %v3570_v52 = vmul.f32 0.35355338, %v12187_v10 }
 0x60a   : > { %v3423_v50 = vpop.f32.mrf.mxu1  ;;  %v3321_v4 = vpop.f32.mrf.mxu0 }
 0x60b   : > { %v15801_v42 = vadd.f32 %v15664_v21, %v3577_v41  ;;  %v3575_v3 = vmul.f32 0.35355338, %v3423_v50  ;;  %v15812_v41 = vadd.f32 %v15664_v21, %v3569_v6  ;;  %v3567_v50 = vmul.f32 0.35355338, %v3318_v13 }
 0x60c   : > { %v12203_v59 = vpop.f32.mrf.mxu1  ;;  %v3568_v6 = vmul.f32 0.35355338, %v3321_v4  ;;  %v15825_v13 = vadd.f32 %v15698_v33, %v3570_v52  ;;  %v12190_v10 = vpop.f32.mrf.mxu0 }
 0x60d   : > { %v15804_v23 = vadd.f32 %v15686_v62, %v3575_v3  ;;  %v3578_v9 = vmul.f32 0.35355338, %v12203_v59  ;;  %v3686_v16 = vsel %vm1934_vm6, %v15801_v42, -inf  ;;  %v3662_v22 = vsel %vm1934_vm6, %v15812_v41, -inf }
 0x60e   : > { %3687 = vmax.xlane.f32.xlu1 %v3686_v16  ;;  %v3426_v58 = vpop.f32.mrf.mxu1  ;;  %v3334_v4 = vpop.f32.mrf.mxu0  ;;  %v3665_v15 = vsel %vm1934_vm6, %v15825_v13, -inf }
 0x60f   : > { %v15809_v49 = vadd.f32 %v15698_v33, %v3578_v9  ;;  %v3576_v57 = vmul.f32 0.35355338, %v3426_v58  ;;  %v3680_v3 = vsel %vm1934_vm6, %v15804_v23, -inf  ;;  %v15822_v58 = vadd.f32 %v15686_v62, %v3567_v50 }
 0x610   : > { %v12206_v45 = vpop.f32.mrf.mxu1  ;;  %v15834_v50 = vadd.f32 %v15705_v31, %v3568_v6  ;;  %v12191_v56 = vpop.f32.mrf.mxu0 }
 0x611   : > { %v3689_v59 = vsel %vm1934_vm6, %v15809_v49, -inf  ;;  %v15819_v16 = vadd.f32 %v15705_v31, %v3576_v57  ;;  %v3581_v48 = vmul.f32 0.35355338, %v12206_v45 }
 0x612   : > { %3681 = vmax.xlane.f32.xlu1 %v3680_v3  ;;  %3690 = vmax.xlane.f32.xlu0 %v3689_v59  ;;  %v3439_v9 = vpop.f32.mrf.mxu1  ;;  %v3656_v3 = vsel %vm1934_vm6, %v15822_v58, -inf }
 0x613   : > { %v3683_v14 = vsel %vm1934_vm6, %v15819_v16, -inf  ;;  %v15837_v52 = vadd.f32 %v15743_v12, %v3581_v48  ;;  %v3579_v45 = vmul.f32 0.35355338, %v3439_v9 }
 0x614   : > { %v12207_v57 = vpop.f32.mrf.mxu1 }
 0x615   : > { %v3582_v59 = vmul.f32 0.35355338, %v12207_v57  ;;  %v15844_v6 = vadd.f32 %v15748_v36, %v3579_v45  ;;  %v3698_v9 = vsel %vm1934_vm6, %v15837_v52, -inf }
 0x616   : > { %3684 = vmax.xlane.f32.xlu0 %v3683_v14  ;;  %3663 = vmax.xlane.f32.xlu1 %v3662_v22  ;;  %v3442_v30 = vpop.f32.mrf.mxu1  ;;  %v3573_v14 = vmul.f32 0.35355338, %v12190_v10  ;;  %v3659_v22 = vsel %vm1934_vm6, %v15834_v50, -inf  ;;  %v3574_v10 = vmul.f32 0.35355338, %v12191_v56 }
 0x617   : > { %v15847_v47 = vadd.f32 %v15756_v24, %v3582_v59  ;;  %v3580_v48 = vmul.f32 0.35355338, %v3442_v30  ;;  %v3692_v27 = vsel %vm1934_vm6, %v15844_v6, -inf }
 0x618   : > { %v15852_v57 = vadd.f32 %v15743_v12, %v3573_v14 }
 0x619   : > { %v3701_v45 = vsel %vm1934_vm6, %v15847_v47, -inf  ;;  %v15859_v59 = vadd.f32 %v15767_v43, %v3580_v48 }
 0x61a   : > { %3657 = vmax.xlane.f32.xlu1 %v3656_v3  ;;  %3666 = vmax.xlane.f32.xlu0 %v3665_v15  ;;  %v3571_v15 = vmul.f32 0.35355338, %v3334_v4  ;;  %v3337_v3 = vpop.f32.mrf.mxu0  ;;  %v3674_v14 = vsel %vm1934_vm6, %v15852_v57, -inf  ;;  %v15864_v4 = vadd.f32 %v15756_v24, %v3574_v10 }
 0x61b   : > { %v3572_v30 = vmul.f32 0.35355338, %v3337_v3 }
 0x61c   : > { %v15869_v25 = vadd.f32 %v15748_v36, %v3571_v15  ;;  %v3677_v46 = vsel %vm1934_vm6, %v15864_v4, -inf }
 0x61d   : > { %v15872_v3 = vadd.f32 %v15767_v43, %v3572_v30 }
 0x61e   : > { %3699 = vmax.xlane.f32.xlu1 %v3698_v9  ;;  %3660 = vmax.xlane.f32.xlu0 %v3659_v22  ;;  %v3695_v22 = vsel %vm1934_vm6, %v15859_v59, -inf }
 0x622   : > { %3693 = vmax.xlane.f32.xlu1 %v3692_v27  ;;  %3702 = vmax.xlane.f32.xlu0 %v3701_v45 }
 0x624   : > { %v12218_v9 = vpop.f32.mrf.mxu0 }
 0x625   : > { %v3585_v56 = vmul.f32 0.35355338, %v12218_v9  ;;  %v3668_v9 = vsel %vm1934_vm6, %v15869_v25, -inf }
 0x626   : > { %v3528_v38 = vpop.f32.mrf.mxu0  ;;  %3696 = vmax.xlane.f32.xlu0 %v3695_v22  ;;  %3675 = vmax.xlane.f32.xlu1 %v3674_v14 }
 0x627   : > { %v3583_v27 = vmul.f32 0.35355338, %v3528_v38  ;;  %v15875_v45 = vadd.f32 %v15664_v21, %v3585_v56  ;;  %v3671_v38 = vsel %vm1934_vm6, %v15872_v3, -inf }
 0x628   : > { %v12219_v48 = vpop.f32.mrf.mxu0 }
 0x629   : > { %v3586_v10 = vmul.f32 0.35355338, %v12219_v48  ;;  %v15884_v30 = vadd.f32 %v15686_v62, %v3583_v27  ;;  %v3710_v48 = vsel %vm1934_vm6, %v15875_v45, -inf }
 0x62a   : > { %v3531_v15 = vpop.f32.mrf.mxu0  ;;  %3669 = vmax.xlane.f32.xlu1 %v3668_v9  ;;  %3678 = vmax.xlane.f32.xlu0 %v3677_v46 }
 0x62b   : > { %v15887_v21 = vadd.f32 %v15698_v33, %v3586_v10  ;;  %v3584_v14 = vmul.f32 0.35355338, %v3531_v15  ;;  %v3704_v46 = vsel %vm1934_vm6, %v15884_v30, -inf }
 0x62c   : > { %v12222_v22 = vpop.f32.mrf.mxu0 }
 0x62d   : > { %v3589_v56 = vmul.f32 0.35355338, %v12222_v22  ;;  %v3713_v62 = vsel %vm1934_vm6, %v15887_v21, -inf  ;;  %v15899_v33 = vadd.f32 %v15705_v31, %v3584_v14  ;;  %v19539_v31 = vld [vmem:[#allocation21_spill] sm:$0xff] }
 0x62e   : > { %v3544_v2 = vpop.f32.mrf.mxu0  ;;  %3672 = vmax.xlane.f32.xlu0 %v3671_v38  ;;  %3711 = vmax.xlane.f32.xlu1 %v3710_v48  ;;  %v19542_v38 = vld [vmem:[#allocation25_spill] sm:$0xff]  ;;  %v19543_v48 = vld [vmem:[#allocation26_spill] sm:$0xff] }
 0x62f   : > { %v15894_v9 = vadd.f32 %v15743_v12, %v3589_v56  ;;  %v3587_v37 = vmul.f32 0.35355338, %v3544_v2  ;;  %v3707_v10 = vsel %vm1934_vm6, %v15899_v33, -inf  ;;  %v19540_v12 = vld [vmem:[#allocation23_spill] sm:$0xff] }
 0x631   : > { %v15902_v27 = vadd.f32 %v15748_v36, %v3587_v37  ;;  %v3722_v15 = vsel %vm1934_vm6, %v15894_v9, -inf  ;;  %v15914_v37 = vpop.permute.xlu0 %13148  ;;  %v19541_v36 = vld [vmem:[#allocation22_spill] sm:$0xff] }
 0x632   : > { %3705 = vmax.xlane.f32.xlu1 %v3704_v46  ;;  %3714 = vmax.xlane.f32.xlu0 %v3713_v62 }
 0x633   : > { %v3716_v2 = vsel %vm1934_vm6, %v15902_v27, -inf }
 0x636   : > { %3708 = vmax.xlane.f32.xlu0 %v3707_v10  ;;  %3723 = vmax.xlane.f32.xlu1 %v3722_v15  ;;  %v19544_v10 = vld [vmem:[#allocation14_spill] sm:$0xff] }
 0x63a   : > { %3717 = vmax.xlane.f32.xlu1 %v3716_v2  ;;  %v15926_v2 = vpop.permute.xlu1 %13143 }
 0x64b   : > { %13153 = vrot.lane.b32.xlu1 %v19539_v31, %s13974_s27 }
 0x64c   : > { %4457 = vrot.lane.b32.xlu0 %v19540_v12, %s13974_s27 }
 0x64f   : > { %v3640_v22 = vpop.xlane.xlu0 %3639 }
 0x650   : > { %4455 = vrot.lane.b32.xlu0 %v19541_v36, %s13974_s27  ;;  %v3730_v14 = vsub.f32 %v15680_v19, %v3640_v22 }
 0x652   : > { %v3764_v46 = vmul.f32 1.442695, %v3730_v14 }
 0x653   : > { %v3634_v56 = vpop.xlane.xlu0 %3633 }
 0x654   : > { %4453 = vrot.lane.b32.xlu0 %v19542_v38, %s13974_s27  ;;  %v3728_v62 = vsub.f32 %v15693_v7, %v3634_v56  ;;  %13481 = vpow2.f32 %v3764_v46  ;;  %v3637_v19 = vpop.xlane.xlu1 %3636  ;;  %v12223_v56 = vpop.f32.mrf.mxu0 }
 0x655   : > { %v3729_v22 = vsub.f32 %v15717_v18, %v3637_v19  ;;  %v3590_v46 = vmul.f32 0.35355338, %v12223_v56 }
 0x656   : > { %v3760_v15 = vmul.f32 1.442695, %v3728_v62 }
 0x657   : > { %v3643_v36 = vpop.xlane.xlu0 %3642  ;;  %v3762_v62 = vmul.f32 1.442695, %v3729_v22 }
 0x658   : > { %4451 = vrot.lane.b32.xlu0 %v19543_v48, %s13974_s27  ;;  %13483 = vpow2.f32 %v3760_v15  ;;  %v3731_v38 = vsub.f32 %v15710_v1, %v3643_v36  ;;  %v3547_v1 = vpop.f32.mrf.mxu0  ;;  %v15939_v36 = vadd.f32 %v15756_v24, %v3590_v46 }
 0x659   : > { %v3588_v18 = vmul.f32 0.35355338, %v3547_v1 }
 0x65a   : > { %v3766_v48 = vmul.f32 1.442695, %v3731_v38  ;;  %v3725_v38 = vsel %vm1934_vm6, %v15939_v36, -inf }
 0x65b   : > { %v15944_v19 = vadd.f32 %v15767_v43, %v3588_v18 }
 0x65c   : > { %4449 = vrot.lane.b32.xlu0 %v19544_v10, %s13974_s27  ;;  %13485 = vpow2.f32 %v3766_v48 }
 0x65d   : > { %13487 = vpow2.f32 %v3762_v62  ;;  %v3719_v48 = vsel %vm1934_vm6, %v15944_v19, -inf }
 0x661   : > { %v15929_v31 = vpop.eup %13481 }
 0x662   : > { %v3830_v7 = vsel %vm1934_vm6, %v15929_v31, 0.0 }
 0x665   : > { %v15934_v14 = vpop.eup %13483 }
 0x666   : > { %v3824_v15 = vsel %vm1934_vm6, %v15934_v14, 0.0 }
 0x669   : > { %v15948_v22 = vpop.eup %13485 }
 0x66a   : > { %v3833_v24 = vsel %vm1934_vm6, %v15948_v22, 0.0  ;;  %v15953_v46 = vpop.eup %13487 }
 0x66f   : > { %3831 = vadd.xlane.f32.xlu1 %v3830_v7 }
 0x673   : > { %3825 = vadd.xlane.f32.xlu1 %v3824_v15 }
 0x67b   : > { %3726 = vmax.xlane.f32.xlu0 %v3725_v38  ;;  %v3827_v38 = vsel %vm1934_vm6, %v15953_v46, 0.0 }
 0x67f   : > { %3720 = vmax.xlane.f32.xlu0 %v3719_v48 }
 0x680   : > { %v3652_v7 = vpop.xlane.xlu1 %3651 }
 0x681   : > { %v3734_v56 = vsub.f32 %v15751_v20, %v3652_v7 }
 0x683   : > { %v3772_v62 = vmul.f32 1.442695, %v3734_v56  ;;  %3834 = vadd.xlane.f32.xlu0 %v3833_v24 }
 0x684   : > { %v3646_v15 = vpop.xlane.xlu1 %3645  ;;  %v3655_v43 = vpop.xlane.xlu0 %3654 }
 0x685   : > { %13489 = vpow2.f32 %v3772_v62  ;;  %v3732_v1 = vsub.f32 %v15759_v28, %v3646_v15  ;;  %v3735_v18 = vsub.f32 %v15770_v0, %v3655_v43 }
 0x687   : > { %v3768_v48 = vmul.f32 1.442695, %v3732_v1  ;;  %v3774_v10 = vmul.f32 1.442695, %v3735_v18  ;;  %3828 = vadd.xlane.f32.xlu0 %v3827_v38 }
 0x688   : > { %v3649_v20 = vpop.xlane.xlu0 %3648 }
 0x689   : > { %13491 = vpow2.f32 %v3768_v48  ;;  %v3733_v7 = vsub.f32 %v15783_v40, %v3649_v20 }
 0x68a   : > { %13493 = vpow2.f32 %v3774_v10 }
 0x68b   : > { %v3770_v56 = vmul.f32 1.442695, %v3733_v7 }
 0x68d   : > { %13495 = vpow2.f32 %v3770_v56 }
 0x692   : > { %v15960_v24 = vpop.eup %13489 }
 0x693   : > { %v3842_v28 = vsel %vm1934_vm6, %v15960_v24, 0.0 }
 0x694   : > { %3843 = vadd.xlane.f32.xlu1 %v3842_v28 }
 0x696   : > { %v15964_v0 = vpop.eup %13491 }
 0x697   : > { %v15966_v62 = vpop.eup %13493  ;;  %v3688_v15 = vpop.xlane.xlu1 %3687  ;;  %v3836_v43 = vsel %vm1934_vm6, %v15964_v0, 0.0 }
 0x698   : > { %v3746_v1 = vsub.f32 %v15801_v42, %v3688_v15  ;;  %3837 = vadd.xlane.f32.xlu1 %v3836_v43  ;;  %v3845_v40 = vsel %vm1934_vm6, %v15966_v62, 0.0 }
 0x699   : > { %3846 = vadd.xlane.f32.xlu0 %v3845_v40 }
 0x69a   : > { %v15973_v10 = vpop.eup %13495  ;;  %v3796_v18 = vmul.f32 1.442695, %v3746_v1 }
 0x69b   : > { %v3682_v38 = vpop.xlane.xlu1 %3681  ;;  %v3691_v48 = vpop.xlane.xlu0 %3690  ;;  %v3839_v20 = vsel %vm1934_vm6, %v15973_v10, 0.0 }
 0x69c   : > { %13497 = vpow2.f32 %v3796_v18  ;;  %v3744_v7 = vsub.f32 %v15804_v23, %v3682_v38  ;;  %v3747_v56 = vsub.f32 %v15809_v49, %v3691_v48 }
 0x69d   : > { %3840 = vadd.xlane.f32.xlu0 %v3839_v20 }
 0x69e   : > { %v3792_v42 = vmul.f32 1.442695, %v3744_v7  ;;  %v3798_v28 = vmul.f32 1.442695, %v3747_v56 }
 0x69f   : > { %v3685_v15 = vpop.xlane.xlu0 %3684  ;;  %v3664_v43 = vpop.xlane.xlu1 %3663 }
 0x6a0   : > { %13499 = vpow2.f32 %v3792_v42  ;;  %v3745_v40 = vsub.f32 %v15819_v16, %v3685_v15  ;;  %v3738_v1 = vsub.f32 %v15812_v41, %v3664_v43 }
 0x6a1   : > { %13501 = vpow2.f32 %v3798_v28 }
 0x6a2   : > { %v3780_v12 = vmul.f32 1.442695, %v3738_v1  ;;  %v3794_v44 = vmul.f32 1.442695, %v3745_v40 }
 0x6a3   : > { %v3658_v17 = vpop.xlane.xlu1 %3657  ;;  %v3667_v63 = vpop.xlane.xlu0 %3666 }
 0x6a4   : > { %v3736_v18 = vsub.f32 %v15822_v58, %v3658_v17  ;;  %13503 = vpow2.f32 %v3780_v12  ;;  %v3739_v49 = vsub.f32 %v15825_v13, %v3667_v63 }
 0x6a5   : > { %13505 = vpow2.f32 %v3794_v44 }
 0x6a6   : > { %v3776_v23 = vmul.f32 1.442695, %v3736_v18  ;;  %v3782_v41 = vmul.f32 1.442695, %v3739_v49 }
 0x6a7   : > { %v3700_v38 = vpop.xlane.xlu1 %3699  ;;  %v3661_v48 = vpop.xlane.xlu0 %3660 }
 0x6a8   : > { %13507 = vpow2.f32 %v3776_v23  ;;  %v3750_v20 = vsub.f32 %v15837_v52, %v3700_v38  ;;  %v3737_v58 = vsub.f32 %v15834_v50, %v3661_v48 }
 0x6a9   : > { %v15984_v16 = vpop.eup %13497 }
 0x6aa   : > { %v3804_v7 = vmul.f32 1.442695, %v3750_v20  ;;  %v3878_v56 = vsel %vm1934_vm6, %v15984_v16, 0.0 }
 0x6ab   : > { %v3694_v42 = vpop.xlane.xlu1 %3693  ;;  %v3703_v28 = vpop.xlane.xlu0 %3702  ;;  %3879 = vadd.xlane.f32.xlu0 %v3878_v56 }
 0x6ac   : > { %13509 = vpow2.f32 %v3804_v7  ;;  %v3748_v17 = vsub.f32 %v15844_v6, %v3694_v42  ;;  %v3751_v63 = vsub.f32 %v15847_v47, %v3703_v28  ;;  %v3778_v6 = vmul.f32 1.442695, %v3737_v58 }
 0x6ad   : > { %v15990_v44 = vpop.eup %13499  ;;  %13511 = vpow2.f32 %v3782_v41 }
 0x6ae   : > { %v15993_v13 = vpop.eup %13501  ;;  %v3800_v52 = vmul.f32 1.442695, %v3748_v17  ;;  %v3806_v12 = vmul.f32 1.442695, %v3751_v63  ;;  %v3872_v15 = vsel %vm1934_vm6, %v15990_v44, 0.0 }
 0x6af   : > { %v3697_v43 = vpop.xlane.xlu0 %3696  ;;  %v3676_v40 = vpop.xlane.xlu1 %3675  ;;  %v3881_v1 = vsel %vm1934_vm6, %v15993_v13, 0.0  ;;  %3873 = vadd.xlane.f32.xlu0 %v3872_v15 }
 0x6b0   : > { %v3749_v47 = vsub.f32 %v15859_v59, %v3697_v43  ;;  %3882 = vadd.xlane.f32.xlu1 %v3881_v1  ;;  %13513 = vpow2.f32 %v3806_v12  ;;  %v3742_v23 = vsub.f32 %v15852_v57, %v3676_v40 }
 0x6b1   : > { %v16000_v50 = vpop.eup %13503  ;;  %13515 = vpow2.f32 %v3800_v52 }
 0x6b2   : > { %v3802_v18 = vmul.f32 1.442695, %v3749_v47  ;;  %v3854_v48 = vsel %vm1934_vm6, %v16000_v50, 0.0  ;;  %v16005_v20 = vpop.eup %13505  ;;  %v3788_v7 = vmul.f32 1.442695, %v3742_v23 }
 0x6b3   : > { %v3670_v49 = vpop.xlane.xlu1 %3669  ;;  %v3679_v38 = vpop.xlane.xlu0 %3678  ;;  %v3875_v63 = vsel %vm1934_vm6, %v16005_v20, 0.0 }
 0x6b4   : > { %13517 = vpow2.f32 %v3802_v18  ;;  %v3743_v41 = vsub.f32 %v15864_v4, %v3679_v38  ;;  %3855 = vadd.xlane.f32.xlu1 %v3854_v48  ;;  %v3740_v56 = vsub.f32 %v15869_v25, %v3670_v49 }
 0x6b5   : > { %v16008_v59 = vpop.eup %13507  ;;  %13519 = vpow2.f32 %v3778_v6 }
 0x6b6   : > { %v3790_v42 = vmul.f32 1.442695, %v3743_v41  ;;  %v3848_v57 = vsel %vm1934_vm6, %v16008_v59, 0.0  ;;  %v3784_v52 = vmul.f32 1.442695, %v3740_v56 }
 0x6b7   : > { %v3673_v28 = vpop.xlane.xlu0 %3672  ;;  %v3712_v17 = vpop.xlane.xlu1 %3711  ;;  %3849 = vadd.xlane.f32.xlu0 %v3848_v57 }
 0x6b8   : > { %v3741_v58 = vsub.f32 %v15872_v3, %v3673_v28  ;;  %3876 = vadd.xlane.f32.xlu1 %v3875_v63  ;;  %13521 = vpow2.f32 %v3790_v42  ;;  %v3754_v47 = vsub.f32 %v15875_v45, %v3712_v17 }
 0x6b9   : > { %v16016_v4 = vpop.eup %13509  ;;  %13523 = vpow2.f32 %v3788_v7 }
 0x6ba   : > { %v3890_v25 = vsel %vm1934_vm6, %v16016_v4, 0.0  ;;  %v16020_v12 = vpop.eup %13511  ;;  %v3786_v40 = vmul.f32 1.442695, %v3741_v58  ;;  %13525 = vpow2.f32 %v3784_v52  ;;  %v3812_v45 = vmul.f32 1.442695, %v3754_v47 }
 0x6bb   : > { %v3706_v15 = vpop.xlane.xlu1 %3705  ;;  %v3715_v43 = vpop.xlane.xlu0 %3714  ;;  %3891 = vadd.xlane.f32.xlu0 %v3890_v25  ;;  %v3857_v18 = vsel %vm1934_vm6, %v16020_v12, 0.0 }
 0x6bc   : > { %v3755_v1 = vsub.f32 %v15887_v21, %v3715_v43  ;;  %13527 = vpow2.f32 %v3786_v40  ;;  %v3752_v56 = vsub.f32 %v15884_v30, %v3706_v15 }
 0x6bd   : > { %v16024_v3 = vpop.eup %13513 }
 0x6be   : > { %v3814_v6 = vmul.f32 1.442695, %v3755_v1  ;;  %v16028_v23 = vpop.eup %13515  ;;  %v3893_v38 = vsel %vm1934_vm6, %v16024_v3, 0.0  ;;  %v3808_v63 = vmul.f32 1.442695, %v3752_v56 }
 0x6bf   : > { %v3709_v49 = vpop.xlane.xlu0 %3708  ;;  %3858 = vadd.xlane.f32.xlu0 %v3857_v18  ;;  %3894 = vadd.xlane.f32.xlu1 %v3893_v38  ;;  %v3724_v41 = vpop.xlane.xlu1 %3723  ;;  %v3884_v28 = vsel %vm1934_vm6, %v16028_v23, 0.0 }
 0x6c0   : > { %v3753_v48 = vsub.f32 %v15899_v33, %v3709_v49  ;;  %13529 = vpow2.f32 %v3814_v6  ;;  %v3758_v30 = vsub.f32 %v15894_v9, %v3724_v41 }
 0x6c1   : > { %v16033_v21 = vpop.eup %13517 }
 0x6c2   : > { %v16035_v7 = vpop.eup %13519  ;;  %v3810_v42 = vmul.f32 1.442695, %v3753_v48  ;;  %v3887_v57 = vsel %vm1934_vm6, %v16033_v21, 0.0  ;;  %v3820_v43 = vmul.f32 1.442695, %v3758_v30 }
 0x6c3   : > { %v16042_v17 = vpop.permute.xlu0 %4457  ;;  %3885 = vadd.xlane.f32.xlu0 %v3884_v28  ;;  %3888 = vadd.xlane.f32.xlu1 %v3887_v57  ;;  %v3851_v58 = vsel %vm1934_vm6, %v16035_v7, 0.0  ;;  %v3718_v25 = vpop.xlane.xlu1 %3717 }
 0x6c4   : > { %13531 = vpow2.f32 %v3810_v42  ;;  %12308 = vmatprep.subr.mxu0 %v16042_v17  ;;  %v3756_v40 = vsub.f32 %v15902_v27, %v3718_v25 }
 0x6c5   : > { %v16045_v33 = vpop.eup %13521  ;;  %13533 = vpow2.f32 %v3812_v45 }
 0x6c6   : > { %v16050_v52 = vpop.eup %13523  ;;  %v3869_v15 = vsel %vm1934_vm6, %v16045_v33, 0.0  ;;  %13535 = vpow2.f32 %v3808_v63  ;;  %v3816_v18 = vmul.f32 1.442695, %v3756_v40 }
 0x6c7   : > { %3852 = vadd.xlane.f32.xlu0 %v3851_v58  ;;  %3870 = vadd.xlane.f32.xlu1 %v3869_v15  ;;  %v3866_v1 = vsel %vm1934_vm6, %v16050_v52, 0.0  ;;  %v16057_v47 = vpop.eup %13525  ;;  %13537 = vpow2.f32 %v3820_v43  ;;  %v16089_v25 = vpop.permute.xlu0 %4455 }
 0x6c8   : > { %v3860_v49 = vsel %vm1934_vm6, %v16057_v47, 0.0  ;;  %13539 = vpow2.f32 %v3816_v18  ;;  %v16091_v15 = vpop.permute.xlu1 %13153 }
 0x6c9   : > { %v16059_v9 = vpop.eup %13527 }
 0x6ca   : > { %v3863_v45 = vsel %vm1934_vm6, %v16059_v9, 0.0 }
 0x6cb   : > { %3867 = vadd.xlane.f32.xlu0 %v3866_v1  ;;  %v16093_v43 = vpop.permute.xlu0 %4453  ;;  %v19546_v1 = vld [vmem:[#allocation28_spill] sm:$0xff] }
 0x6cd   : > { %v16061_v6 = vpop.eup %13529 }
 0x6ce   : > { %v3905_v38 = vsel %vm1934_vm6, %v16061_v6, 0.0 }
 0x6cf   : > { %3861 = vadd.xlane.f32.xlu0 %v3860_v49  ;;  %3906 = vadd.xlane.f32.xlu1 %v3905_v38  ;;  %v16097_v18 = vpop.permute.xlu0 %4451  ;;  %v19547_v38 = vld [vmem:[#allocation29_spill] sm:$0xff] }
 0x6d1   : > { %v16067_v27 = vpop.eup %13531 }
 0x6d2   : > { %v3899_v48 = vsel %vm1934_vm6, %v16067_v27, 0.0  ;;  %v16073_v41 = vpop.eup %13533 }
 0x6d3   : > { %3864 = vadd.xlane.f32.xlu0 %v3863_v45  ;;  %3900 = vadd.xlane.f32.xlu1 %v3899_v48  ;;  %v3902_v56 = vsel %vm1934_vm6, %v16073_v41, 0.0  ;;  %v16077_v42 = vpop.eup %13535  ;;  %v16101_v48 = vpop.permute.xlu0 %4449 }
 0x6d4   : > { %v3896_v57 = vsel %vm1934_vm6, %v16077_v42, 0.0  ;;  %v16081_v28 = vpop.eup %13537 }
 0x6d5   : > { %19545 = vst [vmem:[#allocation62_spill] sm:$0xff] %v16081_v28  ;;  %v3914_v63 = vsel %vm1934_vm6, %v16081_v28, 0.0  ;;  %v16085_v30 = vpop.eup %13539 }
 0x6d6   : > { %v3908_v58 = vsel %vm1934_vm6, %v16085_v30, 0.0 }
 0x6d7   : > { %3903 = vadd.xlane.f32.xlu0 %v3902_v56 }
 0x6db   : > { %3897 = vadd.xlane.f32.xlu0 %v3896_v57 }
 0x6df   : > { %3915 = vadd.xlane.f32.xlu0 %v3914_v63 }
 0x6e3   : > { %3909 = vadd.xlane.f32.xlu0 %v3908_v58 }
 0x6f8   : > { %v3832_v40 = vpop.xlane.xlu1 %3831 }
 0x6f9   : > { %4445 = vrot.lane.b32.xlu0 %v19546_v1, %s13974_s27 }
 0x6fc   : > { %v3826_v49 = vpop.xlane.xlu1 %3825 }
 0x6fd   : > { %13541 = vrcp.f32 %v3826_v49  ;;  %4443 = vrot.lane.b32.xlu0 %v19547_v38, %s13974_s27 }
 0x701   : > { %5243 = vrot.lane.b32.xlu0 %v14587_v32, %s13975_s21 }
 0x704   : > { %v3727_v45 = vpop.xlane.xlu0 %3726 }
 0x705   : > { %v3759_v56 = vsub.f32 %v15939_v36, %v3727_v45  ;;  %5241 = vrot.lane.b32.xlu0 %v14592_v39, %s13975_s21 }
 0x707   : > { %v3822_v57 = vmul.f32 1.442695, %v3759_v56 }
 0x708   : > { %v3721_v63 = vpop.xlane.xlu0 %3720 }
 0x709   : > { %13543 = vpow2.f32 %v3822_v57  ;;  %v3757_v58 = vsub.f32 %v15944_v19, %v3721_v63  ;;  %5348 = vrot.lane.b32.xlu0 %v14651_v29, %s13975_s21  ;;  %v19548_v19 = vld [vmem:[#allocation5_spill] sm:$0xff] }
 0x70a   : > { %v13542_v49 = vpop.eup %13541 }
 0x70b   : > { %v3818_v38 = vmul.f32 1.442695, %v3757_v58  ;;  %v3921_v1 = vmul.f32 %v13542_v49, %v15934_v14  ;;  %v13141_v49 = vunpack.i.h.bf16 %v15580_v53 }
 0x70c   : > { %v3835_v28 = vpop.xlane.xlu0 %3834 }
 0x70d   : > { %13545 = vpow2.f32 %v3818_v38  ;;  %12240 = vmatprep.mubr.msk.f32.mxu1 %vm1934_vm6, %v3921_v1  ;;  %5346 = vrot.lane.b32.xlu0 %v14659_v55, %s13975_s21 }
 0x70e   : > { %13547 = vrcp.f32 %v3832_v40 }
 0x710   : > { %v3829_v36 = vpop.xlane.xlu0 %3828 }
 0x711   : > { %13549 = vrcp.f32 %v3829_v36  ;;  %5344 = vrot.lane.b32.xlu0 %v14665_v26, %s13975_s21 }
 0x712   : > { %13551 = vrcp.f32 %v3835_v28 }
 0x715   : > { %5231 = vrot.lane.b32.xlu0 %v19548_v19, %s13976_s22 }
 0x716   : > { %v16119_v45 = vpop.eup %13543 }
 0x717   : > { %v3917_v14 = vsel %vm1934_vm6, %v16119_v45, 0.0 }
 0x718   : > { %3918 = vadd.xlane.f32.xlu1 %v3917_v14  ;;  %v19549_v14 = vunpack.i.l.bf16 %v15580_v53 }
 0x719   : > { %5451 = vrot.lane.b32.xlu0 %v14740_v35, %s13975_s21 }
 0x71a   : > { %v16125_v40 = vpop.eup %13545 }
 0x71b   : > { %v3911_v1 = vsel %vm1934_vm6, %v16125_v40, 0.0  ;;  %v13548_v28 = vpop.eup %13547 }
 0x71c   : > { %3912 = vadd.xlane.f32.xlu1 %v3911_v1  ;;  %v3925_v63 = vmul.f32 %v13548_v28, %v15929_v31  ;;  %v13146_v28 = vunpack.i.h.bf16 %v15926_v2 }
 0x71d   : > { %v3844_v38 = vpop.xlane.xlu1 %3843  ;;  %5235 = vrot.lane.b32.xlu0 %v14587_v32, %s13976_s22 }
 0x71e   : > { %v13550_v56 = vpop.eup %13549 }
 0x71f   : > { %v3923_v57 = vmul.f32 %v13550_v56, %v15953_v46  ;;  %v13552_v58 = vpop.eup %13551  ;;  %v13145_v46 = vunpack.i.l.bf16 %v15926_v2  ;;  %v13150_v56 = vunpack.i.l.bf16 %v15914_v37  ;;  %v13155_v2 = vunpack.i.l.bf16 %v16091_v15 }
 0x720   : > { %v3927_v31 = vmul.f32 %v13552_v58, %v15948_v22  ;;  %v13151_v22 = vunpack.i.h.bf16 %v15914_v37 }
 0x721   : > { %v3838_v36 = vpop.xlane.xlu1 %3837  ;;  %5336 = vrot.lane.b32.xlu0 %v14665_v26, %s13976_s22  ;;  %12241 = vmatmul.mubr.msk.f32.vlgmr.msra.gmra.mxu1 %vm1934_vm6, %v3923_v57  ;;  %v19550_v57 = vld [vmem:[#allocation13_spill] sm:$0xff] }
 0x722   : > { %13553 = vrcp.f32 %v3838_v36  ;;  %12281 = vmatpush3.msra.mxu1 %v19549_v14  ;;  %v3847_v1 = vpop.xlane.xlu0 %3846  ;;  %12243 = vmatprep.mubr.msk.f32.mxu1 %vm1934_vm6, %v3925_v63  ;;  %v19551_v14 = vld [vmem:[#allocation2_spill] sm:$0xff] }
 0x723   : > { %12282 = vmatprep.subr.mxu1 %v13141_v49  ;;  %13555 = vrcp.f32 %v3844_v38  ;;  %v13156_v38 = vunpack.i.h.bf16 %v16091_v15 }
 0x724   : > { %12283 = vmatpush3.msra.mxu1 %v13141_v49 }
 0x725   : > { %12284 = vmatprep.subr.mxu1 %v13145_v46  ;;  %5558 = vrot.lane.b32.xlu0 %v14801_v34, %s13975_s21 }
 0x726   : > { %12244 = vmatmul.mubr.msk.f32.gmra.mxu1 %vm1934_vm6, %v3927_v31  ;;  %v3841_v53 = vpop.xlane.xlu0 %3840 }
 0x727   : > { %12285 = vmatpush3.msra.mxu1 %v13145_v46  ;;  %13557 = vrcp.f32 %v3841_v53 }
 0x728   : > { %12286 = vmatprep.subr.mxu1 %v13146_v28  ;;  %13559 = vrcp.f32 %v3847_v1 }
 0x729   : > { %12287 = vmatpush3.msra.mxu1 %v13146_v28  ;;  %5340 = vrot.lane.b32.xlu0 %v14651_v29, %s13976_s22 }
 0x72a   : > { %12288 = vmatprep.subr.mxu1 %v13150_v56 }
 0x72b   : > { %12289 = vmatpush3.msra.mxu1 %v13150_v56 }
 0x72c   : > { %12290 = vmatprep.subr.mxu1 %v13151_v22 }
 0x72d   : > { %12291 = vmatpush3.msra.mxu1 %v13151_v22  ;;  %5556 = vrot.lane.b32.xlu0 %v14814_v51, %s13975_s21 }
 0x72e   : > { %12292 = vmatprep.subr.mxu1 %v13155_v2  ;;  %4447 = vrot.lane.b32.xlu1 %v19550_v57, %s13974_s27  ;;  %s13977_s27 = smov 48  }
 0x72f   : > { %v13554_v63 = vpop.eup %13553  ;;  %12293 = vmatpush3.msra.mxu1 %v13155_v2 }
 0x730   : > { %12294 = vmatprep.subr.mxu1 %v13156_v38  ;;  %v3929_v37 = vmul.f32 %v13554_v63, %v15964_v0  ;;  %v13556_v58 = vpop.eup %13555  ;;  %v19552_v63 = vld [vmem:[#allocation4_spill] sm:$0xff] }
 0x731   : > { %12295 = vmatpush3.msra.mxu1 %v13156_v38  ;;  %5441 = vrot.lane.b32.xlu0 %v14707_v8, %s13976_s22  ;;  %v3933_v1 = vmul.f32 %v13556_v58, %v15960_v24 }
 0x732   : > { %12912 = vmatprep.subr.mxu1 %v16042_v17  ;;  %5239 = vrot.lane.b32.xlu1 %v19548_v19, %s13975_s21 }
 0x733   : > { %12246 = vmatprep.mubr.msk.f32.mxu1 %vm1934_vm6, %v3929_v37 }
 0x734   : > { %v13558_v15 = vpop.eup %13557  ;;  %v3880_v49 = vpop.xlane.xlu0 %3879 }
 0x735   : > { %5443 = vrot.lane.b32.xlu0 %v14740_v35, %s13976_s22  ;;  %v3931_v36 = vmul.f32 %v13558_v15, %v15973_v10  ;;  %v13560_v0 = vpop.eup %13559 }
 0x736   : > { %5237 = vrot.lane.b32.xlu1 %v19551_v14, %s13975_s21  ;;  %v3935_v28 = vmul.f32 %v13560_v0, %v15966_v62 }
 0x737   : > { %12247 = vmatmul.mubr.msk.f32.gmra.mxu1 %vm1934_vm6, %v3931_v36 }
 0x738   : > { %12249 = vmatprep.mubr.msk.f32.mxu1 %vm1934_vm6, %v3933_v1  ;;  %v3874_v46 = vpop.xlane.xlu0 %3873 }
 0x739   : > { %v3883_v31 = vpop.xlane.xlu1 %3882  ;;  %13561 = vrcp.f32 %v3874_v46  ;;  %5552 = vrot.lane.b32.xlu0 %v14829_v60, %s13975_s21 }
 0x73a   : > { %5229 = vrot.lane.b32.xlu1 %v19551_v14, %s13976_s22  ;;  %13563 = vrcp.f32 %v3880_v49  ;;  %v19553_v49 = vld [vmem:[#allocation16_spill] sm:$0xff] }
 0x73b   : > { %12250 = vmatmul.mubr.msk.f32.gmra.mxu1 %vm1934_vm6, %v3935_v28 }
 0x73d   : > { %v3856_v10 = vpop.xlane.xlu1 %3855  ;;  %5546 = vrot.lane.b32.xlu0 %v19479_v61, %s13976_s22 }
 0x73e   : > { %5453 = vrot.lane.b32.xlu1 %v19483_v5, %s13975_s21 }
 0x740   : > { %v3850_v24 = vpop.xlane.xlu0 %3849 }
 0x741   : > { %v3877_v53 = vpop.xlane.xlu1 %3876  ;;  %13565 = vrcp.f32 %v3850_v24  ;;  %5550 = vrot.lane.b32.xlu0 %v14801_v34, %s13976_s22 }
 0x742   : > { %13567 = vrcp.f32 %v3877_v53  ;;  %5342 = vrot.lane.b32.xlu1 %v14675_v11, %s13975_s21 }
 0x743   : > { %13569 = vrcp.f32 %v3883_v31  ;;  %v19554_v31 = vld [vmem:[#allocation8_spill] sm:$0xff] }
 0x744   : > { %v3892_v62 = vpop.xlane.xlu0 %3891 }
 0x745   : > { %13158 = vrot.lane.b32.xlu0 %v19482_v54, %s13977_s27  ;;  %13571 = vrcp.f32 %v3892_v62 }
 0x746   : > { %v13562_v56 = vpop.eup %13561  ;;  %5233 = vrot.lane.b32.xlu1 %v14592_v39, %s13976_s22 }
 0x747   : > { %v3953_v22 = vmul.f32 %v13562_v56, %v15990_v44  ;;  %v13564_v58 = vpop.eup %13563  ;;  %v19557_v56 = vld [vmem:[#allocation20_spill] sm:$0xff] }
 0x748   : > { %v3859_v2 = vpop.xlane.xlu0 %3858  ;;  %v3895_v38 = vpop.xlane.xlu1 %3894  ;;  %v3957_v28 = vmul.f32 %v13564_v58, %v15984_v16 }
 0x749   : > { %13168 = vrot.lane.b32.xlu0 %v19552_v63, %s13977_s27  ;;  %12296 = vmatprep.mubr.msk.f32.mxu1 %vm1934_vm6, %v3953_v22 }
 0x74a   : > { %5334 = vrot.lane.b32.xlu1 %v14675_v11, %s13976_s22 }
 0x74c   : > { %v3886_v37 = vpop.xlane.xlu0 %3885  ;;  %v3889_v15 = vpop.xlane.xlu1 %3888 }
 0x74d   : > { %13573 = vrcp.f32 %v3886_v37  ;;  %13178 = vrot.lane.b32.xlu0 %v19553_v49, %s13977_s27 }
 0x74e   : > { %v13566_v36 = vpop.eup %13565  ;;  %13575 = vrcp.f32 %v3889_v15  ;;  %5449 = vrot.lane.b32.xlu1 %v14707_v8, %s13975_s21 }
 0x74f   : > { %v13568_v44 = vpop.eup %13567  ;;  %13577 = vrcp.f32 %v3856_v10  ;;  %v3937_v0 = vmul.f32 %v13566_v36, %v16008_v59  ;;  %v19555_v59 = vld [vmem:[#allocation19_spill] sm:$0xff]  ;;  %v19556_v10 = vld [vmem:[#allocation10_spill] sm:$0xff] }
 0x750   : > { %v3955_v1 = vmul.f32 %v13568_v44, %v16005_v20  ;;  %13579 = vrcp.f32 %v3895_v38  ;;  %v3853_v46 = vpop.xlane.xlu0 %3852  ;;  %v13570_v24 = vpop.eup %13569  ;;  %v19558_v44 = vld [vmem:[#allocation23_spill] sm:$0xff] }
 0x751   : > { %13581 = vrcp.f32 %v3853_v46  ;;  %13188 = vrot.lane.b32.xlu0 %v19554_v31, %s13977_s27  ;;  %12268 = vmatprep.mubr.msk.f32.mxu0 %vm1934_vm6, %v3937_v0  ;;  %v3959_v16 = vmul.f32 %v13570_v24, %v15993_v13  ;;  %v3871_v37 = vpop.xlane.xlu1 %3870 }
 0x752   : > { %5338 = vrot.lane.b32.xlu1 %v14659_v55, %s13976_s22  ;;  %12297 = vmatmul.mubr.msk.f32.vlgmr.msra.gmra.mxu1 %vm1934_vm6, %v3955_v1  ;;  %13583 = vrcp.f32 %v3859_v2  ;;  %v13572_v62 = vpop.eup %13571 }
 0x753   : > { %12920 = vmatpush3.msra.mxu1 %v16042_v17  ;;  %12299 = vmatprep.mubr.msk.f32.mxu1 %vm1934_vm6, %v3957_v28  ;;  %v3965_v0 = vmul.f32 %v13572_v62, %v16016_v4 }
 0x754   : > { %12913 = vmatprep.subr.mxu1 %v16089_v25  ;;  %v3868_v20 = vpop.xlane.xlu0 %3867 }
 0x755   : > { %12921 = vmatpush3.msra.mxu1 %v16089_v25  ;;  %13198 = vrot.lane.b32.xlu0 %v19555_v59, %s13977_s27 }
 0x756   : > { %12914 = vmatprep.subr.mxu1 %v16093_v43  ;;  %5447 = vrot.lane.b32.xlu1 %v19556_v10, %s13975_s21 }
 0x757   : > { %12300 = vmatmul.mubr.msk.f32.gmra.mxu1 %vm1934_vm6, %v3959_v16 }
 0x758   : > { %12922 = vmatpush3.msra.mxu1 %v16093_v43  ;;  %v3862_v53 = vpop.xlane.xlu0 %3861 }
 0x759   : > { %12915 = vmatprep.subr.mxu1 %v16097_v18  ;;  %13585 = vrcp.f32 %v3862_v53  ;;  %13208 = vrot.lane.b32.xlu0 %v19557_v56, %s13977_s27  ;;  %v19559_v53 = vld [vmem:[#allocation7_spill] sm:$0xff] }
 0x75a   : > { %v13574_v22 = vpop.eup %13573  ;;  %12923 = vmatpush3.msra.mxu1 %v16097_v18  ;;  %5439 = vrot.lane.b32.xlu1 %v19556_v10, %s13976_s22  ;;  %13587 = vrcp.f32 %v3868_v20 }
 0x75b   : > { %v13576_v13 = vpop.eup %13575  ;;  %12916 = vmatprep.subr.mxu1 %v16101_v48  ;;  %v3961_v2 = vmul.f32 %v13574_v22, %v16028_v23 }
 0x75c   : > { %v13578_v38 = vpop.eup %13577  ;;  %12924 = vmatpush3.msra.mxu1 %v16101_v48  ;;  %v3865_v58 = vpop.xlane.xlu0 %3864  ;;  %v3963_v15 = vmul.f32 %v13576_v13, %v16033_v21  ;;  %v19562_v13 = vld [vmem:[#allocation9_spill] sm:$0xff] }
 0x75d   : > { %v13580_v36 = vpop.eup %13579  ;;  %13589 = vrcp.f32 %v3865_v58  ;;  %6547 = vrot.lane.b32.xlu0 %v19558_v44, %s13977_s27  ;;  %12302 = vmatprep.mubr.msk.f32.mxu1 %vm1934_vm6, %v3961_v2  ;;  %v3941_v46 = vmul.f32 %v13578_v38, %v16000_v50  ;;  %v19564_v38 = vld [vmem:[#allocation21_spill] sm:$0xff] }
 0x75e   : > { %v13582_v1 = vpop.eup %13581  ;;  %5554 = vrot.lane.b32.xlu1 %v19479_v61, %s13975_s21  ;;  %12303 = vmatmul.mubr.msk.f32.gmra.mxu1 %vm1934_vm6, %v3963_v15  ;;  %13591 = vrcp.f32 %v3871_v37  ;;  %v3967_v28 = vmul.f32 %v13580_v36, %v16024_v3  ;;  %v3907_v37 = vpop.xlane.xlu1 %3906  ;;  %s13978_s21 = smov 72  }
 0x75f   : > { %v3939_v23 = vmul.f32 %v13582_v1, %v16035_v7  ;;  %12305 = vmatprep.mubr.msk.f32.mxu1 %vm1934_vm6, %v3965_v0  ;;  %v13584_v24 = vpop.eup %13583 }
 0x760   : > { %v3904_v21 = vpop.xlane.xlu0 %3903  ;;  %v3943_v50 = vmul.f32 %v13584_v24, %v16020_v12  ;;  %v1437_v24 = vld [vmem:[%s19299_s6] sm:$0xf] }
 0x761   : > { %12269 = vmatmul.mubr.msk.f32.vlgmr.msra.gmra.mxu0 %vm1934_vm6, %v3939_v23 }
 0x762   : > { %5445 = vrot.lane.b32.xlu1 %v19483_v5, %s13976_s22  ;;  %12309 = vmatpush3.msra.mxu0 %v16042_v17  ;;  %v3901_v15 = vpop.xlane.xlu1 %3900 }
 0x763   : > { %12271 = vmatprep.mubr.msk.f32.mxu0 %vm1934_vm6, %v3941_v46  ;;  %12306 = vmatmul.mubr.msk.f32.gmra.mxu1 %vm1934_vm6, %v3967_v28 }
 0x764   : > { %12310 = vmatprep.subr.mxu0 %v16089_v25  ;;  %v3898_v4 = vpop.xlane.xlu0 %3897 }
 0x765   : > { %12311 = vmatpush3.msra.mxu0 %v16089_v25  ;;  %13593 = vrcp.f32 %v3898_v4 }
 0x766   : > { %v13586_v7 = vpop.eup %13585  ;;  %12312 = vmatprep.subr.mxu0 %v16093_v43  ;;  %5544 = vrot.lane.b32.xlu1 %v14829_v60, %s13976_s22 }
 0x767   : > { %12272 = vmatmul.mubr.msk.f32.gmra.mxu0 %vm1934_vm6, %v3943_v50  ;;  %v3945_v3 = vmul.f32 %v13586_v7, %v16057_v47  ;;  %v13588_v20 = vpop.eup %13587  ;;  %v19565_v50 = vld [vmem:[#allocation31_spill] sm:$0xff] }
 0x768   : > { %12313 = vmatpush3.msra.mxu0 %v16093_v43  ;;  %v3916_v17 = vpop.xlane.xlu0 %3915  ;;  %v3949_v43 = vmul.f32 %v13588_v20, %v16050_v52  ;;  %v19561_v52 = vld [vmem:[#allocation15_spill] sm:$0xff]  ;;  %vm2933_vm2 = vcmp.gt.f32.partialorder %v19565_v50, 0.5 }
 0x769   : > { %12314 = vmatprep.subr.mxu0 %v16097_v18  ;;  %12274 = vmatprep.mubr.msk.f32.mxu0 %vm1934_vm6, %v3945_v3  ;;  %v5066_v3 = vsel %vm4852_vm1, %v1437_v24, 0 }
 0x76a   : > { %v13590_v25 = vpop.eup %13589  ;;  %12315 = vmatpush3.msra.mxu0 %v16097_v18  ;;  %5548 = vrot.lane.b32.xlu1 %v14814_v51, %s13976_s22  ;;  %s13979_s22 = smov 104  }
 0x76b   : > { %12316 = vmatprep.subr.mxu0 %v16101_v48  ;;  %v3947_v12 = vmul.f32 %v13590_v25, %v16059_v9  ;;  %v13592_v16 = vpop.eup %13591  ;;  %v19560_v9 = vld [vmem:[#allocation3_spill] sm:$0xff]  ;;  %v1438_v25 = vld [vmem:[%s19299_s6 + $0x4] sm:$0xf] }
 0x76c   : > { %12317 = vmatpush3.msra.mxu0 %v16101_v48  ;;  %v3910_v47 = vpop.xlane.xlu0 %3909  ;;  %v3951_v18 = vmul.f32 %v13592_v16, %v16045_v33  ;;  %v19563_v33 = vld [vmem:[#allocation17_spill] sm:$0xff] }
 0x76d   : > { %13595 = vrcp.f32 %v3910_v47  ;;  %12275 = vmatmul.mubr.msk.f32.gmra.mxu0 %vm1934_vm6, %v3947_v12  ;;  %v19566_v12 = vmov 0.0  }
 0x76e   : > { %13163 = vrot.lane.b32.xlu1 %v19559_v53, %s13977_s27  ;;  %12277 = vmatprep.mubr.msk.f32.mxu0 %vm1934_vm6, %v3949_v43  ;;  %13597 = vrcp.f32 %v3901_v15  ;;  %v10915_v16 = vsel %vm2933_vm2, 1.0, %v19566_v12  ;;  %v19569_v15 = vld [vmem:[#allocation62_spill] sm:$0xff] }
 0x76f   : > { %13599 = vrcp.f32 %v3904_v21 }
 0x770   : > { %13601 = vrcp.f32 %v3907_v37  ;;  %v4854_v37 = vsel %vm4852_vm1, %v1438_v25, 0 }
 0x771   : > { %12278 = vmatmul.mubr.msk.f32.gmra.mxu0 %vm1934_vm6, %v3951_v18  ;;  %13603 = vrcp.f32 %v3916_v17  ;;  %v19567_v18 = vld [vmem:[#allocation34_spill] sm:$0xff] }
 0x772   : > { %v13594_v62 = vpop.eup %13593  ;;  %13173 = vrot.lane.b32.xlu1 %v19560_v9, %s13977_s27 }
 0x773   : > { %v3969_v48 = vmul.f32 %v13594_v62, %v16077_v42  ;;  %v4446_v42 = vpop.permute.xlu0 %4445  ;;  %v19568_v62 = vld [vmem:[#allocation11_spill] sm:$0xff] }
 0x775   : > { %12324 = vmatprep.mubr.msk.f32.mxu0 %vm1934_vm6, %v3969_v48  ;;  %v3123_v48 = vpack.c.bf16 %v19568_v62, %v19567_v18 }
 0x776   : > { %13183 = vrot.lane.b32.xlu1 %v19561_v52, %s13977_s27 }
 0x777   : > { %v4444_v58 = vpop.permute.xlu0 %4443 }
 0x77a   : > { %v13596_v22 = vpop.eup %13595  ;;  %13193 = vrot.lane.b32.xlu1 %v19562_v13, %s13977_s27 }
 0x77b   : > { %v3977_v2 = vmul.f32 %v13596_v22, %v16085_v30  ;;  %v16285_v36 = vpop.permute.xlu0 %5243  ;;  %v13598_v28 = vpop.eup %13597 }
 0x77c   : > { %v13600_v21 = vpop.eup %13599  ;;  %v3971_v7 = vmul.f32 %v13598_v28, %v16067_v27  ;;  %v19571_v28 = vld [vmem:[#allocation37_spill] sm:$0xff] }
 0x77d   : > { %12330 = vmatprep.mubr.msk.f32.mxu1 %vm1934_vm6, %v3977_v2  ;;  %v13602_v17 = vpop.eup %13601  ;;  %v3973_v20 = vmul.f32 %v13600_v21, %v16073_v41  ;;  %v2965_v2 = vsub.f32 1.0, %v10915_v16  ;;  %vm2937_vm3 = vcmp.gt.f32.partialorder %v19571_v28, 0.5 }
 0x77e   : > { %13203 = vrot.lane.b32.xlu1 %v19563_v33, %s13977_s27  ;;  %v13604_v47 = vpop.eup %13603  ;;  %v3975_v41 = vmul.f32 %v13602_v17, %v16061_v6  ;;  %v2957_v6 = vmul.f32 0.25, %v19565_v50  ;;  %v19572_v17 = vld [vmem:[#allocation33_spill] sm:$0xff] }
 0x77f   : > { %v16287_v0 = vpop.permute.xlu0 %5241 }
 0x780   : > { %v5264_v31 = vsel %vm1469_vm5, %v16287_v0, 0 }
 0x782   : > { %13213 = vrot.lane.b32.xlu1 %v19564_v38, %s13977_s27 }
 0x783   : > { %v5349_v23 = vpop.permute.xlu0 %5348 }
 0x784   : > { %v5372_v21 = vsel %vm1469_vm5, %v5349_v23, 0 }
 0x787   : > { %v5347_v4 = vpop.permute.xlu0 %5346 }
 0x78b   : > { %v5345_v22 = vpop.permute.xlu0 %5344 }
 0x7a1   : > { %v3919_v1 = vpop.xlane.xlu1 %3918 }
 0x7a5   : > { %v3913_v30 = vpop.xlane.xlu1 %3912 }
 0x7a6   : > { %13605 = vrcp.f32 %v3913_v30  ;;  %v19570_v30 = vld [vmem:[#allocation36_spill] sm:$0xff] }
 0x7a7   : > { %13607 = vrcp.f32 %v3919_v1  ;;  %v3981_v1 = vmul.f32 %v13604_v47, %v19569_v15 }
 0x7a9   : > { %v4448_v46 = vpop.permute.xlu1 %4447 }
 0x7aa   : > { %12318 = vmatprep.subr.mxu0 %v4448_v46  ;;  %12917 = vmatprep.subr.mxu1 %v4448_v46 }
 0x7ab   : > { %12319 = vmatpush3.msra.mxu0 %v4448_v46  ;;  %12925 = vmatpush3.msra.mxu1 %v4448_v46  ;;  %v3124_v46 = vpack.c.bf16 %v19570_v30, %v10915_v16  ;;  %v19575_v16 = vld [vmem:[#allocation39_spill] sm:$0xff] }
 0x7ac   : > { %12320 = vmatprep.subr.mxu0 %v4446_v42  ;;  %12918 = vmatprep.subr.mxu1 %v4446_v42 }
 0x7ad   : > { %12321 = vmatpush3.msra.mxu0 %v4446_v42  ;;  %12926 = vmatpush3.msra.mxu1 %v4446_v42  ;;  %v16302_v27 = vpop.permute.xlu1 %5239 }
 0x7ae   : > { %12322 = vmatprep.subr.mxu0 %v4444_v58  ;;  %12919 = vmatprep.subr.mxu1 %v4444_v58 }
 0x7af   : > { %12323 = vmatpush3.msra.mxu0 %v4444_v58  ;;  %12927 = vmatpush3.msra.mxu1 %v4444_v58 }
 0x7b0   : > { %12325 = vmatmul.mubr.msk.f32.vlgmr.msra.gmra.mxu0 %vm1934_vm6, %v3971_v7  ;;  %12961 = vmatprep.subr.msk.bf16.mxu0 %vm4852_vm1, %v1437_v24  ;;  %v10919_v7 = vsel %vm2937_vm3, 1.0, %v19566_v12 }
 0x7b1   : > { %12327 = vmatprep.mubr.msk.f32.mxu0 %vm1934_vm6, %v3973_v20  ;;  %12371 = vmatpush3.bf16.msra.mxu0 %v5066_v3  ;;  %v16319_v24 = vpop.permute.xlu1 %5237  ;;  %v16328_v3 = vpop.permute.xlu0 %5231  ;;  %v19573_v20 = vld [vmem:[#allocation32_spill] sm:$0xff] }
 0x7b2   : > { %12966 = vmatprep.subr.msk.bf16.mxu0 %vm1469_vm5, %v5349_v23  ;;  %12960 = vmatprep.subr.msk.bf16.mxu1 %vm4852_vm1, %v1438_v25  ;;  %v19574_v25 = vpack.c.bf16 %v19572_v17, %v19573_v20  ;;  %v5258_v63 = vsel %vm1469_vm5, %v16319_v24, 0 }
 0x7b3   : > { %v13606_v43 = vpop.eup %13605 }
 0x7b4   : > { %v3979_v42 = vmul.f32 %v13606_v43, %v16125_v40  ;;  %12328 = vmatmul.mubr.msk.f32.gmra.mxu0 %vm1934_vm6, %v3975_v41  ;;  %v13608_v58 = vpop.eup %13607  ;;  %v2973_v40 = vmul.f32 %v2965_v2, %v2957_v6  ;;  %v2969_v41 = vsub.f32 1.0, %v10919_v7  ;;  %v19576_v43 = vld [vmem:[#allocation41_spill] sm:$0xff]  ;;  %v5369_v2 = vsel %vm1469_vm5, %v5347_v4, 0 }
 0x7b5   : > { %12372 = vmatprep.mubr.msk.bf16.mxu0 %vm1469_vm5, %v3123_v48  ;;  %v3983_v50 = vmul.f32 %v13608_v58, %v16119_v45  ;;  %v16337_v23 = vpop.permute.xlu1 %5229  ;;  %v2961_v45 = vmul.f32 0.25, %v19571_v28  ;;  %v3126_v18 = vpack.c.bf16 %v19576_v43, %v10919_v7  ;;  %v16341_v62 = vpop.permute.xlu0 %5451  ;;  %v19578_v58 = vld [vmem:[#allocation38_spill] sm:$0xff]  ;;  %v5366_v7 = vsel %vm1469_vm5, %v5345_v22, 0 }
 0x7b6   : > { %12331 = vmatmul.mubr.msk.f32.vlgmr.msra.gmra.mxu1 %vm1934_vm6, %v3979_v42  ;;  %v2981_v47 = vadd.f32 %v2973_v40, %v19575_v16  ;;  %v19583_v16 = vld [vmem:[#allocation48_spill] sm:$0xff] }
 0x7b7   : > { %12337 = vmatpush3.bf16.msra.mxu1 %v4854_v37  ;;  %12333 = vmatprep.mubr.msk.f32.mxu1 %vm1934_vm6, %v3981_v1  ;;  %v2977_v48 = vmul.f32 %v2969_v41, %v2961_v45  ;;  %v19577_v37 = vld [vmem:[#allocation40_spill] sm:$0xff]  ;;  %v19580_v1 = vld [vmem:[#allocation49_spill] sm:$0xff]  ;;  %v19585_v45 = vld [vmem:[#allocation35_spill] sm:$0xff] }
 0x7b8   : > { %12962 = vmatprep.subr.msk.bf16.mxu1 %vm1469_vm5, %v16285_v36  ;;  %12373 = vmatmul.mubr.msk.bf16.vlgmr.msra.gmra.mxu0 %vm1469_vm5, %v3124_v46  ;;  %vm2989_vm4 = vcmp.gt.f32.partialorder %v2981_v47, 0.5  ;;  %v19579_v15 = vpack.c.bf16 %v19577_v37, %v19578_v58  ;;  %v3013_v40 = vmul.f32 0.25, %v2981_v47 }
 0x7b9   : > { %12421 = vmatpush3.bf16.xpose.msra.mxu0 %v5372_v21  ;;  %12376 = vmatprep.mubr.msk.bf16.mxu0 %vm1469_vm5, %v19574_v25  ;;  %v10923_v42 = vsel %vm2989_vm4, 1.0, %v19566_v12  ;;  %v2985_v6 = vadd.f32 %v2977_v48, %v19580_v1  ;;  %v16352_v30 = vpop.permute.xlu1 %5453  ;;  %v16354_v28 = vpop.permute.xlu0 %5235  ;;  %v19581_v21 = vld [vmem:[#allocation42_spill] sm:$0xff]  ;;  %v19587_v1 = vld [vmem:[#allocation45_spill] sm:$0xff] }
 0x7ba   : > { %12967 = vmatprep.subr.msk.bf16.mxu0 %vm1469_vm5, %v5347_v4  ;;  %12334 = vmatmul.mubr.msk.f32.gmra.mxu1 %vm1934_vm6, %v3983_v50  ;;  %v3021_v46 = vsub.f32 1.0, %v10923_v42  ;;  %v3128_v4 = vpack.c.bf16 %v19581_v21, %v10923_v42  ;;  %v19582_v25 = vld [vmem:[#allocation46_spill] sm:$0xff]  ;;  %v19590_v21 = vld [vmem:[#allocation43_spill] sm:$0xff] }
 0x7bb   : > { %vm2993_vm7 = vcmp.gt.f32.partialorder %v2985_v6, 0.5  ;;  %v19584_v41 = vpack.c.bf16 %v19582_v25, %v19583_v16  ;;  %v3017_v48 = vmul.f32 0.25, %v2985_v6 }
 0x7bc   : > { %v3029_v50 = vmul.f32 %v3021_v46, %v3013_v40  ;;  %v10927_v17 = vsel %vm2993_vm7, 1.0, %v19566_v12  ;;  %v19588_v46 = vld [vmem:[#allocation44_spill] sm:$0xff] }
 0x7bd   : > { %v5343_v20 = vpop.permute.xlu1 %5342  ;;  %v16365_v47 = vpop.permute.xlu0 %5336  ;;  %v19589_v40 = vpack.c.bf16 %v19587_v1, %v19588_v46  ;;  %v19596_v46 = vld [vmem:[#allocation56_spill] sm:$0xff] }
 0x7be   : > { %v3037_v43 = vadd.f32 %v3029_v50, %v19585_v45  ;;  %v5363_v58 = vsel %vm1469_vm5, %v5343_v20, 0  ;;  %v19593_v45 = vld [vmem:[#allocation55_spill] sm:$0xff] }
 0x7c0   : > { %12377 = vmatmul.mubr.msk.bf16.gmra.mxu0 %vm1469_vm5, %v3126_v18  ;;  %v3025_v18 = vsub.f32 1.0, %v10927_v17  ;;  %vm3045_vm8 = vcmp.gt.f32.partialorder %v3037_v43, 0.5  ;;  %v3069_v16 = vmul.f32 0.25, %v3037_v43 }
 0x7c1   : > { %12423 = vmatpush3.bf16.xpose.msra.mxu0 %v5369_v2  ;;  %12380 = vmatprep.mubr.msk.bf16.mxu0 %vm1469_vm5, %v19579_v15  ;;  %v19586_v2 = vld [vmem:[#allocation50_spill] sm:$0xff]  ;;  %v16373_v15 = vpop.permute.xlu0 %5558  ;;  %v10931_v6 = vsel %vm3045_vm8, 1.0, %v19566_v12 }
 0x7c2   : > { %12968 = vmatprep.subr.msk.bf16.mxu0 %vm1469_vm5, %v5345_v22  ;;  %v3130_v42 = vpack.c.bf16 %v19586_v2, %v10927_v17  ;;  %v16369_v22 = vpop.permute.xlu1 %5233  ;;  %v3033_v37 = vmul.f32 %v3025_v18, %v3017_v48  ;;  %v3077_v25 = vsub.f32 1.0, %v10931_v6 }
 0x7c4   : > { %v3085_v48 = vmul.f32 %v3077_v25, %v3069_v16  ;;  %v19598_v25 = vld [vmem:[#allocation53_spill] sm:$0xff] }
 0x7c6   : > { %v5335_v50 = vpop.permute.xlu1 %5334 }
 0x7c8   : > { %12381 = vmatmul.mubr.msk.bf16.gmra.mxu0 %vm1469_vm5, %v3128_v4  ;;  %v3041_v4 = vadd.f32 %v3033_v37, %v19590_v21  ;;  %v19595_v37 = vld [vmem:[#allocation57_spill] sm:$0xff] }
 0x7c9   : > { %12425 = vmatpush3.bf16.xpose.msra.mxu0 %v5366_v7  ;;  %12384 = vmatprep.mubr.msk.bf16.mxu0 %vm1469_vm5, %v19584_v41  ;;  %v19591_v7 = vld [vmem:[#allocation47_spill] sm:$0xff]  ;;  %v19592_v41 = vld [vmem:[#allocation54_spill] sm:$0xff] }
 0x7ca   : > { %12969 = vmatprep.subr.msk.bf16.mxu0 %vm1469_vm5, %v5343_v20  ;;  %v3132_v17 = vpack.c.bf16 %v19591_v7, %v10931_v6  ;;  %v16384_v20 = vpop.permute.xlu0 %5340  ;;  %vm3049_vm9 = vcmp.gt.f32.partialorder %v3041_v4, 0.5  ;;  %v19594_v18 = vpack.c.bf16 %v19592_v41, %v19593_v45  ;;  %v3073_v6 = vmul.f32 0.25, %v3041_v4  ;;  %v19600_v41 = vld [vmem:[#allocation51_spill] sm:$0xff] }
 0x7cb   : > { %v10935_v2 = vsel %vm3049_vm9, 1.0, %v19566_v12  ;;  %vm3102_vm11 = vcmp.gt.f32.partialorder %v19600_v41, 0.5 }
 0x7cc   : > { %v3081_v43 = vsub.f32 1.0, %v10935_v2 }
 0x7ce   : > { %v16395_v1 = vpop.permute.xlu0 %5556  ;;  %v3089_v45 = vmul.f32 %v3081_v43, %v3073_v6 }
 0x7d0   : > { %12385 = vmatmul.mubr.msk.bf16.gmra.mxu0 %vm1469_vm5, %v3130_v42  ;;  %v16392_v42 = vpop.permute.xlu1 %5449 }
 0x7d1   : > { %12427 = vmatpush3.bf16.xpose.msra.mxu0 %v5363_v58  ;;  %12388 = vmatprep.mubr.msk.bf16.mxu0 %vm1469_vm5, %v19589_v40  ;;  %v3093_v58 = vadd.f32 %v3085_v48, %v19595_v37  ;;  %v3134_v40 = vpack.c.bf16 %v19596_v46, %v10935_v2  ;;  %v19601_v2 = vld [vmem:[#allocation61_spill] sm:$0xff] }
 0x7d2   : > { %12974 = vmatprep.subr.msk.bf16.mxu0 %vm1469_vm5, %v16373_v15  ;;  %v16408_v48 = vpop.permute.xlu0 %5441  ;;  %v3097_v37 = vadd.f32 %v3089_v45, %v19601_v2  ;;  %v19602_v45 = vld [vmem:[#allocation59_spill] sm:$0xff] }
 0x7d3   : > { %vm3101_vm10 = vcmp.gt.f32.partialorder %v3093_v58, 0.5  ;;  %v10940_v58 = vsel %vm3102_vm11, 1.0, %v19566_v12 }
 0x7d4   : > { %v5339_v21 = vpop.permute.xlu1 %5338  ;;  %vm3105_vm15 = vcmp.gt.f32.partialorder %v3097_v37, 0.5 }
 0x7d6   : > { %v16432_v41 = vpop.permute.xlu0 %5443 }
 0x7d8   : > { %12389 = vmatmul.mubr.msk.bf16.gmra.mxu0 %vm1469_vm5, %v3132_v17  ;;  %v19597_v17 = vld [vmem:[#allocation52_spill] sm:$0xff] }
 0x7d9   : > { %12392 = vmatprep.mubr.msk.bf16.mxu0 %vm1469_vm5, %v19594_v18  ;;  %v19599_v16 = vpack.c.bf16 %v19597_v17, %v19598_v25  ;;  %v10939_v18 = vsel %vm3101_vm10, 1.0, %v19566_v12  ;;  %v16425_v25 = vpop.permute.xlu1 %5447 }
 0x7da   : > { %v3136_v43 = vpack.c.bf16 %v10940_v58, %v10939_v18  ;;  %v19603_v18 = vld [vmem:[#allocation60_spill] sm:$0xff]  ;;  %v19605_v58 = vld [vmem:[#allocation58_spill] sm:$0xff] }
 0x7db   : > { %v19604_v2 = vpack.c.bf16 %v19602_v45, %v19603_v18  ;;  %vm3106_vm3 = vcmp.gt.f32.partialorder %v19605_v58, 0.5  ;;  %v5267_v45 = vsel %vm1469_vm5, %v16285_v36, 0 }
 0x7dc   : > { %v10944_v56 = vsel %vm3106_vm3, 1.0, %v19566_v12 }
 0x7dd   : > { %v16450_v38 = vpop.permute.xlu1 %5439 }
 0x7e0   : > { %12393 = vmatmul.mubr.msk.bf16.gmra.mxu0 %vm1469_vm5, %v3134_v40 }
 0x7e1   : > { %v16399_v7 = vpop.f32.mrf.mxu1  ;;  %12396 = vmatprep.mubr.msk.bf16.mxu0 %vm1469_vm5, %v19599_v16  ;;  %v5555_v58 = vpop.permute.xlu1 %5554 }
 0x7e2   : > { %vm4597_vm12 = vcmp.gt.f32.partialorder %v16399_v7, 0.5  ;;  %v4621_v53 = vmul.f32 0.25, %v16399_v7 }
 0x7e3   : > { %v16410_v4 = vpop.f32.mrf.mxu1  ;;  %v16416_v46 = vsel %vm4597_vm12, 1.0, %v19566_v12 }
 0x7e4   : > { %vm4596_vm13 = vcmp.gt.f32.partialorder %v16410_v4, 0.5  ;;  %v4629_v9 = vsub.f32 1.0, %v16416_v46  ;;  %v4620_v60 = vmul.f32 0.25, %v16410_v4 }
 0x7e5   : > { %v16419_v40 = vsel %vm4596_vm13, 1.0, %v19566_v12 }
 0x7e6   : > { %v4788_v6 = vpack.c.bf16 %v16416_v46, %v16419_v40  ;;  %v16423_v17 = vpop.f32.mrf.mxu1 }
 0x7e7   : > { %vm4599_vm14 = vcmp.gt.f32.partialorder %v16423_v17, 0.5 }
 0x7e8   : > { %v16428_v16 = vpop.f32.mrf.mxu1  ;;  %12338 = vmatprep.mubr.msk.bf16.mxu1 %vm1469_vm5, %v4788_v6  ;;  %12397 = vmatmul.mubr.msk.bf16.gmra.mxu0 %vm1469_vm5, %v3136_v43  ;;  %v16441_v44 = vsel %vm4599_vm14, 1.0, %v19566_v12  ;;  %v10943_v6 = vsel %vm3105_vm15, 1.0, %v19566_v12 }
 0x7e9   : > { %vm4598_vm2 = vcmp.gt.f32.partialorder %v16428_v16, 0.5  ;;  %12400 = vmatprep.mubr.msk.bf16.mxu0 %vm1469_vm5, %v19604_v2  ;;  %v3138_v18 = vpack.c.bf16 %v10944_v56, %v10943_v6  ;;  %v5553_v2 = vpop.permute.xlu0 %5552  ;;  %v5582_v56 = vsel %vm1469_vm5, %v16373_v15, 0 }
 0x7ea   : > { %v16444_v37 = vsel %vm4598_vm2, 1.0, %v19566_v12 }
 0x7eb   : > { %v4789_v43 = vpack.c.bf16 %v16441_v44, %v16444_v37 }
 0x7ed   : > { %12339 = vmatmul.mubr.msk.bf16.vlgmr.msra.gmra.mxu1 %vm1469_vm5, %v4789_v43  ;;  %v5547_v59 = vpop.permute.xlu0 %5546 }
 0x7ee   : > { %12405 = vmatpush3.bf16.xpose.msra.mxu1 %v5267_v45  ;;  %v5261_v45 = vsel %vm1469_vm5, %v16302_v27, 0 }
 0x7ef   : > { %12963 = vmatprep.subr.msk.bf16.mxu1 %vm1469_vm5, %v16287_v0 }
 0x7f0   : > { %12401 = vmatmul.mubr.msk.bf16.gmra.mxu0 %vm1469_vm5, %v3138_v18 }
 0x7f1   : > { %12428 = vmatprep.mubr.msk.bf16.mxu0 %vm1469_vm5, %v5335_v50  ;;  %v16470_v50 = vpop.permute.xlu1 %5445 }
 0x7f5   : > { %v5545_v18 = vpop.permute.xlu1 %5544 }
 0x7f6   : > { %12407 = vmatpush3.bf16.xpose.msra.mxu1 %v5264_v31  ;;  %v5551_v31 = vpop.permute.xlu0 %5550 }
 0x7f7   : > { %12964 = vmatprep.subr.msk.bf16.mxu1 %vm1469_vm5, %v16302_v27  ;;  %v16463_v36 = vpop.f32.mrf.mxu1  ;;  %v5579_v27 = vsel %vm1469_vm5, %v16395_v1, 0 }
 0x7f8   : > { %vm4601_vm4 = vcmp.gt.f32.partialorder %v16463_v36, 0.5  ;;  %12429 = vmatmul.mubr.msk.bf16.vlgmr.msra.gmra.mxu0 %vm1469_vm5, %v16365_v47 }
 0x7f9   : > { %v16472_v6 = vpop.f32.mrf.mxu1  ;;  %12453 = vmatpush3.bf16.xpose.msra.mxu0 %v5582_v56  ;;  %12432 = vmatprep.mubr.msk.bf16.mxu0 %vm1469_vm5, %v5339_v21  ;;  %v16479_v0 = vsel %vm4601_vm4, 1.0, %v19566_v12 }
 0x7fa   : > { %vm4600_vm7 = vcmp.gt.f32.partialorder %v16472_v6, 0.5  ;;  %12975 = vmatprep.subr.msk.bf16.mxu0 %vm1469_vm5, %v16395_v1 }
 0x7fb   : > { %v16482_v47 = vsel %vm4600_vm7, 1.0, %v19566_v12  ;;  %v16484_v15 = vpop.f32.mrf.mxu1 }
 0x7fc   : > { %v4790_v43 = vpack.c.bf16 %v16479_v0, %v16482_v47  ;;  %vm4603_vm8 = vcmp.gt.f32.partialorder %v16484_v15, 0.5 }
 0x7fd   : > { %v16489_v21 = vpop.f32.mrf.mxu1  ;;  %v16496_v56 = vsel %vm4603_vm8, 1.0, %v19566_v12 }
 0x7fe   : > { %vm4602_vm9 = vcmp.gt.f32.partialorder %v16489_v21, 0.5  ;;  %12409 = vmatpush3.bf16.xpose.msra.mxu1 %v5261_v45  ;;  %12342 = vmatprep.mubr.msk.bf16.mxu1 %vm1469_vm5, %v4790_v43  ;;  %v16509_v43 = vpop.permute.xlu0 %13158  ;;  %v5549_v45 = vpop.permute.xlu1 %5548 }
 0x7ff   : > { %v16499_v49 = vsel %vm4602_vm9, 1.0, %v19566_v12  ;;  %12965 = vmatprep.subr.msk.bf16.mxu1 %vm1469_vm5, %v16319_v24 }
 0x800   : > { %v4791_v33 = vpack.c.bf16 %v16496_v56, %v16499_v49  ;;  %12433 = vmatmul.mubr.msk.bf16.gmra.mxu0 %vm1469_vm5, %v16384_v20  ;;  %v5576_v20 = vsel %vm1469_vm5, %v5555_v58, 0 }
 0x801   : > { %12455 = vmatpush3.bf16.xpose.msra.mxu0 %v5579_v27  ;;  %12460 = vmatprep.mubr.msk.bf16.mxu0 %vm1469_vm5, %v5545_v18  ;;  %v5573_v27 = vsel %vm1469_vm5, %v5553_v2, 0 }
 0x802   : > { %12343 = vmatmul.mubr.msk.bf16.gmra.mxu1 %vm1469_vm5, %v4791_v33  ;;  %12976 = vmatprep.subr.msk.bf16.mxu0 %vm1469_vm5, %v5555_v58  ;;  %v16516_v13 = vpop.permute.xlu0 %13168  ;;  %v16522_v1 = vpop.permute.xlu1 %13163 }
 0x806   : > { %12411 = vmatpush3.bf16.xpose.msra.mxu1 %v5258_v63  ;;  %v13179_v33 = vpop.permute.xlu0 %13178  ;;  %v16525_v54 = vpop.permute.xlu1 %13173 }
 0x807   : > { %12970 = vmatprep.subr.msk.bf16.mxu1 %vm1469_vm5, %v16352_v30  ;;  %v13180_v18 = vunpack.i.l.bf16 %v13179_v33  ;;  %v13181_v52 = vunpack.i.h.bf16 %v13179_v33  ;;  %v4628_v33 = vsub.f32 1.0, %v16419_v40 }
 0x809   : > { %12457 = vmatpush3.bf16.xpose.msra.mxu0 %v5576_v20  ;;  %v4636_v40 = vmul.f32 %v4628_v33, %v4620_v60  ;;  %v4622_v60 = vmul.f32 0.25, %v16428_v16  ;;  %v4633_v33 = vsub.f32 1.0, %v16479_v0  ;;  %v4632_v16 = vsub.f32 1.0, %v16482_v47 }
 0x80a   : > { %12977 = vmatprep.subr.msk.bf16.mxu0 %vm1469_vm5, %v5553_v2  ;;  %v13189_v63 = vpop.permute.xlu0 %13188  ;;  %v13184_v24 = vpop.permute.xlu1 %13183 }
 0x80b   : > { %v13185_v20 = vunpack.i.l.bf16 %v13184_v24  ;;  %v13186_v2 = vunpack.i.h.bf16 %v13184_v24  ;;  %v4631_v24 = vsub.f32 1.0, %v16441_v44 }
 0x80e   : > { %v16529_v58 = vpop.permute.xlu0 %13198 }
 0x811   : > { %12459 = vmatpush3.bf16.xpose.msra.mxu0 %v5573_v27  ;;  %v13190_v27 = vunpack.i.l.bf16 %v13189_v63 }
 0x812   : > { %12496 = vmatprep.subr.mxu0 %v13180_v18  ;;  %v12298_v51 = vpop.f32.mrf.mxu1 }
 0x818   : > { %12461 = vmatmul.mubr.msk.bf16.vlgmr.msra.gmra.mxu0 %vm1469_vm5, %v5547_v59  ;;  %v13194_v59 = vpop.permute.xlu1 %13193 }
 0x819   : > { %12464 = vmatprep.mubr.msk.bf16.mxu0 %vm1469_vm5, %v5549_v45  ;;  %12497 = vmatpush3.msra.mxu0 %v13180_v18  ;;  %v13191_v45 = vunpack.i.h.bf16 %v13189_v63  ;;  %v16534_v18 = vpop.permute.xlu0 %13208  ;;  %v4623_v63 = vmul.f32 0.25, %v16423_v17  ;;  %v4404_v17 = vpop.f32.mrf.mxu1 }
 0x81a   : > { %12498 = vmatprep.subr.mxu0 %v13181_v52  ;;  %19606 = vst [vmem:[#allocation5_spill] sm:$0xff] %v16534_v18  ;;  %v13196_v18 = vunpack.i.h.bf16 %v13194_v59 }
 0x81b   : > { %12499 = vmatpush3.msra.mxu0 %v13181_v52  ;;  %v4637_v52 = vmul.f32 %v4629_v9, %v4621_v53 }
 0x81c   : > { %12500 = vmatprep.subr.mxu0 %v13185_v20 }
 0x81d   : > { %12501 = vmatpush3.msra.mxu0 %v13185_v20  ;;  %v13195_v20 = vunpack.i.l.bf16 %v13194_v59  ;;  %v16542_v9 = vpop.permute.xlu0 %6547 }
 0x81e   : > { %12502 = vmatprep.subr.mxu0 %v13186_v2 }
 0x81f   : > { %12503 = vmatpush3.msra.mxu0 %v13186_v2 }
 0x820   : > { %12465 = vmatmul.mubr.msk.bf16.gmra.mxu0 %vm1469_vm5, %v5551_v31  ;;  %12504 = vmatprep.subr.mxu0 %v13190_v27  ;;  %v4630_v31 = vsub.f32 1.0, %v16444_v37 }
 0x821   : > { %12505 = vmatpush3.msra.mxu0 %v13190_v27  ;;  %v12270_v46 = vpop.f32.mrf.mxu0  ;;  %v4639_v27 = vmul.f32 %v4631_v24, %v4623_v63  ;;  %v4625_v63 = vmul.f32 0.25, %v16463_v36 }
 0x822   : > { %v4645_v7 = vadd.f32 %v12270_v46, %v4637_v52  ;;  %12506 = vmatprep.subr.mxu0 %v13191_v45  ;;  %v4638_v24 = vmul.f32 %v4630_v31, %v4622_v60  ;;  %v4634_v31 = vsub.f32 1.0, %v16499_v49 }
 0x823   : > { %12507 = vmatpush3.msra.mxu0 %v13191_v45  ;;  %v4251_v2 = vpop.f32.mrf.mxu0 }
 0x824   : > { %vm4653_vm10 = vcmp.gt.f32.partialorder %v4645_v7, 0.5  ;;  %v4644_v4 = vadd.f32 %v4636_v40, %v4251_v2  ;;  %12508 = vmatprep.subr.mxu0 %v13195_v20  ;;  %v4677_v59 = vmul.f32 0.25, %v4645_v7  ;;  %v12301_v7 = vpop.f32.mrf.mxu1 }
 0x825   : > { %v11010_v53 = vsel %vm4653_vm10, 1.0, %v19566_v12  ;;  %12509 = vmatpush3.msra.mxu0 %v13195_v20 }
 0x826   : > { %v4685_v44 = vsub.f32 1.0, %v11010_v53  ;;  %vm4652_vm11 = vcmp.gt.f32.partialorder %v4644_v4, 0.5  ;;  %12510 = vmatprep.subr.mxu0 %v13196_v18  ;;  %v4676_v37 = vmul.f32 0.25, %v4644_v4  ;;  %v4635_v4 = vsub.f32 1.0, %v16496_v56  ;;  %v4414_v56 = vpop.f32.mrf.mxu1 }
 0x827   : > { %v11009_v45 = vsel %vm4652_vm11, 1.0, %v19566_v12  ;;  %v12273_v52 = vpop.f32.mrf.mxu0  ;;  %12511 = vmatpush3.msra.mxu0 %v13196_v18  ;;  %v4624_v18 = vmul.f32 0.25, %v16472_v6  ;;  %v4626_v6 = vmul.f32 0.25, %v16489_v21 }
 0x828   : > { %v4684_v46 = vsub.f32 1.0, %v11009_v45  ;;  %v4792_v40 = vpack.c.bf16 %v11010_v53, %v11009_v45  ;;  %v4647_v20 = vadd.f32 %v12273_v52, %v4639_v27  ;;  %12552 = vmatprep.subr.mxu0 %v16542_v9  ;;  %v4693_v2 = vmul.f32 %v4685_v44, %v4677_v59 }
 0x829   : > { %v4261_v61 = vpop.f32.mrf.mxu0  ;;  %v4641_v27 = vmul.f32 %v4633_v33, %v4625_v63  ;;  %v4627_v44 = vmul.f32 0.25, %v16484_v15  ;;  %v4640_v45 = vmul.f32 %v4632_v16, %v4624_v18  ;;  %v4642_v63 = vmul.f32 %v4634_v31, %v4626_v6 }
 0x82a   : > { %v4692_v0 = vmul.f32 %v4684_v46, %v4676_v37  ;;  %vm4655_vm12 = vcmp.gt.f32.partialorder %v4647_v20, 0.5  ;;  %12346 = vmatprep.mubr.msk.bf16.mxu1 %vm1469_vm5, %v4792_v40  ;;  %v4646_v34 = vadd.f32 %v4638_v24, %v4261_v61  ;;  %v16556_v36 = vadd.f32 %v12298_v51, %v4693_v2  ;;  %v12304_v40 = vpop.f32.mrf.mxu1 }
 0x82b   : > { %v11012_v53 = vsel %vm4655_vm12, 1.0, %v19566_v12  ;;  %v4643_v51 = vmul.f32 %v4635_v4, %v4627_v44 }
 0x82c   : > { %vm4654_vm13 = vcmp.gt.f32.partialorder %v4646_v34, 0.5  ;;  %v16558_v60 = vadd.f32 %v4692_v0, %v4404_v17  ;;  %v4687_v52 = vsub.f32 1.0, %v11012_v53  ;;  %v4678_v15 = vmul.f32 0.25, %v4646_v34 }
 0x82d   : > { %v12276_v47 = vpop.f32.mrf.mxu0  ;;  %v11011_v59 = vsel %vm4654_vm13, 1.0, %v19566_v12  ;;  %vm4709_vm15 = vcmp.gt.f32.partialorder %v16556_v36, 0.5  ;;  %v4679_v17 = vmul.f32 0.25, %v4647_v20 }
 0x82e   : > { %v4649_v61 = vadd.f32 %v12276_v47, %v4641_v27  ;;  %v4686_v37 = vsub.f32 1.0, %v11011_v59  ;;  %v4793_v33 = vpack.c.bf16 %v11012_v53, %v11011_v59  ;;  %vm4708_vm2 = vcmp.gt.f32.partialorder %v16558_v60, 0.5  ;;  %v4424_v59 = vpop.f32.mrf.mxu1 }
 0x82f   : > { %v4271_v46 = vpop.f32.mrf.mxu0  ;;  %v4695_v0 = vmul.f32 %v4687_v52, %v4679_v17  ;;  %v11017_v31 = vsel %vm4708_vm2, 1.0, %v19566_v12 }
 0x830   : > { %vm4657_vm14 = vcmp.gt.f32.partialorder %v4649_v61, 0.5  ;;  %v4648_v49 = vadd.f32 %v4640_v45, %v4271_v46  ;;  %12347 = vmatmul.mubr.msk.bf16.gmra.mxu1 %vm1469_vm5, %v4793_v33  ;;  %v4694_v21 = vmul.f32 %v4686_v37, %v4678_v15  ;;  %v4681_v34 = vmul.f32 0.25, %v4649_v61 }
 0x831   : > { %v11014_v2 = vsel %vm4657_vm14, 1.0, %v19566_v12  ;;  %v12279_v24 = vpop.f32.mrf.mxu0  ;;  %v4703_v61 = vadd.f32 %v12301_v7, %v4695_v0  ;;  %v11018_v15 = vsel %vm4709_vm15, 1.0, %v19566_v12 }
 0x832   : > { %v4689_v16 = vsub.f32 1.0, %v11014_v2  ;;  %vm4656_vm3 = vcmp.gt.f32.partialorder %v4648_v49, 0.5  ;;  %v4651_v4 = vadd.f32 %v12279_v24, %v4643_v51  ;;  %v4680_v27 = vmul.f32 0.25, %v4648_v49  ;;  %v12307_v24 = vpop.f32.mrf.mxu1 }
 0x833   : > { %v11013_v18 = vsel %vm4656_vm3, 1.0, %v19566_v12  ;;  %v4281_v53 = vpop.f32.mrf.mxu0  ;;  %v4702_v6 = vadd.f32 %v4694_v21, %v4414_v56  ;;  %vm4711_vm10 = vcmp.gt.f32.partialorder %v4703_v61, 0.5 }
 0x834   : > { %v4688_v44 = vsub.f32 1.0, %v11013_v18  ;;  %v4794_v20 = vpack.c.bf16 %v11014_v2, %v11013_v18  ;;  %v4650_v47 = vadd.f32 %v4642_v63, %v4281_v53  ;;  %v4697_v45 = vmul.f32 %v4689_v16, %v4681_v34  ;;  %v4434_v0 = vpop.f32.mrf.mxu1 }
 0x835   : > { %vm4659_vm4 = vcmp.gt.f32.partialorder %v4651_v4, 0.5  ;;  %v4796_v63 = vpack.c.bf16 %v11018_v15, %v11017_v31  ;;  %v4683_v21 = vmul.f32 0.25, %v4651_v4  ;;  %vm4710_vm8 = vcmp.gt.f32.partialorder %v4702_v6, 0.5 }
 0x836   : > { %v4696_v37 = vmul.f32 %v4688_v44, %v4680_v27  ;;  %v11016_v52 = vsel %vm4659_vm4, 1.0, %v19566_v12  ;;  %vm4658_vm7 = vcmp.gt.f32.partialorder %v4650_v47, 0.5  ;;  %12350 = vmatprep.mubr.msk.bf16.mxu1 %vm1469_vm5, %v4794_v20  ;;  %v4682_v51 = vmul.f32 0.25, %v4650_v47 }
 0x837   : > { %v4691_v33 = vsub.f32 1.0, %v11016_v52  ;;  %v11015_v46 = vsel %vm4658_vm7, 1.0, %v19566_v12  ;;  %v4705_v56 = vadd.f32 %v12304_v40, %v4697_v45  ;;  %v11019_v34 = vsel %vm4710_vm8, 1.0, %v19566_v12 }
 0x838   : > { %v4704_v49 = vadd.f32 %v4696_v37, %v4424_v59  ;;  %v4690_v17 = vsub.f32 1.0, %v11015_v46  ;;  %v4795_v2 = vpack.c.bf16 %v11016_v52, %v11015_v46  ;;  %v11020_v40 = vsel %vm4711_vm10, 1.0, %v19566_v12 }
 0x839   : > { %v4699_v7 = vmul.f32 %v4691_v33, %v4683_v21  ;;  %vm4713_vm11 = vcmp.gt.f32.partialorder %v4705_v56, 0.5  ;;  %v4797_v4 = vpack.c.bf16 %v11020_v40, %v11019_v34  ;;  %v4741_v37 = vsub.f32 1.0, %v11018_v15 }
 0x83a   : > { %v4698_v16 = vmul.f32 %v4690_v17, %v4682_v51  ;;  %12351 = vmatmul.mubr.msk.bf16.gmra.mxu1 %vm1469_vm5, %v4795_v2  ;;  %vm4712_vm9 = vcmp.gt.f32.partialorder %v4704_v49, 0.5  ;;  %v11022_v44 = vsel %vm4713_vm11, 1.0, %v19566_v12  ;;  %v4733_v52 = vmul.f32 0.25, %v16556_v36 }
 0x83b   : > { %12354 = vmatprep.mubr.msk.bf16.mxu1 %vm1469_vm5, %v4796_v63  ;;  %v11021_v53 = vsel %vm4712_vm9, 1.0, %v19566_v12  ;;  %v4707_v27 = vadd.f32 %v12307_v24, %v4699_v7  ;;  %v4740_v33 = vsub.f32 1.0, %v11017_v31  ;;  %v4732_v51 = vmul.f32 0.25, %v16558_v60 }
 0x83c   : > { %v4706_v18 = vadd.f32 %v4698_v16, %v4434_v0  ;;  %v4798_v20 = vpack.c.bf16 %v11022_v44, %v11021_v53  ;;  %v4749_v46 = vmul.f32 %v4741_v37, %v4733_v52  ;;  %v4743_v17 = vsub.f32 1.0, %v11020_v40 }
 0x83d   : > { %vm4715_vm13 = vcmp.gt.f32.partialorder %v4707_v27, 0.5  ;;  %v4742_v24 = vsub.f32 1.0, %v11019_v34  ;;  %v4745_v63 = vsub.f32 1.0, %v11022_v44  ;;  %v4748_v16 = vmul.f32 %v4740_v33, %v4732_v51 }
 0x83e   : > { %vm4714_vm12 = vcmp.gt.f32.partialorder %v4706_v18, 0.5  ;;  %v11024_v59 = vsel %vm4715_vm13, 1.0, %v19566_v12  ;;  %v4735_v7 = vmul.f32 0.25, %v4703_v61  ;;  %v4744_v10 = vsub.f32 1.0, %v11021_v53 }
 0x83f   : > { %v11023_v47 = vsel %vm4714_vm12, 1.0, %v19566_v12  ;;  %v4736_v37 = vmul.f32 0.25, %v4704_v49  ;;  %v4739_v40 = vmul.f32 0.25, %v4707_v27  ;;  %v4747_v52 = vsub.f32 1.0, %v11024_v59 }
 0x840   : > { %v4799_v45 = vpack.c.bf16 %v11024_v59, %v11023_v47  ;;  %v4751_v15 = vmul.f32 %v4743_v17, %v4735_v7  ;;  %v4738_v49 = vmul.f32 0.25, %v4706_v18 }
 0x841   : > { %v4755_v27 = vmul.f32 %v4747_v52, %v4739_v40 }
 0x842   : > { %12355 = vmatmul.mubr.msk.bf16.gmra.mxu1 %vm1469_vm5, %v4797_v4  ;;  %v4734_v4 = vmul.f32 0.25, %v4702_v6  ;;  %v4752_v6 = vmul.f32 %v4744_v10, %v4736_v37 }
 0x843   : > { %12358 = vmatprep.mubr.msk.bf16.mxu1 %vm1469_vm5, %v4798_v20  ;;  %v4737_v20 = vmul.f32 0.25, %v4705_v56  ;;  %v4746_v56 = vsub.f32 1.0, %v11023_v47 }
 0x844   : > { %v4750_v36 = vmul.f32 %v4742_v24, %v4734_v4 }
 0x845   : > { %v4753_v31 = vmul.f32 %v4745_v63, %v4737_v20 }
 0x84a   : > { %12359 = vmatmul.mubr.msk.bf16.gmra.mxu1 %vm1469_vm5, %v4799_v45 }
 0x870   : > { %v12326_v2 = vpop.f32.mrf.mxu0 }
 0x871   : > { %v4757_v21 = vadd.f32 %v12326_v2, %v4749_v46 }
 0x872   : > { %v4557_v0 = vpop.f32.mrf.mxu0 }
 0x873   : > { %vm4765_vm14 = vcmp.gt.f32.partialorder %v4757_v21, 0.5  ;;  %v4756_v45 = vadd.f32 %v4748_v16, %v4557_v0  ;;  %v4754_v16 = vmul.f32 %v4746_v56, %v4738_v49 }
 0x874   : > { %v12329_v35 = vpop.f32.mrf.mxu0  ;;  %v11026_v34 = vsel %vm4765_vm14, 1.0, %v19566_v12 }
 0x875   : > { %vm4764_vm15 = vcmp.gt.f32.partialorder %v4756_v45, 0.5  ;;  %v4759_v60 = vadd.f32 %v12329_v35, %v4751_v15 }
 0x876   : > { %v11025_v44 = vsel %vm4764_vm15, 1.0, %v19566_v12  ;;  %v4567_v61 = vpop.f32.mrf.mxu0  ;;  %v12332_v33 = vpop.f32.mrf.mxu1 }
 0x877   : > { %v4800_v53 = vpack.c.bf16 %v11026_v34, %v11025_v44  ;;  %vm4767_vm2 = vcmp.gt.f32.partialorder %v4759_v60, 0.5  ;;  %v4758_v46 = vadd.f32 %v4750_v36, %v4567_v61  ;;  %v4761_v51 = vadd.f32 %v12332_v33, %v4753_v31 }
 0x878   : > { %v4577_v17 = vpop.f32.mrf.mxu1  ;;  %v16591_v2 = vpop.f32.mrf.mxu0  ;;  %v11028_v59 = vsel %vm4767_vm2, 1.0, %v19566_v12 }
 0x879   : > { %vm4766_vm3 = vcmp.gt.f32.partialorder %v4758_v46, 0.5  ;;  %vm4769_vm4 = vcmp.gt.f32.partialorder %v4761_v51, 0.5  ;;  %v4760_v35 = vadd.f32 %v4752_v6, %v4577_v17  ;;  %12362 = vmatprep.mubr.msk.bf16.mxu1 %vm1469_vm5, %v4800_v53  ;;  %v5477_v6 = vsel %vm1469_vm5, %v16352_v30, 0 }
 0x87a   : > { %v11027_v24 = vsel %vm4766_vm3, 1.0, %v19566_v12  ;;  %v12335_v10 = vpop.f32.mrf.mxu1  ;;  %v16596_v47 = vpop.f32.mrf.mxu0  ;;  %v11030_v7 = vsel %vm4769_vm4, 1.0, %v19566_v12 }
 0x87b   : > { %v4801_v63 = vpack.c.bf16 %v11028_v59, %v11027_v24  ;;  %vm4768_vm7 = vcmp.gt.f32.partialorder %v4760_v35, 0.5  ;;  %v4763_v21 = vadd.f32 %v12335_v10, %v4755_v27  ;;  %v13160_v27 = vunpack.i.l.bf16 %v16509_v43 }
 0x87c   : > { %v11029_v18 = vsel %vm4768_vm7, 1.0, %v19566_v12  ;;  %v4587_v0 = vpop.f32.mrf.mxu1  ;;  %v16600_v4 = vpop.f32.mrf.mxu0  ;;  %v5468_v59 = vsel %vm1469_vm5, %v16425_v25, 0 }
 0x87d   : > { %v4802_v20 = vpack.c.bf16 %v11030_v7, %v11029_v18  ;;  %v4762_v45 = vadd.f32 %v4754_v16, %v4587_v0  ;;  %12363 = vmatmul.mubr.msk.bf16.gmra.mxu1 %vm1469_vm5, %v4801_v63  ;;  %vm4771_vm8 = vcmp.gt.f32.partialorder %v4763_v21, 0.5  ;;  %v13161_v21 = vunpack.i.h.bf16 %v16509_v43 }
 0x87e   : > { %v16603_v15 = vpop.f32.mrf.mxu0  ;;  %v11032_v37 = vsel %vm4771_vm8, 1.0, %v19566_v12  ;;  %v13165_v18 = vunpack.i.l.bf16 %v16522_v1 }
 0x87f   : > { %19607 = vst [vmem:[#allocation13_spill] sm:$0xff] %v16603_v15  ;;  %vm4770_vm9 = vcmp.gt.f32.partialorder %v4762_v45, 0.5  ;;  %12366 = vmatprep.mubr.msk.bf16.mxu1 %vm1469_vm5, %v4802_v20  ;;  %v13166_v20 = vunpack.i.h.bf16 %v16522_v1  ;;  %v13170_v45 = vunpack.i.l.bf16 %v16516_v13 }
 0x880   : > { %v11031_v36 = vsel %vm4770_vm9, 1.0, %v19566_v12  ;;  %v16607_v31 = vpop.f32.mrf.mxu0 }
 0x881   : > { %19608 = vst [vmem:[#allocation2_spill] sm:$0xff] %v16607_v31  ;;  %v4803_v40 = vpack.c.bf16 %v11032_v37, %v11031_v36  ;;  %v13171_v37 = vunpack.i.h.bf16 %v16516_v13 }
 0x882   : > { %v16610_v60 = vpop.f32.mrf.mxu0 }
 0x883   : > { %19609 = vst [vmem:[#allocation31_spill] sm:$0xff] %v16610_v60 }
 0x884   : > { %v16612_v52 = vpop.f32.mrf.mxu0 }
 0x885   : > { %19610 = vst [vmem:[#allocation34_spill] sm:$0xff] %v16612_v52  ;;  %12367 = vmatmul.mubr.msk.bf16.gmra.mxu1 %vm1469_vm5, %v4803_v40 }
 0x886   : > { %v16615_v34 = vpop.f32.mrf.mxu0  ;;  %12412 = vmatprep.mubr.msk.bf16.mxu1 %vm1469_vm5, %v16337_v23 }
 0x887   : > { %19611 = vst [vmem:[#allocation11_spill] sm:$0xff] %v16615_v34 }
 0x888   : > { %v16619_v44 = vpop.f32.mrf.mxu0 }
 0x889   : > { %19612 = vst [vmem:[#allocation62_spill] sm:$0xff] %v16619_v44 }
 0x88a   : > { %v16621_v61 = vpop.f32.mrf.mxu0 }
 0x88b   : > { %19613 = vst [vmem:[#allocation36_spill] sm:$0xff] %v16621_v61 }
 0x88c   : > { %v16623_v33 = vpop.f32.mrf.mxu0 }
 0x88d   : > { %19614 = vst [vmem:[#allocation37_spill] sm:$0xff] %v16623_v33  ;;  %12413 = vmatmul.mubr.msk.bf16.vlgmr.msra.gmra.mxu1 %vm1469_vm5, %v16328_v3  ;;  %v5474_v3 = vsel %vm1469_vm5, %v16341_v62, 0 }
 0x88e   : > { %12437 = vmatpush3.bf16.xpose.msra.mxu1 %v5477_v6  ;;  %v16629_v56 = vpop.f32.mrf.mxu0  ;;  %12416 = vmatprep.mubr.msk.bf16.mxu1 %vm1469_vm5, %v16369_v22  ;;  %v16713_v6 = vld [vmem:[%s19298_s5 + $0x90] sm:$0xff] }
 0x88f   : > { %19615 = vst [vmem:[#allocation33_spill] sm:$0xff] %v16629_v56  ;;  %12971 = vmatprep.subr.msk.bf16.mxu1 %vm1469_vm5, %v16341_v62 }
 0x890   : > { %v16635_v23 = vpop.f32.mrf.mxu0 }
 0x891   : > { %19616 = vst [vmem:[#allocation32_spill] sm:$0xff] %v16635_v23 }
 0x892   : > { %v16637_v53 = vpop.f32.mrf.mxu0 }
 0x893   : > { %19617 = vst [vmem:[#allocation39_spill] sm:$0xff] %v16637_v53 }
 0x894   : > { %v16639_v46 = vpop.f32.mrf.mxu0 }
 0x895   : > { %19618 = vst [vmem:[#allocation41_spill] sm:$0xff] %v16639_v46  ;;  %12417 = vmatmul.mubr.msk.bf16.gmra.mxu1 %vm1469_vm5, %v16354_v28  ;;  %v5471_v28 = vsel %vm1469_vm5, %v16392_v42, 0 }
 0x896   : > { %12439 = vmatpush3.bf16.xpose.msra.mxu1 %v5474_v3  ;;  %v16645_v30 = vpop.f32.mrf.mxu0  ;;  %12444 = vmatprep.mubr.msk.bf16.mxu1 %vm1469_vm5, %v16450_v38  ;;  %v13176_v3 = vunpack.i.h.bf16 %v16525_v54 }
 0x897   : > { %19619 = vst [vmem:[#allocation40_spill] sm:$0xff] %v16645_v30  ;;  %12972 = vmatprep.subr.msk.bf16.mxu1 %vm1469_vm5, %v16392_v42 }
 0x898   : > { %v16651_v22 = vpop.f32.mrf.mxu0 }
 0x899   : > { %19620 = vst [vmem:[#allocation38_spill] sm:$0xff] %v16651_v22 }
 0x89a   : > { %v16653_v51 = vpop.f32.mrf.mxu0 }
 0x89b   : > { %19621 = vst [vmem:[#allocation49_spill] sm:$0xff] %v16653_v51 }
 0x89c   : > { %v16655_v17 = vpop.f32.mrf.mxu0 }
 0x89d   : > { %19622 = vst [vmem:[#allocation42_spill] sm:$0xff] %v16655_v17 }
 0x89e   : > { %12441 = vmatpush3.bf16.xpose.msra.mxu1 %v5471_v28  ;;  %v16659_v62 = vpop.f32.mrf.mxu0  ;;  %v16719_v28 = vld [vmem:[%s19298_s5 + $0x80] sm:$0xff] }
 0x89f   : > { %19623 = vst [vmem:[#allocation46_spill] sm:$0xff] %v16659_v62  ;;  %12973 = vmatprep.subr.msk.bf16.mxu1 %vm1469_vm5, %v16425_v25 }
 0x8a0   : > { %v16663_v49 = vpop.f32.mrf.mxu0 }
 0x8a1   : > { %19624 = vst [vmem:[#allocation48_spill] sm:$0xff] %v16663_v49 }
 0x8a2   : > { %v16665_v38 = vpop.f32.mrf.mxu0 }
 0x8a3   : > { %19625 = vst [vmem:[#allocation35_spill] sm:$0xff] %v16665_v38 }
 0x8a4   : > { %v16667_v35 = vpop.f32.mrf.mxu0 }
 0x8a5   : > { %19626 = vst [vmem:[#allocation50_spill] sm:$0xff] %v16667_v35 }
 0x8a6   : > { %12443 = vmatpush3.bf16.xpose.msra.mxu1 %v5468_v59  ;;  %v16672_v24 = vpop.f32.mrf.mxu0 }
 0x8a7   : > { %19627 = vst [vmem:[#allocation45_spill] sm:$0xff] %v16672_v24  ;;  %12468 = vmatprep.subr.mxu1 %v13160_v27 }
 0x8a8   : > { %v16674_v42 = vpop.f32.mrf.mxu0 }
 0x8a9   : > { %19628 = vst [vmem:[#allocation44_spill] sm:$0xff] %v16674_v42 }
 0x8aa   : > { %v16676_v10 = vpop.f32.mrf.mxu0 }
 0x8ab   : > { %19629 = vst [vmem:[#allocation43_spill] sm:$0xff] %v16676_v10 }
 0x8ac   : > { %v16678_v63 = vpop.f32.mrf.mxu0 }
 0x8ad   : > { %19630 = vst [vmem:[#allocation47_spill] sm:$0xff] %v16678_v63  ;;  %v12340_v16 = vpop.f32.mrf.mxu1  ;;  %12445 = vmatmul.mubr.msk.bf16.vlgmr.msra.gmra.mxu1 %vm1469_vm5, %v16408_v48 }
 0x8ae   : > { %v16684_v7 = vadd.f32 %v16591_v2, %v12340_v16  ;;  %12448 = vmatprep.mubr.msk.bf16.mxu1 %vm1469_vm5, %v16432_v41  ;;  %12469 = vmatpush3.msra.mxu1 %v13160_v27  ;;  %v16688_v25 = vpop.f32.mrf.mxu0  ;;  %v19408_v27 = vunpack.i.l.bf16 %v16529_v58 }
 0x8af   : > { %19632 = vst [vmem:[#allocation55_spill] sm:$0xff] %v16688_v25  ;;  %v16691_v0 = vpop.f32.mrf.mxu1  ;;  %12470 = vmatprep.subr.mxu1 %v13161_v21  ;;  %v16768_v25 = vld [vmem:[%s19298_s5 + $0xb8] sm:$0xff] }
 0x8b0   : > { %19631 = vst [vmem:[#allocation54_spill] sm:$0xff] %v16684_v7  ;;  %12471 = vmatpush3.msra.mxu1 %v13161_v21  ;;  %v16693_v43 = vpop.f32.mrf.mxu0 }
 0x8b1   : > { %19633 = vst [vmem:[#allocation57_spill] sm:$0xff] %v16693_v43  ;;  %v12341_v48 = vpop.f32.mrf.mxu1  ;;  %12472 = vmatprep.subr.mxu1 %v13165_v18 }
 0x8b2   : > { %v16697_v2 = vadd.f32 %v16600_v4, %v12341_v48  ;;  %12473 = vmatpush3.msra.mxu1 %v13165_v18  ;;  %v16699_v41 = vpop.f32.mrf.mxu0  ;;  %v13175_v4 = vunpack.i.l.bf16 %v16525_v54  ;;  %v16728_v54 = vld [vmem:[%s19298_s5 + $0x98] sm:$0xff] }
 0x8b3   : > { %19635 = vst [vmem:[#allocation52_spill] sm:$0xff] %v16699_v41  ;;  %12474 = vmatprep.subr.mxu1 %v13166_v20 }
 0x8b4   : > { %19634 = vst [vmem:[#allocation56_spill] sm:$0xff] %v16697_v2  ;;  %12475 = vmatpush3.msra.mxu1 %v13166_v20  ;;  %v16702_v36 = vpop.f32.mrf.mxu0 }
 0x8b5   : > { %19636 = vst [vmem:[#allocation53_spill] sm:$0xff] %v16702_v36  ;;  %12449 = vmatmul.mubr.msk.bf16.gmra.mxu1 %vm1469_vm5, %v16470_v50  ;;  %12476 = vmatprep.subr.mxu1 %v13170_v45 }
 0x8b6   : > { %12477 = vmatpush3.msra.mxu1 %v13170_v45  ;;  %v16707_v1 = vpop.f32.mrf.mxu0 }
 0x8b7   : > { %19637 = vst [vmem:[#allocation51_spill] sm:$0xff] %v16707_v1  ;;  %12478 = vmatprep.subr.mxu1 %v13171_v37 }
 0x8b8   : > { %12479 = vmatpush3.msra.mxu1 %v13171_v37  ;;  %v12430_v40 = vpop.f32.mrf.mxu0  ;;  %v16740_v37 = vld [vmem:[%s19298_s5 + $0x88] sm:$0xff] }
 0x8b9   : > { %v5659_v13 = vmul.f32 0.35355338, %v12430_v40  ;;  %12480 = vmatprep.subr.mxu1 %v13175_v4 }
 0x8ba   : > { %12481 = vmatpush3.msra.mxu1 %v13175_v4  ;;  %v5408_v50 = vpop.f32.mrf.mxu0 }
 0x8bb   : > { %v16723_v59 = vadd.f32 %v16713_v6, %v5659_v13  ;;  %v5657_v21 = vmul.f32 0.35355338, %v5408_v50  ;;  %12482 = vmatprep.subr.mxu1 %v13176_v3  ;;  %v16748_v13 = vld [vmem:[%s19298_s5 + $0xb0] sm:$0xff] }
 0x8bc   : > { %12483 = vmatpush3.msra.mxu1 %v13176_v3  ;;  %v12431_v16 = vpop.f32.mrf.mxu0 }
 0x8bd   : > { %v16731_v18 = vadd.f32 %v16719_v28, %v5657_v21  ;;  %v5660_v20 = vmul.f32 0.35355338, %v12431_v16  ;;  %12524 = vmatprep.subr.mxu1 %v19408_v27  ;;  %v5752_v48 = vsel %vm1934_vm6, %v16723_v59, -inf }
 0x8be   : > { %5753 = vmax.xlane.f32.xlu0 %v5752_v48  ;;  %v5411_v45 = vpop.f32.mrf.mxu0 }
 0x8bf   : > { %v16743_v4 = vadd.f32 %v16728_v54, %v5660_v20  ;;  %v5658_v40 = vmul.f32 0.35355338, %v5411_v45  ;;  %v5746_v21 = vsel %vm1934_vm6, %v16731_v18, -inf  ;;  %v16760_v45 = vld [vmem:[%s19298_s5 + $0xa0] sm:$0xff] }
 0x8c0   : > { %v12434_v3 = vpop.f32.mrf.mxu0 }
 0x8c1   : > { %v5663_v50 = vmul.f32 0.35355338, %v12434_v3  ;;  %v5755_v16 = vsel %vm1934_vm6, %v16743_v4, -inf  ;;  %v16755_v48 = vadd.f32 %v16740_v37, %v5658_v40 }
 0x8c2   : > { %5747 = vmax.xlane.f32.xlu0 %v5746_v21  ;;  %5756 = vmax.xlane.f32.xlu1 %v5755_v16  ;;  %v5424_v20 = vpop.f32.mrf.mxu0 }
 0x8c3   : > { %v16763_v27 = vadd.f32 %v16748_v13, %v5663_v50  ;;  %v5661_v3 = vmul.f32 0.35355338, %v5424_v20  ;;  %v5749_v16 = vsel %vm1934_vm6, %v16755_v48, -inf  ;;  %v16780_v20 = vld [vmem:[%s19298_s5 + $0xa8] sm:$0xff] }
 0x8c4   : > { %v12435_v1 = vpop.f32.mrf.mxu0 }
 0x8c5   : > { %v16771_v40 = vadd.f32 %v16760_v45, %v5661_v3  ;;  %v5664_v21 = vmul.f32 0.35355338, %v12435_v1  ;;  %v5764_v24 = vsel %vm1934_vm6, %v16763_v27, -inf }
 0x8c6   : > { %5750 = vmax.xlane.f32.xlu1 %v5749_v16  ;;  %5765 = vmax.xlane.f32.xlu0 %v5764_v24  ;;  %v5427_v50 = vpop.f32.mrf.mxu0 }
 0x8c7   : > { %v16783_v62 = vadd.f32 %v16768_v25, %v5664_v21  ;;  %v5662_v3 = vmul.f32 0.35355338, %v5427_v50  ;;  %v5758_v1 = vsel %vm1934_vm6, %v16771_v40, -inf }
 0x8c9   : > { %v5767_v30 = vsel %vm1934_vm6, %v16783_v62, -inf  ;;  %v16790_v53 = vadd.f32 %v16780_v20, %v5662_v3 }
 0x8ca   : > { %5759 = vmax.xlane.f32.xlu0 %v5758_v1  ;;  %5768 = vmax.xlane.f32.xlu1 %v5767_v30 }
 0x8cb   : > { %v5761_v24 = vsel %vm1934_vm6, %v16790_v53, -inf }
 0x8ce   : > { %5762 = vmax.xlane.f32.xlu1 %v5761_v24 }
 0x8d8   : > { %v12462_v16 = vpop.f32.mrf.mxu0 }
 0x8d9   : > { %v5675_v56 = vmul.f32 0.35355338, %v12462_v16 }
 0x8da   : > { %v5618_v21 = vpop.f32.mrf.mxu0 }
 0x8db   : > { %v16795_v50 = vadd.f32 %v16713_v6, %v5675_v56  ;;  %v5673_v61 = vmul.f32 0.35355338, %v5618_v21 }
 0x8dc   : > { %v12463_v34 = vpop.f32.mrf.mxu0 }
 0x8dd   : > { %v16798_v60 = vadd.f32 %v16719_v28, %v5673_v61  ;;  %v5676_v15 = vmul.f32 0.35355338, %v12463_v34  ;;  %v5800_v3 = vsel %vm1934_vm6, %v16795_v50, -inf }
 0x8de   : > { %5801 = vmax.xlane.f32.xlu0 %v5800_v3  ;;  %v5621_v30 = vpop.f32.mrf.mxu0 }
 0x8df   : > { %v16803_v1 = vadd.f32 %v16728_v54, %v5676_v15  ;;  %v5674_v24 = vmul.f32 0.35355338, %v5621_v30  ;;  %v5794_v56 = vsel %vm1934_vm6, %v16798_v60, -inf }
 0x8e0   : > { %v12466_v16 = vpop.f32.mrf.mxu0 }
 0x8e1   : > { %v5679_v36 = vmul.f32 0.35355338, %v12466_v16  ;;  %v5803_v21 = vsel %vm1934_vm6, %v16803_v1, -inf  ;;  %v16810_v61 = vadd.f32 %v16740_v37, %v5674_v24 }
 0x8e2   : > { %5795 = vmax.xlane.f32.xlu0 %v5794_v56  ;;  %5804 = vmax.xlane.f32.xlu1 %v5803_v21  ;;  %v5634_v34 = vpop.f32.mrf.mxu0 }
 0x8e3   : > { %v16813_v3 = vadd.f32 %v16748_v13, %v5679_v36  ;;  %v5677_v15 = vmul.f32 0.35355338, %v5634_v34  ;;  %v5797_v43 = vsel %vm1934_vm6, %v16810_v61, -inf }
 0x8e4   : > { %v12467_v41 = vpop.f32.mrf.mxu0 }
 0x8e5   : > { %v16816_v30 = vadd.f32 %v16760_v45, %v5677_v15  ;;  %v5680_v16 = vmul.f32 0.35355338, %v12467_v41  ;;  %v5812_v63 = vsel %vm1934_vm6, %v16813_v3, -inf }
 0x8e6   : > { %5798 = vmax.xlane.f32.xlu1 %v5797_v43  ;;  %5813 = vmax.xlane.f32.xlu0 %v5812_v63  ;;  %v5637_v24 = vpop.f32.mrf.mxu0  ;;  %v16834_v63 = vpop.f32.mrf.mxu1 }
 0x8e7   : > { %v16823_v56 = vadd.f32 %v16768_v25, %v5680_v16  ;;  %v5678_v36 = vmul.f32 0.35355338, %v5637_v24  ;;  %v5806_v21 = vsel %vm1934_vm6, %v16816_v30, -inf  ;;  %19638 = vst [vmem:[#allocation61_spill] sm:$0xff] %v16834_v63 }
 0x8e8   : > { %v16836_v15 = vpop.f32.mrf.mxu1 }
 0x8e9   : > { %v5815_v34 = vsel %vm1934_vm6, %v16823_v56, -inf  ;;  %v16830_v41 = vadd.f32 %v16780_v20, %v5678_v36  ;;  %19639 = vst [vmem:[#allocation59_spill] sm:$0xff] %v16836_v15 }
 0x8ea   : > { %5807 = vmax.xlane.f32.xlu0 %v5806_v21  ;;  %5816 = vmax.xlane.f32.xlu1 %v5815_v34  ;;  %v16838_v16 = vpop.f32.mrf.mxu1 }
 0x8eb   : > { %v5809_v43 = vsel %vm1934_vm6, %v16830_v41, -inf  ;;  %19640 = vst [vmem:[#allocation60_spill] sm:$0xff] %v16838_v16 }
 0x8ec   : > { %v16840_v24 = vpop.f32.mrf.mxu1 }
 0x8ed   : > { %19641 = vst [vmem:[#allocation58_spill] sm:$0xff] %v16840_v24 }
 0x8ee   : > { %5810 = vmax.xlane.f32.xlu1 %v5809_v43  ;;  %v16842_v10 = vpop.f32.mrf.mxu1 }
 0x8ef   : > { %19642 = vst [vmem:[#allocation63_spill] sm:$0xff] %v16842_v10 }
 0x8f0   : > { %v16844_v42 = vpop.f32.mrf.mxu1 }
 0x8f1   : > { %19643 = vst [vmem:[#allocation64_spill] sm:$0xff] %v16844_v42 }
 0x8f2   : > { %v16846_v36 = vpop.f32.mrf.mxu1 }
 0x8f3   : > { %19644 = vst [vmem:[#allocation65_spill] sm:$0xff] %v16846_v36 }
 0x8f4   : > { %v16848_v21 = vpop.f32.mrf.mxu1 }
 0x8f5   : > { %19645 = vst [vmem:[#allocation66_spill] sm:$0xff] %v16848_v21 }
 0x8f6   : > { %v16850_v34 = vpop.f32.mrf.mxu1 }
 0x8f7   : > { %19646 = vst [vmem:[#allocation67_spill] sm:$0xff] %v16850_v34 }
 0x8fa   : > { %v16852_v35 = vpop.f32.mrf.mxu1 }
 0x8fb   : > { %19647 = vst [vmem:[#allocation68_spill] sm:$0xff] %v16852_v35 }
 0x8fc   : > { %v16854_v43 = vpop.f32.mrf.mxu1 }
 0x8fd   : > { %19648 = vst [vmem:[#allocation69_spill] sm:$0xff] %v16854_v43 }
 0x8fe   : > { %v16856_v63 = vpop.f32.mrf.mxu1 }
 0x8ff   : > { %19649 = vst [vmem:[#allocation70_spill] sm:$0xff] %v16856_v63 }
 0x900   : > { %v16858_v38 = vpop.f32.mrf.mxu1 }
 0x901   : > { %19650 = vst [vmem:[#allocation71_spill] sm:$0xff] %v16858_v38 }
 0x902   : > { %v16860_v16 = vpop.f32.mrf.mxu1 }
 0x903   : > { %19651 = vst [vmem:[#allocation72_spill] sm:$0xff] %v16860_v16  ;;  %v16882_v16 = vpop.permute.xlu1 %13203 }
 0x904   : > { %v16862_v49 = vpop.f32.mrf.mxu1 }
 0x905   : > { %19652 = vst [vmem:[#allocation73_spill] sm:$0xff] %v16862_v49 }
 0x906   : > { %v16864_v10 = vpop.f32.mrf.mxu1 }
 0x907   : > { %19653 = vst [vmem:[#allocation74_spill] sm:$0xff] %v16864_v10 }
 0x908   : > { %v16866_v17 = vpop.f32.mrf.mxu1 }
 0x909   : > { %19654 = vst [vmem:[#allocation75_spill] sm:$0xff] %v16866_v17 }
 0x90a   : > { %v16868_v36 = vpop.f32.mrf.mxu1 }
 0x90b   : > { %19655 = vst [vmem:[#allocation76_spill] sm:$0xff] %v16868_v36 }
 0x90c   : > { %v16870_v51 = vpop.f32.mrf.mxu1 }
 0x90d   : > { %19656 = vst [vmem:[#allocation77_spill] sm:$0xff] %v16870_v51  ;;  %v16890_v51 = vpop.permute.xlu1 %13213 }
 0x90e   : > { %v16872_v34 = vpop.f32.mrf.mxu1 }
 0x90f   : > { %19657 = vst [vmem:[#allocation78_spill] sm:$0xff] %v16872_v34 }
 0x910   : > { %v16874_v22 = vpop.f32.mrf.mxu1 }
 0x911   : > { %19658 = vst [vmem:[#allocation79_spill] sm:$0xff] %v16874_v22 }
 0x93d   : > { %v16876_v43 = vpop.f32.mrf.mxu1 }
 0x93e   : > { %19659 = vst [vmem:[#allocation80_spill] sm:$0xff] %v16876_v43 }
 0x93f   : > { %v16878_v46 = vpop.f32.mrf.mxu1 }
 0x940   : > { %19660 = vst [vmem:[#allocation81_spill] sm:$0xff] %v16878_v46 }
 0x941   : > { %v16880_v38 = vpop.f32.mrf.mxu1 }
 0x942   : > { %19661 = vst [vmem:[#allocation82_spill] sm:$0xff] %v16880_v38 }
 0x943   : > { %v16884_v49 = vpop.f32.mrf.mxu1 }
 0x944   : > { %19662 = vst [vmem:[#allocation83_spill] sm:$0xff] %v16884_v49 }
 0x945   : > { %v16886_v10 = vpop.f32.mrf.mxu1 }
 0x946   : > { %19663 = vst [vmem:[#allocation84_spill] sm:$0xff] %v16886_v10 }
 0x947   : > { %v16888_v17 = vpop.f32.mrf.mxu1  ;;  %v5754_v36 = vpop.xlane.xlu0 %5753 }
 0x948   : > { %19664 = vst [vmem:[#allocation85_spill] sm:$0xff] %v16888_v17  ;;  %v5828_v34 = vsub.f32 %v16723_v59, %v5754_v36 }
 0x949   : > { %v16893_v22 = vpop.f32.mrf.mxu1 }
 0x94a   : > { %19665 = vst [vmem:[#allocation86_spill] sm:$0xff] %v16893_v22  ;;  %v5870_v43 = vmul.f32 1.442695, %v5828_v34 }
 0x94b   : > { %v16895_v63 = vpop.f32.mrf.mxu1  ;;  %v5748_v46 = vpop.xlane.xlu0 %5747 }
 0x94c   : > { %19666 = vst [vmem:[#allocation87_spill] sm:$0xff] %v16895_v63  ;;  %v5826_v38 = vsub.f32 %v16731_v18, %v5748_v46  ;;  %v5757_v23 = vpop.xlane.xlu1 %5756  ;;  %13609 = vpow2.f32 %v5870_v43 }
 0x94d   : > { %v12414_v35 = vpop.f32.mrf.mxu1  ;;  %v5829_v10 = vsub.f32 %v16743_v4, %v5757_v23 }
 0x94e   : > { %v5866_v49 = vmul.f32 1.442695, %v5826_v38  ;;  %v5651_v33 = vmul.f32 0.35355338, %v12414_v35 }
 0x94f   : > { %v5303_v17 = vpop.f32.mrf.mxu1  ;;  %v5766_v21 = vpop.xlane.xlu0 %5765  ;;  %v5872_v22 = vmul.f32 1.442695, %v5829_v10 }
 0x950   : > { %13611 = vpow2.f32 %v5866_v49  ;;  %v16900_v59 = vadd.f32 %v16713_v6, %v5651_v33  ;;  %v5649_v36 = vmul.f32 0.35355338, %v5303_v17  ;;  %v5832_v34 = vsub.f32 %v16763_v27, %v5766_v21  ;;  %v5751_v18 = vpop.xlane.xlu1 %5750 }
 0x951   : > { %v12415_v63 = vpop.f32.mrf.mxu1  ;;  %13613 = vpow2.f32 %v5872_v22  ;;  %v5827_v10 = vsub.f32 %v16755_v48, %v5751_v18 }
 0x952   : > { %v16904_v46 = vadd.f32 %v16719_v28, %v5649_v36  ;;  %v5652_v38 = vmul.f32 0.35355338, %v12415_v63  ;;  %v5728_v23 = vsel %vm1934_vm6, %v16900_v59, -inf  ;;  %v5878_v4 = vmul.f32 1.442695, %v5832_v34 }
 0x953   : > { %v5306_v35 = vpop.f32.mrf.mxu1  ;;  %5729 = vmax.xlane.f32.xlu0 %v5728_v23  ;;  %v5760_v21 = vpop.xlane.xlu0 %5759  ;;  %v5868_v18 = vmul.f32 1.442695, %v5827_v10 }
 0x954   : > { %v5650_v49 = vmul.f32 0.35355338, %v5306_v35  ;;  %v16909_v33 = vadd.f32 %v16728_v54, %v5652_v38  ;;  %v5722_v27 = vsel %vm1934_vm6, %v16904_v46, -inf  ;;  %13615 = vpow2.f32 %v5878_v4  ;;  %v5769_v34 = vpop.xlane.xlu1 %5768 }
 0x955   : > { %v12418_v17 = vpop.f32.mrf.mxu1  ;;  %5723 = vmax.xlane.f32.xlu1 %v5722_v27  ;;  %v5830_v35 = vsub.f32 %v16771_v40, %v5760_v21  ;;  %v5833_v42 = vsub.f32 %v16783_v62, %v5769_v34  ;;  %13617 = vpow2.f32 %v5868_v18 }
 0x956   : > { %v5655_v43 = vmul.f32 0.35355338, %v12418_v17  ;;  %v16915_v63 = vadd.f32 %v16740_v37, %v5650_v49  ;;  %v5731_v48 = vsel %vm1934_vm6, %v16909_v33, -inf }
 0x957   : > { %v5319_v36 = vpop.f32.mrf.mxu1  ;;  %v5874_v44 = vmul.f32 1.442695, %v5830_v35  ;;  %v5880_v35 = vmul.f32 1.442695, %v5833_v42 }
 0x958   : > { %v16918_v23 = vadd.f32 %v16748_v13, %v5655_v43  ;;  %v5725_v38 = vsel %vm1934_vm6, %v16915_v63, -inf  ;;  %v5653_v4 = vmul.f32 0.35355338, %v5319_v36  ;;  %v5763_v40 = vpop.xlane.xlu1 %5762 }
 0x959   : > { %v12419_v22 = vpop.f32.mrf.mxu1  ;;  %5726 = vmax.xlane.f32.xlu0 %v5725_v38  ;;  %5732 = vmax.xlane.f32.xlu1 %v5731_v48  ;;  %v16925_v49 = vpop.eup %13609  ;;  %13619 = vpow2.f32 %v5874_v44  ;;  %v5831_v62 = vsub.f32 %v16790_v53, %v5763_v40 }
 0x95a   : > { %v5656_v17 = vmul.f32 0.35355338, %v12419_v22  ;;  %v5740_v27 = vsel %vm1934_vm6, %v16918_v23, -inf  ;;  %v16938_v36 = vadd.f32 %v16760_v45, %v5653_v4  ;;  %v5944_v22 = vsel %vm1934_vm6, %v16925_v49, 0.0 }
 0x95b   : > { %v5322_v38 = vpop.f32.mrf.mxu1  ;;  %13621 = vpow2.f32 %v5880_v35 }
 0x95c   : > { %v16933_v21 = vadd.f32 %v16768_v25, %v5656_v17  ;;  %v5654_v34 = vmul.f32 0.35355338, %v5322_v38  ;;  %v5734_v17 = vsel %vm1934_vm6, %v16938_v36, -inf }
 0x95d   : > { %v16929_v43 = vpop.eup %13611  ;;  %5741 = vmax.xlane.f32.xlu0 %v5740_v27  ;;  %v5876_v27 = vmul.f32 1.442695, %v5831_v62 }
 0x95e   : > { %v5938_v10 = vsel %vm1934_vm6, %v16929_v43, 0.0  ;;  %v5743_v48 = vsel %vm1934_vm6, %v16933_v21, -inf  ;;  %v16945_v18 = vpop.eup %13613  ;;  %v16954_v53 = vadd.f32 %v16780_v20, %v5654_v34 }
 0x95f   : > { %5939 = vadd.xlane.f32.xlu1 %v5938_v10  ;;  %v5947_v44 = vsel %vm1934_vm6, %v16945_v18, 0.0  ;;  %13623 = vpow2.f32 %v5876_v27 }
 0x960   : > { %v5737_v10 = vsel %vm1934_vm6, %v16954_v53, -inf }
 0x961   : > { %5945 = vadd.xlane.f32.xlu0 %v5944_v22  ;;  %v16949_v4 = vpop.eup %13615 }
 0x962   : > { %v5956_v40 = vsel %vm1934_vm6, %v16949_v4, 0.0  ;;  %v16960_v38 = vpop.eup %13617 }
 0x963   : > { %5744 = vmax.xlane.f32.xlu1 %v5743_v48  ;;  %v5941_v27 = vsel %vm1934_vm6, %v16960_v38, 0.0 }
 0x965   : > { %5735 = vmax.xlane.f32.xlu0 %v5734_v17 }
 0x966   : > { %v16964_v48 = vpop.eup %13619 }
 0x967   : > { %5948 = vadd.xlane.f32.xlu1 %v5947_v44  ;;  %v5802_v42 = vpop.xlane.xlu0 %5801 }
 0x968   : > { %v5844_v62 = vsub.f32 %v16795_v50, %v5802_v42 }
 0x969   : > { %5957 = vadd.xlane.f32.xlu0 %v5956_v40 }
 0x96b   : > { %v5805_v22 = vpop.xlane.xlu1 %5804  ;;  %5738 = vmax.xlane.f32.xlu1 %v5737_v10  ;;  %v5796_v17 = vpop.xlane.xlu0 %5795 }
 0x96c   : > { %v5845_v35 = vsub.f32 %v16803_v1, %v5805_v22  ;;  %v5902_v22 = vmul.f32 1.442695, %v5844_v62  ;;  %v5842_v50 = vsub.f32 %v16798_v60, %v5796_v17 }
 0x96d   : > { %v12446_v34 = vpop.f32.mrf.mxu1 }
 0x96e   : > { %v5904_v44 = vmul.f32 1.442695, %v5845_v35  ;;  %v5667_v52 = vmul.f32 0.35355338, %v12446_v34  ;;  %v5950_v35 = vsel %vm1934_vm6, %v16964_v48, 0.0  ;;  %v16975_v34 = vpop.eup %13621 }
 0x96f   : > { %v5513_v40 = vpop.f32.mrf.mxu1  ;;  %v5799_v24 = vpop.xlane.xlu1 %5798  ;;  %5942 = vadd.xlane.f32.xlu1 %v5941_v27 }
 0x970   : > { %v16969_v31 = vadd.f32 %v16713_v6, %v5667_v52  ;;  %v5665_v10 = vmul.f32 0.35355338, %v5513_v40  ;;  %v5843_v1 = vsub.f32 %v16810_v61, %v5799_v24  ;;  %13625 = vpow2.f32 %v5904_v44  ;;  %v16985_v40 = vpop.eup %13623 }
 0x971   : > { %v12447_v42 = vpop.f32.mrf.mxu1  ;;  %13627 = vpow2.f32 %v5902_v22  ;;  %v5898_v24 = vmul.f32 1.442695, %v5842_v50  ;;  %v5959_v44 = vsel %vm1934_vm6, %v16975_v34, 0.0 }
 0x972   : > { %v16978_v15 = vadd.f32 %v16719_v28, %v5665_v10  ;;  %v5900_v27 = vmul.f32 1.442695, %v5843_v1  ;;  %v5776_v52 = vsel %vm1934_vm6, %v16969_v31, -inf  ;;  %v5668_v62 = vmul.f32 0.35355338, %v12447_v42 }
 0x973   : > { %v5516_v6 = vpop.f32.mrf.mxu1  ;;  %5777 = vmax.xlane.f32.xlu0 %v5776_v52  ;;  %v5817_v61 = vpop.xlane.xlu1 %5816  ;;  %5951 = vadd.xlane.f32.xlu1 %v5950_v35 }
 0x974   : > { %v5849_v60 = vsub.f32 %v16823_v56, %v5817_v61  ;;  %13629 = vpow2.f32 %v5900_v27  ;;  %v5770_v1 = vsel %vm1934_vm6, %v16978_v15, -inf  ;;  %v5814_v56 = vpop.xlane.xlu0 %5813  ;;  %v16994_v61 = vadd.f32 %v16728_v54, %v5668_v62 }
 0x975   : > { %v12450_v17 = vpop.f32.mrf.mxu1  ;;  %13631 = vpow2.f32 %v5898_v24  ;;  %v5666_v27 = vmul.f32 0.35355338, %v5516_v6 }
 0x976   : > { %v5912_v28 = vmul.f32 1.442695, %v5849_v60  ;;  %v5671_v10 = vmul.f32 0.35355338, %v12450_v17  ;;  %v5953_v60 = vsel %vm1934_vm6, %v16985_v40, 0.0  ;;  %v5779_v6 = vsel %vm1934_vm6, %v16994_v61, -inf }
 0x977   : > { %v5529_v52 = vpop.f32.mrf.mxu1  ;;  %5771 = vmax.xlane.f32.xlu0 %v5770_v1  ;;  %v5811_v35 = vpop.xlane.xlu1 %5810  ;;  %5960 = vadd.xlane.f32.xlu1 %v5959_v44  ;;  %v17009_v62 = vadd.f32 %v16740_v37, %v5666_v27 }
 0x978   : > { %v16990_v22 = vadd.f32 %v16748_v13, %v5671_v10  ;;  %v5669_v50 = vmul.f32 0.35355338, %v5529_v52  ;;  %v5847_v42 = vsub.f32 %v16830_v41, %v5811_v35  ;;  %13633 = vpow2.f32 %v5912_v28  ;;  %v5808_v24 = vpop.xlane.xlu0 %5807 }
 0x979   : > { %v5848_v41 = vsub.f32 %v16813_v3, %v5814_v56  ;;  %v5846_v28 = vsub.f32 %v16816_v30, %v5808_v24  ;;  %v5773_v52 = vsel %vm1934_vm6, %v17009_v62, -inf  ;;  %v12451_v56 = vpop.f32.mrf.mxu1 }
 0x97a   : > { %v16999_v17 = vadd.f32 %v16760_v45, %v5669_v50  ;;  %v5908_v44 = vmul.f32 1.442695, %v5847_v42  ;;  %v5788_v13 = vsel %vm1934_vm6, %v16990_v22, -inf  ;;  %v5672_v42 = vmul.f32 0.35355338, %v12451_v56 }
 0x97b   : > { %5789 = vmax.xlane.f32.xlu0 %v5788_v13  ;;  %5954 = vadd.xlane.f32.xlu1 %v5953_v60  ;;  %v5910_v3 = vmul.f32 1.442695, %v5848_v41  ;;  %v5906_v37 = vmul.f32 1.442695, %v5846_v28 }
 0x97c   : > { %13635 = vpow2.f32 %v5908_v44  ;;  %v5782_v54 = vsel %vm1934_vm6, %v16999_v17, -inf  ;;  %v5532_v44 = vpop.f32.mrf.mxu1  ;;  %v17031_v13 = vadd.f32 %v16768_v25, %v5672_v42 }
 0x97d   : > { %v17011_v45 = vpop.eup %13625  ;;  %13637 = vpow2.f32 %v5910_v3  ;;  %v5670_v41 = vmul.f32 0.35355338, %v5532_v44 }
 0x97e   : > { %v17014_v10 = vpop.eup %13627  ;;  %v5995_v1 = vsel %vm1934_vm6, %v17011_v45, 0.0  ;;  %13639 = vpow2.f32 %v5906_v37  ;;  %v5791_v3 = vsel %vm1934_vm6, %v17031_v13, -inf }
 0x97f   : > { %5783 = vmax.xlane.f32.xlu0 %v5782_v54  ;;  %5780 = vmax.xlane.f32.xlu1 %v5779_v6  ;;  %v5992_v27 = vsel %vm1934_vm6, %v17014_v10, 0.0  ;;  %v17044_v25 = vadd.f32 %v16780_v20, %v5670_v41 }
 0x981   : > { %v17020_v35 = vpop.eup %13629 }
 0x982   : > { %v17022_v50 = vpop.eup %13631  ;;  %v5989_v30 = vsel %vm1934_vm6, %v17020_v35, 0.0 }
 0x983   : > { %5996 = vadd.xlane.f32.xlu0 %v5995_v1  ;;  %5774 = vmax.xlane.f32.xlu1 %v5773_v52  ;;  %v5986_v54 = vsel %vm1934_vm6, %v17022_v50, 0.0  ;;  %v5785_v1 = vsel %vm1934_vm6, %v17044_v25, -inf }
 0x985   : > { %v17028_v60 = vpop.eup %13633 }
 0x986   : > { %v6007_v24 = vsel %vm1934_vm6, %v17028_v60, 0.0 }
 0x987   : > { %5990 = vadd.xlane.f32.xlu0 %v5989_v30  ;;  %5993 = vadd.xlane.f32.xlu1 %v5992_v27 }
 0x989   : > { %v17037_v6 = vpop.eup %13635 }
 0x98a   : > { %v6001_v28 = vsel %vm1934_vm6, %v17037_v6, 0.0  ;;  %v17048_v52 = vpop.eup %13637 }
 0x98b   : > { %6008 = vadd.xlane.f32.xlu0 %v6007_v24  ;;  %5987 = vadd.xlane.f32.xlu1 %v5986_v54  ;;  %v17050_v56 = vpop.eup %13639  ;;  %v6004_v37 = vsel %vm1934_vm6, %v17048_v52, 0.0 }
 0x98c   : > { %v5998_v42 = vsel %vm1934_vm6, %v17050_v56, 0.0 }
 0x98f   : > { %6002 = vadd.xlane.f32.xlu0 %v6001_v28  ;;  %5792 = vmax.xlane.f32.xlu1 %v5791_v3 }
 0x993   : > { %5786 = vmax.xlane.f32.xlu1 %v5785_v1 }
 0x997   : > { %6005 = vadd.xlane.f32.xlu1 %v6004_v37 }
 0x99b   : > { %5999 = vadd.xlane.f32.xlu1 %v5998_v42 }
 0x9dc   : > { %v5730_v20 = vpop.xlane.xlu0 %5729 }
 0x9dd   : > { %v5820_v30 = vsub.f32 %v16900_v59, %v5730_v20 }
 0x9de   : > { %v5724_v44 = vpop.xlane.xlu1 %5723 }
 0x9df   : > { %v5854_v27 = vmul.f32 1.442695, %v5820_v30  ;;  %v5818_v41 = vsub.f32 %v16904_v46, %v5724_v44 }
 0x9e1   : > { %13641 = vpow2.f32 %v5854_v27  ;;  %v5850_v24 = vmul.f32 1.442695, %v5818_v41 }
 0x9e2   : > { %v5727_v54 = vpop.xlane.xlu0 %5726  ;;  %v5733_v3 = vpop.xlane.xlu1 %5732 }
 0x9e3   : > { %v5819_v28 = vsub.f32 %v16915_v63, %v5727_v54  ;;  %13643 = vpow2.f32 %v5850_v24  ;;  %v5821_v1 = vsub.f32 %v16909_v33, %v5733_v3 }
 0x9e5   : > { %v5852_v37 = vmul.f32 1.442695, %v5819_v28  ;;  %v5856_v2 = vmul.f32 1.442695, %v5821_v1 }
 0x9e6   : > { %v5742_v7 = vpop.xlane.xlu0 %5741 }
 0x9e7   : > { %v5824_v42 = vsub.f32 %v16918_v23, %v5742_v7  ;;  %13645 = vpow2.f32 %v5856_v2 }
 0x9e8   : > { %v5940_v59 = vpop.xlane.xlu1 %5939 }
 0x9e9   : > { %v5862_v20 = vmul.f32 1.442695, %v5824_v42  ;;  %13647 = vrcp.f32 %v5940_v59 }
 0x9ea   : > { %13649 = vpow2.f32 %v5852_v37  ;;  %v5946_v46 = vpop.xlane.xlu0 %5945 }
 0x9eb   : > { %13651 = vpow2.f32 %v5862_v20 }
 0x9ec   : > { %v5745_v30 = vpop.xlane.xlu1 %5744 }
 0x9ed   : > { %v5825_v27 = vsub.f32 %v16933_v21, %v5745_v30 }
 0x9ee   : > { %v17062_v63 = vpop.eup %13641  ;;  %v5736_v44 = vpop.xlane.xlu0 %5735 }
 0x9ef   : > { %v5864_v41 = vmul.f32 1.442695, %v5825_v27  ;;  %v5822_v33 = vsub.f32 %v16938_v36, %v5736_v44  ;;  %v5920_v24 = vsel %vm1934_vm6, %v17062_v63, 0.0 }
 0x9f0   : > { %5921 = vadd.xlane.f32.xlu0 %v5920_v24  ;;  %v5949_v7 = vpop.xlane.xlu1 %5948  ;;  %v17067_v2 = vpop.eup %13643 }
 0x9f1   : > { %13653 = vpow2.f32 %v5864_v41  ;;  %v5858_v23 = vmul.f32 1.442695, %v5822_v33  ;;  %v5914_v54 = vsel %vm1934_vm6, %v17067_v2, 0.0 }
 0x9f3   : > { %13655 = vpow2.f32 %v5858_v23  ;;  %v5958_v23 = vpop.xlane.xlu0 %5957 }
 0x9f4   : > { %5915 = vadd.xlane.f32.xlu0 %v5914_v54  ;;  %v5739_v21 = vpop.xlane.xlu1 %5738  ;;  %v17071_v28 = vpop.eup %13645  ;;  %13657 = vrcp.f32 %v5946_v46 }
 0x9f5   : > { %v5823_v3 = vsub.f32 %v16954_v53, %v5739_v21  ;;  %v5923_v1 = vsel %vm1934_vm6, %v17071_v28, 0.0 }
 0x9f6   : > { %v13648_v36 = vpop.eup %13647  ;;  %5924 = vadd.xlane.f32.xlu1 %v5923_v1 }
 0x9f7   : > { %v17076_v37 = vpop.eup %13649  ;;  %v5860_v42 = vmul.f32 1.442695, %v5823_v3  ;;  %v6027_v59 = vmul.f32 %v13648_v36, %v16929_v43 }
 0x9f8   : > { %v17079_v20 = vpop.eup %13651  ;;  %v5943_v30 = vpop.xlane.xlu1 %5942  ;;  %v5917_v27 = vsel %vm1934_vm6, %v17076_v37, 0.0 }
 0x9f9   : > { %13659 = vpow2.f32 %v5860_v42  ;;  %12512 = vmatprep.mubr.msk.f32.mxu0 %vm1934_vm6, %v6027_v59  ;;  %v5932_v53 = vsel %vm1934_vm6, %v17079_v20, 0.0 }
 0x9fa   : > { %13661 = vrcp.f32 %v5943_v30  ;;  %5933 = vadd.xlane.f32.xlu0 %v5932_v53  ;;  %5918 = vadd.xlane.f32.xlu1 %v5917_v27 }
 0x9fb   : > { %13663 = vrcp.f32 %v5949_v7 }
 0x9fc   : > { %v5952_v44 = vpop.xlane.xlu1 %5951 }
 0x9fd   : > { %13665 = vrcp.f32 %v5952_v44 }
 0x9fe   : > { %v17086_v43 = vpop.eup %13653  ;;  %13667 = vrcp.f32 %v5958_v23 }
 0x9ff   : > { %v5935_v46 = vsel %vm1934_vm6, %v17086_v43, 0.0 }
 0xa00   : > { %v17090_v41 = vpop.eup %13655  ;;  %5936 = vadd.xlane.f32.xlu1 %v5935_v46  ;;  %v5961_v33 = vpop.xlane.xlu1 %5960 }
 0xa01   : > { %v5926_v24 = vsel %vm1934_vm6, %v17090_v41, 0.0  ;;  %v13658_v21 = vpop.eup %13657 }
 0xa02   : > { %5927 = vadd.xlane.f32.xlu0 %v5926_v24  ;;  %v6031_v30 = vmul.f32 %v13658_v21, %v16925_v49  ;;  %v19668_v21 = vld [vmem:[#allocation22_spill] sm:$0xff] }
 0xa04   : > { %v5955_v54 = vpop.xlane.xlu1 %5954 }
 0xa05   : > { %13669 = vrcp.f32 %v5955_v54 }
 0xa06   : > { %v17094_v7 = vpop.eup %13659  ;;  %13671 = vrcp.f32 %v5961_v33 }
 0xa07   : > { %v13662_v3 = vpop.eup %13661  ;;  %v5929_v36 = vsel %vm1934_vm6, %v17094_v7, 0.0 }
 0xa08   : > { %v6029_v1 = vmul.f32 %v13662_v3, %v16960_v38  ;;  %5930 = vadd.xlane.f32.xlu1 %v5929_v36  ;;  %v5781_v42 = vpop.xlane.xlu1 %5780  ;;  %v13664_v59 = vpop.eup %13663 }
 0xa09   : > { %v6033_v46 = vmul.f32 %v13664_v59, %v16945_v18  ;;  %v19667_v18 = vld [vmem:[#allocation25_spill] sm:$0xff]  ;;  %v5778_v3 = vpop.xlane.xlu0 %5777 }
 0xa0a   : > { %v13666_v53 = vpop.eup %13665  ;;  %12513 = vmatmul.mubr.msk.f32.vlgmr.msra.gmra.mxu0 %vm1934_vm6, %v6029_v1  ;;  %v5836_v59 = vsub.f32 %v16969_v31, %v5778_v3 }
 0xa0b   : > { %12553 = vmatpush3.msra.mxu0 %v16542_v9  ;;  %12515 = vmatprep.mubr.msk.f32.mxu0 %vm1934_vm6, %v6031_v30  ;;  %v6035_v27 = vmul.f32 %v13666_v53, %v16964_v48  ;;  %v13668_v33 = vpop.eup %13667 }
 0xa0c   : > { %v5775_v44 = vpop.xlane.xlu1 %5774  ;;  %v6039_v9 = vmul.f32 %v13668_v33, %v16949_v4  ;;  %v19670_v4 = vld [vmem:[#allocation14_spill] sm:$0xff] }
 0xa0d   : > { %v5772_v36 = vpop.xlane.xlu0 %5771 }
 0xa0e   : > { %12516 = vmatmul.mubr.msk.f32.gmra.mxu0 %vm1934_vm6, %v6033_v46  ;;  %v5834_v46 = vsub.f32 %v16978_v15, %v5772_v36 }
 0xa0f   : > { %12518 = vmatprep.mubr.msk.f32.mxu0 %vm1934_vm6, %v6035_v27  ;;  %v5886_v27 = vmul.f32 1.442695, %v5836_v59 }
 0xa10   : > { %v17107_v38 = vpop.xlane.xlu1 %5993 }
 0xa11   : > { %v5790_v53 = vpop.xlane.xlu0 %5789 }
 0xa12   : > { %v13670_v49 = vpop.eup %13669 }
 0xa13   : > { %v6037_v23 = vmul.f32 %v13670_v49, %v16985_v40  ;;  %v13672_v54 = vpop.eup %13671  ;;  %v19669_v40 = vld [vmem:[#allocation26_spill] sm:$0xff] }
 0xa14   : > { %v5988_v24 = vpop.xlane.xlu1 %5987  ;;  %v6041_v48 = vmul.f32 %v13672_v54, %v16975_v34  ;;  %v5837_v34 = vsub.f32 %v16994_v61, %v5781_v42  ;;  %v5840_v54 = vsub.f32 %v16990_v22, %v5790_v53 }
 0xa15   : > { %13673 = vrcp.f32 %v5988_v24  ;;  %12519 = vmatmul.mubr.msk.f32.gmra.mxu0 %vm1934_vm6, %v6037_v23  ;;  %v5835_v24 = vsub.f32 %v17009_v62, %v5775_v44  ;;  %v5882_v23 = vmul.f32 1.442695, %v5834_v46 }
 0xa16   : > { %12521 = vmatprep.mubr.msk.f32.mxu0 %vm1934_vm6, %v6039_v9  ;;  %v5888_v49 = vmul.f32 1.442695, %v5837_v34  ;;  %13675 = vpow2.f32 %v5886_v27  ;;  %v5784_v9 = vpop.xlane.xlu0 %5783  ;;  %v5894_v42 = vmul.f32 1.442695, %v5840_v54  ;;  %v19671_v54 = vld [vmem:[#allocation28_spill] sm:$0xff] }
 0xa17   : > { %v5884_v31 = vmul.f32 1.442695, %v5835_v24 }
 0xa18   : > { %6543 = vrot.lane.b32.xlu0 %v19667_v18, %s13977_s27  ;;  %v5793_v33 = vpop.xlane.xlu1 %5792  ;;  %13677 = vpow2.f32 %v5888_v49 }
 0xa19   : > { %6545 = vrot.lane.b32.xlu1 %v19668_v21, %s13977_s27  ;;  %12522 = vmatmul.mubr.msk.f32.gmra.mxu0 %vm1934_vm6, %v6041_v48  ;;  %13679 = vpow2.f32 %v5882_v23  ;;  %v5838_v48 = vsub.f32 %v16999_v17, %v5784_v9 }
 0xa1a   : > { %13681 = vpow2.f32 %v5884_v31  ;;  %v17173_v9 = vpop.xlane.xlu0 %5996  ;;  %v19672_v31 = vld [vmem:[#allocation29_spill] sm:$0xff] }
 0xa1b   : > { %13683 = vpow2.f32 %v5894_v42  ;;  %v5890_v62 = vmul.f32 1.442695, %v5838_v48 }
 0xa1c   : > { %6541 = vrot.lane.b32.xlu0 %v19669_v40, %s13977_s27  ;;  %v5787_v61 = vpop.xlane.xlu1 %5786 }
 0xa1d   : > { %v5839_v3 = vsub.f32 %v17044_v25, %v5787_v61 }
 0xa1f   : > { %v5892_v44 = vmul.f32 1.442695, %v5839_v3  ;;  %v19673_v3 = vld [vmem:[#allocation12_spill] sm:$0xff] }
 0xa20   : > { %6539 = vrot.lane.b32.xlu0 %v19670_v4, %s13977_s27 }
 0xa22   : > { %v13674_v1 = vpop.eup %13673 }
 0xa23   : > { %v6059_v30 = vmul.f32 %v13674_v1, %v17022_v50  ;;  %v5841_v50 = vsub.f32 %v17031_v13, %v5793_v33  ;;  %v17133_v22 = vpop.eup %13675 }
 0xa24   : > { %v5968_v13 = vsel %vm1934_vm6, %v17133_v22, 0.0 }
 0xa25   : > { %12568 = vmatprep.mubr.msk.f32.mxu0 %vm1934_vm6, %v6059_v30  ;;  %v5896_v15 = vmul.f32 1.442695, %v5841_v50  ;;  %v17135_v36 = vpop.eup %13677  ;;  %v17179_v50 = vpop.xlane.xlu0 %5990 }
 0xa26   : > { %v17139_v1 = vpop.eup %13679  ;;  %v5971_v17 = vsel %vm1934_vm6, %v17135_v36, 0.0 }
 0xa27   : > { %13685 = vpow2.f32 %v5896_v15  ;;  %v17143_v25 = vpop.eup %13681  ;;  %v5962_v59 = vsel %vm1934_vm6, %v17139_v1, 0.0 }
 0xa28   : > { %13687 = vpow2.f32 %v5890_v62  ;;  %v17147_v30 = vpop.eup %13683  ;;  %v5965_v34 = vsel %vm1934_vm6, %v17143_v25, 0.0 }
 0xa29   : > { %13689 = vpow2.f32 %v5892_v44  ;;  %v5980_v27 = vsel %vm1934_vm6, %v17147_v30, 0.0  ;;  %v17189_v61 = vpop.xlane.xlu0 %6008  ;;  %v19675_v44 = vld [vmem:[#allocation24_spill] sm:$0xff] }
 0xa2d   : > { %v17195_v42 = vpop.xlane.xlu0 %6002 }
 0xa34   : > { %v17151_v53 = vpop.eup %13685 }
 0xa35   : > { %v17155_v46 = vpop.eup %13687  ;;  %v5983_v33 = vsel %vm1934_vm6, %v17151_v53, 0.0 }
 0xa36   : > { %v17159_v49 = vpop.eup %13689  ;;  %v5974_v24 = vsel %vm1934_vm6, %v17155_v46, 0.0 }
 0xa37   : > { %v5977_v23 = vsel %vm1934_vm6, %v17159_v49, 0.0 }
 0xa3d   : > { %5969 = vadd.xlane.f32.xlu1 %v5968_v13 }
 0xa3f   : > { %5972 = vadd.xlane.f32.xlu0 %v5971_v17 }
 0xa41   : > { %5963 = vadd.xlane.f32.xlu1 %v5962_v59 }
 0xa43   : > { %5966 = vadd.xlane.f32.xlu0 %v5965_v34 }
 0xa45   : > { %5981 = vadd.xlane.f32.xlu1 %v5980_v27  ;;  %v19677_v27 = vld [vmem:[#allocation27_spill] sm:$0xff] }
 0xa47   : > { %5984 = vadd.xlane.f32.xlu0 %v5983_v33 }
 0xa49   : > { %5975 = vadd.xlane.f32.xlu1 %v5974_v24 }
 0xa4b   : > { %5978 = vadd.xlane.f32.xlu0 %v5977_v23 }
 0xa5a   : > { %6535 = vrot.lane.b32.xlu1 %v19671_v54, %s13977_s27 }
 0xa5e   : > { %7152 = vrot.lane.b32.xlu1 %v14587_v32, %s13978_s21 }
 0xa61   : > { %6537 = vrot.lane.b32.xlu0 %v19550_v57, %s13977_s27 }
 0xa62   : > { %7148 = vrot.lane.b32.xlu1 %v19548_v19, %s13978_s21 }
 0xa65   : > { %6533 = vrot.lane.b32.xlu0 %v19672_v31, %s13977_s27  ;;  %s13980_s27 = smov 40  }
 0xa66   : > { %7138 = vrot.lane.b32.xlu1 %v19551_v14, %s13979_s22 }
 0xa69   : > { %7150 = vrot.lane.b32.xlu0 %v14592_v39, %s13978_s21 }
 0xa6a   : > { %7140 = vrot.lane.b32.xlu1 %v19548_v19, %s13979_s22  ;;  %v17199_v19 = vpop.xlane.xlu1 %6005 }
 0xa6d   : > { %7146 = vrot.lane.b32.xlu0 %v19551_v14, %s13978_s21 }
 0xa6e   : > { %7253 = vrot.lane.b32.xlu1 %v14665_v26, %s13978_s21  ;;  %v17207_v48 = vpop.xlane.xlu1 %5999 }
 0xa71   : > { %7257 = vrot.lane.b32.xlu0 %v14651_v29, %s13978_s21 }
 0xa72   : > { %7142 = vrot.lane.b32.xlu1 %v14592_v39, %s13979_s22 }
 0xa75   : > { %7255 = vrot.lane.b32.xlu0 %v14659_v55, %s13978_s21 }
 0xa76   : > { %7251 = vrot.lane.b32.xlu1 %v14675_v11, %s13978_s21 }
 0xa79   : > { %v5922_v14 = vpop.xlane.xlu0 %5921  ;;  %7362 = vrot.lane.b32.xlu0 %v19483_v5, %s13978_s21 }
 0xa7a   : > { %7243 = vrot.lane.b32.xlu1 %v14675_v11, %s13979_s22  ;;  %v19674_v11 = vld [vmem:[#allocation10_spill] sm:$0xff] }
 0xa7d   : > { %v5916_v39 = vpop.xlane.xlu0 %5915  ;;  %7144 = vrot.lane.b32.xlu0 %v14587_v32, %s13979_s22 }
 0xa7e   : > { %13691 = vrcp.f32 %v5916_v39  ;;  %7358 = vrot.lane.b32.xlu1 %v14707_v8, %s13978_s21  ;;  %v13201_v39 = vunpack.i.h.bf16 %v16529_v58 }
 0xa7f   : > { %v5925_v15 = vpop.xlane.xlu1 %5924  ;;  %13693 = vrcp.f32 %v5922_v14 }
 0xa81   : > { %7360 = vrot.lane.b32.xlu0 %v19673_v3, %s13978_s21 }
 0xa82   : > { %7247 = vrot.lane.b32.xlu1 %v14659_v55, %s13979_s22 }
 0xa83   : > { %v5919_v62 = vpop.xlane.xlu1 %5918  ;;  %v5934_v32 = vpop.xlane.xlu0 %5933 }
 0xa84   : > { %13695 = vrcp.f32 %v5919_v62  ;;  %v19678_v62 = vunpack.i.l.bf16 %v16529_v58 }
 0xa85   : > { %7245 = vrot.lane.b32.xlu0 %v14665_v26, %s13979_s22  ;;  %13697 = vrcp.f32 %v5925_v15  ;;  %v19676_v26 = vld [vmem:[#allocation18_spill] sm:$0xff] }
 0xa86   : > { %7356 = vrot.lane.b32.xlu1 %v19674_v11, %s13978_s21 }
 0xa89   : > { %7467 = vrot.lane.b32.xlu0 %v19675_v44, %s13978_s21  ;;  %v5937_v59 = vpop.xlane.xlu1 %5936 }
 0xa8a   : > { %7348 = vrot.lane.b32.xlu1 %v19674_v11, %s13979_s22 }
 0xa8b   : > { %v13692_v13 = vpop.eup %13691  ;;  %v5928_v17 = vpop.xlane.xlu0 %5927 }
 0xa8c   : > { %13699 = vrcp.f32 %v5928_v17  ;;  %v6011_v55 = vmul.f32 %v13692_v13, %v17067_v2  ;;  %v13694_v34 = vpop.eup %13693  ;;  %v19680_v13 = vld [vmem:[#allocation5_spill] sm:$0xff] }
 0xa8d   : > { %7249 = vrot.lane.b32.xlu0 %v14651_v29, %s13979_s22  ;;  %v6015_v29 = vmul.f32 %v13694_v34, %v17062_v63  ;;  %v19679_v63 = vld [vmem:[#allocation30_spill] sm:$0xff]  ;;  %v13210_v17 = vunpack.i.l.bf16 %v19680_v13  ;;  %v19681_v34 = vld [vmem:[#allocation7_spill] sm:$0xff] }
 0xa8e   : > { %12484 = vmatprep.mubr.msk.f32.mxu1 %vm1934_vm6, %v6011_v55  ;;  %7463 = vrot.lane.b32.xlu1 %v19676_v26, %s13978_s21 }
 0xa8f   : > { %v6544_v23 = vpop.permute.xlu0 %6543 }
 0xa91   : > { %7465 = vrot.lane.b32.xlu0 %v19677_v27, %s13978_s21  ;;  %v5931_v33 = vpop.xlane.xlu1 %5930  ;;  %v13696_v24 = vpop.eup %13695 }
 0xa92   : > { %13701 = vrcp.f32 %v5931_v33  ;;  %7354 = vrot.lane.b32.xlu1 %v19483_v5, %s13979_s22  ;;  %v6013_v2 = vmul.f32 %v13696_v24, %v17076_v37  ;;  %v13698_v14 = vpop.eup %13697  ;;  %v13205_v5 = vunpack.i.l.bf16 %v16882_v16  ;;  %v13216_v33 = vunpack.i.h.bf16 %v16890_v51  ;;  %v17272_v24 = vld [vmem:[%s19299_s6 + $0x8] sm:$0xf] }
 0xa93   : > { %13703 = vrcp.f32 %v5934_v32  ;;  %v6017_v37 = vmul.f32 %v13698_v14, %v17071_v28  ;;  %v6542_v32 = vpop.permute.xlu0 %6541  ;;  %v13211_v28 = vunpack.i.h.bf16 %v19680_v13  ;;  %v19688_v14 = vld [vmem:[#allocation16_spill] sm:$0xff] }
 0xa94   : > { %12485 = vmatmul.mubr.msk.f32.vlgmr.msra.gmra.mxu1 %vm1934_vm6, %v6013_v2  ;;  %13705 = vrcp.f32 %v5937_v59  ;;  %v13215_v59 = vunpack.i.l.bf16 %v16890_v51  ;;  %v19682_v2 = vld [vmem:[#allocation3_spill] sm:$0xff] }
 0xa95   : > { %7350 = vrot.lane.b32.xlu0 %v14707_v8, %s13979_s22  ;;  %v6546_v15 = vpop.permute.xlu1 %6545  ;;  %12525 = vmatpush3.msra.mxu1 %v19678_v62  ;;  %v13206_v8 = vunpack.i.h.bf16 %v16882_v16  ;;  %13707 = vrcp.f32 %v17179_v50 }
 0xa96   : > { %12487 = vmatprep.mubr.msk.f32.mxu1 %vm1934_vm6, %v6015_v29  ;;  %12526 = vmatprep.subr.mxu1 %v13201_v39  ;;  %v19687_v29 = vld [vmem:[#allocation17_spill] sm:$0xff] }
 0xa97   : > { %7453 = vrot.lane.b32.xlu1 %v19679_v63, %s13979_s22  ;;  %12527 = vmatpush3.msra.mxu1 %v13201_v39  ;;  %v6540_v55 = vpop.permute.xlu0 %6539  ;;  %v19690_v39 = vld [vmem:[#allocation19_spill] sm:$0xff] }
 0xa98   : > { %12554 = vmatprep.subr.mxu0 %v6546_v15  ;;  %12528 = vmatprep.subr.mxu1 %v13205_v5 }
 0xa99   : > { %v13700_v11 = vpop.eup %13699  ;;  %12555 = vmatpush3.msra.mxu0 %v6546_v15  ;;  %12488 = vmatmul.mubr.msk.f32.gmra.mxu1 %vm1934_vm6, %v6017_v37 }
 0xa9a   : > { %12556 = vmatprep.subr.mxu0 %v6544_v23  ;;  %12529 = vmatpush3.msra.mxu1 %v13205_v5  ;;  %v6019_v58 = vmul.f32 %v13700_v11, %v17090_v41 }
 0xa9b   : > { %7352 = vrot.lane.b32.xlu0 %v19673_v3, %s13979_s22  ;;  %12530 = vmatprep.subr.mxu1 %v13206_v8 }
 0xa9c   : > { %12557 = vmatpush3.msra.mxu0 %v6544_v23  ;;  %7457 = vrot.lane.b32.xlu1 %v19677_v27, %s13979_s22  ;;  %v19685_v23 = vld [vmem:[#allocation9_spill] sm:$0xff] }
 0xa9d   : > { %12531 = vmatpush3.msra.mxu1 %v13206_v8  ;;  %12558 = vmatprep.subr.mxu0 %v6542_v32 }
 0xa9e   : > { %12532 = vmatprep.subr.mxu1 %v13210_v17  ;;  %12559 = vmatpush3.msra.mxu0 %v6542_v32 }
 0xa9f   : > { %v13702_v16 = vpop.eup %13701  ;;  %12490 = vmatprep.mubr.msk.f32.mxu1 %vm1934_vm6, %v6019_v58  ;;  %12533 = vmatpush3.msra.mxu1 %v13210_v17 }
 0xaa0   : > { %12560 = vmatprep.subr.mxu0 %v6540_v55  ;;  %v6021_v41 = vmul.f32 %v13702_v16, %v17094_v7  ;;  %7461 = vrot.lane.b32.xlu0 %v19679_v63, %s13978_s21  ;;  %v13704_v3 = vpop.eup %13703 }
 0xaa1   : > { %12534 = vmatprep.subr.mxu1 %v13211_v28  ;;  %12561 = vmatpush3.msra.mxu0 %v6540_v55  ;;  %v13706_v27 = vpop.eup %13705  ;;  %v6023_v7 = vmul.f32 %v13704_v3, %v17079_v20  ;;  %v19683_v20 = vld [vmem:[#allocation15_spill] sm:$0xff] }
 0xaa2   : > { %13223 = vrot.lane.b32.xlu1 %v19681_v34, %s13980_s27  ;;  %12535 = vmatpush3.msra.mxu1 %v13211_v28  ;;  %v6025_v51 = vmul.f32 %v13706_v27, %v17086_v43  ;;  %v19686_v43 = vld [vmem:[#allocation4_spill] sm:$0xff]  ;;  %v13708_v58 = vpop.eup %13707 }
 0xaa3   : > { %12536 = vmatprep.subr.mxu1 %v13215_v59  ;;  %12491 = vmatmul.mubr.msk.f32.gmra.mxu1 %vm1934_vm6, %v6021_v41 }
 0xaa4   : > { %12537 = vmatpush3.msra.mxu1 %v13215_v59  ;;  %7455 = vrot.lane.b32.xlu0 %v19676_v26, %s13979_s22  ;;  %v19684_v26 = vld [vmem:[#allocation6_spill] sm:$0xff] }
 0xaa5   : > { %12538 = vmatprep.subr.mxu1 %v13216_v33  ;;  %12493 = vmatprep.mubr.msk.f32.mxu1 %vm1934_vm6, %v6023_v7 }
 0xaa6   : > { %13233 = vrot.lane.b32.xlu1 %v19682_v2, %s13980_s27  ;;  %12539 = vmatpush3.msra.mxu1 %v13216_v33 }
 0xaa7   : > { %12494 = vmatmul.mubr.msk.f32.gmra.mxu1 %vm1934_vm6, %v6025_v51  ;;  %12978 = vmatprep.subr.msk.bf16.mxu1 %vm4852_vm1, %v17272_v24 }
 0xaa8   : > { %7459 = vrot.lane.b32.xlu0 %v19675_v44, %s13979_s22  ;;  %v19689_v44 = vld [vmem:[#allocation8_spill] sm:$0xff] }
 0xaaa   : > { %13243 = vrot.lane.b32.xlu1 %v19683_v20, %s13980_s27 }
 0xaac   : > { %13218 = vrot.lane.b32.xlu0 %v19684_v26, %s13980_s27 }
 0xaae   : > { %13253 = vrot.lane.b32.xlu1 %v19685_v23, %s13980_s27 }
 0xab0   : > { %13228 = vrot.lane.b32.xlu0 %v19686_v43, %s13980_s27 }
 0xab2   : > { %13263 = vrot.lane.b32.xlu1 %v19687_v29, %s13980_s27 }
 0xab4   : > { %13238 = vrot.lane.b32.xlu0 %v19688_v14, %s13980_s27 }
 0xab8   : > { %13248 = vrot.lane.b32.xlu0 %v19689_v44, %s13980_s27 }
 0xabc   : > { %13258 = vrot.lane.b32.xlu0 %v19690_v39, %s13980_s27 }
 0xac6   : > { %v5970_v15 = vpop.xlane.xlu1 %5969 }
 0xac8   : > { %v5973_v62 = vpop.xlane.xlu0 %5972 }
 0xaca   : > { %v5964_v5 = vpop.xlane.xlu1 %5963 }
 0xacb   : > { %13709 = vrcp.f32 %v5964_v5 }
 0xacc   : > { %13711 = vrcp.f32 %v5970_v15  ;;  %v5967_v63 = vpop.xlane.xlu0 %5966 }
 0xacd   : > { %13713 = vrcp.f32 %v5967_v63 }
 0xace   : > { %13715 = vrcp.f32 %v17107_v38  ;;  %v5982_v37 = vpop.xlane.xlu1 %5981 }
 0xacf   : > { %13717 = vrcp.f32 %v5973_v62 }
 0xad0   : > { %13719 = vrcp.f32 %v17173_v9  ;;  %v5985_v11 = vpop.xlane.xlu0 %5984 }
 0xad1   : > { %13721 = vrcp.f32 %v17195_v42 }
 0xad2   : > { %13723 = vrcp.f32 %v17207_v48  ;;  %v5976_v32 = vpop.xlane.xlu1 %5975 }
 0xad3   : > { %13725 = vrcp.f32 %v5976_v32 }
 0xad4   : > { %13727 = vrcp.f32 %v5982_v37  ;;  %v5979_v50 = vpop.xlane.xlu0 %5978 }
 0xad5   : > { %13729 = vrcp.f32 %v5979_v50 }
 0xad6   : > { %13731 = vrcp.f32 %v17199_v19  ;;  %v6536_v8 = vpop.permute.xlu1 %6535 }
 0xad7   : > { %13733 = vrcp.f32 %v5985_v11 }
 0xad8   : > { %v13710_v38 = vpop.eup %13709  ;;  %v6538_v13 = vpop.permute.xlu0 %6537  ;;  %13735 = vrcp.f32 %v17189_v61  ;;  %v6061_v61 = vmul.f32 %v13708_v58, %v17020_v35  ;;  %v6943_v35 = vsel %vm4852_vm1, %v17272_v24, 0 }
 0xad9   : > { %v13712_v17 = vpop.eup %13711  ;;  %12562 = vmatprep.subr.mxu0 %v6538_v13  ;;  %v6043_v9 = vmul.f32 %v13710_v38, %v17139_v1 }
 0xada   : > { %v13714_v42 = vpop.eup %13713  ;;  %12563 = vmatpush3.msra.mxu0 %v6538_v13  ;;  %v7153_v48 = vpop.permute.xlu1 %7152  ;;  %v6047_v41 = vmul.f32 %v13712_v17, %v17133_v22 }
 0xadb   : > { %v13716_v16 = vpop.eup %13715  ;;  %v6045_v28 = vmul.f32 %v13714_v42, %v17143_v25  ;;  %12540 = vmatprep.mubr.msk.f32.mxu1 %vm1934_vm6, %v6043_v9  ;;  %12564 = vmatprep.subr.mxu0 %v6536_v8  ;;  %v7176_v22 = vsel %vm1469_vm5, %v7153_v48, 0 }
 0xadc   : > { %v13718_v19 = vpop.eup %13717  ;;  %v6534_v55 = vpop.permute.xlu0 %6533  ;;  %12565 = vmatpush3.msra.mxu0 %v6536_v8  ;;  %v6063_v25 = vmul.f32 %v13716_v16, %v17014_v10 }
 0xadd   : > { %v13720_v3 = vpop.eup %13719  ;;  %12541 = vmatmul.mubr.msk.f32.vlgmr.msra.gmra.mxu1 %vm1934_vm6, %v6045_v28  ;;  %12566 = vmatprep.subr.mxu0 %v6534_v55  ;;  %v6049_v27 = vmul.f32 %v13718_v19, %v17135_v36 }
 0xade   : > { %v13722_v1 = vpop.eup %13721  ;;  %12543 = vmatprep.mubr.msk.f32.mxu1 %vm1934_vm6, %v6047_v41  ;;  %12567 = vmatpush3.msra.mxu0 %v6534_v55  ;;  %v7149_v59 = vpop.permute.xlu1 %7148  ;;  %v6065_v51 = vmul.f32 %v13720_v3, %v17011_v45 }
 0xadf   : > { %v13724_v34 = vpop.eup %13723  ;;  %12569 = vmatmul.mubr.msk.f32.vlgmr.msra.gmra.mxu0 %vm1934_vm6, %v6061_v61  ;;  %12979 = vmatprep.subr.msk.bf16.mxu0 %vm1469_vm5, %v7153_v48  ;;  %v6069_v45 = vmul.f32 %v13722_v1, %v17037_v6  ;;  %v7170_v5 = vsel %vm1469_vm5, %v7149_v59, 0 }
 0xae0   : > { %v13726_v33 = vpop.eup %13725  ;;  %v7151_v7 = vpop.permute.xlu0 %7150  ;;  %12571 = vmatprep.mubr.msk.f32.mxu0 %vm1934_vm6, %v6063_v25  ;;  %12615 = vmatpush3.bf16.xpose.msra.mxu0 %v7176_v22  ;;  %v6067_v36 = vmul.f32 %v13724_v34, %v17050_v56 }
 0xae1   : > { %v13728_v2 = vpop.eup %13727  ;;  %12544 = vmatmul.mubr.msk.f32.gmra.mxu1 %vm1934_vm6, %v6049_v27  ;;  %12980 = vmatprep.subr.msk.bf16.mxu0 %vm1469_vm5, %v7151_v7  ;;  %v6051_v10 = vmul.f32 %v13726_v33, %v17155_v46 }
 0xae2   : > { %v13730_v20 = vpop.eup %13729  ;;  %v7139_v26 = vpop.permute.xlu1 %7138  ;;  %12581 = vmatpush3.bf16.msra.mxu1 %v6943_v35  ;;  %v6055_v46 = vmul.f32 %v13728_v2, %v17147_v30 }
 0xae3   : > { %v13732_v24 = vpop.eup %13731  ;;  %12546 = vmatprep.mubr.msk.f32.mxu1 %vm1934_vm6, %v6051_v10  ;;  %12572 = vmatmul.mubr.msk.f32.gmra.mxu0 %vm1934_vm6, %v6065_v51  ;;  %v6053_v23 = vmul.f32 %v13730_v20, %v17159_v49  ;;  %v7173_v49 = vsel %vm1469_vm5, %v7151_v7, 0 }
 0xae4   : > { %v13734_v43 = vpop.eup %13733  ;;  %v7147_v29 = vpop.permute.xlu0 %7146  ;;  %12574 = vmatprep.mubr.msk.f32.mxu0 %vm1934_vm6, %v6067_v36  ;;  %v6071_v44 = vmul.f32 %v13732_v24, %v17048_v52 }
 0xae5   : > { %12547 = vmatmul.mubr.msk.f32.gmra.mxu1 %vm1934_vm6, %v6053_v23  ;;  %v13736_v14 = vpop.eup %13735  ;;  %v6057_v39 = vmul.f32 %v13734_v43, %v17151_v53  ;;  %v7167_v11 = vsel %vm1469_vm5, %v7147_v29, 0 }
 0xae6   : > { %12549 = vmatprep.mubr.msk.f32.mxu1 %vm1934_vm6, %v6055_v46  ;;  %v7141_v56 = vpop.permute.xlu1 %7140  ;;  %v6073_v6 = vmul.f32 %v13736_v14, %v17028_v60 }
 0xae7   : > { %12575 = vmatmul.mubr.msk.f32.gmra.mxu0 %vm1934_vm6, %v6069_v45 }
 0xae8   : > { %v7258_v15 = vpop.permute.xlu0 %7257  ;;  %12577 = vmatprep.mubr.msk.f32.mxu0 %vm1934_vm6, %v6071_v44  ;;  %12617 = vmatpush3.bf16.xpose.msra.mxu0 %v7173_v49 }
 0xae9   : > { %12550 = vmatmul.mubr.msk.f32.gmra.mxu1 %vm1934_vm6, %v6057_v39  ;;  %12981 = vmatprep.subr.msk.bf16.mxu0 %vm1469_vm5, %v7149_v59  ;;  %v7281_v38 = vsel %vm1469_vm5, %v7258_v15, 0  ;;  %v12514_v39 = vpop.f32.mrf.mxu0 }
 0xaea   : > { %v7254_v30 = vpop.permute.xlu1 %7253 }
 0xaeb   : > { %12578 = vmatmul.mubr.msk.f32.gmra.mxu0 %vm1934_vm6, %v6073_v6  ;;  %v7275_v55 = vsel %vm1469_vm5, %v7254_v30, 0 }
 0xaec   : > { %v7256_v52 = vpop.permute.xlu0 %7255  ;;  %12622 = vmatprep.mubr.msk.bf16.mxu0 %vm1469_vm5, %v7139_v26 }
 0xaed   : > { %v7278_v42 = vsel %vm1469_vm5, %v7256_v52, 0 }
 0xaee   : > { %v7143_v62 = vpop.permute.xlu1 %7142 }
 0xaf0   : > { %v17345_v53 = vpop.permute.xlu0 %7362  ;;  %12619 = vmatpush3.bf16.xpose.msra.mxu0 %v7170_v5 }
 0xaf1   : > { %12982 = vmatprep.subr.msk.bf16.mxu0 %vm1469_vm5, %v7147_v29  ;;  %12987 = vmatprep.subr.msk.bf16.mxu1 %vm1469_vm5, %v17345_v53 }
 0xaf2   : > { %v7252_v63 = vpop.permute.xlu1 %7251 }
 0xaf3   : > { %v7272_v1 = vsel %vm1469_vm5, %v7252_v63, 0 }
 0xaf4   : > { %v7145_v37 = vpop.permute.xlu0 %7144 }
 0xaf6   : > { %v7244_v60 = vpop.permute.xlu1 %7243 }
 0xaf8   : > { %v17351_v32 = vpop.permute.xlu0 %7360  ;;  %12621 = vmatpush3.bf16.xpose.msra.mxu0 %v7167_v11 }
 0xaf9   : > { %12983 = vmatprep.subr.msk.bf16.mxu0 %vm1469_vm5, %v7258_v15 }
 0xafa   : > { %v17354_v50 = vpop.permute.xlu1 %7358 }
 0xafc   : > { %v7246_v8 = vpop.permute.xlu0 %7245 }
 0xafe   : > { %v7248_v58 = vpop.permute.xlu1 %7247 }
 0xaff   : > { %12623 = vmatmul.mubr.msk.bf16.vlgmr.msra.gmra.mxu0 %vm1469_vm5, %v7141_v56 }
 0xb00   : > { %v7468_v13 = vpop.permute.xlu0 %7467  ;;  %12626 = vmatprep.mubr.msk.bf16.mxu0 %vm1469_vm5, %v7143_v62  ;;  %12631 = vmatpush3.bf16.xpose.msra.mxu0 %v7281_v38 }
 0xb01   : > { %12984 = vmatprep.subr.msk.bf16.mxu0 %vm1469_vm5, %v7256_v52  ;;  %v7491_v22 = vsel %vm1469_vm5, %v7468_v13, 0 }
 0xb02   : > { %v17360_v17 = vpop.permute.xlu1 %7356 }
 0xb04   : > { %v7250_v9 = vpop.permute.xlu0 %7249 }
 0xb06   : > { %v17364_v48 = vpop.permute.xlu1 %7348 }
 0xb07   : > { %12627 = vmatmul.mubr.msk.bf16.gmra.mxu0 %vm1469_vm5, %v7145_v37 }
 0xb08   : > { %v7466_v16 = vpop.permute.xlu0 %7465  ;;  %12633 = vmatpush3.bf16.xpose.msra.mxu0 %v7278_v42  ;;  %12638 = vmatprep.mubr.msk.bf16.mxu0 %vm1469_vm5, %v7244_v60  ;;  %v7386_v42 = vsel %vm1469_vm5, %v17345_v53, 0 }
 0xb09   : > { %12985 = vmatprep.subr.msk.bf16.mxu0 %vm1469_vm5, %v7254_v30  ;;  %v7488_v2 = vsel %vm1469_vm5, %v7466_v16, 0 }
 0xb0a   : > { %v7464_v19 = vpop.permute.xlu1 %7463 }
 0xb0b   : > { %v7485_v26 = vsel %vm1469_vm5, %v7464_v19, 0 }
 0xb0c   : > { %v17368_v28 = vpop.permute.xlu0 %7350 }
 0xb0e   : > { %v17374_v3 = vpop.permute.xlu1 %7354 }
 0xb10   : > { %v17371_v41 = vpop.permute.xlu0 %7352  ;;  %12635 = vmatpush3.bf16.xpose.msra.mxu0 %v7275_v55 }
 0xb11   : > { %12986 = vmatprep.subr.msk.bf16.mxu0 %vm1469_vm5, %v7252_v63  ;;  %v6341_v63 = vpop.f32.mrf.mxu0 }
 0xb12   : > { %v7454_v25 = vpop.permute.xlu1 %7453 }
 0xb14   : > { %v7462_v61 = vpop.permute.xlu0 %7461 }
 0xb15   : > { %v7482_v43 = vsel %vm1469_vm5, %v7462_v61, 0 }
 0xb16   : > { %v7458_v27 = vpop.permute.xlu1 %7457 }
 0xb18   : > { %v7456_v59 = vpop.permute.xlu0 %7455  ;;  %12637 = vmatpush3.bf16.xpose.msra.mxu0 %v7272_v1 }
 0xb19   : > { %12991 = vmatprep.subr.msk.bf16.mxu0 %vm1469_vm5, %v7468_v13 }
 0xb1a   : > { %v17386_v7 = vpop.permute.xlu1 %13223 }
 0xb1c   : > { %v7460_v34 = vpop.permute.xlu0 %7459 }
 0xb1e   : > { %v17394_v51 = vpop.permute.xlu1 %13233 }
 0xb1f   : > { %12639 = vmatmul.mubr.msk.bf16.vlgmr.msra.gmra.mxu0 %vm1469_vm5, %v7246_v8 }
 0xb20   : > { %v17380_v35 = vpop.permute.xlu0 %13218  ;;  %12642 = vmatprep.mubr.msk.bf16.mxu0 %vm1469_vm5, %v7248_v58  ;;  %12663 = vmatpush3.bf16.xpose.msra.mxu0 %v7491_v22 }
 0xb21   : > { %12992 = vmatprep.subr.msk.bf16.mxu0 %vm1469_vm5, %v7466_v16 }
 0xb22   : > { %v17400_v36 = vpop.permute.xlu1 %13243 }
 0xb24   : > { %v17384_v33 = vpop.permute.xlu0 %13228 }
 0xb26   : > { %v17403_v29 = vpop.permute.xlu1 %13253 }
 0xb27   : > { %12643 = vmatmul.mubr.msk.bf16.gmra.mxu0 %vm1469_vm5, %v7250_v9  ;;  %v12517_v9 = vpop.f32.mrf.mxu0 }
 0xb28   : > { %v17390_v10 = vpop.permute.xlu0 %13238  ;;  %12665 = vmatpush3.bf16.xpose.msra.mxu0 %v7488_v2  ;;  %12670 = vmatprep.mubr.msk.bf16.mxu0 %vm1469_vm5, %v7454_v25 }
 0xb29   : > { %12993 = vmatprep.subr.msk.bf16.mxu0 %vm1469_vm5, %v7464_v19  ;;  %v6351_v1 = vpop.f32.mrf.mxu0 }
 0xb2a   : > { %v13264_v46 = vpop.permute.xlu1 %13263 }
 0xb2b   : > { %v13265_v14 = vunpack.i.l.bf16 %v13264_v46  ;;  %v13266_v56 = vunpack.i.h.bf16 %v13264_v46  ;;  %v12520_v2 = vpop.f32.mrf.mxu0 }
 0xb2c   : > { %v17396_v20 = vpop.permute.xlu0 %13248 }
 0xb30   : > { %12667 = vmatpush3.bf16.xpose.msra.mxu0 %v7485_v26  ;;  %v13259_v24 = vpop.permute.xlu0 %13258 }
 0xb31   : > { %12994 = vmatprep.subr.msk.bf16.mxu0 %vm1469_vm5, %v7462_v61  ;;  %v13260_v23 = vunpack.i.l.bf16 %v13259_v24  ;;  %v13261_v45 = vunpack.i.h.bf16 %v13259_v24  ;;  %v7383_v24 = vsel %vm1469_vm5, %v17351_v32, 0 }
 0xb38   : > { %12669 = vmatpush3.bf16.xpose.msra.mxu0 %v7482_v43 }
 0xb39   : > { %12734 = vmatprep.subr.mxu0 %v13260_v23 }
 0xb3f   : > { %12671 = vmatmul.mubr.msk.bf16.vlgmr.msra.gmra.mxu0 %vm1469_vm5, %v7456_v59 }
 0xb40   : > { %12674 = vmatprep.mubr.msk.bf16.mxu0 %vm1469_vm5, %v7458_v27  ;;  %12735 = vmatpush3.msra.mxu0 %v13260_v23 }
 0xb41   : > { %12736 = vmatprep.subr.mxu0 %v13261_v45 }
 0xb42   : > { %12737 = vmatpush3.msra.mxu0 %v13261_v45 }
 0xb43   : > { %12738 = vmatprep.subr.mxu0 %v13265_v14 }
 0xb44   : > { %12739 = vmatpush3.msra.mxu0 %v13265_v14 }
 0xb45   : > { %12740 = vmatprep.subr.mxu0 %v13266_v56 }
 0xb46   : > { %12741 = vmatpush3.msra.mxu0 %v13266_v56 }
 0xb47   : > { %12675 = vmatmul.mubr.msk.bf16.gmra.mxu0 %vm1469_vm5, %v7460_v34 }
 0xb54   : > { %v12486_v44 = vpop.f32.mrf.mxu1 }
 0xb55   : > { %vm6687_vm10 = vcmp.gt.f32.partialorder %v12486_v44, 0.5  ;;  %v6711_v38 = vmul.f32 0.25, %v12486_v44 }
 0xb56   : > { %v6188_v49 = vpop.f32.mrf.mxu1  ;;  %v11122_v15 = vsel %vm6687_vm10, 1.0, %v19566_v12 }
 0xb57   : > { %vm6686_vm11 = vcmp.gt.f32.partialorder %v6188_v49, 0.5  ;;  %v6719_v37 = vsub.f32 1.0, %v11122_v15  ;;  %v6710_v60 = vmul.f32 0.25, %v6188_v49 }
 0xb58   : > { %v11121_v6 = vsel %vm6686_vm11, 1.0, %v19566_v12 }
 0xb59   : > { %v6878_v30 = vpack.c.bf16 %v11122_v15, %v11121_v6  ;;  %v12489_v52 = vpop.f32.mrf.mxu1  ;;  %v6718_v62 = vsub.f32 1.0, %v11121_v6  ;;  %v6727_v16 = vmul.f32 %v6719_v37, %v6711_v38  ;;  %v6361_v15 = vpop.f32.mrf.mxu0 }
 0xb5a   : > { %vm6689_vm12 = vcmp.gt.f32.partialorder %v12489_v52, 0.5  ;;  %v6713_v53 = vmul.f32 0.25, %v12489_v52 }
 0xb5b   : > { %v6198_v5 = vpop.f32.mrf.mxu1  ;;  %12582 = vmatprep.mubr.msk.bf16.mxu1 %vm1469_vm5, %v6878_v30  ;;  %v11124_v11 = vsel %vm6689_vm12, 1.0, %v19566_v12  ;;  %v6726_v13 = vmul.f32 %v6718_v62, %v6710_v60  ;;  %v17420_v59 = vadd.f32 %v12514_v39, %v6727_v16 }
 0xb5c   : > { %vm6688_vm13 = vcmp.gt.f32.partialorder %v6198_v5, 0.5  ;;  %v6721_v25 = vsub.f32 1.0, %v11124_v11  ;;  %v6712_v34 = vmul.f32 0.25, %v6198_v5 }
 0xb5d   : > { %v11123_v8 = vsel %vm6688_vm13, 1.0, %v19566_v12  ;;  %v17418_v19 = vadd.f32 %v6726_v13, %v6341_v63  ;;  %vm6743_vm4 = vcmp.gt.f32.partialorder %v17420_v59, 0.5  ;;  %v12523_v13 = vpop.f32.mrf.mxu0 }
 0xb5e   : > { %v6879_v58 = vpack.c.bf16 %v11124_v11, %v11123_v8  ;;  %v6720_v55 = vsub.f32 1.0, %v11123_v8  ;;  %v6729_v49 = vmul.f32 %v6721_v25, %v6713_v53  ;;  %v11130_v60 = vsel %vm6743_vm4, 1.0, %v19566_v12 }
 0xb5f   : > { %vm6742_vm2 = vcmp.gt.f32.partialorder %v17418_v19, 0.5  ;;  %v6371_v25 = vpop.f32.mrf.mxu0 }
 0xb60   : > { %12583 = vmatmul.mubr.msk.bf16.vlgmr.msra.gmra.mxu1 %vm1469_vm5, %v6879_v58  ;;  %v6728_v23 = vmul.f32 %v6720_v55, %v6712_v34  ;;  %v11129_v5 = vsel %vm6742_vm2, 1.0, %v19566_v12  ;;  %v6737_v11 = vadd.f32 %v12517_v9, %v6729_v49 }
 0xb61   : > { %12647 = vmatpush3.bf16.xpose.msra.mxu1 %v7386_v42  ;;  %v6882_v16 = vpack.c.bf16 %v11130_v60, %v11129_v5  ;;  %v6774_v49 = vsub.f32 1.0, %v11129_v5 }
 0xb62   : > { %12988 = vmatprep.subr.msk.bf16.mxu1 %vm1469_vm5, %v17351_v32  ;;  %v6736_v52 = vadd.f32 %v6728_v23, %v6351_v1  ;;  %v7380_v1 = vsel %vm1469_vm5, %v17354_v50, 0  ;;  %vm6745_vm10 = vcmp.gt.f32.partialorder %v6737_v11, 0.5  ;;  %v13220_v23 = vunpack.i.l.bf16 %v17380_v35 }
 0xb63   : > { %v12492_v61 = vpop.f32.mrf.mxu1 }
 0xb64   : > { %vm6691_vm14 = vcmp.gt.f32.partialorder %v12492_v61, 0.5  ;;  %v6715_v43 = vmul.f32 0.25, %v12492_v61  ;;  %vm6744_vm8 = vcmp.gt.f32.partialorder %v6736_v52, 0.5 }
 0xb65   : > { %v11126_v22 = vsel %vm6691_vm14, 1.0, %v19566_v12  ;;  %v6208_v27 = vpop.f32.mrf.mxu1  ;;  %v11131_v34 = vsel %vm6744_vm8, 1.0, %v19566_v12 }
 0xb66   : > { %v6723_v26 = vsub.f32 1.0, %v11126_v22  ;;  %vm6690_vm15 = vcmp.gt.f32.partialorder %v6208_v27, 0.5  ;;  %v6714_v14 = vmul.f32 0.25, %v6208_v27 }
 0xb67   : > { %v11125_v46 = vsel %vm6690_vm15, 1.0, %v19566_v12  ;;  %v12495_v45 = vpop.f32.mrf.mxu1 }
 0xb68   : > { %v6722_v56 = vsub.f32 1.0, %v11125_v46  ;;  %v6880_v44 = vpack.c.bf16 %v11126_v22, %v11125_v46  ;;  %vm6693_vm3 = vcmp.gt.f32.partialorder %v12495_v45, 0.5  ;;  %v6731_v6 = vmul.f32 %v6723_v26, %v6715_v43 }
 0xb69   : > { %12649 = vmatpush3.bf16.xpose.msra.mxu1 %v7383_v24  ;;  %v6218_v39 = vpop.f32.mrf.mxu1  ;;  %v11128_v32 = vsel %vm6693_vm3, 1.0, %v19566_v12  ;;  %v6717_v55 = vmul.f32 0.25, %v12495_v45  ;;  %v7377_v43 = vsel %vm1469_vm5, %v17360_v17, 0 }
 0xb6a   : > { %v6730_v30 = vmul.f32 %v6722_v56, %v6714_v14  ;;  %vm6692_vm7 = vcmp.gt.f32.partialorder %v6218_v39, 0.5  ;;  %12989 = vmatprep.subr.msk.bf16.mxu1 %vm1469_vm5, %v17354_v50  ;;  %12586 = vmatprep.mubr.msk.bf16.mxu1 %vm1469_vm5, %v6880_v44  ;;  %v6725_v8 = vsub.f32 1.0, %v11128_v32  ;;  %v6716_v58 = vmul.f32 0.25, %v6218_v39 }
 0xb6b   : > { %v11127_v62 = vsel %vm6692_vm7, 1.0, %v19566_v12  ;;  %v6739_v42 = vadd.f32 %v12520_v2, %v6731_v6  ;;  %v11132_v2 = vsel %vm6745_vm10, 1.0, %v19566_v12  ;;  %v6775_v56 = vsub.f32 1.0, %v11130_v60 }
 0xb6c   : > { %v17436_v63 = vadd.f32 %v6730_v30, %v6361_v15  ;;  %v6724_v37 = vsub.f32 1.0, %v11127_v62  ;;  %v6881_v38 = vpack.c.bf16 %v11128_v32, %v11127_v62  ;;  %v6733_v9 = vmul.f32 %v6725_v8, %v6717_v55 }
 0xb6d   : > { %vm6747_vm11 = vcmp.gt.f32.partialorder %v6739_v42, 0.5  ;;  %v6883_v53 = vpack.c.bf16 %v11132_v2, %v11131_v34  ;;  %v6767_v44 = vmul.f32 0.25, %v17420_v59  ;;  %v6777_v15 = vsub.f32 1.0, %v11132_v2 }
 0xb6e   : > { %v6732_v61 = vmul.f32 %v6724_v37, %v6716_v58  ;;  %12587 = vmatmul.mubr.msk.bf16.gmra.mxu1 %vm1469_vm5, %v6881_v38  ;;  %vm6746_vm9 = vcmp.gt.f32.partialorder %v17436_v63, 0.5  ;;  %v6741_v26 = vadd.f32 %v12523_v13, %v6733_v9  ;;  %v11134_v50 = vsel %vm6747_vm11, 1.0, %v19566_v12 }
 0xb6f   : > { %12590 = vmatprep.mubr.msk.bf16.mxu1 %vm1469_vm5, %v6882_v16  ;;  %v17452_v27 = vsel %vm6746_vm9, 1.0, %v19566_v12  ;;  %v6783_v39 = vmul.f32 %v6775_v56, %v6767_v44  ;;  %v6776_v30 = vsub.f32 1.0, %v11131_v34  ;;  %v6769_v37 = vmul.f32 0.25, %v6737_v11 }
 0xb70   : > { %v17449_v22 = vadd.f32 %v6732_v61, %v6371_v25  ;;  %v6884_v24 = vpack.c.bf16 %v11134_v50, %v17452_v27  ;;  %vm6749_vm13 = vcmp.gt.f32.partialorder %v6741_v26, 0.5  ;;  %v6768_v38 = vmul.f32 0.25, %v6736_v52 }
 0xb71   : > { %12651 = vmatpush3.bf16.xpose.msra.mxu1 %v7380_v1  ;;  %v11136_v45 = vsel %vm6749_vm13, 1.0, %v19566_v12  ;;  %v6785_v16 = vmul.f32 %v6777_v15, %v6769_v37  ;;  %v6779_v55 = vsub.f32 1.0, %v11134_v50  ;;  %v6771_v9 = vmul.f32 0.25, %v6739_v42 }
 0xb72   : > { %12990 = vmatprep.subr.msk.bf16.mxu1 %vm1469_vm5, %v17360_v17  ;;  %vm6748_vm12 = vcmp.gt.f32.partialorder %v17449_v22, 0.5  ;;  %v6766_v17 = vmul.f32 0.25, %v17418_v19  ;;  %v6784_v61 = vmul.f32 %v6776_v30, %v6768_v38  ;;  %v6770_v2 = vmul.f32 0.25, %v17436_v63 }
 0xb73   : > { %v17464_v46 = vsel %vm6748_vm12, 1.0, %v19566_v12  ;;  %v6778_v52 = vsub.f32 1.0, %v17452_v27  ;;  %v6773_v15 = vmul.f32 0.25, %v6741_v26 }
 0xb74   : > { %v6885_v14 = vpack.c.bf16 %v11136_v45, %v17464_v46  ;;  %v6782_v62 = vmul.f32 %v6774_v49, %v6766_v17 }
 0xb75   : > { %v6786_v27 = vmul.f32 %v6778_v52, %v6770_v2 }
 0xb76   : > { %12591 = vmatmul.mubr.msk.bf16.gmra.mxu1 %vm1469_vm5, %v6883_v53 }
 0xb77   : > { %12594 = vmatprep.mubr.msk.bf16.mxu1 %vm1469_vm5, %v6884_v24  ;;  %v6787_v24 = vmul.f32 %v6779_v55, %v6771_v9 }
 0xb79   : > { %12653 = vmatpush3.bf16.xpose.msra.mxu1 %v7377_v43  ;;  %v6781_v43 = vsub.f32 1.0, %v11136_v45 }
 0xb7a   : > { %12678 = vmatprep.subr.mxu1 %v13220_v23 }
 0xb7b   : > { %v6789_v45 = vmul.f32 %v6781_v43, %v6773_v15 }
 0xb7e   : > { %12595 = vmatmul.mubr.msk.bf16.gmra.mxu1 %vm1469_vm5, %v6885_v14 }
 0xb9d   : > { %v12542_v6 = vpop.f32.mrf.mxu1 }
 0xb9e   : > { %v6791_v32 = vadd.f32 %v12542_v6, %v6783_v39 }
 0xb9f   : > { %v6494_v8 = vpop.f32.mrf.mxu1  ;;  %v12570_v58 = vpop.f32.mrf.mxu0 }
 0xba0   : > { %vm6799_vm14 = vcmp.gt.f32.partialorder %v6791_v32, 0.5  ;;  %v6790_v13 = vadd.f32 %v6782_v62, %v6494_v8  ;;  %v6823_v25 = vmul.f32 0.25, %v6791_v32  ;;  %v6780_v62 = vsub.f32 1.0, %v17464_v46 }
 0xba1   : > { %v11138_v60 = vsel %vm6799_vm14, 1.0, %v19566_v12  ;;  %v12545_v59 = vpop.f32.mrf.mxu1  ;;  %v6647_v5 = vpop.f32.mrf.mxu0 }
 0xba2   : > { %vm6798_vm15 = vcmp.gt.f32.partialorder %v6790_v13, 0.5  ;;  %v6831_v19 = vsub.f32 1.0, %v11138_v60  ;;  %v6793_v1 = vadd.f32 %v12545_v59, %v6785_v16  ;;  %v6822_v14 = vmul.f32 0.25, %v6790_v13 }
 0xba3   : > { %v11137_v34 = vsel %vm6798_vm15, 1.0, %v19566_v12  ;;  %v6504_v11 = vpop.f32.mrf.mxu1  ;;  %v12573_v50 = vpop.f32.mrf.mxu0  ;;  %v6772_v59 = vmul.f32 0.25, %v17449_v22 }
 0xba4   : > { %v6886_v53 = vpack.c.bf16 %v11138_v60, %v11137_v34  ;;  %vm6801_vm2 = vcmp.gt.f32.partialorder %v6793_v1, 0.5  ;;  %v6839_v56 = vmul.f32 %v6831_v19, %v6823_v25  ;;  %v6830_v44 = vsub.f32 1.0, %v11137_v34 }
 0xba5   : > { %v6792_v49 = vadd.f32 %v6784_v61, %v6504_v11  ;;  %v12548_v39 = vpop.f32.mrf.mxu1  ;;  %v11140_v42 = vsel %vm6801_vm2, 1.0, %v19566_v12  ;;  %v6657_v32 = vpop.f32.mrf.mxu0  ;;  %v6825_v61 = vmul.f32 0.25, %v6793_v1 }
 0xba6   : > { %v6795_v17 = vadd.f32 %v12548_v39, %v6787_v24  ;;  %12598 = vmatprep.mubr.msk.bf16.mxu1 %vm1469_vm5, %v6886_v53  ;;  %v6838_v6 = vmul.f32 %v6830_v44, %v6822_v14  ;;  %v6847_v37 = vadd.f32 %v12570_v58, %v6839_v56  ;;  %v6833_v38 = vsub.f32 1.0, %v11140_v42 }
 0xba7   : > { %vm6800_vm3 = vcmp.gt.f32.partialorder %v6792_v49, 0.5  ;;  %v6514_v63 = vpop.f32.mrf.mxu1  ;;  %v6824_v19 = vmul.f32 0.25, %v6792_v49  ;;  %v12576_v25 = vpop.f32.mrf.mxu0  ;;  %v6788_v58 = vmul.f32 %v6780_v62, %v6772_v59 }
 0xba8   : > { %v11139_v30 = vsel %vm6800_vm3, 1.0, %v19566_v12  ;;  %vm6803_vm4 = vcmp.gt.f32.partialorder %v6795_v17, 0.5  ;;  %v6846_v55 = vadd.f32 %v6838_v6, %v6647_v5  ;;  %v6794_v26 = vadd.f32 %v6786_v27, %v6514_v63 }
 0xba9   : > { %v6887_v8 = vpack.c.bf16 %v11140_v42, %v11139_v30  ;;  %v11142_v13 = vsel %vm6803_vm4, 1.0, %v19566_v12  ;;  %v12551_v16 = vpop.f32.mrf.mxu1  ;;  %v6832_v60 = vsub.f32 1.0, %v11139_v30  ;;  %vm6855_vm8 = vcmp.gt.f32.partialorder %v6847_v37, 0.5  ;;  %v6667_v56 = vpop.f32.mrf.mxu0 }
 0xbaa   : > { %v6797_v9 = vadd.f32 %v12551_v16, %v6789_v45  ;;  %vm6802_vm7 = vcmp.gt.f32.partialorder %v6794_v26, 0.5  ;;  %v6835_v34 = vsub.f32 1.0, %v11142_v13  ;;  %v6841_v11 = vmul.f32 %v6833_v38, %v6825_v61 }
 0xbab   : > { %12599 = vmatmul.mubr.msk.bf16.gmra.mxu1 %vm1469_vm5, %v6887_v8  ;;  %v6524_v46 = vpop.f32.mrf.mxu1  ;;  %v6840_v2 = vmul.f32 %v6832_v60, %v6824_v19  ;;  %v11141_v52 = vsel %vm6802_vm7, 1.0, %v19566_v12  ;;  %vm6854_vm9 = vcmp.gt.f32.partialorder %v6846_v55, 0.5  ;;  %v6827_v5 = vmul.f32 0.25, %v6795_v17  ;;  %v12579_v38 = vpop.f32.mrf.mxu0 }
 0xbac   : > { %v6888_v53 = vpack.c.bf16 %v11142_v13, %v11141_v52  ;;  %vm6805_vm10 = vcmp.gt.f32.partialorder %v6797_v9, 0.5  ;;  %v6826_v22 = vmul.f32 0.25, %v6794_v26  ;;  %v6834_v24 = vsub.f32 1.0, %v11141_v52 }
 0xbad   : > { %v11144_v1 = vsel %vm6805_vm10, 1.0, %v19566_v12  ;;  %v6796_v43 = vadd.f32 %v6788_v58, %v6524_v46  ;;  %v6843_v14 = vmul.f32 %v6835_v34, %v6827_v5  ;;  %v11145_v44 = vsel %vm6854_vm9, 1.0, %v19566_v12  ;;  %v6677_v37 = vpop.f32.mrf.mxu0  ;;  %v17502_v34 = vld [vmem:[%s19298_s5 + $0xd0] sm:$0xff] }
 0xbae   : > { %12602 = vmatprep.mubr.msk.bf16.mxu1 %vm1469_vm5, %v6888_v53  ;;  %v6848_v49 = vadd.f32 %v6840_v2, %v6657_v32  ;;  %v6842_v39 = vmul.f32 %v6834_v24, %v6826_v22  ;;  %v11146_v42 = vsel %vm6855_vm8, 1.0, %v19566_v12  ;;  %v6849_v17 = vadd.f32 %v12573_v50, %v6841_v11  ;;  %v17508_v2 = vld [vmem:[%s19298_s5 + $0xc0] sm:$0xff]  ;;  %v17517_v24 = vld [vmem:[%s19298_s5 + $0xd8] sm:$0xff] }
 0xbaf   : > { %vm6804_vm11 = vcmp.gt.f32.partialorder %v6796_v43, 0.5  ;;  %v6837_v6 = vsub.f32 1.0, %v11144_v1  ;;  %v6828_v27 = vmul.f32 0.25, %v6796_v43  ;;  %v6890_v62 = vpack.c.bf16 %v11146_v42, %v11145_v44 }
 0xbb0   : > { %v11143_v15 = vsel %vm6804_vm11, 1.0, %v19566_v12  ;;  %v6850_v63 = vadd.f32 %v6842_v39, %v6667_v56  ;;  %v6851_v8 = vadd.f32 %v12576_v25, %v6843_v14  ;;  %vm6856_vm12 = vcmp.gt.f32.partialorder %v6848_v49, 0.5  ;;  %v17528_v49 = vld [vmem:[%s19298_s5 + $0xc8] sm:$0xff] }
 0xbb1   : > { %v6889_v30 = vpack.c.bf16 %v11144_v1, %v11143_v15  ;;  %v6836_v45 = vsub.f32 1.0, %v11143_v15  ;;  %v6829_v13 = vmul.f32 0.25, %v6797_v9  ;;  %vm6857_vm14 = vcmp.gt.f32.partialorder %v6849_v17, 0.5 }
 0xbb2   : > { %vm6858_vm13 = vcmp.gt.f32.partialorder %v6850_v63, 0.5  ;;  %v11147_v32 = vsel %vm6856_vm12, 1.0, %v19566_v12  ;;  %vm6859_vm15 = vcmp.gt.f32.partialorder %v6851_v8, 0.5  ;;  %v11148_v26 = vsel %vm6857_vm14, 1.0, %v19566_v12 }
 0xbb3   : > { %v6844_v16 = vmul.f32 %v6836_v45, %v6828_v27  ;;  %12603 = vmatmul.mubr.msk.bf16.gmra.mxu1 %vm1469_vm5, %v6889_v30  ;;  %v6845_v50 = vmul.f32 %v6837_v6, %v6829_v13  ;;  %v11149_v55 = vsel %vm6858_vm13, 1.0, %v19566_v12  ;;  %v6891_v59 = vpack.c.bf16 %v11148_v26, %v11147_v32  ;;  %v17540_v6 = vld [vmem:[%s19298_s5 + $0xf0] sm:$0xff] }
 0xbb4   : > { %12606 = vmatprep.mubr.msk.bf16.mxu1 %vm1469_vm5, %v6890_v62  ;;  %v11150_v61 = vsel %vm6859_vm15, 1.0, %v19566_v12  ;;  %v13221_v32 = vunpack.i.h.bf16 %v17380_v35 }
 0xbb5   : > { %v6852_v60 = vadd.f32 %v6844_v16, %v6677_v37  ;;  %v6853_v19 = vadd.f32 %v12579_v38, %v6845_v50  ;;  %v6892_v9 = vpack.c.bf16 %v11150_v61, %v11149_v55  ;;  %v17555_v38 = vld [vmem:[%s19298_s5 + $0xe0] sm:$0xff]  ;;  %v17560_v16 = vld [vmem:[%s19298_s5 + $0xf8] sm:$0xff]  ;;  %v13225_v61 = vunpack.i.l.bf16 %v17386_v7 }
 0xbb7   : > { %vm6860_vm2 = vcmp.gt.f32.partialorder %v6852_v60, 0.5  ;;  %vm6861_vm3 = vcmp.gt.f32.partialorder %v6853_v19, 0.5 }
 0xbb8   : > { %v11151_v46 = vsel %vm6860_vm2, 1.0, %v19566_v12  ;;  %v11152_v52 = vsel %vm6861_vm3, 1.0, %v19566_v12 }
 0xbb9   : > { %v6893_v22 = vpack.c.bf16 %v11152_v52, %v11151_v46  ;;  %v13235_v46 = vunpack.i.l.bf16 %v17394_v51 }
 0xbbb   : > { %12607 = vmatmul.mubr.msk.bf16.gmra.mxu1 %vm1469_vm5, %v6891_v59  ;;  %v17578_v59 = vld [vmem:[%s19298_s5 + $0xe8] sm:$0xff] }
 0xbbc   : > { %12610 = vmatprep.mubr.msk.bf16.mxu1 %vm1469_vm5, %v6892_v9  ;;  %v13230_v9 = vunpack.i.l.bf16 %v17384_v33 }
 0xbbf   : > { %v12624_v25 = vpop.f32.mrf.mxu0 }
 0xbc0   : > { %v7560_v58 = vmul.f32 0.35355338, %v12624_v25  ;;  %v13231_v25 = vunpack.i.h.bf16 %v17384_v33 }
 0xbc1   : > { %v7212_v11 = vpop.f32.mrf.mxu0 }
 0xbc2   : > { %v17512_v5 = vadd.f32 %v17502_v34, %v7560_v58  ;;  %v7558_v53 = vmul.f32 0.35355338, %v7212_v11  ;;  %v13236_v58 = vunpack.i.h.bf16 %v17394_v51  ;;  %v19409_v11 = vunpack.i.l.bf16 %v17390_v10 }
 0xbc3   : > { %v12625_v1 = vpop.f32.mrf.mxu0  ;;  %12611 = vmatmul.mubr.msk.bf16.gmra.mxu1 %vm1469_vm5, %v6893_v22 }
 0xbc4   : > { %v17520_v43 = vadd.f32 %v17508_v2, %v7558_v53  ;;  %v7561_v14 = vmul.f32 0.35355338, %v12625_v1  ;;  %v7637_v56 = vsel %vm1934_vm6, %v17512_v5, -inf  ;;  %12654 = vmatprep.mubr.msk.bf16.mxu1 %vm1469_vm5, %v17364_v48 }
 0xbc5   : > { %7638 = vmax.xlane.f32.xlu0 %v7637_v56  ;;  %v7215_v44 = vpop.f32.mrf.mxu0 }
 0xbc6   : > { %v17531_v39 = vadd.f32 %v17517_v24, %v7561_v14  ;;  %v7559_v42 = vmul.f32 0.35355338, %v7215_v44  ;;  %v7631_v17 = vsel %vm1934_vm6, %v17520_v43, -inf }
 0xbc7   : > { %7632 = vmax.xlane.f32.xlu1 %v7631_v17  ;;  %v12628_v15 = vpop.f32.mrf.mxu0 }
 0xbc8   : > { %v17543_v63 = vadd.f32 %v17528_v49, %v7559_v42  ;;  %v7564_v27 = vmul.f32 0.35355338, %v12628_v15  ;;  %v7640_v62 = vsel %vm1934_vm6, %v17531_v39, -inf }
 0xbc9   : > { %v7228_v30 = vpop.f32.mrf.mxu0 }
 0xbca   : > { %v17546_v45 = vadd.f32 %v17540_v6, %v7564_v27  ;;  %v7562_v48 = vmul.f32 0.35355338, %v7228_v30  ;;  %v7634_v8 = vsel %vm1934_vm6, %v17543_v63, -inf }
 0xbcb   : > { %7641 = vmax.xlane.f32.xlu1 %v7640_v62  ;;  %7635 = vmax.xlane.f32.xlu0 %v7634_v8  ;;  %v12629_v13 = vpop.f32.mrf.mxu0 }
 0xbcc   : > { %v7565_v50 = vmul.f32 0.35355338, %v12629_v13  ;;  %12655 = vmatmul.mubr.msk.bf16.vlgmr.msra.gmra.mxu1 %vm1469_vm5, %v17368_v28  ;;  %v17566_v55 = vadd.f32 %v17555_v38, %v7562_v48  ;;  %v7649_v28 = vsel %vm1934_vm6, %v17546_v45, -inf }
 0xbcd   : > { %v7231_v37 = vpop.f32.mrf.mxu0  ;;  %12679 = vmatpush3.msra.mxu1 %v13220_v23  ;;  %12658 = vmatprep.mubr.msk.bf16.mxu1 %vm1469_vm5, %v17371_v41  ;;  %v13226_v23 = vunpack.i.h.bf16 %v17386_v7 }
 0xbce   : > { %v17571_v60 = vadd.f32 %v17560_v16, %v7565_v50  ;;  %v7563_v26 = vmul.f32 0.35355338, %v7231_v37  ;;  %12680 = vmatprep.subr.mxu1 %v13221_v32  ;;  %v7643_v19 = vsel %vm1934_vm6, %v17566_v55, -inf }
 0xbcf   : > { %7650 = vmax.xlane.f32.xlu0 %v7649_v28  ;;  %12681 = vmatpush3.msra.mxu1 %v13221_v32 }
 0xbd0   : > { %v7652_v35 = vsel %vm1934_vm6, %v17571_v60, -inf  ;;  %v17587_v41 = vadd.f32 %v17578_v59, %v7563_v26  ;;  %12682 = vmatprep.subr.mxu1 %v13225_v61 }
 0xbd1   : > { %7653 = vmax.xlane.f32.xlu1 %v7652_v35  ;;  %12683 = vmatpush3.msra.mxu1 %v13225_v61 }
 0xbd2   : > { %12684 = vmatprep.subr.mxu1 %v13226_v23  ;;  %v7646_v7 = vsel %vm1934_vm6, %v17587_v41, -inf }
 0xbd3   : > { %7644 = vmax.xlane.f32.xlu0 %v7643_v19  ;;  %12685 = vmatpush3.msra.mxu1 %v13226_v23 }
 0xbd4   : > { %12686 = vmatprep.subr.mxu1 %v13230_v9  ;;  %12659 = vmatmul.mubr.msk.bf16.gmra.mxu1 %vm1469_vm5, %v17374_v3 }
 0xbd5   : > { %12687 = vmatpush3.msra.mxu1 %v13230_v9  ;;  %7647 = vmax.xlane.f32.xlu1 %v7646_v7 }
 0xbd6   : > { %12688 = vmatprep.subr.mxu1 %v13231_v25 }
 0xbd7   : > { %12689 = vmatpush3.msra.mxu1 %v13231_v25 }
 0xbd8   : > { %12690 = vmatprep.subr.mxu1 %v13235_v46 }
 0xbd9   : > { %12691 = vmatpush3.msra.mxu1 %v13235_v46 }
 0xbda   : > { %12692 = vmatprep.subr.mxu1 %v13236_v58 }
 0xbdb   : > { %12693 = vmatpush3.msra.mxu1 %v13236_v58 }
 0xbdc   : > { %12706 = vmatprep.subr.mxu1 %v19409_v11 }
 0xbdf   : > { %v12640_v3 = vpop.f32.mrf.mxu0 }
 0xbe0   : > { %v7568_v33 = vmul.f32 0.35355338, %v12640_v3 }
 0xbe1   : > { %v7317_v52 = vpop.f32.mrf.mxu0 }
 0xbe2   : > { %v17603_v53 = vadd.f32 %v17502_v34, %v7568_v33  ;;  %v7566_v22 = vmul.f32 0.35355338, %v7317_v52 }
 0xbe3   : > { %v12641_v1 = vpop.f32.mrf.mxu0 }
 0xbe4   : > { %v17606_v14 = vadd.f32 %v17508_v2, %v7566_v22  ;;  %v7569_v51 = vmul.f32 0.35355338, %v12641_v1  ;;  %v7661_v56 = vsel %vm1934_vm6, %v17603_v53, -inf }
 0xbe5   : > { %7662 = vmax.xlane.f32.xlu0 %v7661_v56  ;;  %v7320_v44 = vpop.f32.mrf.mxu0 }
 0xbe6   : > { %v17611_v42 = vadd.f32 %v17517_v24, %v7569_v51  ;;  %v7567_v17 = vmul.f32 0.35355338, %v7320_v44  ;;  %v7655_v48 = vsel %vm1934_vm6, %v17606_v14, -inf }
 0xbe7   : > { %v12644_v15 = vpop.f32.mrf.mxu0 }
 0xbe8   : > { %v17614_v27 = vadd.f32 %v17528_v49, %v7567_v17  ;;  %v7572_v30 = vmul.f32 0.35355338, %v12644_v15  ;;  %v7664_v62 = vsel %vm1934_vm6, %v17611_v42, -inf }
 0xbe9   : > { %7656 = vmax.xlane.f32.xlu0 %v7655_v48  ;;  %7665 = vmax.xlane.f32.xlu1 %v7664_v62  ;;  %v7333_v8 = vpop.f32.mrf.mxu0 }
 0xbea   : > { %v17621_v13 = vadd.f32 %v17540_v6, %v7572_v30  ;;  %v7570_v50 = vmul.f32 0.35355338, %v7333_v8  ;;  %v7658_v28 = vsel %vm1934_vm6, %v17614_v27, -inf }
 0xbeb   : > { %v12645_v32 = vpop.f32.mrf.mxu0 }
 0xbec   : > { %v17624_v37 = vadd.f32 %v17555_v38, %v7570_v50  ;;  %v7573_v26 = vmul.f32 0.35355338, %v12645_v32  ;;  %v7673_v61 = vsel %vm1934_vm6, %v17621_v13, -inf }
 0xbed   : > { %7659 = vmax.xlane.f32.xlu1 %v7658_v28  ;;  %7674 = vmax.xlane.f32.xlu0 %v7673_v61  ;;  %v7336_v35 = vpop.f32.mrf.mxu0 }
 0xbee   : > { %v17631_v23 = vadd.f32 %v17560_v16, %v7573_v26  ;;  %v7571_v19 = vmul.f32 0.35355338, %v7336_v35  ;;  %v7667_v25 = vsel %vm1934_vm6, %v17624_v37, -inf }
 0xbf0   : > { %v17634_v9 = vadd.f32 %v17578_v59, %v7571_v19  ;;  %v7676_v7 = vsel %vm1934_vm6, %v17631_v23, -inf }
 0xbf1   : > { %7668 = vmax.xlane.f32.xlu0 %v7667_v25  ;;  %7677 = vmax.xlane.f32.xlu1 %v7676_v7 }
 0xbf2   : > { %v7670_v46 = vsel %vm1934_vm6, %v17634_v9, -inf }
 0xbf5   : > { %7671 = vmax.xlane.f32.xlu1 %v7670_v46 }
 0xbff   : > { %v12672_v58 = vpop.f32.mrf.mxu0 }
 0xc00   : > { %v7584_v3 = vmul.f32 0.35355338, %v12672_v58 }
 0xc01   : > { %v7527_v33 = vpop.f32.mrf.mxu0 }
 0xc02   : > { %v17643_v52 = vadd.f32 %v17502_v34, %v7584_v3  ;;  %v7582_v22 = vmul.f32 0.35355338, %v7527_v33 }
 0xc03   : > { %v12673_v1 = vpop.f32.mrf.mxu0 }
 0xc04   : > { %v17646_v51 = vadd.f32 %v17508_v2, %v7582_v22  ;;  %v7585_v56 = vmul.f32 0.35355338, %v12673_v1  ;;  %v7709_v44 = vsel %vm1934_vm6, %v17643_v52, -inf }
 0xc05   : > { %7710 = vmax.xlane.f32.xlu0 %v7709_v44  ;;  %v7530_v17 = vpop.f32.mrf.mxu0 }
 0xc06   : > { %v17651_v15 = vadd.f32 %v17517_v24, %v7585_v56  ;;  %v7583_v30 = vmul.f32 0.35355338, %v7530_v17  ;;  %v7703_v50 = vsel %vm1934_vm6, %v17646_v51, -inf }
 0xc07   : > { %v12676_v48 = vpop.f32.mrf.mxu0 }
 0xc08   : > { %v17654_v62 = vadd.f32 %v17528_v49, %v7583_v30  ;;  %v7588_v8 = vmul.f32 0.35355338, %v12676_v48  ;;  %v7712_v32 = vsel %vm1934_vm6, %v17651_v15, -inf  ;;  %v5103_v30 = vadd.f32 %v16596_v47, %v16691_v0  ;;  %v19691_v48 = vld [vmem:[#allocation54_spill] sm:$0xff] }
 0xc09   : > { %7704 = vmax.xlane.f32.xlu0 %v7703_v50  ;;  %7713 = vmax.xlane.f32.xlu1 %v7712_v32  ;;  %v7543_v26 = vpop.f32.mrf.mxu0  ;;  %v19699_v47 = vld [vmem:[#allocation58_spill] sm:$0xff] }
 0xc0a   : > { %v17661_v28 = vadd.f32 %v17540_v6, %v7588_v8  ;;  %v7586_v61 = vmul.f32 0.35355338, %v7543_v26  ;;  %v7706_v7 = vsel %vm1934_vm6, %v17654_v62, -inf  ;;  %v19700_v0 = vld [vmem:[#allocation34_spill] sm:$0xff] }
 0xc0b   : > { %v12677_v35 = vpop.f32.mrf.mxu0 }
 0xc0c   : > { %v17664_v19 = vadd.f32 %v17555_v38, %v7586_v61  ;;  %v7589_v25 = vmul.f32 0.35355338, %v12677_v35  ;;  %v7721_v46 = vsel %vm1934_vm6, %v17661_v28, -inf  ;;  %v19694_v61 = vld [vmem:[#allocation56_spill] sm:$0xff] }
 0xc0d   : > { %7707 = vmax.xlane.f32.xlu1 %v7706_v7  ;;  %7722 = vmax.xlane.f32.xlu0 %v7721_v46  ;;  %v7546_v58 = vpop.f32.mrf.mxu0  ;;  %v19696_v7 = vld [vmem:[#allocation59_spill] sm:$0xff]  ;;  %v19697_v46 = vld [vmem:[#allocation2_spill] sm:$0xff] }
 0xc0e   : > { %v17671_v3 = vadd.f32 %v17560_v16, %v7589_v25  ;;  %v7587_v33 = vmul.f32 0.35355338, %v7546_v58  ;;  %v7715_v1 = vsel %vm1934_vm6, %v17664_v19, -inf  ;;  %v5127_v58 = vadd.f32 %v19697_v46, %v19696_v7  ;;  %v19706_v46 = vld [vmem:[#allocation66_spill] sm:$0xff] }
 0xc10   : > { %v17674_v22 = vadd.f32 %v17578_v59, %v7587_v33  ;;  %v7724_v56 = vsel %vm1934_vm6, %v17671_v3, -inf }
 0xc11   : > { %7716 = vmax.xlane.f32.xlu0 %v7715_v1  ;;  %7725 = vmax.xlane.f32.xlu1 %v7724_v56 }
 0xc12   : > { %v7718_v44 = vsel %vm1934_vm6, %v17674_v22, -inf }
 0xc15   : > { %7719 = vmax.xlane.f32.xlu1 %v7718_v44  ;;  %v5130_v44 = vadd.f32 %v19700_v0, %v19699_v47  ;;  %v19710_v0 = vld [vmem:[#allocation68_spill] sm:$0xff] }
 0xc20   : > { %v12584_v17 = vpop.f32.mrf.mxu1 }
 0xc21   : > { %v17685_v8 = vadd.f32 %v12584_v17, %v19691_v48 }
 0xc22   : > { %v6979_v50 = vpop.f32.mrf.mxu1 }
 0xc23   : > { %19692 = vst [vmem:[#allocation25_spill] sm:$0xff] %v17685_v8  ;;  %v17687_v32 = vadd.f32 %v6979_v50, %v5103_v30  ;;  %v19702_v50 = vld [vmem:[#allocation64_spill] sm:$0xff] }
 0xc24   : > { %v12585_v26 = vpop.f32.mrf.mxu1 }
 0xc25   : > { %19693 = vst [vmem:[#allocation22_spill] sm:$0xff] %v17687_v32  ;;  %v17690_v35 = vadd.f32 %v12585_v26, %v19694_v61  ;;  %v19703_v26 = vld [vmem:[#allocation62_spill] sm:$0xff] }
 0xc26   : > { %v17692_v25 = vpop.f32.mrf.mxu1  ;;  %v5143_v61 = vadd.f32 %v19703_v26, %v19702_v50  ;;  %v19715_v26 = vld [vmem:[#allocation41_spill] sm:$0xff] }
 0xc27   : > { %19695 = vst [vmem:[#allocation26_spill] sm:$0xff] %v17690_v35 }
 0xc2e   : > { %v12588_v33 = vpop.f32.mrf.mxu1 }
 0xc2f   : > { %v17696_v1 = vadd.f32 %v12588_v33, %v5127_v58  ;;  %v19707_v58 = vld [vmem:[#allocation37_spill] sm:$0xff] }
 0xc30   : > { %v17698_v56 = vpop.f32.mrf.mxu1  ;;  %v5146_v33 = vadd.f32 %v19707_v58, %v19706_v46 }
 0xc31   : > { %19698 = vst [vmem:[#allocation14_spill] sm:$0xff] %v17696_v1 }
 0xc32   : > { %v12589_v17 = vpop.f32.mrf.mxu1 }
 0xc33   : > { %v17702_v30 = vadd.f32 %v12589_v17, %v5130_v44  ;;  %v19711_v44 = vld [vmem:[#allocation32_spill] sm:$0xff] }
 0xc34   : > { %v17704_v48 = vpop.f32.mrf.mxu1  ;;  %v5159_v17 = vadd.f32 %v19711_v44, %v19710_v0 }
 0xc35   : > { %19701 = vst [vmem:[#allocation28_spill] sm:$0xff] %v17702_v30 }
 0xc36   : > { %v12592_v11 = vpop.f32.mrf.mxu1 }
 0xc37   : > { %v17708_v35 = vadd.f32 %v12592_v11, %v5143_v61  ;;  %v19714_v11 = vld [vmem:[#allocation70_spill] sm:$0xff] }
 0xc38   : > { %v17710_v7 = vpop.f32.mrf.mxu1  ;;  %v5162_v61 = vadd.f32 %v19715_v26, %v19714_v11 }
 0xc39   : > { %19704 = vst [vmem:[#allocation29_spill] sm:$0xff] %v17708_v35  ;;  %19705 = vst [vmem:[#allocation12_spill] sm:$0xff] %v17710_v7 }
 0xc3a   : > { %v12593_v1 = vpop.f32.mrf.mxu1 }
 0xc3b   : > { %v17714_v32 = vadd.f32 %v12593_v1, %v5146_v33 }
 0xc3c   : > { %v17716_v47 = vpop.f32.mrf.mxu1 }
 0xc3d   : > { %19708 = vst [vmem:[#allocation10_spill] sm:$0xff] %v17714_v32  ;;  %19709 = vst [vmem:[#allocation24_spill] sm:$0xff] %v17716_v47 }
 0xc3e   : > { %v12596_v30 = vpop.f32.mrf.mxu1 }
 0xc3f   : > { %v17720_v8 = vadd.f32 %v12596_v30, %v5159_v17 }
 0xc40   : > { %v17722_v50 = vpop.f32.mrf.mxu1 }
 0xc41   : > { %19712 = vst [vmem:[#allocation18_spill] sm:$0xff] %v17720_v8  ;;  %19713 = vst [vmem:[#allocation27_spill] sm:$0xff] %v17722_v50 }
 0xc42   : > { %v12597_v35 = vpop.f32.mrf.mxu1 }
 0xc43   : > { %v17726_v7 = vadd.f32 %v12597_v35, %v5162_v61 }
 0xc45   : > { %19716 = vst [vmem:[#allocation30_spill] sm:$0xff] %v17726_v7 }
 0xc4e   : > { %v7639_v46 = vpop.xlane.xlu0 %7638 }
 0xc4f   : > { %v7729_v1 = vsub.f32 %v17512_v5, %v7639_v46 }
 0xc50   : > { %v7633_v58 = vpop.xlane.xlu1 %7632 }
 0xc51   : > { %v7763_v33 = vmul.f32 1.442695, %v7729_v1  ;;  %v7727_v32 = vsub.f32 %v17520_v43, %v7633_v58 }
 0xc53   : > { %13737 = vpow2.f32 %v7763_v33  ;;  %v7759_v0 = vmul.f32 1.442695, %v7727_v32 }
 0xc54   : > { %v7636_v44 = vpop.xlane.xlu0 %7635  ;;  %v7642_v30 = vpop.xlane.xlu1 %7641 }
 0xc55   : > { %13739 = vpow2.f32 %v7759_v0  ;;  %v7728_v17 = vsub.f32 %v17543_v63, %v7636_v44  ;;  %v7730_v8 = vsub.f32 %v17531_v39, %v7642_v30 }
 0xc57   : > { %v7765_v11 = vmul.f32 1.442695, %v7730_v8  ;;  %v7761_v26 = vmul.f32 1.442695, %v7728_v17 }
 0xc58   : > { %v7651_v35 = vpop.xlane.xlu0 %7650 }
 0xc59   : > { %v7733_v61 = vsub.f32 %v17546_v45, %v7651_v35  ;;  %13741 = vpow2.f32 %v7765_v11  ;;  %v19719_v35 = vld [vmem:[#allocation38_spill] sm:$0xff] }
 0xc5a   : > { %v7654_v5 = vpop.xlane.xlu1 %7653  ;;  %13743 = vpow2.f32 %v7761_v26  ;;  %v19718_v26 = vld [vmem:[#allocation72_spill] sm:$0xff] }
 0xc5b   : > { %v7771_v46 = vmul.f32 1.442695, %v7733_v61  ;;  %v7734_v1 = vsub.f32 %v17571_v60, %v7654_v5  ;;  %v5175_v61 = vadd.f32 %v19719_v35, %v19718_v26 }
 0xc5c   : > { %v7645_v43 = vpop.xlane.xlu0 %7644 }
 0xc5d   : > { %13745 = vpow2.f32 %v7771_v46  ;;  %v7773_v32 = vmul.f32 1.442695, %v7734_v1  ;;  %v7731_v58 = vsub.f32 %v17566_v55, %v7645_v43  ;;  %v19720_v1 = vld [vmem:[#allocation73_spill] sm:$0xff] }
 0xc5e   : > { %v7648_v63 = vpop.xlane.xlu1 %7647  ;;  %v19721_v43 = vld [vmem:[#allocation49_spill] sm:$0xff] }
 0xc5f   : > { %v7767_v33 = vmul.f32 1.442695, %v7731_v58  ;;  %13747 = vpow2.f32 %v7773_v32  ;;  %v7732_v39 = vsub.f32 %v17587_v41, %v7648_v63  ;;  %v17750_v41 = vpop.f32.mrf.mxu1  ;;  %v5167_v32 = vadd.f32 %v19721_v43, %v19720_v1 }
 0xc60   : > { %v17735_v0 = vpop.eup %13737  ;;  %19717 = vst [vmem:[#allocation5_spill] sm:$0xff] %v17750_v41 }
 0xc61   : > { %13749 = vpow2.f32 %v7767_v33  ;;  %v7829_v45 = vsel %vm1934_vm6, %v17735_v0, 0.0  ;;  %v7769_v60 = vmul.f32 1.442695, %v7732_v39 }
 0xc62   : > { %v17740_v8 = vpop.eup %13739  ;;  %7830 = vadd.xlane.f32.xlu0 %v7829_v45 }
 0xc63   : > { %13751 = vpow2.f32 %v7769_v60  ;;  %v7823_v44 = vsel %vm1934_vm6, %v17740_v8, 0.0  ;;  %v19723_v60 = vld [vmem:[#allocation74_spill] sm:$0xff] }
 0xc66   : > { %7824 = vadd.xlane.f32.xlu0 %v7823_v44  ;;  %v17744_v55 = vpop.eup %13741  ;;  %v19724_v44 = vld [vmem:[#allocation42_spill] sm:$0xff] }
 0xc67   : > { %v7832_v30 = vsel %vm1934_vm6, %v17744_v55, 0.0  ;;  %v17748_v17 = vpop.eup %13743 }
 0xc68   : > { %7833 = vadd.xlane.f32.xlu1 %v7832_v30  ;;  %v7826_v33 = vsel %vm1934_vm6, %v17748_v17, 0.0  ;;  %v5178_v30 = vadd.f32 %v19724_v44, %v19723_v60  ;;  %v19728_v44 = vld [vmem:[#allocation76_spill] sm:$0xff] }
 0xc6a   : > { %v17752_v11 = vpop.eup %13745 }
 0xc6b   : > { %v12600_v5 = vpop.f32.mrf.mxu1  ;;  %v7841_v46 = vsel %vm1934_vm6, %v17752_v11, 0.0 }
 0xc6c   : > { %v17760_v58 = vadd.f32 %v12600_v5, %v5175_v61  ;;  %7842 = vadd.xlane.f32.xlu0 %v7841_v46  ;;  %v17764_v63 = vpop.eup %13747  ;;  %7827 = vadd.xlane.f32.xlu1 %v7826_v33 }
 0xc6d   : > { %v7043_v39 = vpop.f32.mrf.mxu1  ;;  %v7844_v1 = vsel %vm1934_vm6, %v17764_v63, 0.0 }
 0xc6e   : > { %19722 = vst [vmem:[#allocation7_spill] sm:$0xff] %v17760_v58  ;;  %v17766_v45 = vpop.eup %13749  ;;  %v17770_v26 = vadd.f32 %v7043_v39, %v5167_v32  ;;  %v7663_v35 = vpop.xlane.xlu0 %7662 }
 0xc6f   : > { %v12601_v7 = vpop.f32.mrf.mxu1  ;;  %v7737_v61 = vsub.f32 %v17603_v53, %v7663_v35  ;;  %v7835_v5 = vsel %vm1934_vm6, %v17766_v45, 0.0 }
 0xc70   : > { %19725 = vst [vmem:[#allocation3_spill] sm:$0xff] %v17770_v26  ;;  %v17775_v46 = vadd.f32 %v12601_v7, %v5178_v30  ;;  %7836 = vadd.xlane.f32.xlu0 %v7835_v5  ;;  %v17779_v43 = vpop.eup %13751  ;;  %7845 = vadd.xlane.f32.xlu1 %v7844_v1  ;;  %v19729_v7 = vld [vmem:[#allocation48_spill] sm:$0xff] }
 0xc71   : > { %v7779_v33 = vmul.f32 1.442695, %v7737_v61  ;;  %v17781_v58 = vpop.f32.mrf.mxu1  ;;  %v5191_v30 = vadd.f32 %v19729_v7, %v19728_v44  ;;  %v7838_v35 = vsel %vm1934_vm6, %v17779_v43, 0.0  ;;  %v19730_v61 = vld [vmem:[#allocation77_spill] sm:$0xff]  ;;  %v19734_v44 = vld [vmem:[#allocation50_spill] sm:$0xff] }
 0xc72   : > { %19726 = vst [vmem:[#allocation15_spill] sm:$0xff] %v17775_v46  ;;  %19727 = vst [vmem:[#allocation6_spill] sm:$0xff] %v17781_v58  ;;  %v7657_v32 = vpop.xlane.xlu0 %7656  ;;  %v7666_v39 = vpop.xlane.xlu1 %7665  ;;  %v19731_v58 = vld [vmem:[#allocation35_spill] sm:$0xff] }
 0xc73   : > { %13753 = vpow2.f32 %v7779_v33  ;;  %v7735_v53 = vsub.f32 %v17606_v14, %v7657_v32  ;;  %v7738_v60 = vsub.f32 %v17611_v42, %v7666_v39  ;;  %v12604_v5 = vpop.f32.mrf.mxu1  ;;  %v5183_v1 = vadd.f32 %v19731_v58, %v19730_v61  ;;  %v19733_v39 = vld [vmem:[#allocation78_spill] sm:$0xff]  ;;  %v19737_v61 = vld [vmem:[#allocation80_spill] sm:$0xff] }
 0xc74   : > { %7839 = vadd.xlane.f32.xlu1 %v7838_v35  ;;  %v17791_v41 = vadd.f32 %v12604_v5, %v5191_v30  ;;  %v5194_v7 = vadd.f32 %v19734_v44, %v19733_v39 }
 0xc75   : > { %v7775_v46 = vmul.f32 1.442695, %v7735_v53  ;;  %v7781_v26 = vmul.f32 1.442695, %v7738_v60  ;;  %v7059_v14 = vpop.f32.mrf.mxu1 }
 0xc76   : > { %19732 = vst [vmem:[#allocation9_spill] sm:$0xff] %v17791_v41  ;;  %v7675_v33 = vpop.xlane.xlu0 %7674  ;;  %v7660_v50 = vpop.xlane.xlu1 %7659  ;;  %v17797_v47 = vadd.f32 %v7059_v14, %v5183_v1  ;;  %v19739_v14 = vld [vmem:[#allocation81_spill] sm:$0xff] }
 0xc77   : > { %13755 = vpow2.f32 %v7775_v46  ;;  %v7741_v42 = vsub.f32 %v17621_v13, %v7675_v33  ;;  %v7736_v32 = vsub.f32 %v17614_v27, %v7660_v50  ;;  %v12605_v53 = vpop.f32.mrf.mxu1  ;;  %v19738_v27 = vld [vmem:[#allocation44_spill] sm:$0xff] }
 0xc78   : > { %19735 = vst [vmem:[#allocation4_spill] sm:$0xff] %v17797_v47  ;;  %13757 = vpow2.f32 %v7781_v26  ;;  %v17799_v58 = vadd.f32 %v12605_v53, %v5194_v7  ;;  %v5207_v50 = vadd.f32 %v19738_v27, %v19737_v61 }
 0xc79   : > { %v7787_v60 = vmul.f32 1.442695, %v7741_v42  ;;  %v7777_v35 = vmul.f32 1.442695, %v7736_v32  ;;  %v17801_v46 = vpop.f32.mrf.mxu1  ;;  %v19740_v42 = vld [vmem:[#allocation43_spill] sm:$0xff] }
 0xc7a   : > { %19736 = vst [vmem:[#allocation17_spill] sm:$0xff] %v17799_v58  ;;  %v7669_v30 = vpop.xlane.xlu0 %7668  ;;  %v7678_v5 = vpop.xlane.xlu1 %7677  ;;  %v5199_v32 = vadd.f32 %v19740_v42, %v19739_v14  ;;  %v19743_v58 = vld [vmem:[#allocation47_spill] sm:$0xff]  ;;  %v19747_v14 = vld [vmem:[#allocation57_spill] sm:$0xff] }
 0xc7b   : > { %13759 = vpow2.f32 %v7787_v60  ;;  %v7739_v13 = vsub.f32 %v17624_v37, %v7669_v30  ;;  %v12608_v33 = vpop.f32.mrf.mxu1  ;;  %v7742_v26 = vsub.f32 %v17631_v23, %v7678_v5  ;;  %v19742_v60 = vld [vmem:[#allocation82_spill] sm:$0xff] }
 0xc7c   : > { %13761 = vpow2.f32 %v7777_v35  ;;  %v17809_v39 = vadd.f32 %v12608_v33, %v5207_v50  ;;  %v5210_v37 = vadd.f32 %v19743_v58, %v19742_v60  ;;  %v19746_v33 = vld [vmem:[#allocation84_spill] sm:$0xff] }
 0xc7d   : > { %v7783_v1 = vmul.f32 1.442695, %v7739_v13  ;;  %v7075_v7 = vpop.f32.mrf.mxu1  ;;  %v7789_v35 = vmul.f32 1.442695, %v7742_v26  ;;  %v5223_v58 = vadd.f32 %v19747_v14, %v19746_v33 }
 0xc7e   : > { %19741 = vst [vmem:[#allocation16_spill] sm:$0xff] %v17809_v39  ;;  %v7672_v44 = vpop.xlane.xlu1 %7671  ;;  %v17815_v30 = vadd.f32 %v7075_v7, %v5199_v32  ;;  %v19748_v32 = vld [vmem:[#allocation85_spill] sm:$0xff] }
 0xc7f   : > { %13763 = vpow2.f32 %v7783_v1  ;;  %v12609_v61 = vpop.f32.mrf.mxu1  ;;  %v7740_v13 = vsub.f32 %v17634_v9, %v7672_v44  ;;  %v19749_v44 = vld [vmem:[#allocation52_spill] sm:$0xff] }
 0xc80   : > { %v17811_v53 = vpop.eup %13753  ;;  %19744 = vst [vmem:[#allocation8_spill] sm:$0xff] %v17815_v30  ;;  %v17820_v5 = vadd.f32 %v12609_v61, %v5210_v37  ;;  %13765 = vpow2.f32 %v7789_v35  ;;  %v5215_v7 = vadd.f32 %v19749_v44, %v19748_v32 }
 0xc81   : > { %v7853_v23 = vsel %vm1934_vm6, %v17811_v53, 0.0  ;;  %v17822_v27 = vpop.f32.mrf.mxu1  ;;  %v7785_v42 = vmul.f32 1.442695, %v7740_v13 }
 0xc82   : > { %19745 = vst [vmem:[#allocation19_spill] sm:$0xff] %v17820_v5  ;;  %7854 = vadd.xlane.f32.xlu0 %v7853_v23  ;;  %v19751_v23 = vld [vmem:[#allocation86_spill] sm:$0xff]  ;;  %v19752_v5 = vld [vmem:[#allocation53_spill] sm:$0xff] }
 0xc83   : > { %v12612_v1 = vpop.f32.mrf.mxu1  ;;  %v5226_v33 = vadd.f32 %v19752_v5, %v19751_v23  ;;  %13767 = vpow2.f32 %v7785_v42 }
 0xc84   : > { %v17824_v50 = vpop.eup %13755  ;;  %v17834_v60 = vadd.f32 %v12612_v1, %v5223_v58 }
 0xc85   : > { %v7847_v26 = vsel %vm1934_vm6, %v17824_v50, 0.0  ;;  %v17830_v9 = vpop.eup %13757  ;;  %v7091_v37 = vpop.f32.mrf.mxu1 }
 0xc86   : > { %19750 = vst [vmem:[#allocation54_spill] sm:$0xff] %v17834_v60  ;;  %7848 = vadd.xlane.f32.xlu1 %v7847_v26  ;;  %v17840_v35 = vadd.f32 %v7091_v37, %v5215_v7  ;;  %v7856_v30 = vsel %vm1934_vm6, %v17830_v9, 0.0 }
 0xc87   : > { %v12613_v13 = vpop.f32.mrf.mxu1 }
 0xc88   : > { %v17836_v61 = vpop.eup %13759  ;;  %19753 = vst [vmem:[#allocation56_spill] sm:$0xff] %v17840_v35  ;;  %v17848_v58 = vadd.f32 %v12613_v13, %v5226_v33 }
 0xc89   : > { %v7865_v14 = vsel %vm1934_vm6, %v17836_v61, 0.0  ;;  %v17846_v32 = vpop.eup %13761  ;;  %v17850_v1 = vpop.f32.mrf.mxu1 }
 0xc8a   : > { %19754 = vst [vmem:[#allocation59_spill] sm:$0xff] %v17848_v58  ;;  %7866 = vadd.xlane.f32.xlu0 %v7865_v14  ;;  %7857 = vadd.xlane.f32.xlu1 %v7856_v30  ;;  %19755 = vst [vmem:[#allocation2_spill] sm:$0xff] %v17850_v1  ;;  %v7850_v5 = vsel %vm1934_vm6, %v17846_v32, 0.0 }
 0xc8c   : > { %v17854_v26 = vpop.eup %13763  ;;  %v12656_v7 = vpop.f32.mrf.mxu1 }
 0xc8d   : > { %v7859_v23 = vsel %vm1934_vm6, %v17854_v26, 0.0  ;;  %v17859_v33 = vpop.eup %13765 }
 0xc8e   : > { %v7711_v42 = vpop.xlane.xlu0 %7710  ;;  %7851 = vadd.xlane.f32.xlu1 %v7850_v5  ;;  %v7422_v35 = vpop.f32.mrf.mxu1 }
 0xc8f   : > { %v7753_v44 = vsub.f32 %v17643_v52, %v7711_v42  ;;  %v7868_v52 = vsel %vm1934_vm6, %v17859_v33, 0.0 }
 0xc90   : > { %v17865_v42 = vpop.eup %13767 }
 0xc91   : > { %v7811_v37 = vmul.f32 1.442695, %v7753_v44 }
 0xc92   : > { %v7705_v13 = vpop.xlane.xlu0 %7704  ;;  %7860 = vadd.xlane.f32.xlu1 %v7859_v23  ;;  %v7714_v30 = vpop.xlane.xlu1 %7713 }
 0xc93   : > { %13769 = vpow2.f32 %v7811_v37  ;;  %v7751_v14 = vsub.f32 %v17646_v51, %v7705_v13  ;;  %v7754_v58 = vsub.f32 %v17651_v15, %v7714_v30  ;;  %v7862_v51 = vsel %vm1934_vm6, %v17865_v42, 0.0  ;;  %v12657_v15 = vpop.f32.mrf.mxu1 }
 0xc95   : > { %v7807_v60 = vmul.f32 1.442695, %v7751_v14  ;;  %v7813_v5 = vmul.f32 1.442695, %v7754_v58  ;;  %v7425_v14 = vpop.f32.mrf.mxu1 }
 0xc96   : > { %v17867_v44 = vpop.xlane.xlu0 %7722  ;;  %7869 = vadd.xlane.f32.xlu1 %v7868_v52  ;;  %v7708_v39 = vpop.xlane.xlu1 %7707  ;;  %v7577_v52 = vmul.f32 0.35355338, %v12657_v15 }
 0xc97   : > { %13771 = vpow2.f32 %v7807_v60  ;;  %v7752_v23 = vsub.f32 %v17654_v62, %v7708_v39  ;;  %v12660_v39 = vpop.f32.mrf.mxu1 }
 0xc98   : > { %13773 = vpow2.f32 %v7813_v5 }
 0xc99   : > { %v7809_v37 = vmul.f32 1.442695, %v7752_v23  ;;  %v17882_v23 = vadd.f32 %v17517_v24, %v7577_v52  ;;  %v7574_v52 = vmul.f32 0.35355338, %v7422_v35 }
 0xc9a   : > { %v7717_v13 = vpop.xlane.xlu0 %7716  ;;  %7863 = vadd.xlane.f32.xlu1 %v7862_v51  ;;  %v7576_v51 = vmul.f32 0.35355338, %v12656_v7 }
 0xc9b   : > { %v7755_v58 = vsub.f32 %v17664_v19, %v7717_v13  ;;  %13775 = vpow2.f32 %v7809_v37  ;;  %v7575_v19 = vmul.f32 0.35355338, %v7425_v14  ;;  %v7438_v13 = vpop.f32.mrf.mxu1  ;;  %v7688_v24 = vsel %vm1934_vm6, %v17882_v23, -inf }
 0xc9c   : > { %v17896_v14 = vadd.f32 %v17502_v34, %v7576_v51 }
 0xc9d   : > { %v7815_v30 = vmul.f32 1.442695, %v7755_v58 }
 0xc9e   : > { %v7685_v34 = vsel %vm1934_vm6, %v17896_v14, -inf }
 0xc9f   : > { %13777 = vpow2.f32 %v7815_v30  ;;  %v17891_v30 = vadd.f32 %v17528_v49, %v7575_v19  ;;  %v17905_v49 = vadd.f32 %v17508_v2, %v7574_v52  ;;  %v7580_v19 = vmul.f32 0.35355338, %v12660_v39 }
 0xca0   : > { %v17873_v47 = vpop.eup %13769 }
 0xca1   : > { %v7901_v62 = vsel %vm1934_vm6, %v17873_v47, 0.0  ;;  %v7679_v2 = vsel %vm1934_vm6, %v17905_v49, -inf }
 0xca2   : > { %7902 = vadd.xlane.f32.xlu1 %v7901_v62  ;;  %v12661_v62 = vpop.f32.mrf.mxu1 }
 0xca4   : > { %v17877_v60 = vpop.eup %13771  ;;  %v7441_v1 = vpop.f32.mrf.mxu1 }
 0xca5   : > { %v17879_v5 = vpop.eup %13773  ;;  %v7895_v37 = vsel %vm1934_vm6, %v17877_v60, 0.0  ;;  %v7579_v51 = vmul.f32 0.35355338, %v7441_v1 }
 0xca6   : > { %7896 = vadd.xlane.f32.xlu1 %v7895_v37  ;;  %v7904_v15 = vsel %vm1934_vm6, %v17879_v5, 0.0  ;;  %v7581_v37 = vmul.f32 0.35355338, %v12661_v62  ;;  %v17915_v62 = vadd.f32 %v17540_v6, %v7580_v19  ;;  %v7757_v19 = vsub.f32 %v17661_v28, %v17867_v44 }
 0xca7   : > { %7905 = vadd.xlane.f32.xlu0 %v7904_v15  ;;  %v7682_v15 = vsel %vm1934_vm6, %v17891_v30, -inf  ;;  %v17920_v39 = vadd.f32 %v17578_v59, %v7579_v51  ;;  %v19756_v59 = vld [vmem:[#allocation21_spill] sm:$0xff] }
 0xca8   : > { %v17888_v58 = vpop.eup %13775  ;;  %v17910_v35 = vadd.f32 %v17560_v16, %v7581_v37  ;;  %v7697_v6 = vsel %vm1934_vm6, %v17915_v62, -inf  ;;  %v7726_v37 = vpop.xlane.xlu1 %7725  ;;  %v7819_v51 = vmul.f32 1.442695, %v7757_v19 }
 0xca9   : > { %v7898_v7 = vsel %vm1934_vm6, %v17888_v58, 0.0 }
 0xcaa   : > { %7689 = vmax.xlane.f32.xlu1 %v7688_v24  ;;  %v7700_v16 = vsel %vm1934_vm6, %v17910_v35, -inf  ;;  %13779 = vpow2.f32 %v7819_v51 }
 0xcab   : > { %7899 = vadd.xlane.f32.xlu0 %v7898_v7  ;;  %v7578_v7 = vmul.f32 0.35355338, %v7438_v13  ;;  %v7694_v13 = vsel %vm1934_vm6, %v17920_v39, -inf }
 0xcac   : > { %v17902_v41 = vpop.eup %13777 }
 0xcad   : > { %v7907_v24 = vsel %vm1934_vm6, %v17902_v41, 0.0  ;;  %v17925_v1 = vadd.f32 %v17555_v38, %v7578_v7  ;;  %v19757_v38 = vld [vmem:[#allocation20_spill] sm:$0xff] }
 0xcae   : > { %7683 = vmax.xlane.f32.xlu1 %v7682_v15  ;;  %v7720_v15 = vpop.xlane.xlu1 %7719 }
 0xcaf   : > { %7686 = vmax.xlane.f32.xlu0 %v7685_v34  ;;  %v7691_v52 = vsel %vm1934_vm6, %v17925_v1, -inf  ;;  %v7756_v34 = vsub.f32 %v17674_v22, %v7720_v15 }
 0xcb1   : > { %v7817_v7 = vmul.f32 1.442695, %v7756_v34 }
 0xcb2   : > { %7908 = vadd.xlane.f32.xlu1 %v7907_v24  ;;  %v7758_v24 = vsub.f32 %v17671_v3, %v7726_v37 }
 0xcb3   : > { %7680 = vmax.xlane.f32.xlu0 %v7679_v2  ;;  %13781 = vpow2.f32 %v7817_v7 }
 0xcb4   : > { %v7821_v2 = vmul.f32 1.442695, %v7758_v24 }
 0xcb6   : > { %7701 = vmax.xlane.f32.xlu1 %v7700_v16  ;;  %13783 = vpow2.f32 %v7821_v2 }
 0xcb7   : > { %7698 = vmax.xlane.f32.xlu0 %v7697_v6  ;;  %v17941_v16 = vpop.eup %13779 }
 0xcba   : > { %7695 = vmax.xlane.f32.xlu1 %v7694_v13 }
 0xcbb   : > { %7692 = vmax.xlane.f32.xlu0 %v7691_v52  ;;  %v7913_v52 = vsel %vm1934_vm6, %v17941_v16, 0.0 }
 0xcc0   : > { %v17943_v13 = vpop.eup %13781 }
 0xcc1   : > { %v7910_v28 = vsel %vm1934_vm6, %v17943_v13, 0.0 }
 0xcc3   : > { %v17949_v22 = vpop.eup %13783 }
 0xcc4   : > { %v7916_v44 = vsel %vm1934_vm6, %v17949_v22, 0.0 }
 0xccb   : > { %13273 = vrot.lane.b32.xlu1 %v19756_v59, %s13980_s27 }
 0xcd1   : > { %13268 = vrot.lane.b32.xlu0 %v19757_v38, %s13980_s27 }
 0xceb   : > { %v7831_v6 = vpop.xlane.xlu0 %7830 }
 0xcef   : > { %v7825_v59 = vpop.xlane.xlu0 %7824  ;;  %7914 = vadd.xlane.f32.xlu1 %v7913_v52 }
 0xcf0   : > { %13785 = vrcp.f32 %v7825_v59  ;;  %7911 = vadd.xlane.f32.xlu0 %v7910_v28 }
 0xcf1   : > { %v7834_v3 = vpop.xlane.xlu1 %7833  ;;  %13787 = vrcp.f32 %v7831_v6 }
 0xcf4   : > { %7917 = vadd.xlane.f32.xlu0 %v7916_v44  ;;  %v13245_v44 = vunpack.i.l.bf16 %v17400_v36 }
 0xcf5   : > { %v7843_v37 = vpop.xlane.xlu0 %7842  ;;  %v7828_v38 = vpop.xlane.xlu1 %7827 }
 0xcf6   : > { %13789 = vrcp.f32 %v7828_v38  ;;  %v13246_v38 = vunpack.i.h.bf16 %v17400_v36  ;;  %v13251_v36 = vunpack.i.h.bf16 %v17396_v20 }
 0xcf7   : > { %13791 = vrcp.f32 %v7834_v3  ;;  %v13241_v3 = vunpack.i.h.bf16 %v17390_v10 }
 0xcf9   : > { %v7837_v15 = vpop.xlane.xlu0 %7836  ;;  %v7846_v19 = vpop.xlane.xlu1 %7845 }
 0xcfa   : > { %13793 = vrcp.f32 %v7837_v15 }
 0xcfb   : > { %13795 = vrcp.f32 %v7843_v37 }
 0xcfd   : > { %v13786_v34 = vpop.eup %13785  ;;  %v7840_v51 = vpop.xlane.xlu1 %7839 }
 0xcfe   : > { %v7920_v24 = vmul.f32 %v13786_v34, %v17740_v8  ;;  %13797 = vrcp.f32 %v7840_v51  ;;  %v13788_v7 = vpop.eup %13787  ;;  %v19758_v8 = vunpack.i.l.bf16 %v17390_v10  ;;  %v13255_v51 = vunpack.i.l.bf16 %v17403_v29 }
 0xcff   : > { %13799 = vrcp.f32 %v7846_v19  ;;  %v7924_v59 = vmul.f32 %v13788_v7, %v17735_v0  ;;  %v19759_v0 = vld [vmem:[#allocation23_spill] sm:$0xff] }
 0xd00   : > { %12694 = vmatprep.mubr.msk.f32.mxu1 %vm1934_vm6, %v7920_v24  ;;  %8454 = vrot.lane.b32.xlu1 %v19668_v21, %s13980_s27 }
 0xd03   : > { %v13790_v2 = vpop.eup %13789 }
 0xd04   : > { %v7922_v6 = vmul.f32 %v13790_v2, %v17748_v17  ;;  %v13792_v52 = vpop.eup %13791 }
 0xd05   : > { %v7926_v17 = vmul.f32 %v13792_v52, %v17744_v55 }
 0xd06   : > { %12695 = vmatmul.mubr.msk.f32.vlgmr.msra.gmra.mxu1 %vm1934_vm6, %v7922_v6 }
 0xd07   : > { %v13794_v28 = vpop.eup %13793  ;;  %12707 = vmatpush3.msra.mxu1 %v19758_v8  ;;  %12697 = vmatprep.mubr.msk.f32.mxu1 %vm1934_vm6, %v7924_v59 }
 0xd08   : > { %v7928_v21 = vmul.f32 %v13794_v28, %v17766_v45  ;;  %12708 = vmatprep.subr.mxu1 %v13241_v3  ;;  %v13796_v37 = vpop.eup %13795  ;;  %v13250_v45 = vunpack.i.l.bf16 %v17396_v20 }
 0xd09   : > { %12709 = vmatpush3.msra.mxu1 %v13241_v3  ;;  %v7932_v19 = vmul.f32 %v13796_v37, %v17752_v11 }
 0xd0a   : > { %8456 = vrot.lane.b32.xlu0 %v19759_v0, %s13980_s27  ;;  %12710 = vmatprep.subr.mxu1 %v13245_v44 }
 0xd0b   : > { %12698 = vmatmul.mubr.msk.f32.gmra.mxu1 %vm1934_vm6, %v7926_v17  ;;  %v13798_v10 = vpop.eup %13797  ;;  %v7855_v11 = vpop.xlane.xlu0 %7854 }
 0xd0c   : > { %12711 = vmatpush3.msra.mxu1 %v13245_v44  ;;  %12700 = vmatprep.mubr.msk.f32.mxu1 %vm1934_vm6, %v7928_v21  ;;  %v7930_v15 = vmul.f32 %v13798_v10, %v17779_v43  ;;  %v13800_v55 = vpop.eup %13799 }
 0xd0d   : > { %12712 = vmatprep.subr.mxu1 %v13246_v38  ;;  %v7934_v43 = vmul.f32 %v13800_v55, %v17764_v63 }
 0xd0e   : > { %12713 = vmatpush3.msra.mxu1 %v13246_v38  ;;  %8452 = vrot.lane.b32.xlu0 %v19667_v18, %s13980_s27  ;;  %v13256_v18 = vunpack.i.h.bf16 %v17403_v29 }
 0xd0f   : > { %12714 = vmatprep.subr.mxu1 %v13250_v45  ;;  %12701 = vmatmul.mubr.msk.f32.gmra.mxu1 %vm1934_vm6, %v7930_v15  ;;  %v7849_v34 = vpop.xlane.xlu1 %7848 }
 0xd10   : > { %12715 = vmatpush3.msra.mxu1 %v13250_v45  ;;  %13801 = vrcp.f32 %v7849_v34  ;;  %12703 = vmatprep.mubr.msk.f32.mxu1 %vm1934_vm6, %v7932_v19 }
 0xd11   : > { %12716 = vmatprep.subr.mxu1 %v13251_v36  ;;  %13803 = vrcp.f32 %v7855_v11 }
 0xd12   : > { %12717 = vmatpush3.msra.mxu1 %v13251_v36  ;;  %8450 = vrot.lane.b32.xlu0 %v19669_v40, %s13980_s27 }
 0xd13   : > { %12718 = vmatprep.subr.mxu1 %v13255_v51  ;;  %12704 = vmatmul.mubr.msk.f32.gmra.mxu1 %vm1934_vm6, %v7934_v43  ;;  %v7858_v20 = vpop.xlane.xlu1 %7857  ;;  %v7867_v2 = vpop.xlane.xlu0 %7866 }
 0xd14   : > { %12719 = vmatpush3.msra.mxu1 %v13255_v51 }
 0xd15   : > { %12720 = vmatprep.subr.mxu1 %v13256_v18 }
 0xd16   : > { %12721 = vmatpush3.msra.mxu1 %v13256_v18  ;;  %8448 = vrot.lane.b32.xlu0 %v19670_v4, %s13980_s27 }
 0xd17   : > { %v7852_v24 = vpop.xlane.xlu1 %7851 }
 0xd18   : > { %13805 = vrcp.f32 %v7852_v24 }
 0xd19   : > { %13807 = vrcp.f32 %v7858_v20 }
 0xd1b   : > { %v7861_v63 = vpop.xlane.xlu1 %7860 }
 0xd1c   : > { %13809 = vrcp.f32 %v7861_v63 }
 0xd1d   : > { %v13802_v40 = vpop.eup %13801  ;;  %13811 = vrcp.f32 %v7867_v2 }
 0xd1e   : > { %v7936_v29 = vmul.f32 %v13802_v40, %v17824_v50  ;;  %v13804_v52 = vpop.eup %13803 }
 0xd1f   : > { %v7870_v7 = vpop.xlane.xlu1 %7869  ;;  %v7940_v3 = vmul.f32 %v13804_v52, %v17811_v53 }
 0xd20   : > { %12722 = vmatprep.mubr.msk.f32.mxu1 %vm1934_vm6, %v7936_v29 }
 0xd23   : > { %v7864_v6 = vpop.xlane.xlu1 %7863 }
 0xd24   : > { %13813 = vrcp.f32 %v7864_v6 }
 0xd25   : > { %v13806_v59 = vpop.eup %13805  ;;  %13815 = vrcp.f32 %v7870_v7 }
 0xd26   : > { %v7938_v4 = vmul.f32 %v13806_v59, %v17846_v32  ;;  %v13808_v28 = vpop.eup %13807 }
 0xd27   : > { %v7942_v50 = vmul.f32 %v13808_v28, %v17830_v9 }
 0xd28   : > { %12723 = vmatmul.mubr.msk.f32.vlgmr.msra.gmra.mxu1 %vm1934_vm6, %v7938_v4 }
 0xd29   : > { %v13810_v8 = vpop.eup %13809  ;;  %12725 = vmatprep.mubr.msk.f32.mxu1 %vm1934_vm6, %v7940_v3 }
 0xd2a   : > { %v7944_v21 = vmul.f32 %v13810_v8, %v17854_v26  ;;  %v13812_v17 = vpop.eup %13811 }
 0xd2b   : > { %v17996_v44 = vpop.xlane.xlu1 %7902  ;;  %v7948_v9 = vmul.f32 %v13812_v17, %v17836_v61 }
 0xd2c   : > { %12726 = vmatmul.mubr.msk.f32.gmra.mxu1 %vm1934_vm6, %v7942_v50 }
 0xd2d   : > { %12728 = vmatprep.mubr.msk.f32.mxu1 %vm1934_vm6, %v7944_v21 }
 0xd2f   : > { %v7897_v32 = vpop.xlane.xlu1 %7896 }
 0xd30   : > { %v18000_v0 = vpop.xlane.xlu0 %7905  ;;  %13817 = vrcp.f32 %v7897_v32 }
 0xd31   : > { %v13814_v53 = vpop.eup %13813 }
 0xd32   : > { %v7946_v37 = vmul.f32 %v13814_v53, %v17865_v42  ;;  %v13816_v38 = vpop.eup %13815 }
 0xd33   : > { %v7690_v10 = vpop.xlane.xlu1 %7689  ;;  %v7950_v55 = vmul.f32 %v13816_v38, %v17859_v33 }
 0xd34   : > { %v18004_v45 = vpop.xlane.xlu0 %7899  ;;  %v7746_v26 = vsub.f32 %v17882_v23, %v7690_v10  ;;  %12729 = vmatmul.mubr.msk.f32.gmra.mxu1 %vm1934_vm6, %v7946_v37 }
 0xd35   : > { %12731 = vmatprep.mubr.msk.f32.mxu1 %vm1934_vm6, %v7948_v9 }
 0xd36   : > { %v7797_v15 = vmul.f32 1.442695, %v7746_v26 }
 0xd37   : > { %v7684_v19 = vpop.xlane.xlu1 %7683 }
 0xd38   : > { %13819 = vpow2.f32 %v7797_v15  ;;  %v7687_v36 = vpop.xlane.xlu0 %7686  ;;  %v7744_v42 = vsub.f32 %v17891_v30, %v7684_v19  ;;  %12732 = vmatmul.mubr.msk.f32.gmra.mxu1 %vm1934_vm6, %v7950_v55 }
 0xd39   : > { %v7745_v61 = vsub.f32 %v17896_v14, %v7687_v36 }
 0xd3a   : > { %v7793_v34 = vmul.f32 1.442695, %v7744_v42  ;;  %v18063_v42 = vld [vmem:[%s19299_s6 + $0xc] sm:$0xf] }
 0xd3b   : > { %v7795_v51 = vmul.f32 1.442695, %v7745_v61  ;;  %v18013_v43 = vpop.xlane.xlu1 %7908 }
 0xd3c   : > { %13821 = vpow2.f32 %v7793_v34  ;;  %v7681_v23 = vpop.xlane.xlu0 %7680 }
 0xd3d   : > { %v13818_v18 = vpop.eup %13817  ;;  %13823 = vpow2.f32 %v7795_v51  ;;  %v7743_v20 = vsub.f32 %v17905_v49, %v7681_v23 }
 0xd3e   : > { %v7968_v33 = vmul.f32 %v13818_v18, %v17877_v60 }
 0xd3f   : > { %v7791_v11 = vmul.f32 1.442695, %v7743_v20  ;;  %v7702_v24 = vpop.xlane.xlu1 %7701 }
 0xd40   : > { %v7699_v63 = vpop.xlane.xlu0 %7698  ;;  %v7750_v30 = vsub.f32 %v17910_v35, %v7702_v24  ;;  %12778 = vmatprep.mubr.msk.f32.mxu1 %vm1934_vm6, %v7968_v33 }
 0xd41   : > { %13825 = vpow2.f32 %v7791_v11  ;;  %v7749_v14 = vsub.f32 %v17915_v62, %v7699_v63 }
 0xd42   : > { %v7805_v40 = vmul.f32 1.442695, %v7750_v30 }
 0xd43   : > { %v7803_v29 = vmul.f32 1.442695, %v7749_v14  ;;  %v7696_v7 = vpop.xlane.xlu1 %7695 }
 0xd44   : > { %13827 = vpow2.f32 %v7805_v40  ;;  %v7693_v2 = vpop.xlane.xlu0 %7692  ;;  %v7748_v6 = vsub.f32 %v17920_v39, %v7696_v7 }
 0xd45   : > { %v18021_v49 = vpop.eup %13819  ;;  %13829 = vpow2.f32 %v7803_v29  ;;  %v7747_v60 = vsub.f32 %v17925_v1, %v7693_v2 }
 0xd46   : > { %v7801_v52 = vmul.f32 1.442695, %v7748_v6  ;;  %v7880_v35 = vsel %vm1934_vm6, %v18021_v49, 0.0 }
 0xd47   : > { %v7799_v59 = vmul.f32 1.442695, %v7747_v60  ;;  %7881 = vadd.xlane.f32.xlu0 %v7880_v35  ;;  %v13274_v39 = vpop.permute.xlu1 %13273 }
 0xd48   : > { %13831 = vpow2.f32 %v7801_v52  ;;  %v13269_v62 = vpop.permute.xlu0 %13268  ;;  %v13275_v21 = vunpack.i.l.bf16 %v13274_v39  ;;  %v13276_v17 = vunpack.i.h.bf16 %v13274_v39 }
 0xd49   : > { %v18026_v4 = vpop.eup %13821  ;;  %13833 = vpow2.f32 %v7799_v59  ;;  %v13270_v28 = vunpack.i.l.bf16 %v13269_v62  ;;  %v13271_v50 = vunpack.i.h.bf16 %v13269_v62 }
 0xd4a   : > { %v18028_v3 = vpop.eup %13823  ;;  %v7874_v8 = vsel %vm1934_vm6, %v18026_v4, 0.0  ;;  %13835 = vrcp.f32 %v17996_v44 }
 0xd4b   : > { %12742 = vmatprep.subr.mxu0 %v13270_v28  ;;  %v7877_v1 = vsel %vm1934_vm6, %v18028_v3, 0.0  ;;  %7875 = vadd.xlane.f32.xlu0 %v7874_v8  ;;  %13837 = vrcp.f32 %v18000_v0 }
 0xd4c   : > { %7878 = vadd.xlane.f32.xlu1 %v7877_v1  ;;  %12743 = vmatpush3.msra.mxu0 %v13270_v28  ;;  %13839 = vrcp.f32 %v18004_v45 }
 0xd4d   : > { %12744 = vmatprep.subr.mxu0 %v13271_v50  ;;  %13841 = vrcp.f32 %v18013_v43 }
 0xd4e   : > { %v18034_v32 = vpop.eup %13825  ;;  %12745 = vmatpush3.msra.mxu0 %v13271_v50 }
 0xd4f   : > { %12746 = vmatprep.subr.mxu0 %v13275_v21  ;;  %v7871_v53 = vsel %vm1934_vm6, %v18034_v32, 0.0 }
 0xd50   : > { %7872 = vadd.xlane.f32.xlu1 %v7871_v53  ;;  %12747 = vmatpush3.msra.mxu0 %v13275_v21 }
 0xd51   : > { %v18038_v37 = vpop.eup %13827  ;;  %12748 = vmatprep.subr.mxu0 %v13276_v17 }
 0xd52   : > { %v18040_v38 = vpop.eup %13829  ;;  %12749 = vmatpush3.msra.mxu0 %v13276_v17  ;;  %v7892_v10 = vsel %vm1934_vm6, %v18038_v37, 0.0 }
 0xd53   : > { %v7889_v9 = vsel %vm1934_vm6, %v18040_v38, 0.0  ;;  %7893 = vadd.xlane.f32.xlu0 %v7892_v10  ;;  %12995 = vmatprep.subr.msk.bf16.mxu0 %vm4852_vm1, %v18063_v42 }
 0xd54   : > { %7890 = vadd.xlane.f32.xlu1 %v7889_v9 }
 0xd55   : > { %v18046_v26 = vpop.eup %13831 }
 0xd56   : > { %v18048_v15 = vpop.eup %13833  ;;  %v7886_v55 = vsel %vm1934_vm6, %v18046_v26, 0.0 }
 0xd57   : > { %v7883_v19 = vsel %vm1934_vm6, %v18048_v15, 0.0  ;;  %7887 = vadd.xlane.f32.xlu0 %v7886_v55  ;;  %v13836_v45 = vpop.eup %13835 }
 0xd58   : > { %7884 = vadd.xlane.f32.xlu1 %v7883_v19  ;;  %v13838_v43 = vpop.eup %13837  ;;  %v7972_v39 = vmul.f32 %v13836_v45, %v17873_v47 }
 0xd59   : > { %v13840_v6 = vpop.eup %13839  ;;  %v18092_v8 = vmul.f32 %v13838_v43, %v17879_v5 }
 0xd5a   : > { %v13842_v52 = vpop.eup %13841  ;;  %v7970_v1 = vmul.f32 %v13840_v6, %v17888_v58 }
 0xd5b   : > { %v7976_v19 = vmul.f32 %v13842_v52, %v17902_v41 }
 0xd69   : > { %8444 = vrot.lane.b32.xlu1 %v19671_v54, %s13980_s27 }
 0xd6d   : > { %8446 = vrot.lane.b32.xlu0 %v19550_v57, %s13980_s27 }
 0xd71   : > { %8442 = vrot.lane.b32.xlu0 %v19672_v31, %s13980_s27 }
 0xd78   : > { %v7915_v61 = vpop.xlane.xlu1 %7914 }
 0xd79   : > { %v7912_v36 = vpop.xlane.xlu0 %7911  ;;  %13843 = vrcp.f32 %v7915_v61  ;;  %v8852_v61 = vsel %vm4852_vm1, %v18063_v42, 0 }
 0xd7a   : > { %13845 = vrcp.f32 %v7912_v36 }
 0xd7c   : > { %v8455_v54 = vpop.permute.xlu1 %8454 }
 0xd7d   : > { %v7918_v34 = vpop.xlane.xlu0 %7917 }
 0xd81   : > { %v8457_v51 = vpop.permute.xlu0 %8456 }
 0xd82   : > { %12762 = vmatprep.subr.mxu1 %v8457_v51 }
 0xd83   : > { %12763 = vmatpush3.msra.mxu1 %v8457_v51 }
 0xd84   : > { %12764 = vmatprep.subr.mxu1 %v8455_v54 }
 0xd85   : > { %v8453_v57 = vpop.permute.xlu0 %8452  ;;  %12765 = vmatpush3.msra.mxu1 %v8455_v54 }
 0xd86   : > { %12766 = vmatprep.subr.mxu1 %v8453_v57  ;;  %v13844_v62 = vpop.eup %13843 }
 0xd87   : > { %12767 = vmatpush3.msra.mxu1 %v8453_v57  ;;  %v13846_v50 = vpop.eup %13845  ;;  %v18110_v36 = vmul.f32 %v13844_v62, %v17941_v16 }
 0xd89   : > { %v8451_v31 = vpop.permute.xlu0 %8450 }
 0xd8a   : > { %12768 = vmatprep.subr.mxu1 %v8451_v31 }
 0xd8b   : > { %12769 = vmatpush3.msra.mxu1 %v8451_v31 }
 0xd8d   : > { %v8449_v23 = vpop.permute.xlu0 %8448 }
 0xd8e   : > { %12770 = vmatprep.subr.mxu1 %v8449_v23 }
 0xd8f   : > { %12771 = vmatpush3.msra.mxu1 %v8449_v23 }
 0xdc6   : > { %v12696_v18 = vpop.f32.mrf.mxu1 }
 0xdc7   : > { %vm8596_vm4 = vcmp.gt.f32.partialorder %v12696_v18, 0.5  ;;  %v8620_v10 = vmul.f32 0.25, %v12696_v18 }
 0xdc8   : > { %v8097_v20 = vpop.f32.mrf.mxu1  ;;  %v18080_v7 = vsel %vm8596_vm4, 1.0, %v19566_v12 }
 0xdc9   : > { %vm8595_vm7 = vcmp.gt.f32.partialorder %v8097_v20, 0.5  ;;  %v8628_v28 = vsub.f32 1.0, %v18080_v7  ;;  %v8619_v51 = vmul.f32 0.25, %v8097_v20  ;;  %v18124_v20 = vmul.f32 %v13846_v50, %v17943_v13 }
 0xdca   : > { %v18084_v35 = vsel %vm8595_vm7, 1.0, %v19566_v12 }
 0xdcb   : > { %v18068_v11 = vpop.f32.mrf.mxu1  ;;  %v8627_v9 = vsub.f32 1.0, %v18084_v35  ;;  %v8636_v31 = vmul.f32 %v8628_v28, %v8620_v10 }
 0xdcc   : > { %vm8598_vm8 = vcmp.gt.f32.partialorder %v18068_v11, 0.5  ;;  %v8622_v23 = vmul.f32 0.25, %v18068_v11 }
 0xdcd   : > { %v18073_v30 = vpop.f32.mrf.mxu1  ;;  %v18096_v21 = vsel %vm8598_vm8, 1.0, %v19566_v12  ;;  %v8635_v11 = vmul.f32 %v8627_v9, %v8619_v51 }
 0xdce   : > { %vm8597_vm9 = vcmp.gt.f32.partialorder %v18073_v30, 0.5  ;;  %v8630_v54 = vsub.f32 1.0, %v18096_v21 }
 0xdcf   : > { %v18075_v40 = vpop.f32.mrf.mxu1  ;;  %v18103_v47 = vsel %vm8597_vm9, 1.0, %v19566_v12 }
 0xdd0   : > { %v7882_v33 = vpop.xlane.xlu0 %7881  ;;  %vm8600_vm10 = vcmp.gt.f32.partialorder %v18075_v40, 0.5  ;;  %v8629_v41 = vsub.f32 1.0, %v18103_v47  ;;  %v8638_v43 = vmul.f32 %v8630_v54, %v8622_v23 }
 0xdd1   : > { %v18077_v29 = vpop.f32.mrf.mxu1  ;;  %v18118_v57 = vsel %vm8600_vm10, 1.0, %v19566_v12 }
 0xdd2   : > { %vm8599_vm11 = vcmp.gt.f32.partialorder %v18077_v29, 0.5 }
 0xdd3   : > { %v18087_v59 = vpop.f32.mrf.mxu1 }
 0xdd4   : > { %v7876_v24 = vpop.xlane.xlu0 %7875  ;;  %vm8602_vm1 = vcmp.gt.f32.partialorder %v18087_v59, 0.5 }
 0xdd5   : > { %v7879_v63 = vpop.xlane.xlu1 %7878  ;;  %13847 = vrcp.f32 %v7876_v24  ;;  %v18106_v58 = vpop.f32.mrf.mxu1  ;;  %v18152_v50 = vsel %vm8602_vm1, 1.0, %v19566_v12 }
 0xdd6   : > { %13849 = vrcp.f32 %v7879_v63  ;;  %vm8601_vm14 = vcmp.gt.f32.partialorder %v18106_v58, 0.5 }
 0xdd9   : > { %v7873_v14 = vpop.xlane.xlu1 %7872 }
 0xdda   : > { %13851 = vrcp.f32 %v7873_v14 }
 0xddb   : > { %13853 = vrcp.f32 %v7882_v33  ;;  %v18129_v33 = vsel %vm8599_vm11, 1.0, %v19566_v12 }
 0xddc   : > { %v7894_v44 = vpop.xlane.xlu0 %7893 }
 0xddd   : > { %v7891_v0 = vpop.xlane.xlu1 %7890 }
 0xdde   : > { %13855 = vrcp.f32 %v7891_v0  ;;  %v8624_v0 = vmul.f32 0.25, %v18075_v40  ;;  %v8631_v40 = vsub.f32 1.0, %v18129_v33 }
 0xde0   : > { %v7888_v2 = vpop.xlane.xlu0 %7887 }
 0xde1   : > { %13857 = vrcp.f32 %v7888_v2  ;;  %v7885_v60 = vpop.xlane.xlu1 %7884 }
 0xde2   : > { %13859 = vrcp.f32 %v7885_v60  ;;  %v13848_v53 = vpop.eup %13847 }
 0xde3   : > { %13861 = vrcp.f32 %v7918_v34  ;;  %v13850_v5 = vpop.eup %13849  ;;  %v7954_v24 = vmul.f32 %v13848_v53, %v18026_v4 }
 0xde4   : > { %v8447_v17 = vpop.permute.xlu0 %8446  ;;  %13863 = vrcp.f32 %v7894_v44  ;;  %v8621_v44 = vmul.f32 0.25, %v18073_v30  ;;  %v7956_v45 = vmul.f32 %v13850_v5, %v18028_v3  ;;  %v8623_v30 = vmul.f32 0.25, %v18077_v29 }
 0xde5   : > { %12772 = vmatprep.subr.mxu1 %v8447_v17  ;;  %v8445_v55 = vpop.permute.xlu1 %8444 }
 0xde6   : > { %12773 = vmatpush3.msra.mxu1 %v8447_v17  ;;  %v8637_v3 = vmul.f32 %v8629_v41, %v8621_v44 }
 0xde7   : > { %v13852_v34 = vpop.eup %13851  ;;  %12774 = vmatprep.subr.mxu1 %v8445_v55 }
 0xde8   : > { %v8443_v16 = vpop.permute.xlu0 %8442  ;;  %v12724_v18 = vpop.f32.mrf.mxu1  ;;  %12775 = vmatpush3.msra.mxu1 %v8445_v55  ;;  %v7952_v42 = vmul.f32 %v13852_v34, %v18034_v32  ;;  %v8632_v32 = vsub.f32 1.0, %v18118_v57 }
 0xde9   : > { %v8644_v63 = vadd.f32 %v12724_v18, %v8636_v31  ;;  %12776 = vmatprep.subr.mxu1 %v8443_v16  ;;  %v13854_v14 = vpop.eup %13853 }
 0xdea   : > { %12750 = vmatprep.mubr.msk.f32.mxu0 %vm1934_vm6, %v7952_v42  ;;  %v8250_v13 = vpop.f32.mrf.mxu1  ;;  %12777 = vmatpush3.msra.mxu1 %v8443_v16  ;;  %v7958_v62 = vmul.f32 %v13854_v14, %v18021_v49  ;;  %v8640_v53 = vmul.f32 %v8632_v32, %v8624_v0 }
 0xdeb   : > { %vm8652_vm12 = vcmp.gt.f32.partialorder %v8644_v63, 0.5  ;;  %v8643_v4 = vadd.f32 %v8635_v11, %v8250_v13  ;;  %12751 = vmatmul.mubr.msk.f32.vlgmr.msra.gmra.mxu0 %vm1934_vm6, %v7954_v24  ;;  %12779 = vmatmul.mubr.msk.f32.vlgmr.msra.gmra.mxu1 %vm1934_vm6, %v7970_v1  ;;  %v13856_v60 = vpop.eup %13855  ;;  %v8676_v1 = vmul.f32 0.25, %v8644_v63  ;;  %v8626_v63 = vmul.f32 0.25, %v18087_v59 }
 0xdec   : > { %v18143_v2 = vsel %vm8652_vm12, 1.0, %v19566_v12  ;;  %12753 = vmatprep.mubr.msk.f32.mxu0 %vm1934_vm6, %v7956_v45  ;;  %v12727_v6 = vpop.f32.mrf.mxu1  ;;  %12781 = vmatprep.mubr.msk.f32.mxu1 %vm1934_vm6, %v7972_v39  ;;  %v8787_v13 = vpack.c.bf16 %v18080_v7, %v18084_v35  ;;  %v8625_v59 = vmul.f32 0.25, %v18106_v58  ;;  %v8789_v58 = vpack.c.bf16 %v18118_v57, %v18129_v33 }
 0xded   : > { %vm8651_vm13 = vcmp.gt.f32.partialorder %v8643_v4, 0.5  ;;  %v8646_v52 = vadd.f32 %v12727_v6, %v8638_v43  ;;  %12791 = vmatpush3.bf16.msra.mxu0 %v8852_v61  ;;  %v8684_v28 = vsub.f32 1.0, %v18143_v2  ;;  %v8675_v9 = vmul.f32 0.25, %v8643_v4 }
 0xdee   : > { %v13858_v29 = vpop.eup %13857  ;;  %v18155_v17 = vsel %vm8651_vm13, 1.0, %v19566_v12  ;;  %v8260_v39 = vpop.f32.mrf.mxu1 }
 0xdef   : > { %v13860_v10 = vpop.eup %13859  ;;  %vm8654_vm15 = vcmp.gt.f32.partialorder %v8646_v52, 0.5  ;;  %v8645_v49 = vadd.f32 %v8637_v3, %v8260_v39  ;;  %12754 = vmatmul.mubr.msk.f32.gmra.mxu0 %vm1934_vm6, %v7958_v62  ;;  %12782 = vmatmul.mubr.msk.f32.gmra.mxu1 %vm1934_vm6, %v18092_v8  ;;  %v7962_v61 = vmul.f32 %v13858_v29, %v18046_v26  ;;  %v18167_v34 = vmul.f32 %v8684_v28, %v8676_v1 }
 0xdf0   : > { %v18162_v5 = vsel %vm8654_vm15, 1.0, %v19566_v12  ;;  %12784 = vmatprep.mubr.msk.f32.mxu1 %vm1934_vm6, %v7976_v19  ;;  %v7960_v55 = vmul.f32 %v13860_v10, %v18048_v15  ;;  %v13862_v51 = vpop.eup %13861  ;;  %v8678_v54 = vmul.f32 0.25, %v8646_v52  ;;  %v8683_v31 = vsub.f32 1.0, %v18155_v17 }
 0xdf1   : > { %vm8653_vm2 = vcmp.gt.f32.partialorder %v8645_v49, 0.5  ;;  %v8686_v23 = vsub.f32 1.0, %v18162_v5  ;;  %v13864_v41 = vpop.eup %13863  ;;  %v8634_v8 = vsub.f32 1.0, %v18152_v50  ;;  %v11231_v19 = vsel %vm8601_vm14, 1.0, %v19566_v12 }
 0xdf2   : > { %v18176_v15 = vsel %vm8653_vm2, 1.0, %v19566_v12  ;;  %12756 = vmatprep.mubr.msk.f32.mxu0 %vm1934_vm6, %v7960_v55  ;;  %v7964_v26 = vmul.f32 %v13856_v60, %v18040_v38  ;;  %v8677_v16 = vmul.f32 0.25, %v8645_v49  ;;  %v18183_v18 = vmul.f32 %v8683_v31, %v8675_v9 }
 0xdf3   : > { %12757 = vmatmul.mubr.msk.f32.gmra.mxu0 %vm1934_vm6, %v7962_v61  ;;  %12785 = vmatmul.mubr.msk.f32.gmra.mxu1 %vm1934_vm6, %v18124_v20  ;;  %v18185_v42 = vmul.f32 %v8686_v23, %v8678_v54  ;;  %v8685_v24 = vsub.f32 1.0, %v18176_v15  ;;  %v8639_v38 = vmul.f32 %v8631_v40, %v8623_v30  ;;  %v7982_v14 = vmul.f32 %v13862_v51, %v17949_v22 }
 0xdf4   : > { %12759 = vmatprep.mubr.msk.f32.mxu0 %vm1934_vm6, %v7964_v26  ;;  %v12730_v11 = vpop.f32.mrf.mxu1  ;;  %12787 = vmatprep.mubr.msk.f32.mxu1 %vm1934_vm6, %v18110_v36  ;;  %v8633_v44 = vsub.f32 1.0, %v11231_v19  ;;  %v7966_v20 = vmul.f32 %v13864_v41, %v18038_v37  ;;  %v8642_v36 = vmul.f32 %v8634_v8, %v8626_v63  ;;  %v8788_v22 = vpack.c.bf16 %v18096_v21, %v18103_v47  ;;  %v19763_v26 = vld [vmem:[#allocation31_spill] sm:$0xff] }
 0xdf5   : > { %v8648_v0 = vadd.f32 %v12730_v11, %v8640_v53  ;;  %v18194_v32 = vmul.f32 %v8685_v24, %v8677_v16  ;;  %v8790_v10 = vpack.c.bf16 %v18152_v50, %v11231_v19  ;;  %v8791_v49 = vpack.c.bf16 %v18143_v2, %v18155_v17  ;;  %v19760_v2 = vld [vmem:[#allocation61_spill] sm:$0xff]  ;;  %v19762_v19 = vld [vmem:[#allocation60_spill] sm:$0xff]  ;;  %v19765_v16 = vld [vmem:[#allocation11_spill] sm:$0xff] }
 0xdf6   : > { %v8270_v45 = vpop.f32.mrf.mxu1  ;;  %v8641_v35 = vmul.f32 %v8633_v44, %v8625_v59  ;;  %v8792_v55 = vpack.c.bf16 %v18162_v5, %v18176_v15  ;;  %v19761_v17 = vld [vmem:[#allocation13_spill] sm:$0xff]  ;;  %v5119_v5 = vadd.f32 %v19763_v26, %v19762_v19  ;;  %v19764_v15 = vld [vmem:[#allocation63_spill] sm:$0xff] }
 0xdf7   : > { %vm8656_vm3 = vcmp.gt.f32.partialorder %v8648_v0, 0.5  ;;  %v8647_v4 = vadd.f32 %v8639_v38, %v8270_v45  ;;  %12760 = vmatmul.mubr.msk.f32.gmra.mxu0 %vm1934_vm6, %v7966_v20  ;;  %12788 = vmatmul.mubr.msk.f32.gmra.mxu1 %vm1934_vm6, %v7982_v14  ;;  %v8680_v40 = vmul.f32 0.25, %v8648_v0  ;;  %v5106_v23 = vadd.f32 %v19761_v17, %v19760_v2  ;;  %v19766_v11 = vld [vmem:[#allocation65_spill] sm:$0xff]  ;;  %v19767_v38 = vld [vmem:[#allocation36_spill] sm:$0xff]  ;;  %v19768_v44 = vld [vmem:[#allocation67_spill] sm:$0xff] }
 0xdf8   : > { %v11238_v37 = vsel %vm8656_vm3, 1.0, %v19566_v12  ;;  %12792 = vmatprep.mubr.msk.bf16.mxu0 %vm1469_vm5, %v8787_v13  ;;  %v12733_v43 = vpop.f32.mrf.mxu1  ;;  %v5122_v24 = vadd.f32 %v19765_v16, %v19764_v15  ;;  %v5135_v14 = vadd.f32 %v19767_v38, %v19766_v11  ;;  %v19769_v0 = vld [vmem:[#allocation33_spill] sm:$0xff]  ;;  %v19771_v13 = vld [vmem:[#allocation39_spill] sm:$0xff]  ;;  %v19775_v38 = vld [vmem:[#allocation24_spill] sm:$0xff] }
 0xdf9   : > { %vm8655_vm4 = vcmp.gt.f32.partialorder %v8647_v4, 0.5  ;;  %v8650_v7 = vadd.f32 %v12733_v43, %v8642_v36  ;;  %v8688_v30 = vsub.f32 1.0, %v11238_v37  ;;  %v8679_v21 = vmul.f32 0.25, %v8647_v4  ;;  %v19770_v20 = vld [vmem:[#allocation69_spill] sm:$0xff] }
 0xdfa   : > { %v11237_v6 = vsel %vm8655_vm4, 1.0, %v19566_v12  ;;  %v8280_v3 = vpop.f32.mrf.mxu1  ;;  %v18242_v45 = vadd.f32 %v19771_v13, %v19770_v20 }
 0xdfb   : > { %vm8658_vm6 = vcmp.gt.f32.partialorder %v8650_v7, 0.5  ;;  %v8649_v60 = vadd.f32 %v8641_v35, %v8280_v3  ;;  %12793 = vmatmul.mubr.msk.bf16.vlgmr.msra.gmra.mxu0 %vm1469_vm5, %v8788_v22  ;;  %v8696_v52 = vmul.f32 %v8688_v30, %v8680_v40  ;;  %v8687_v62 = vsub.f32 1.0, %v11237_v6 }
 0xdfc   : > { %v11240_v47 = vsel %vm8658_vm6, 1.0, %v19566_v12  ;;  %12796 = vmatprep.mubr.msk.bf16.mxu0 %vm1469_vm5, %v8789_v58  ;;  %v8682_v28 = vmul.f32 0.25, %v8650_v7  ;;  %v8793_v61 = vpack.c.bf16 %v11238_v37, %v11237_v6  ;;  %v19773_v7 = vld [vmem:[#allocation40_spill] sm:$0xff]  ;;  %v18251_v30 = vadd.f32 %v17692_v25, %v5106_v23 }
 0xdfd   : > { %vm8657_vm7 = vcmp.gt.f32.partialorder %v8649_v60, 0.5  ;;  %v8690_v29 = vsub.f32 1.0, %v11240_v47  ;;  %v18212_v33 = vmul.f32 %v8687_v62, %v8679_v21  ;;  %v8681_v1 = vmul.f32 0.25, %v8649_v60 }
 0xdfe   : > { %v11239_v57 = vsel %vm8657_vm7, 1.0, %v19566_v12 }
 0xdff   : > { %v18214_v39 = vmul.f32 %v8690_v29, %v8682_v28  ;;  %v8689_v53 = vsub.f32 1.0, %v11239_v57  ;;  %v8794_v51 = vpack.c.bf16 %v11240_v47, %v11239_v57  ;;  %v18255_v47 = vadd.f32 %v17698_v56, %v5119_v5 }
 0xe01   : > { %v18217_v9 = vmul.f32 %v8689_v53, %v8681_v1 }
 0xe03   : > { %12797 = vmatmul.mubr.msk.bf16.gmra.mxu0 %vm1469_vm5, %v8790_v10 }
 0xe04   : > { %12800 = vmatprep.mubr.msk.bf16.mxu0 %vm1469_vm5, %v8791_v49  ;;  %v18261_v49 = vadd.f32 %v17704_v48, %v5122_v24 }
 0xe0b   : > { %12801 = vmatmul.mubr.msk.bf16.gmra.mxu0 %vm1469_vm5, %v8792_v55  ;;  %v19774_v55 = vld [vmem:[#allocation12_spill] sm:$0xff] }
 0xe0c   : > { %12804 = vmatprep.mubr.msk.bf16.mxu0 %vm1469_vm5, %v8793_v61  ;;  %v18264_v61 = vadd.f32 %v19774_v55, %v5135_v14  ;;  %v19778_v55 = vld [vmem:[#allocation27_spill] sm:$0xff] }
 0xe13   : > { %12805 = vmatmul.mubr.msk.bf16.gmra.mxu0 %vm1469_vm5, %v8794_v51 }
 0xeab   : > { %v12752_v50 = vpop.f32.mrf.mxu0  ;;  %v12780_v54 = vpop.f32.mrf.mxu1 }
 0xeac   : > { %v8700_v31 = vadd.f32 %v12752_v50, %v18167_v34  ;;  %v5138_v34 = vadd.f32 %v19769_v0, %v19768_v44 }
 0xead   : > { %v8403_v41 = vpop.f32.mrf.mxu0  ;;  %v8556_v8 = vpop.f32.mrf.mxu1 }
 0xeae   : > { %vm8708_vm8 = vcmp.gt.f32.partialorder %v8700_v31, 0.5  ;;  %v8699_v63 = vadd.f32 %v18183_v18, %v8403_v41  ;;  %v8732_v36 = vmul.f32 0.25, %v8700_v31  ;;  %v19772_v18 = vld [vmem:[#allocation71_spill] sm:$0xff]  ;;  %v18278_v14 = vadd.f32 %v19775_v38, %v5138_v34 }
 0xeaf   : > { %v11242_v59 = vsel %vm8708_vm8, 1.0, %v19566_v12  ;;  %v12755_v4 = vpop.f32.mrf.mxu0  ;;  %v12783_v43 = vpop.f32.mrf.mxu1  ;;  %v18248_v35 = vadd.f32 %v19773_v7, %v19772_v18 }
 0xeb0   : > { %v8740_v22 = vsub.f32 1.0, %v11242_v59  ;;  %vm8707_vm9 = vcmp.gt.f32.partialorder %v8699_v63, 0.5  ;;  %v8702_v37 = vadd.f32 %v12755_v4, %v18185_v42  ;;  %v8731_v40 = vmul.f32 0.25, %v8699_v63 }
 0xeb1   : > { %v11241_v58 = vsel %vm8707_vm9, 1.0, %v19566_v12  ;;  %v8413_v6 = vpop.f32.mrf.mxu0  ;;  %v8566_v53 = vpop.f32.mrf.mxu1 }
 0xeb2   : > { %v8748_v3 = vmul.f32 %v8740_v22, %v8732_v36  ;;  %v8795_v60 = vpack.c.bf16 %v11242_v59, %v11241_v58  ;;  %v8739_v21 = vsub.f32 1.0, %v11241_v58  ;;  %vm8710_vm10 = vcmp.gt.f32.partialorder %v8702_v37, 0.5 }
 0xeb3   : > { %v11244_v42 = vsel %vm8710_vm10, 1.0, %v19566_v12  ;;  %v8734_v62 = vmul.f32 0.25, %v8702_v37  ;;  %v8701_v28 = vadd.f32 %v18194_v32, %v8413_v6  ;;  %v12758_v29 = vpop.f32.mrf.mxu0  ;;  %v12786_v19 = vpop.f32.mrf.mxu1  ;;  %v18293_v6 = vld [vmem:[%s19300_s7] ss:$0 sm:$0xff] }
 0xeb4   : > { %v8756_v57 = vadd.f32 %v12780_v54, %v8748_v3  ;;  %v8747_v25 = vmul.f32 %v8739_v21, %v8731_v40  ;;  %v8742_v1 = vsub.f32 1.0, %v11244_v42  ;;  %v8704_v10 = vadd.f32 %v12758_v29, %v8696_v52  ;;  %12808 = vmatprep.mubr.msk.bf16.mxu0 %vm1469_vm5, %v8795_v60 }
 0xeb5   : > { %vm8709_vm11 = vcmp.gt.f32.partialorder %v8701_v28, 0.5  ;;  %v8733_v56 = vmul.f32 0.25, %v8701_v28  ;;  %v8423_v51 = vpop.f32.mrf.mxu0  ;;  %v8576_v4 = vpop.f32.mrf.mxu1  ;;  %v19777_v28 = vld [vmem:[#allocation22_spill] sm:$0xff] }
 0xeb6   : > { %vm8764_vm1 = vcmp.gt.f32.partialorder %v8756_v57, 0.5  ;;  %v8755_v50 = vadd.f32 %v8747_v25, %v8556_v8  ;;  %v8750_v32 = vmul.f32 %v8742_v1, %v8734_v62  ;;  %v11243_v54 = vsel %vm8709_vm11, 1.0, %v19566_v12 }
 0xeb7   : > { %v18268_v31 = vsel %vm8764_vm1, 1.0, %v19566_v12  ;;  %v8796_v52 = vpack.c.bf16 %v11244_v42, %v11243_v54  ;;  %v8741_v2 = vsub.f32 1.0, %v11243_v54  ;;  %vm8712_vm12 = vcmp.gt.f32.partialorder %v8704_v10, 0.5  ;;  %v12761_v17 = vpop.f32.mrf.mxu0  ;;  %v12789_v60 = vpop.f32.mrf.mxu1  ;;  %v19776_v42 = vld [vmem:[#allocation25_spill] sm:$0xff] }
 0xeb8   : > { %vm8763_vm13 = vcmp.gt.f32.partialorder %v8755_v50, 0.5  ;;  %v8758_v48 = vadd.f32 %v12783_v43, %v8750_v32  ;;  %v11246_v23 = vsel %vm8712_vm12, 1.0, %v19566_v12  ;;  %v8736_v41 = vmul.f32 0.25, %v8704_v10  ;;  %v19779_v32 = vld [vmem:[#allocation26_spill] sm:$0xff] }
 0xeb9   : > { %v11249_v26 = vsel %vm8763_vm13, 1.0, %v19566_v12  ;;  %v8749_v5 = vmul.f32 %v8741_v2, %v8733_v56  ;;  %v8744_v8 = vsub.f32 1.0, %v11246_v23  ;;  %v8703_v15 = vadd.f32 %v18212_v33, %v8423_v51  ;;  %12809 = vmatmul.mubr.msk.bf16.gmra.mxu0 %vm1469_vm5, %v8796_v52  ;;  %v8433_v16 = vpop.f32.mrf.mxu0 }
 0xeba   : > { %v8799_v24 = vpack.c.bf16 %v18268_v31, %v11249_v26  ;;  %vm8766_vm14 = vcmp.gt.f32.partialorder %v8758_v48, 0.5  ;;  %v8706_v63 = vadd.f32 %v12761_v17, %v18214_v39  ;;  %v8705_v11 = vadd.f32 %v18217_v9, %v8433_v16 }
 0xebb   : > { %v8757_v44 = vadd.f32 %v8749_v5, %v8566_v53  ;;  %v8752_v0 = vmul.f32 %v8744_v8, %v8736_v41  ;;  %vm8711_vm15 = vcmp.gt.f32.partialorder %v8703_v15, 0.5  ;;  %v12794_v20 = vpop.f32.mrf.mxu0  ;;  %v18281_v13 = vsel %vm8766_vm14, 1.0, %v19566_v12 }
 0xebc   : > { %v11245_v33 = vsel %vm8711_vm15, 1.0, %v19566_v12  ;;  %v8735_v59 = vmul.f32 0.25, %v8703_v15  ;;  %vm8714_vm2 = vcmp.gt.f32.partialorder %v8706_v63, 0.5  ;;  %v8738_v43 = vmul.f32 0.25, %v8706_v63 }
 0xebd   : > { %vm8765_vm3 = vcmp.gt.f32.partialorder %v8757_v44, 0.5  ;;  %v8760_v36 = vadd.f32 %v12786_v19, %v8752_v0  ;;  %v8797_v39 = vpack.c.bf16 %v11246_v23, %v11245_v33  ;;  %v8743_v22 = vsub.f32 1.0, %v11245_v33  ;;  %v8888_v9 = vpop.f32.mrf.mxu0  ;;  %v8586_v23 = vpop.f32.mrf.mxu1 }
 0xebe   : > { %v18285_v34 = vsel %vm8765_vm3, 1.0, %v19566_v12  ;;  %v11248_v37 = vsel %vm8714_vm2, 1.0, %v19566_v12  ;;  %vm8713_vm4 = vcmp.gt.f32.partialorder %v8705_v11, 0.5  ;;  %v8737_v40 = vmul.f32 0.25, %v8705_v11 }
 0xebf   : > { %v8800_v18 = vpack.c.bf16 %v18281_v13, %v18285_v34  ;;  %v8751_v7 = vmul.f32 %v8743_v22, %v8735_v59  ;;  %v8746_v58 = vsub.f32 1.0, %v11248_v37  ;;  %12812 = vmatprep.mubr.msk.bf16.mxu0 %vm1469_vm5, %v8797_v39  ;;  %v12795_v3 = vpop.f32.mrf.mxu0  ;;  %vm8768_vm6 = vcmp.gt.f32.partialorder %v8760_v36, 0.5  ;;  %v13929_v59 = vld [vmem:[%s14073_s18] sm:$0xff]  ;;  %v13930_v13 = vld [vmem:[%s14073_s18 + $0x18] sm:$0xff] }
 0xec0   : > { %v11247_v21 = vsel %vm8713_vm4, 1.0, %v19566_v12  ;;  %v9017_v62 = vadd.f32 %v12794_v20, %v19776_v42  ;;  %v9015_v29 = vadd.f32 %v8888_v9, %v19777_v28  ;;  %v18301_v56 = vadd.f32 %v19778_v55, %v18242_v45  ;;  %v19782_v42 = vld [vmem:[#allocation28_spill] sm:$0xff] }
 0xec1   : > { %v8759_v57 = vadd.f32 %v8751_v7, %v8576_v4  ;;  %v8754_v25 = vmul.f32 %v8746_v58, %v8738_v43  ;;  %v8798_v1 = vpack.c.bf16 %v11248_v37, %v11247_v21  ;;  %v8745_v53 = vsub.f32 1.0, %v11247_v21  ;;  %v8891_v10 = vpop.f32.mrf.mxu0 }
 0xec2   : > { %v9056_v51 = vadd.f32 %v18293_v6, %v9017_v62  ;;  %v9054_v50 = vadd.f32 %v18293_v6, %v9015_v29  ;;  %v9018_v54 = vadd.f32 %v12795_v3, %v19779_v32  ;;  %v9016_v2 = vadd.f32 %v8891_v10, %v18251_v30  ;;  %v19780_v30 = vld [vmem:[#allocation5_spill] sm:$0xff] }
 0xec3   : > { %vm8767_vm7 = vcmp.gt.f32.partialorder %v8759_v57, 0.5  ;;  %v8762_v31 = vadd.f32 %v12789_v60, %v8754_v25  ;;  %v8753_v52 = vmul.f32 %v8745_v53, %v8737_v40  ;;  %12813 = vmatmul.mubr.msk.bf16.gmra.mxu0 %vm1469_vm5, %v8798_v1  ;;  %v12798_v17 = vpop.f32.mrf.mxu0  ;;  %v11254_v48 = vsel %vm8768_vm6, 1.0, %v19566_v12  ;;  %v19783_v32 = vld [vmem:[#allocation29_spill] sm:$0xff] }
 0xec4   : > { %v11253_v45 = vsel %vm8767_vm7, 1.0, %v19566_v12  ;;  %vm9088_vm8 = vcmp.gt.f32.partialorder %v9056_v51, 0.5  ;;  %vm9086_vm9 = vcmp.gt.f32.partialorder %v9054_v50, 0.5  ;;  %12816 = vmatprep.mubr.msk.bf16.mxu0 %vm1469_vm5, %v8799_v24  ;;  %v18317_v8 = vadd.f32 %v19780_v30, %v18248_v35  ;;  %v19781_v35 = vld [vmem:[#allocation14_spill] sm:$0xff] }
 0xec5   : > { %v8801_v41 = vpack.c.bf16 %v11254_v48, %v11253_v45  ;;  %vm8770_vm10 = vcmp.gt.f32.partialorder %v8762_v31, 0.5  ;;  %v8761_v19 = vadd.f32 %v8753_v52, %v8586_v23  ;;  %v18313_v26 = vsel %vm9088_vm8, 1.0, %v19566_v12  ;;  %v8904_v5 = vpop.f32.mrf.mxu0 }
 0xec6   : > { %v18320_v15 = vsel %vm8770_vm10, 1.0, %v19566_v12  ;;  %v9112_v16 = vmul.f32 0.25, %v9056_v51  ;;  %v18323_v63 = vsel %vm9086_vm9, 1.0, %v19566_v12  ;;  %v9120_v24 = vsub.f32 1.0, %v18313_v26  ;;  %v13931_v51 = vld [vmem:[%s14073_s18 + $0x8] sm:$0xff] }
 0xec7   : > { %vm8769_vm11 = vcmp.gt.f32.partialorder %v8761_v19, 0.5  ;;  %v9057_v11 = vadd.f32 %v18293_v6, %v9018_v54  ;;  %v9055_v38 = vadd.f32 %v18293_v6, %v9016_v2  ;;  %v12799_v44 = vpop.f32.mrf.mxu0  ;;  %v9021_v20 = vadd.f32 %v12798_v17, %v19781_v35 }
 0xec8   : > { %v18329_v0 = vsel %vm8769_vm11, 1.0, %v19566_v12  ;;  %v9019_v33 = vadd.f32 %v8904_v5, %v18255_v47  ;;  %v18335_v4 = vadd.f32 %v13929_v59, %v18323_v63  ;;  %v9110_v39 = vmul.f32 0.25, %v9054_v50 }
 0xec9   : > { %v8802_v36 = vpack.c.bf16 %v18320_v15, %v18329_v0  ;;  %vm9089_vm1 = vcmp.gt.f32.partialorder %v9057_v11, 0.5  ;;  %vm9087_vm12 = vcmp.gt.f32.partialorder %v9055_v38, 0.5  ;;  %v8907_v22 = vpop.f32.mrf.mxu0  ;;  %v9118_v9 = vsub.f32 1.0, %v18323_v63  ;;  %v19784_v0 = vld [vmem:[#allocation10_spill] sm:$0xff] }
 0xeca   : > { %v11277_v37 = vsel %vm9089_vm1, 1.0, %v19566_v12  ;;  %v18342_v43 = vsel %vm9087_vm12, 1.0, %v19566_v12  ;;  %v9060_v47 = vadd.f32 %v18293_v6, %v9021_v20  ;;  %v9113_v7 = vmul.f32 0.25, %v9057_v11 }
 0xecb   : > { %v18345_v58 = vmul.f32 0.25, %v9055_v38  ;;  %v9058_v40 = vadd.f32 %v18293_v6, %v9019_v33  ;;  %v9310_v3 = vsel %vm501_vm0, %v18335_v4, 0.0  ;;  %12817 = vmatmul.mubr.msk.bf16.gmra.mxu0 %vm1469_vm5, %v8800_v18  ;;  %v12802_v60 = vpop.f32.mrf.mxu0  ;;  %v9121_v21 = vsub.f32 1.0, %v11277_v37  ;;  %v13932_v38 = vld [vmem:[%s14073_s18 + $0x10] sm:$0xff] }
 0xecc   : > { %vm9092_vm13 = vcmp.gt.f32.partialorder %v9060_v47, 0.5  ;;  %9311 = vadd.xlane.f32.xlu1 %v9310_v3  ;;  %v9022_v62 = vadd.f32 %v12799_v44, %v19782_v42  ;;  %v9020_v28 = vadd.f32 %v8907_v22, %v18261_v49  ;;  %12820 = vmatprep.mubr.msk.bf16.mxu0 %vm1469_vm5, %v8801_v41  ;;  %v9119_v29 = vsub.f32 1.0, %v18342_v43  ;;  %v13933_v22 = vld [vmem:[%s14073_s18 + $0x20] sm:$0xff] }
 0xecd   : > { %v18359_v57 = vsel %vm9092_vm13, 1.0, %v19566_v12  ;;  %vm9090_vm14 = vcmp.gt.f32.partialorder %v9058_v40, 0.5  ;;  %v18362_v34 = vadd.f32 %v13930_v13, %v11277_v37  ;;  %v8920_v18 = vpop.f32.mrf.mxu0  ;;  %v9116_v25 = vmul.f32 0.25, %v9060_v47 }
 0xece   : > { %v18365_v1 = vsel %vm9090_vm14, 1.0, %v19566_v12  ;;  %v9061_v53 = vadd.f32 %v18293_v6, %v9022_v62  ;;  %v9059_v49 = vadd.f32 %v18293_v6, %v9020_v28  ;;  %v9114_v10 = vmul.f32 0.25, %v9058_v40 }
 0xecf   : > { %v9319_v55 = vsel %vm501_vm0, %v18362_v34, 0.0  ;;  %v18373_v50 = vadd.f32 %v13931_v51, %v18342_v43  ;;  %v9025_v54 = vadd.f32 %v12802_v60, %v19783_v32  ;;  %v12803_v31 = vpop.f32.mrf.mxu0  ;;  %v9124_v52 = vsub.f32 1.0, %v18359_v57  ;;  %v19785_v60 = vld [vmem:[#allocation18_spill] sm:$0xff] }
 0xed0   : > { %v9122_v2 = vsub.f32 1.0, %v18365_v1  ;;  %vm9093_vm15 = vcmp.gt.f32.partialorder %v9061_v53, 0.5  ;;  %vm9091_vm2 = vcmp.gt.f32.partialorder %v9059_v49, 0.5  ;;  %9320 = vadd.xlane.f32.xlu1 %v9319_v55  ;;  %v18381_v48 = vmul.f32 0.25, %v9061_v53  ;;  %v13935_v55 = vld [vmem:[%s14073_s18 + $0x30] sm:$0xff] }
 0xed1   : > { %v18379_v17 = vsel %vm9093_vm15, 1.0, %v19566_v12  ;;  %v9313_v45 = vsel %vm501_vm0, %v18373_v50, 0.0  ;;  %v9064_v23 = vadd.f32 %v18293_v6, %v9025_v54  ;;  %v8923_v41 = vpop.f32.mrf.mxu0  ;;  %v11279_v19 = vsel %vm9091_vm2, 1.0, %v19566_v12 }
 0xed2   : > { %v9115_v5 = vmul.f32 0.25, %v9059_v49  ;;  %9314 = vadd.xlane.f32.xlu0 %v9313_v45  ;;  %v9128_v30 = vmul.f32 %v9120_v24, %v9112_v16  ;;  %v9023_v15 = vadd.f32 %v8920_v18, %v18264_v61  ;;  %v9125_v63 = vsub.f32 1.0, %v18379_v17 }
 0xed3   : > { %v9126_v11 = vmul.f32 %v9118_v9, %v9110_v39  ;;  %v18391_v44 = vadd.f32 %v13932_v38, %v18313_v26  ;;  %v9026_v35 = vadd.f32 %v12803_v31, %v19784_v0  ;;  %12821 = vmatmul.mubr.msk.bf16.gmra.mxu0 %vm1469_vm5, %v8802_v36  ;;  %v12806_v20 = vpop.f32.mrf.mxu0  ;;  %v9129_v16 = vmul.f32 %v9121_v21, %v9113_v7  ;;  %v13934_v9 = vld [vmem:[%s14073_s18 + $0x28] sm:$0xff]  ;;  %v13936_v31 = vld [vmem:[%s14073_s18 + $0x38] sm:$0xff]  ;;  %v13937_v0 = vld [vmem:[%s14073_s18 + $0x40] sm:$0xff] }
 0xed4   : > { %v18395_v33 = vadd.f32 %v9128_v30, %v9064_v23  ;;  %v9062_v59 = vadd.f32 %v18293_v6, %v9023_v15  ;;  %v9024_v61 = vadd.f32 %v8923_v41, %v18278_v14  ;;  %v18404_v26 = vadd.f32 %v13933_v22, %v18365_v1  ;;  %v19786_v23 = vld [vmem:[#allocation30_spill] sm:$0xff] }
 0xed5   : > { %v9316_v24 = vsel %vm501_vm0, %v18391_v44, 0.0  ;;  %v9065_v39 = vadd.f32 %v18293_v6, %v9026_v35  ;;  %v18407_v37 = vadd.f32 %v13934_v9, %v11279_v19  ;;  %v8936_v36 = vpop.f32.mrf.mxu0  ;;  %v9123_v43 = vsub.f32 1.0, %v11279_v19 }
 0xed6   : > { %v9134_v47 = vadd.f32 %v9126_v11, %v9062_v59  ;;  %9317 = vadd.xlane.f32.xlu0 %v9316_v24  ;;  %v9063_v7 = vadd.f32 %v18293_v6, %v9024_v61  ;;  %v9127_v14 = vmul.f32 %v9119_v29, %v18345_v58  ;;  %vm9144_vm5 = vcmp.gt.f32.partialorder %v18395_v33, 0.5 }
 0xed7   : > { %v9137_v40 = vadd.f32 %v9129_v16, %v9065_v39  ;;  %v9325_v3 = vsel %vm501_vm0, %v18407_v37, 0.0  ;;  %v9029_v21 = vadd.f32 %v12806_v20, %v19785_v60  ;;  %v12807_v42 = vpop.f32.mrf.mxu0  ;;  %v18416_v62 = vmul.f32 0.25, %v18395_v33  ;;  %v13938_v20 = vld [vmem:[%s14073_s18 + $0x48] sm:$0xff] }
 0xed8   : > { %vm9142_vm3 = vcmp.gt.f32.partialorder %v9134_v47, 0.5  ;;  %v9135_v28 = vadd.f32 %v9127_v14, %v9063_v7  ;;  %v9322_v13 = vsel %vm501_vm0, %v18404_v26, 0.0  ;;  %9326 = vadd.xlane.f32.xlu1 %v9325_v3  ;;  %v18420_v58 = vmul.f32 0.25, %v9134_v47  ;;  %v13939_v47 = vld [vmem:[%s14073_s18 + $0x50] sm:$0xff]  ;;  %v13940_v14 = vld [vmem:[%s14073_s18 + $0x58] sm:$0xff]  ;;  %v13941_v3 = vld [vmem:[%s14073_s18 + $0x60] sm:$0xff] }
 0xed9   : > { %v9068_v29 = vadd.f32 %v18293_v6, %v9029_v21  ;;  %v9132_v18 = vmul.f32 %v9124_v52, %v9116_v25  ;;  %v9027_v1 = vadd.f32 %v8936_v36, %v18301_v56  ;;  %v8939_v53 = vpop.f32.mrf.mxu0  ;;  %vm9145_vm4 = vcmp.gt.f32.partialorder %v9137_v40, 0.5 }
 0xeda   : > { %vm9143_vm6 = vcmp.gt.f32.partialorder %v9135_v28, 0.5  ;;  %9323 = vadd.xlane.f32.xlu0 %v9322_v13  ;;  %v9130_v49 = vmul.f32 %v9122_v2, %v9114_v10  ;;  %v18426_v51 = vadd.f32 %v13935_v55, %v18359_v57  ;;  %v18431_v45 = vadd.f32 %v13936_v31, %v18379_v17  ;;  %v13942_v13 = vld [vmem:[%s14073_s18 + $0x68] sm:$0xff] }
 0xedb   : > { %v9140_v32 = vadd.f32 %v9132_v18, %v9068_v29  ;;  %v9066_v54 = vadd.f32 %v18293_v6, %v9027_v1  ;;  %v9030_v25 = vadd.f32 %v12807_v42, %v19786_v23  ;;  %v18434_v52 = vmul.f32 0.25, %v9137_v40 }
 0xedc   : > { %v18436_v56 = vmul.f32 0.25, %v9135_v28  ;;  %v9328_v10 = vsel %vm501_vm0, %v18426_v51, 0.0  ;;  %v9028_v57 = vadd.f32 %v8939_v53, %v18317_v8  ;;  %v9331_v41 = vsel %vm501_vm0, %v18431_v45, 0.0 }
 0xedd   : > { %v9138_v2 = vadd.f32 %v9130_v49, %v9066_v54  ;;  %v9133_v19 = vmul.f32 %v9125_v63, %v18381_v48  ;;  %v9131_v17 = vmul.f32 %v9123_v43, %v9115_v5  ;;  %9332 = vadd.xlane.f32.xlu1 %v9331_v41  ;;  %v9069_v30 = vadd.f32 %v18293_v6, %v9030_v25 }
 0xede   : > { %9329 = vadd.xlane.f32.xlu0 %v9328_v10  ;;  %v9067_v15 = vadd.f32 %v18293_v6, %v9028_v57  ;;  %v11282_v11 = vsel %vm9142_vm3, 1.0, %v19566_v12  ;;  %v11283_v8 = vsel %vm9143_vm6, 1.0, %v19566_v12  ;;  %vm9148_vm7 = vcmp.gt.f32.partialorder %v9140_v32, 0.5  ;;  %v13943_v57 = vld [vmem:[%s14073_s18 + $0x70] sm:$0xff] }
 0xedf   : > { %v9172_v38 = vmul.f32 0.25, %v9140_v32  ;;  %vm9146_vm8 = vcmp.gt.f32.partialorder %v9138_v2, 0.5  ;;  %v18451_v35 = vadd.f32 %v13937_v0, %v11282_v11  ;;  %v9170_v48 = vmul.f32 0.25, %v9138_v2 }
 0xee0   : > { %v9141_v5 = vadd.f32 %v9133_v19, %v9069_v30  ;;  %v9139_v63 = vadd.f32 %v9131_v17, %v9067_v15  ;;  %v18454_v59 = vadd.f32 %v13938_v20, %v11283_v8  ;;  %v11284_v61 = vsel %vm9144_vm5, 1.0, %v19566_v12  ;;  %v19793_v20 = vld [vmem:[#allocation3_spill] sm:$0xff] }
 0xee1   : > { %v9334_v16 = vsel %vm501_vm0, %v18451_v35, 0.0  ;;  %v11285_v24 = vsel %vm9145_vm4, 1.0, %v19566_v12  ;;  %v11286_v39 = vsel %vm9146_vm8, 1.0, %v19566_v12  ;;  %v9174_v22 = vsub.f32 1.0, %v11282_v11 }
 0xee2   : > { %19787 = vst [vmem:[#allocation58_spill] sm:$0xff] %v18454_v59  ;;  %vm9149_vm9 = vcmp.gt.f32.partialorder %v9141_v5, 0.5  ;;  %vm9147_vm10 = vcmp.gt.f32.partialorder %v9139_v63, 0.5  ;;  %9335 = vadd.xlane.f32.xlu0 %v9334_v16  ;;  %v9175_v9 = vsub.f32 1.0, %v11283_v8  ;;  %v9337_v36 = vsel %vm501_vm0, %v18454_v59, 0.0 }
 0xee3   : > { %v9176_v43 = vsub.f32 1.0, %v11284_v61  ;;  %v18467_v7 = vadd.f32 %v13939_v47, %v11284_v61  ;;  %v9177_v33 = vsub.f32 1.0, %v11285_v24  ;;  %9338 = vadd.xlane.f32.xlu1 %v9337_v36  ;;  %v18470_v40 = vadd.f32 %v13940_v14, %v11285_v24  ;;  %v19794_v61 = vld [vmem:[#allocation75_spill] sm:$0xff]  ;;  %v19795_v24 = vld [vmem:[#allocation46_spill] sm:$0xff]  ;;  %v19798_v14 = vld [vmem:[#allocation45_spill] sm:$0xff] }
 0xee4   : > { %v18473_v60 = vadd.f32 %v13941_v3, %v11286_v39  ;;  %v9178_v21 = vsub.f32 1.0, %v11286_v39  ;;  %v11287_v42 = vsel %vm9147_vm10, 1.0, %v19566_v12  ;;  %v11288_v1 = vsel %vm9148_vm7, 1.0, %v19566_v12 }
 0xee5   : > { %v9340_v28 = vsel %vm501_vm0, %v18467_v7, 0.0  ;;  %v18479_v29 = vadd.f32 %v13942_v13, %v11287_v42  ;;  %v9179_v18 = vsub.f32 1.0, %v11287_v42  ;;  %v9173_v53 = vmul.f32 0.25, %v9141_v5  ;;  %v19800_v13 = vld [vmem:[#allocation83_spill] sm:$0xff] }
 0xee6   : > { %19788 = vst [vmem:[#allocation34_spill] sm:$0xff] %v18473_v60  ;;  %v9171_v49 = vmul.f32 0.25, %v9139_v63  ;;  %9341 = vadd.xlane.f32.xlu0 %v9340_v28  ;;  %v9343_v55 = vsel %vm501_vm0, %v18470_v40, 0.0  ;;  %v9180_v54 = vsub.f32 1.0, %v11288_v1  ;;  %v9346_v31 = vsel %vm501_vm0, %v18473_v60, 0.0 }
 0xee7   : > { %19789 = vst [vmem:[#allocation64_spill] sm:$0xff] %v18479_v29  ;;  %v11289_v23 = vsel %vm9149_vm9, 1.0, %v19566_v12  ;;  %v9184_v25 = vmul.f32 %v9176_v43, %v18416_v62  ;;  %v9182_v10 = vmul.f32 %v9174_v22, %v18420_v58  ;;  %9344 = vadd.xlane.f32.xlu1 %v9343_v55  ;;  %v9349_v32 = vsel %vm501_vm0, %v18479_v29, 0.0  ;;  %v13944_v58 = vld [vmem:[%s14073_s18 + $0x78] sm:$0xff]  ;;  %v19796_v43 = vld [vmem:[#allocation15_spill] sm:$0xff] }
 0xee8   : > { %v18494_v2 = vadd.f32 %v13943_v57, %v11288_v1  ;;  %v9181_v41 = vsub.f32 1.0, %v11289_v23  ;;  %v9185_v19 = vmul.f32 %v9177_v33, %v18434_v52  ;;  %v9183_v17 = vmul.f32 %v9175_v9, %v18436_v56  ;;  %v19797_v33 = vld [vmem:[#allocation79_spill] sm:$0xff] }
 0xee9   : > { %v9188_v30 = vmul.f32 %v9180_v54, %v9172_v38  ;;  %v18498_v15 = vmul.f32 %v9178_v21, %v9170_v48  ;;  %v18500_v11 = vmul.f32 %v9179_v18, %v9171_v49  ;;  %v18505_v8 = vadd.f32 %v13944_v58, %v11289_v23  ;;  %v19792_v38 = vld [vmem:[#allocation7_spill] sm:$0xff]  ;;  %v19799_v21 = vld [vmem:[#allocation6_spill] sm:$0xff] }
 0xeea   : > { %19790 = vst [vmem:[#allocation62_spill] sm:$0xff] %v18494_v2  ;;  %9347 = vadd.xlane.f32.xlu0 %v9346_v31  ;;  %v18502_v62 = vmul.f32 %v9181_v41, %v9173_v53  ;;  %v9352_v0 = vsel %vm501_vm0, %v18494_v2, 0.0  ;;  %v5170_v39 = vadd.f32 %v19795_v24, %v19794_v61  ;;  %v5186_v3 = vadd.f32 %v19798_v14, %v19797_v33  ;;  %v19801_v18 = vld [vmem:[#allocation55_spill] sm:$0xff]  ;;  %v19804_v58 = vld [vmem:[#allocation2_spill] sm:$0xff]  ;;  %v13946_v24 = vld [vmem:[%s14073_s18 + $0x90] sm:$0xff] }
 0xeeb   : > { %19791 = vst [vmem:[#allocation66_spill] sm:$0xff] %v18505_v8  ;;  %9350 = vadd.xlane.f32.xlu1 %v9349_v32  ;;  %v9355_v52 = vsel %vm501_vm0, %v18505_v8, 0.0  ;;  %v5202_v1 = vadd.f32 %v19801_v18, %v19800_v13  ;;  %v19802_v55 = vld [vmem:[#allocation87_spill] sm:$0xff] }
 0xeec   : > { %v7123_v42 = vadd.f32 %v19799_v21, %v5170_v39  ;;  %v19803_v54 = vld [vmem:[#allocation51_spill] sm:$0xff]  ;;  %v7127_v32 = vadd.f32 %v17801_v46, %v5186_v3  ;;  %v13945_v46 = vld [vmem:[%s14073_s18 + $0x80] sm:$0xff] }
 0xeed   : > { %v5218_v31 = vadd.f32 %v19803_v54, %v19802_v55  ;;  %v18529_v57 = vadd.f32 %v17822_v27, %v5202_v1  ;;  %v13947_v55 = vld [vmem:[%s14073_s18 + $0x88] sm:$0xff] }
 0xeee   : > { %9353 = vadd.xlane.f32.xlu0 %v9352_v0 }
 0xeef   : > { %9356 = vadd.xlane.f32.xlu1 %v9355_v52  ;;  %v18532_v0 = vadd.f32 %v19804_v58, %v5218_v31  ;;  %v13948_v31 = vld [vmem:[%s14073_s18 + $0x98] sm:$0xff] }
 0xf79   : > { %v12810_v56 = vpop.f32.mrf.mxu0 }
 0xf7a   : > { %v9033_v48 = vadd.f32 %v12810_v56, %v19792_v38 }
 0xf7b   : > { %v8952_v5 = vpop.f32.mrf.mxu0 }
 0xf7c   : > { %v9072_v63 = vadd.f32 %v18293_v6, %v9033_v48  ;;  %v9031_v16 = vadd.f32 %v8952_v5, %v19793_v20  ;;  %v19805_v5 = vld [vmem:[#allocation9_spill] sm:$0xff] }
 0xf7d   : > { %v12811_v22 = vpop.f32.mrf.mxu0 }
 0xf7e   : > { %v9192_v9 = vadd.f32 %v9184_v25, %v9072_v63  ;;  %v9070_v36 = vadd.f32 %v18293_v6, %v9031_v16  ;;  %v9034_v47 = vadd.f32 %v12811_v22, %v19796_v43 }
 0xf7f   : > { %v8955_v28 = vpop.f32.mrf.mxu0 }
 0xf80   : > { %vm9200_vm11 = vcmp.gt.f32.partialorder %v9192_v9, 0.5  ;;  %v9190_v53 = vadd.f32 %v9182_v10, %v9070_v36  ;;  %v9073_v49 = vadd.f32 %v18293_v6, %v9034_v47  ;;  %v9032_v25 = vadd.f32 %v8955_v28, %v7123_v42  ;;  %v19808_v36 = vld [vmem:[#allocation4_spill] sm:$0xff]  ;;  %v19809_v28 = vld [vmem:[#allocation17_spill] sm:$0xff] }
 0xf81   : > { %v11292_v23 = vsel %vm9200_vm11, 1.0, %v19566_v12  ;;  %v9224_v48 = vmul.f32 0.25, %v9192_v9 }
 0xf82   : > { %vm9198_vm1 = vcmp.gt.f32.partialorder %v9190_v53, 0.5  ;;  %v9193_v41 = vadd.f32 %v9185_v19, %v9073_v49  ;;  %v9071_v10 = vadd.f32 %v18293_v6, %v9032_v25  ;;  %v9232_v38 = vsub.f32 1.0, %v11292_v23 }
 0xf83   : > { %v12814_v52 = vpop.f32.mrf.mxu0  ;;  %v11290_v56 = vsel %vm9198_vm1, 1.0, %v19566_v12  ;;  %v9222_v27 = vmul.f32 0.25, %v9190_v53  ;;  %v18542_v39 = vadd.f32 %v13946_v24, %v11292_v23 }
 0xf84   : > { %vm9201_vm12 = vcmp.gt.f32.partialorder %v9193_v41, 0.5  ;;  %v9037_v63 = vadd.f32 %v12814_v52, %v19805_v5  ;;  %v18538_v20 = vadd.f32 %v13945_v46, %v11290_v56  ;;  %v9191_v19 = vadd.f32 %v9183_v17, %v9071_v10 }
 0xf85   : > { %v11293_v16 = vsel %vm9201_vm12, 1.0, %v19566_v12  ;;  %v8968_v61 = vpop.f32.mrf.mxu0  ;;  %19807 = vst [vmem:[#allocation68_spill] sm:$0xff] %v18542_v39  ;;  %v9230_v47 = vsub.f32 1.0, %v11290_v56  ;;  %v9225_v33 = vmul.f32 0.25, %v9193_v41  ;;  %v9240_v3 = vmul.f32 %v9232_v38, %v9224_v48 }
 0xf86   : > { %19806 = vst [vmem:[#allocation37_spill] sm:$0xff] %v18538_v20  ;;  %v9076_v22 = vadd.f32 %v18293_v6, %v9037_v63  ;;  %v9035_v43 = vadd.f32 %v8968_v61, %v19808_v36  ;;  %v9358_v9 = vsel %vm501_vm0, %v18538_v20, 0.0  ;;  %vm9199_vm13 = vcmp.gt.f32.partialorder %v9191_v19, 0.5  ;;  %v19812_v63 = vld [vmem:[#allocation16_spill] sm:$0xff]  ;;  %v18570_v61 = vpop.xlane.xlu0 %9314 }
 0xf87   : > { %v12815_v14 = vpop.f32.mrf.mxu0  ;;  %9359 = vadd.xlane.f32.xlu0 %v9358_v9  ;;  %v9233_v17 = vsub.f32 1.0, %v11293_v16  ;;  %v11291_v18 = vsel %vm9199_vm13, 1.0, %v19566_v12  ;;  %v9223_v1 = vmul.f32 0.25, %v9191_v19  ;;  %v9364_v49 = vsel %vm501_vm0, %v18542_v39, 0.0  ;;  %v19813_v36 = vld [vmem:[#allocation8_spill] sm:$0xff] }
 0xf88   : > { %v9196_v21 = vadd.f32 %v9188_v30, %v9076_v22  ;;  %v9074_v42 = vadd.f32 %v18293_v6, %v9035_v43  ;;  %v9038_v13 = vadd.f32 %v12815_v14, %v19809_v28  ;;  %v18554_v54 = vadd.f32 %v13947_v55, %v11291_v18  ;;  %v13950_v55 = vld [vmem:[%s14073_s18 + $0xb0] sm:$0xff] }
 0xf89   : > { %v8971_v53 = vpop.f32.mrf.mxu0  ;;  %v18557_v23 = vadd.f32 %v13948_v31, %v11293_v16  ;;  %v9238_v41 = vmul.f32 %v9230_v47, %v9222_v27  ;;  %v9231_v56 = vsub.f32 1.0, %v11291_v18  ;;  %v9241_v38 = vmul.f32 %v9233_v17, %v9225_v33  ;;  %v13949_v47 = vld [vmem:[%s14073_s18 + $0xa0] sm:$0xff] }
 0xf8a   : > { %19810 = vst [vmem:[#allocation32_spill] sm:$0xff] %v18554_v54  ;;  %vm9204_vm14 = vcmp.gt.f32.partialorder %v9196_v21, 0.5  ;;  %v9194_v30 = vadd.f32 %v18498_v15, %v9074_v42  ;;  %v9077_v25 = vadd.f32 %v18293_v6, %v9038_v13  ;;  %v9036_v58 = vadd.f32 %v8971_v53, %v7127_v32  ;;  %v19815_v13 = vld [vmem:[#allocation19_spill] sm:$0xff] }
 0xf8b   : > { %19811 = vst [vmem:[#allocation70_spill] sm:$0xff] %v18557_v23  ;;  %v12818_v10 = vpop.f32.mrf.mxu0  ;;  %9365 = vadd.xlane.f32.xlu0 %v9364_v49  ;;  %v9361_v52 = vsel %vm501_vm0, %v18554_v54, 0.0  ;;  %v11296_v48 = vsel %vm9204_vm14, 1.0, %v19566_v12  ;;  %v9228_v15 = vmul.f32 0.25, %v9196_v21  ;;  %v9367_v16 = vsel %vm501_vm0, %v18557_v23, 0.0 }
 0xf8c   : > { %vm9202_vm15 = vcmp.gt.f32.partialorder %v9194_v30, 0.5  ;;  %v9197_v5 = vadd.f32 %v18502_v62, %v9077_v25  ;;  %v9041_v46 = vadd.f32 %v12818_v10, %v19812_v63  ;;  %9362 = vadd.xlane.f32.xlu1 %v9361_v52  ;;  %v9075_v27 = vadd.f32 %v18293_v6, %v9036_v58 }
 0xf8d   : > { %v8984_v32 = vpop.f32.mrf.mxu0  ;;  %v11294_v19 = vsel %vm9202_vm15, 1.0, %v19566_v12  ;;  %v9226_v24 = vmul.f32 0.25, %v9194_v30  ;;  %v9239_v14 = vmul.f32 %v9231_v56, %v9223_v1  ;;  %v9236_v17 = vsub.f32 1.0, %v11296_v48 }
 0xf8e   : > { %vm9205_vm2 = vcmp.gt.f32.partialorder %v9197_v5, 0.5  ;;  %v9080_v22 = vadd.f32 %v18293_v6, %v9041_v46  ;;  %v9039_v62 = vadd.f32 %v8984_v32, %v19813_v36  ;;  %v9195_v43 = vadd.f32 %v18500_v11, %v9075_v27  ;;  %v13951_v32 = vld [vmem:[%s14073_s18 + $0xa8] sm:$0xff] }
 0xf8f   : > { %v12819_v9 = vpop.f32.mrf.mxu0  ;;  %v18576_v33 = vadd.f32 %v13949_v47, %v11294_v19  ;;  %v9229_v21 = vmul.f32 0.25, %v9197_v5  ;;  %v11297_v53 = vsel %vm9205_vm2, 1.0, %v19566_v12  ;;  %v18584_v31 = vadd.f32 %v13950_v55, %v11296_v48  ;;  %v18590_v5 = vpop.xlane.xlu0 %9317 }
 0xf90   : > { %v9248_v42 = vadd.f32 %v9240_v3, %v9080_v22  ;;  %v9078_v28 = vadd.f32 %v18293_v6, %v9039_v62  ;;  %v9042_v18 = vadd.f32 %v12819_v9, %v19815_v13  ;;  %9368 = vadd.xlane.f32.xlu1 %v9367_v16  ;;  %vm9203_vm5 = vcmp.gt.f32.partialorder %v9195_v43, 0.5  ;;  %v9312_v22 = vpop.xlane.xlu1 %9311  ;;  %v19819_v62 = vld [vmem:[#allocation56_spill] sm:$0xff]  ;;  %v13952_v13 = vld [vmem:[%s14073_s18 + $0xb8] sm:$0xff] }
 0xf91   : > { %19814 = vst [vmem:[#allocation41_spill] sm:$0xff] %v18576_v33  ;;  %v9370_v49 = vsel %vm501_vm0, %v18576_v33, 0.0  ;;  %v8987_v11 = vpop.f32.mrf.mxu0  ;;  %19816 = vst [vmem:[#allocation72_spill] sm:$0xff] %v18584_v31  ;;  %v9234_v58 = vsub.f32 1.0, %v11294_v19  ;;  %v9244_v52 = vmul.f32 %v9236_v17, %v9228_v15  ;;  %v11295_v56 = vsel %vm9203_vm5, 1.0, %v19566_v12 }
 0xf92   : > { %vm9256_vm3 = vcmp.gt.f32.partialorder %v9248_v42, 0.5  ;;  %v9246_v1 = vadd.f32 %v9238_v41, %v9078_v28  ;;  %v9081_v3 = vadd.f32 %v18293_v6, %v9042_v18  ;;  %9371 = vadd.xlane.f32.xlu0 %v9370_v49  ;;  %v9040_v30 = vadd.f32 %v8987_v11, %v18529_v57  ;;  %v19817_v41 = vld [vmem:[#allocation54_spill] sm:$0xff]  ;;  %v19821_v11 = vld [vmem:[#allocation59_spill] sm:$0xff] }
 0xf93   : > { %v11300_v25 = vsel %vm9256_vm3, 1.0, %v19566_v12  ;;  %v12822_v10 = vpop.f32.mrf.mxu0  ;;  %v9376_v57 = vsel %vm501_vm0, %v18584_v31, 0.0  ;;  %v18598_v16 = vadd.f32 %v13951_v32, %v11295_v56  ;;  %v9237_v19 = vsub.f32 1.0, %v11297_v53 }
 0xf94   : > { %vm9254_vm4 = vcmp.gt.f32.partialorder %v9246_v1, 0.5  ;;  %v9249_v48 = vadd.f32 %v9241_v38, %v9081_v3  ;;  %v9079_v63 = vadd.f32 %v18293_v6, %v9040_v30  ;;  %v9045_v46 = vadd.f32 %v12822_v10, %v19817_v41  ;;  %v9324_v10 = vpop.xlane.xlu0 %9323 }
 0xf95   : > { %v11298_v27 = vsel %vm9254_vm4, 1.0, %v19566_v12  ;;  %19818 = vst [vmem:[#allocation38_spill] sm:$0xff] %v18598_v16  ;;  %v9000_v15 = vpop.f32.mrf.mxu0  ;;  %v9373_v47 = vsel %vm501_vm0, %v18598_v16, 0.0  ;;  %v9235_v17 = vsub.f32 1.0, %v11295_v56  ;;  %v9242_v42 = vmul.f32 %v9234_v58, %v9226_v24  ;;  %v13953_v24 = vld [vmem:[%s14073_s18 + $0xc0] sm:$0xff] }
 0xf96   : > { %vm9257_vm6 = vcmp.gt.f32.partialorder %v9249_v48, 0.5  ;;  %v9247_v36 = vadd.f32 %v9239_v14, %v9079_v63  ;;  %v9084_v38 = vadd.f32 %v18293_v6, %v9045_v46  ;;  %9377 = vadd.xlane.f32.xlu0 %v9376_v57  ;;  %v9043_v9 = vadd.f32 %v9000_v15, %v19819_v62  ;;  %9374 = vadd.xlane.f32.xlu1 %v9373_v47  ;;  %v13954_v48 = vld [vmem:[%s14073_s18 + $0xd0] sm:$0xff]  ;;  %v9321_v15 = vpop.xlane.xlu1 %9320 }
 0xf97   : > { %v12823_v28 = vpop.f32.mrf.mxu0  ;;  %v18605_v18 = vadd.f32 %v13952_v13, %v11297_v53  ;;  %v9227_v1 = vmul.f32 0.25, %v9195_v43  ;;  %v11301_v3 = vsel %vm9257_vm6, 1.0, %v19566_v12  ;;  %v18613_v58 = vadd.f32 %v13953_v24, %v11298_v27  ;;  %v13955_v27 = vld [vmem:[%s14073_s18 + $0xc8] sm:$0xff] }
 0xf98   : > { %vm9255_vm7 = vcmp.gt.f32.partialorder %v9247_v36, 0.5  ;;  %v9252_v49 = vadd.f32 %v9244_v52, %v9084_v38  ;;  %v9082_v14 = vadd.f32 %v18293_v6, %v9043_v9  ;;  %v9046_v55 = vadd.f32 %v12823_v28, %v19821_v11  ;;  %v13956_v9 = vld [vmem:[%s14073_s18 + $0xe0] sm:$0xff]  ;;  %v13957_v28 = vld [vmem:[%s14073_s18 + $0xd8] sm:$0xff] }
 0xf99   : > { %19820 = vst [vmem:[#allocation73_spill] sm:$0xff] %v18605_v18  ;;  %v11299_v30 = vsel %vm9255_vm7, 1.0, %v19566_v12  ;;  %19822 = vst [vmem:[#allocation49_spill] sm:$0xff] %v18613_v58  ;;  %v9003_v53 = vpop.f32.mrf.mxu0  ;;  %v9245_v63 = vmul.f32 %v9237_v19, %v9229_v21  ;;  %v9379_v46 = vsel %vm501_vm0, %v18605_v18, 0.0  ;;  %v9382_v43 = vsel %vm501_vm0, %v18613_v58, 0.0 }
 0xf9a   : > { %v9250_v56 = vadd.f32 %v9242_v42, %v9082_v14  ;;  %v9085_v52 = vadd.f32 %v18293_v6, %v9046_v55  ;;  %v9044_v41 = vadd.f32 %v9003_v53, %v18532_v0  ;;  %v18622_v57 = vadd.f32 %v13954_v48, %v11300_v25  ;;  %9380 = vadd.xlane.f32.xlu1 %v9379_v46  ;;  %v13959_v53 = vld [vmem:[%s14073_s18 + $0xf0] sm:$0xff] }
 0xf9b   : > { %v18625_v32 = vadd.f32 %v13955_v27, %v11299_v30  ;;  %9383 = vadd.xlane.f32.xlu0 %v9382_v43  ;;  %v9243_v21 = vmul.f32 %v9235_v17, %v9227_v1  ;;  %vm9260_vm9 = vcmp.gt.f32.partialorder %v9252_v49, 0.5  ;;  %v9406_v25 = vmul.f32 0.03125, %v9312_v22  ;;  %v9330_v17 = vpop.xlane.xlu0 %9329  ;;  %v13958_v1 = vld [vmem:[%s14073_s18 + $0xe8] sm:$0xff] }
 0xf9c   : > { %19823 = vst [vmem:[#allocation74_spill] sm:$0xff] %v18622_v57  ;;  %vm9258_vm8 = vcmp.gt.f32.partialorder %v9250_v56, 0.5  ;;  %v9253_v36 = vadd.f32 %v9245_v63, %v9085_v52  ;;  %v9083_v0 = vadd.f32 %v18293_v6, %v9044_v41  ;;  %v9388_v42 = vsel %vm501_vm0, %v18622_v57, 0.0  ;;  %v9327_v6 = vpop.xlane.xlu1 %9326 }
 0xf9d   : > { %19824 = vst [vmem:[#allocation42_spill] sm:$0xff] %v18625_v32  ;;  %v11302_v19 = vsel %vm9258_vm8, 1.0, %v19566_v12  ;;  %v9385_v38 = vsel %vm501_vm0, %v18625_v32, 0.0  ;;  %v18637_v13 = vadd.f32 %v13957_v28, %v11301_v3  ;;  %v11304_v49 = vsel %vm9260_vm9, 1.0, %v19566_v12 }
 0xf9e   : > { %v9251_v62 = vadd.f32 %v9243_v21, %v9083_v0  ;;  %v18632_v47 = vadd.f32 %v13956_v9, %v11302_v19  ;;  %9386 = vadd.xlane.f32.xlu1 %v9385_v38  ;;  %vm9261_vm11 = vcmp.gt.f32.partialorder %v9253_v36, 0.5  ;;  %v18644_v11 = vsub.f32 %v18335_v4, %v9406_v25  ;;  %v13960_v0 = vld [vmem:[%s14073_s18 + $0xf8] sm:$0xff] }
 0xf9f   : > { %19826 = vst [vmem:[#allocation48_spill] sm:$0xff] %v18637_v13  ;;  %9389 = vadd.xlane.f32.xlu0 %v9388_v42  ;;  %v9407_v55 = vmul.f32 0.03125, %v18570_v61  ;;  %v9408_v30 = vmul.f32 0.03125, %v18590_v5  ;;  %v9391_v24 = vsel %vm501_vm0, %v18637_v13, 0.0  ;;  %v18654_v56 = vadd.f32 %v13959_v53, %v11304_v49  ;;  %v9336_v5 = vpop.xlane.xlu0 %9335 }
 0xfa0   : > { %19825 = vst [vmem:[#allocation76_spill] sm:$0xff] %v18632_v47  ;;  %vm9259_vm10 = vcmp.gt.f32.partialorder %v9251_v62, 0.5  ;;  %v9394_v14 = vsel %vm501_vm0, %v18632_v47, 0.0  ;;  %v11305_v52 = vsel %vm9261_vm11, 1.0, %v19566_v12  ;;  %v9409_v61 = vmul.f32 0.03125, %v9321_v15  ;;  %v9333_v46 = vpop.xlane.xlu1 %9332 }
 0xfa1   : > { %v11303_v22 = vsel %vm9259_vm10, 1.0, %v19566_v12  ;;  %19828 = vst [vmem:[#allocation35_spill] sm:$0xff] %v18654_v56  ;;  %v18660_v41 = vsub.f32 %v18373_v50, %v9407_v55  ;;  %v9470_v43 = vmul.f32 %v18644_v11, %v18644_v11  ;;  %v18665_v48 = vsub.f32 %v18391_v44, %v9408_v30 }
 0xfa2   : > { %v18648_v3 = vadd.f32 %v13958_v1, %v11303_v22  ;;  %9392 = vadd.xlane.f32.xlu1 %v9391_v24  ;;  %v9410_v27 = vmul.f32 0.03125, %v9324_v10  ;;  %v9400_v36 = vsel %vm501_vm0, %v18654_v56, 0.0  ;;  %v18670_v21 = vadd.f32 %v13960_v0, %v11305_v52 }
 0xfa3   : > { %9395 = vadd.xlane.f32.xlu0 %v9394_v14  ;;  %v18673_v15 = vsub.f32 %v18362_v34, %v9409_v61  ;;  %v9411_v19 = vmul.f32 0.03125, %v9327_v6  ;;  %v9502_v25 = vsel %vm501_vm0, %v9470_v43, 0.0  ;;  %v9471_v62 = vmul.f32 %v18660_v41, %v18660_v41  ;;  %v9342_v49 = vpop.xlane.xlu0 %9341 }
 0xfa4   : > { %19827 = vst [vmem:[#allocation77_spill] sm:$0xff] %v18648_v3  ;;  %v9397_v63 = vsel %vm501_vm0, %v18648_v3, 0.0  ;;  %19829 = vst [vmem:[#allocation78_spill] sm:$0xff] %v18670_v21  ;;  %v9339_v38 = vpop.xlane.xlu1 %9338  ;;  %v18679_v10 = vsub.f32 %v18404_v26, %v9410_v27  ;;  %v9412_v9 = vmul.f32 0.03125, %v9330_v17  ;;  %v9403_v42 = vsel %vm501_vm0, %v18670_v21, 0.0 }
 0xfa5   : > { %v9472_v28 = vmul.f32 %v18665_v48, %v18665_v48  ;;  %v18686_v6 = vsub.f32 %v18407_v37, %v9411_v19  ;;  %v9413_v22 = vmul.f32 0.03125, %v9333_v46  ;;  %v9505_v14 = vsel %vm501_vm0, %v9471_v62, 0.0 }
 0xfa6   : > { %9398 = vadd.xlane.f32.xlu1 %v9397_v63  ;;  %v9473_v55 = vmul.f32 %v18673_v15, %v18673_v15  ;;  %v18692_v17 = vsub.f32 %v18426_v51, %v9412_v9  ;;  %v9414_v1 = vmul.f32 0.03125, %v9336_v5  ;;  %v9474_v24 = vmul.f32 %v18679_v10, %v18679_v10 }
 0xfa7   : > { %9401 = vadd.xlane.f32.xlu0 %v9400_v36  ;;  %v9508_v30 = vsel %vm501_vm0, %v9472_v28, 0.0  ;;  %v18698_v52 = vsub.f32 %v18431_v45, %v9413_v22  ;;  %v9415_v63 = vmul.f32 0.03125, %v9339_v38  ;;  %v9416_v61 = vmul.f32 0.03125, %v9342_v49  ;;  %v9348_v46 = vpop.xlane.xlu0 %9347 }
 0xfa8   : > { %v9345_v53 = vpop.xlane.xlu1 %9344  ;;  %v9511_v43 = vsel %vm501_vm0, %v9473_v55, 0.0  ;;  %v18702_v27 = vsub.f32 %v18451_v35, %v9414_v1  ;;  %v9514_v5 = vsel %vm501_vm0, %v9474_v24, 0.0  ;;  %v9475_v36 = vmul.f32 %v18686_v6, %v18686_v6 }
 0xfa9   : > { %v9476_v0 = vmul.f32 %v18692_v17, %v18692_v17  ;;  %v18710_v19 = vsub.f32 %v18454_v59, %v9415_v63  ;;  %v18713_v38 = vsub.f32 %v18467_v7, %v9416_v61  ;;  %v9477_v9 = vmul.f32 %v18698_v52, %v18698_v52 }
 0xfaa   : > { %9404 = vadd.xlane.f32.xlu1 %v9403_v42  ;;  %v9418_v42 = vmul.f32 0.03125, %v9348_v46  ;;  %v9517_v28 = vsel %vm501_vm0, %v9475_v36, 0.0  ;;  %v9478_v22 = vmul.f32 %v18702_v27, %v18702_v27 }
 0xfab   : > { %9503 = vadd.xlane.f32.xlu0 %v9502_v25  ;;  %v9417_v25 = vmul.f32 0.03125, %v9345_v53  ;;  %v9520_v49 = vsel %vm501_vm0, %v9476_v0, 0.0  ;;  %v9523_v1 = vsel %vm501_vm0, %v9477_v9, 0.0  ;;  %v9480_v24 = vmul.f32 %v18713_v38, %v18713_v38 }
 0xfac   : > { %v9351_v62 = vpop.xlane.xlu1 %9350  ;;  %v18730_v53 = vsub.f32 %v18473_v60, %v9418_v42  ;;  %v9526_v46 = vsel %vm501_vm0, %v9478_v22, 0.0 }
 0xfad   : > { %v18722_v55 = vsub.f32 %v18470_v40, %v9417_v25  ;;  %v9419_v63 = vmul.f32 0.03125, %v9351_v62  ;;  %v9532_v36 = vsel %vm501_vm0, %v9480_v24, 0.0 }
 0xfae   : > { %9506 = vadd.xlane.f32.xlu1 %v9505_v14  ;;  %v9354_v14 = vpop.xlane.xlu0 %9353  ;;  %v9482_v42 = vmul.f32 %v18730_v53, %v18730_v53 }
 0xfaf   : > { %9509 = vadd.xlane.f32.xlu0 %v9508_v30  ;;  %v9479_v30 = vmul.f32 %v18710_v19, %v18710_v19  ;;  %v9420_v61 = vmul.f32 0.03125, %v9354_v14  ;;  %v9481_v0 = vmul.f32 %v18722_v55, %v18722_v55  ;;  %v18738_v25 = vsub.f32 %v18479_v29, %v9419_v63 }
 0xfb0   : > { %v9538_v22 = vsel %vm501_vm0, %v9482_v42, 0.0 }
 0xfb1   : > { %v18741_v9 = vsub.f32 %v18494_v2, %v9420_v61  ;;  %v9483_v14 = vmul.f32 %v18738_v25, %v18738_v25 }
 0xfb2   : > { %9512 = vadd.xlane.f32.xlu1 %v9511_v43  ;;  %v9357_v43 = vpop.xlane.xlu1 %9356 }
 0xfb3   : > { %9515 = vadd.xlane.f32.xlu0 %v9514_v5  ;;  %v9529_v5 = vsel %vm501_vm0, %v9479_v30, 0.0  ;;  %v9421_v62 = vmul.f32 0.03125, %v9357_v43  ;;  %v9541_v30 = vsel %vm501_vm0, %v9483_v14, 0.0  ;;  %v13280_v43 = vld [vmem:[%s19303_s10] sm:$0xff]  }
 0xfb6   : > { %9518 = vadd.xlane.f32.xlu1 %v9517_v28  ;;  %v9535_v28 = vsel %vm501_vm0, %v9481_v0, 0.0 }
 0xfb7   : > { %9521 = vadd.xlane.f32.xlu0 %v9520_v49  ;;  %v18747_v49 = vsub.f32 %v18505_v8, %v9421_v62 }
 0xfb9   : > { %v9485_v63 = vmul.f32 %v18747_v49, %v18747_v49 }
 0xfba   : > { %9524 = vadd.xlane.f32.xlu1 %v9523_v1  ;;  %v9484_v1 = vmul.f32 %v18741_v9, %v18741_v9 }
 0xfbb   : > { %9527 = vadd.xlane.f32.xlu0 %v9526_v46  ;;  %v9547_v61 = vsel %vm501_vm0, %v9485_v63, 0.0  ;;  %v13279_v46 = vld [vmem:[%s19303_s10 + $0x8] sm:$0xff]  }
 0xfbc   : > { %v9544_v24 = vsel %vm501_vm0, %v9484_v1, 0.0  ;;  %12824 = vmatprep.subr.bf16.mxu1 %v13279_v46 }
 0xfbd   : > { %12825 = vmatpush3.bf16.msra.mxu1 %v13279_v46 }
 0xfbe   : > { %9530 = vadd.xlane.f32.xlu1 %v9529_v5  ;;  %12826 = vmatprep.subr.bf16.mxu1 %v13280_v43 }
 0xfbf   : > { %9533 = vadd.xlane.f32.xlu0 %v9532_v36 }
 0xfc1   : > { %12827 = vmatpush3.bf16.msra.mxu1 %v13280_v43 }
 0xfc2   : > { %9536 = vadd.xlane.f32.xlu1 %v9535_v28 }
 0xfc3   : > { %9539 = vadd.xlane.f32.xlu0 %v9538_v22 }
 0xfc6   : > { %9542 = vadd.xlane.f32.xlu1 %v9541_v30 }
 0xfc7   : > { %9545 = vadd.xlane.f32.xlu0 %v9544_v24 }
 0xfca   : > { %9548 = vadd.xlane.f32.xlu1 %v9547_v61 }
0x1010   : > { %v9360_v5 = vpop.xlane.xlu0 %9359 }
0x1011   : > { %v9422_v36 = vmul.f32 0.03125, %v9360_v5 }
0x1013   : > { %v18766_v0 = vsub.f32 %v18538_v20, %v9422_v36 }
0x1014   : > { %v9366_v62 = vpop.xlane.xlu0 %9365 }
0x1015   : > { %v9424_v42 = vmul.f32 0.03125, %v9366_v62  ;;  %v9363_v28 = vpop.xlane.xlu1 %9362  ;;  %v9486_v22 = vmul.f32 %v18766_v0, %v18766_v0 }
0x1016   : > { %v9423_v14 = vmul.f32 0.03125, %v9363_v28 }
0x1017   : > { %v18771_v1 = vsub.f32 %v18542_v39, %v9424_v42  ;;  %v9550_v30 = vsel %vm501_vm0, %v9486_v22, 0.0 }
0x1018   : > { %v18775_v24 = vsub.f32 %v18554_v54, %v9423_v14  ;;  %9551 = vadd.xlane.f32.xlu0 %v9550_v30 }
0x1019   : > { %v9369_v63 = vpop.xlane.xlu1 %9368  ;;  %v9488_v61 = vmul.f32 %v18771_v1, %v18771_v1 }
0x101a   : > { %v9425_v46 = vmul.f32 0.03125, %v9369_v63  ;;  %v9487_v43 = vmul.f32 %v18775_v24, %v18775_v24 }
0x101b   : > { %v9372_v5 = vpop.xlane.xlu0 %9371  ;;  %v9556_v36 = vsel %vm501_vm0, %v9488_v61, 0.0 }
0x101c   : > { %v18783_v62 = vsub.f32 %v18557_v23, %v9425_v46  ;;  %v9426_v42 = vmul.f32 0.03125, %v9372_v5  ;;  %v9553_v28 = vsel %vm501_vm0, %v9487_v43, 0.0  ;;  %9557 = vadd.xlane.f32.xlu0 %v9556_v36 }
0x101d   : > { %9554 = vadd.xlane.f32.xlu1 %v9553_v28 }
0x101e   : > { %v18787_v22 = vsub.f32 %v18576_v33, %v9426_v42  ;;  %v9489_v14 = vmul.f32 %v18783_v62, %v18783_v62 }
0x101f   : > { %v9378_v30 = vpop.xlane.xlu0 %9377  ;;  %v9375_v46 = vpop.xlane.xlu1 %9374 }
0x1020   : > { %v9428_v63 = vmul.f32 0.03125, %v9378_v30  ;;  %v9559_v54 = vsel %vm501_vm0, %v9489_v14, 0.0  ;;  %v9490_v61 = vmul.f32 %v18787_v22, %v18787_v22  ;;  %v9427_v43 = vmul.f32 0.03125, %v9375_v46 }
0x1021   : > { %9560 = vadd.xlane.f32.xlu1 %v9559_v54 }
0x1022   : > { %v18795_v5 = vsub.f32 %v18584_v31, %v9428_v63  ;;  %v9562_v36 = vsel %vm501_vm0, %v9490_v61, 0.0  ;;  %v18799_v42 = vsub.f32 %v18598_v16, %v9427_v43 }
0x1023   : > { %9563 = vadd.xlane.f32.xlu0 %v9562_v36  ;;  %v9381_v30 = vpop.xlane.xlu1 %9380 }
0x1024   : > { %v9492_v28 = vmul.f32 %v18795_v5, %v18795_v5  ;;  %v9384_v14 = vpop.xlane.xlu0 %9383  ;;  %v9429_v33 = vmul.f32 0.03125, %v9381_v30  ;;  %v9491_v54 = vmul.f32 %v18799_v42, %v18799_v42 }
0x1025   : > { %v9430_v23 = vmul.f32 0.03125, %v9384_v14 }
0x1026   : > { %v9568_v63 = vsel %vm501_vm0, %v9492_v28, 0.0  ;;  %v18807_v46 = vsub.f32 %v18605_v18, %v9429_v33  ;;  %v9565_v43 = vsel %vm501_vm0, %v9491_v54, 0.0 }
0x1027   : > { %9569 = vadd.xlane.f32.xlu0 %v9568_v63  ;;  %v18810_v61 = vsub.f32 %v18613_v58, %v9430_v23  ;;  %v9387_v16 = vpop.xlane.xlu1 %9386  ;;  %9566 = vadd.xlane.f32.xlu1 %v9565_v43 }
0x1028   : > { %v9390_v36 = vpop.xlane.xlu0 %9389  ;;  %v9431_v30 = vmul.f32 0.03125, %v9387_v16  ;;  %v9493_v14 = vmul.f32 %v18807_v46, %v18807_v46 }
0x1029   : > { %v9432_v31 = vmul.f32 0.03125, %v9390_v36  ;;  %v9494_v28 = vmul.f32 %v18810_v61, %v18810_v61 }
0x102a   : > { %v18821_v33 = vsub.f32 %v18625_v32, %v9431_v30  ;;  %v9571_v23 = vsel %vm501_vm0, %v9493_v14, 0.0 }
0x102b   : > { %v18818_v63 = vsub.f32 %v18622_v57, %v9432_v31  ;;  %v9574_v54 = vsel %vm501_vm0, %v9494_v28, 0.0  ;;  %v9393_v58 = vpop.xlane.xlu1 %9392  ;;  %9572 = vadd.xlane.f32.xlu1 %v9571_v23 }
0x102c   : > { %9575 = vadd.xlane.f32.xlu0 %v9574_v54  ;;  %v9396_v16 = vpop.xlane.xlu0 %9395  ;;  %v9433_v43 = vmul.f32 0.03125, %v9393_v58  ;;  %v9495_v18 = vmul.f32 %v18821_v33, %v18821_v33 }
0x102d   : > { %v9434_v36 = vmul.f32 0.03125, %v9396_v16  ;;  %v9496_v31 = vmul.f32 %v18818_v63, %v18818_v63 }
0x102e   : > { %v18830_v57 = vsub.f32 %v18637_v13, %v9433_v43  ;;  %v9577_v14 = vsel %vm501_vm0, %v9495_v18, 0.0 }
0x102f   : > { %v18833_v30 = vsub.f32 %v18632_v47, %v9434_v36  ;;  %v9580_v28 = vsel %vm501_vm0, %v9496_v31, 0.0  ;;  %9578 = vadd.xlane.f32.xlu1 %v9577_v14  ;;  %v9399_v23 = vpop.xlane.xlu1 %9398 }
0x1030   : > { %9581 = vadd.xlane.f32.xlu0 %v9580_v28  ;;  %v9402_v58 = vpop.xlane.xlu0 %9401  ;;  %v9435_v54 = vmul.f32 0.03125, %v9399_v23  ;;  %v9497_v32 = vmul.f32 %v18830_v57, %v18830_v57 }
0x1031   : > { %v9436_v16 = vmul.f32 0.03125, %v9402_v58  ;;  %v9498_v43 = vmul.f32 %v18833_v30, %v18833_v30 }
0x1032   : > { %v18842_v13 = vsub.f32 %v18648_v3, %v9435_v54  ;;  %v9583_v18 = vsel %vm501_vm0, %v9497_v32, 0.0 }
0x1033   : > { %v18845_v36 = vsub.f32 %v18654_v56, %v9436_v16  ;;  %v9586_v31 = vsel %vm501_vm0, %v9498_v43, 0.0  ;;  %9584 = vadd.xlane.f32.xlu1 %v9583_v18  ;;  %v9405_v14 = vpop.xlane.xlu1 %9404 }
0x1034   : > { %9587 = vadd.xlane.f32.xlu0 %v9586_v31  ;;  %v9504_v28 = vpop.xlane.xlu0 %9503  ;;  %v9437_v23 = vmul.f32 0.03125, %v9405_v14  ;;  %v9499_v47 = vmul.f32 %v18842_v13, %v18842_v13 }
0x1035   : > { %v9598_v58 = vmul.f32 0.03125, %v9504_v28  ;;  %v9500_v54 = vmul.f32 %v18845_v36, %v18845_v36 }
0x1036   : > { %v18854_v3 = vsub.f32 %v18670_v21, %v9437_v23  ;;  %v9589_v32 = vsel %vm501_vm0, %v9499_v47, 0.0 }
0x1037   : > { %v9630_v16 = vadd.f32 1e-05, %v9598_v58  ;;  %v9592_v43 = vsel %vm501_vm0, %v9500_v54, 0.0  ;;  %9590 = vadd.xlane.f32.xlu1 %v9589_v32  ;;  %v9507_v18 = vpop.xlane.xlu1 %9506 }
0x1038   : > { %9593 = vadd.xlane.f32.xlu0 %v9592_v43  ;;  %v9510_v31 = vpop.xlane.xlu0 %9509  ;;  %v9599_v14 = vmul.f32 0.03125, %v9507_v18  ;;  %v9501_v56 = vmul.f32 %v18854_v3, %v18854_v3 }
0x1039   : > { %13865 = vrsqrt.f32 %v9630_v16  ;;  %v9600_v28 = vmul.f32 0.03125, %v9510_v31 }
0x103a   : > { %v9631_v20 = vadd.f32 1e-05, %v9599_v14  ;;  %v9595_v23 = vsel %vm501_vm0, %v9501_v56, 0.0 }
0x103b   : > { %v9632_v39 = vadd.f32 1e-05, %v9600_v28  ;;  %9596 = vadd.xlane.f32.xlu1 %v9595_v23  ;;  %v9513_v58 = vpop.xlane.xlu1 %9512 }
0x103c   : > { %v9516_v21 = vpop.xlane.xlu0 %9515  ;;  %13867 = vrsqrt.f32 %v9631_v20  ;;  %v9601_v47 = vmul.f32 0.03125, %v9513_v58 }
0x103d   : > { %v9602_v54 = vmul.f32 0.03125, %v9516_v21  ;;  %13869 = vrsqrt.f32 %v9632_v39 }
0x103e   : > { %v9633_v32 = vadd.f32 1e-05, %v9601_v47 }
0x103f   : > { %v9634_v43 = vadd.f32 1e-05, %v9602_v54  ;;  %v9519_v29 = vpop.xlane.xlu1 %9518 }
0x1040   : > { %v9522_v16 = vpop.xlane.xlu0 %9521  ;;  %13871 = vrsqrt.f32 %v9633_v32  ;;  %v9603_v18 = vmul.f32 0.03125, %v9519_v29  ;;  %v18865_v29 = vld [vmem:[%s19301_s8] ss:$0 sm:$0xff] }
0x1041   : > { %v9604_v31 = vmul.f32 0.03125, %v9522_v16  ;;  %13873 = vrsqrt.f32 %v9634_v43 }
0x1042   : > { %v9635_v8 = vadd.f32 1e-05, %v9603_v18 }
0x1043   : > { %v9636_v14 = vadd.f32 1e-05, %v9604_v31  ;;  %v9525_v28 = vpop.xlane.xlu1 %9524 }
0x1044   : > { %v9528_v60 = vpop.xlane.xlu0 %9527  ;;  %13875 = vrsqrt.f32 %v9635_v8  ;;  %v9605_v56 = vmul.f32 0.03125, %v9525_v28 }
0x1045   : > { %v9606_v23 = vmul.f32 0.03125, %v9528_v60  ;;  %13877 = vrsqrt.f32 %v9636_v14 }
0x1046   : > { %v13866_v2 = vpop.eup %13865  ;;  %v9637_v20 = vadd.f32 1e-05, %v9605_v56 }
0x1047   : > { %v9638_v21 = vadd.f32 1e-05, %v9606_v23  ;;  %v9531_v39 = vpop.xlane.xlu1 %9530  ;;  %v9694_v47 = vmul.f32 %v13866_v2, %v18644_v11  ;;  %v18873_v11 = vld [vmem:[%s19302_s9] ss:$0 sm:$0xff] }
0x1048   : > { %v9534_v58 = vpop.xlane.xlu0 %9533  ;;  %13879 = vrsqrt.f32 %v9637_v20  ;;  %v9607_v54 = vmul.f32 0.03125, %v9531_v39 }
0x1049   : > { %v9608_v32 = vmul.f32 0.03125, %v9534_v58  ;;  %v13868_v43 = vpop.eup %13867  ;;  %13881 = vrsqrt.f32 %v9638_v21  ;;  %v9733_v2 = vmul.f32 %v18865_v29, %v9694_v47 }
0x104a   : > { %v13870_v8 = vpop.eup %13869  ;;  %v9639_v60 = vadd.f32 1e-05, %v9607_v54  ;;  %v9695_v18 = vmul.f32 %v13868_v43, %v18660_v41 }
0x104b   : > { %v9640_v16 = vadd.f32 1e-05, %v9608_v32  ;;  %v9696_v31 = vmul.f32 %v13870_v8, %v18665_v48  ;;  %v9537_v14 = vpop.xlane.xlu1 %9536  ;;  %v9772_v8 = vadd.f32 %v18873_v11, %v9733_v2 }
0x104c   : > { %v9540_v28 = vpop.xlane.xlu0 %9539  ;;  %13883 = vrsqrt.f32 %v9639_v60  ;;  %v9609_v56 = vmul.f32 0.03125, %v9537_v14  ;;  %v9734_v20 = vmul.f32 %v18865_v29, %v9695_v18 }
0x104d   : > { %v9610_v23 = vmul.f32 0.03125, %v9540_v28  ;;  %v13872_v21 = vpop.eup %13871  ;;  %v9735_v39 = vmul.f32 %v18865_v29, %v9696_v31  ;;  %13885 = vrsqrt.f32 %v9640_v16 }
0x104e   : > { %v13874_v41 = vpop.eup %13873  ;;  %v9697_v48 = vmul.f32 %v13872_v21, %v18673_v15  ;;  %v9641_v58 = vadd.f32 1e-05, %v9609_v56  ;;  %v9773_v47 = vadd.f32 %v18873_v11, %v9734_v20 }
0x104f   : > { %v9642_v54 = vadd.f32 1e-05, %v9610_v23  ;;  %v9543_v32 = vpop.xlane.xlu1 %9542  ;;  %v9698_v60 = vmul.f32 %v13874_v41, %v18679_v10  ;;  %v9774_v16 = vadd.f32 %v18873_v11, %v9735_v39 }
0x1050   : > { %v9546_v43 = vpop.xlane.xlu0 %9545  ;;  %v9736_v14 = vmul.f32 %v18865_v29, %v9697_v48  ;;  %13887 = vrsqrt.f32 %v9641_v58  ;;  %v9611_v18 = vmul.f32 0.03125, %v9543_v32  ;;  %v9804_v15 = vpack.c.bf16 %v9773_v47, %v9772_v8 }
0x1051   : > { %v9612_v28 = vmul.f32 0.03125, %v9546_v43  ;;  %v13876_v31 = vpop.eup %13875  ;;  %13889 = vrsqrt.f32 %v9642_v54  ;;  %v9737_v56 = vmul.f32 %v18865_v29, %v9698_v60 }
0x1052   : > { %v13878_v23 = vpop.eup %13877  ;;  %v9775_v20 = vadd.f32 %v18873_v11, %v9736_v14  ;;  %v9643_v21 = vadd.f32 1e-05, %v9611_v18  ;;  %v9699_v2 = vmul.f32 %v13876_v31, %v18686_v6  ;;  %12828 = vmatprep.mubr.msk.bf16.mxu1 %vm501_vm0, %v9804_v15 }
0x1053   : > { %v9644_v59 = vadd.f32 1e-05, %v9612_v28  ;;  %v9700_v10 = vmul.f32 %v13878_v23, %v18692_v17  ;;  %v9549_v41 = vpop.xlane.xlu1 %9548  ;;  %v9776_v47 = vadd.f32 %v18873_v11, %v9737_v56 }
0x1054   : > { %v9805_v48 = vpack.c.bf16 %v9775_v20, %v9774_v16  ;;  %13891 = vrsqrt.f32 %v9643_v21  ;;  %v9613_v58 = vmul.f32 0.03125, %v9549_v41  ;;  %v9738_v39 = vmul.f32 %v18865_v29, %v9699_v2 }
0x1055   : > { %v13880_v54 = vpop.eup %13879  ;;  %13893 = vrsqrt.f32 %v9644_v59  ;;  %v9739_v17 = vmul.f32 %v18865_v29, %v9700_v10 }
0x1056   : > { %v13882_v32 = vpop.eup %13881  ;;  %v9701_v43 = vmul.f32 %v13880_v54, %v18698_v52  ;;  %v9645_v8 = vadd.f32 1e-05, %v9613_v58  ;;  %12829 = vmatmul.mubr.msk.bf16.vlgmr.msra.gmra.mxu1 %vm501_vm0, %v9805_v48  ;;  %v9777_v6 = vadd.f32 %v18873_v11, %v9738_v39  ;;  %v13282_v58 = vld [vmem:[%s19305_s12 + $0x30] sm:$0xff]  }
0x1057   : > { %v9702_v60 = vmul.f32 %v13882_v32, %v18702_v27  ;;  %v9778_v31 = vadd.f32 %v18873_v11, %v9739_v17  ;;  %v13283_v17 = vld [vmem:[%s19305_s12 + $0x28] sm:$0xff]  }
0x1058   : > { %13895 = vrsqrt.f32 %v9645_v8  ;;  %v9806_v14 = vpack.c.bf16 %v9777_v6, %v9776_v47  ;;  %v9740_v18 = vmul.f32 %v18865_v29, %v9701_v43 }
0x1059   : > { %v13884_v28 = vpop.eup %13883  ;;  %v9741_v15 = vmul.f32 %v18865_v29, %v9702_v60 }
0x105a   : > { %v13886_v59 = vpop.eup %13885  ;;  %12832 = vmatprep.mubr.msk.bf16.mxu1 %vm501_vm0, %v9806_v14  ;;  %v9779_v52 = vadd.f32 %v18873_v11, %v9740_v18  ;;  %v9703_v16 = vmul.f32 %v13884_v28, %v18710_v19 }
0x105b   : > { %v9704_v56 = vmul.f32 %v13886_v59, %v18713_v38  ;;  %v9780_v10 = vadd.f32 %v18873_v11, %v9741_v15  ;;  %v13281_v38 = vld [vmem:[%s19305_s12 + $0x38] sm:$0xff]  }
0x105c   : > { %v9807_v23 = vpack.c.bf16 %v9779_v52, %v9778_v31  ;;  %v9742_v27 = vmul.f32 %v18865_v29, %v9703_v16  ;;  %12860 = vmatprep.subr.bf16.mxu0 %v13281_v38 }
0x105d   : > { %v13888_v20 = vpop.eup %13887  ;;  %v9743_v48 = vmul.f32 %v18865_v29, %v9704_v56  ;;  %12861 = vmatpush3.bf16.msra.mxu0 %v13281_v38  ;;  %v13285_v56 = vld [vmem:[%s19305_s12 + $0x18] sm:$0xff]  }
0x105e   : > { %v13890_v21 = vpop.eup %13889  ;;  %v9705_v2 = vmul.f32 %v13888_v20, %v18722_v55  ;;  %12833 = vmatmul.mubr.msk.bf16.gmra.mxu1 %vm501_vm0, %v9807_v23  ;;  %v9781_v41 = vadd.f32 %v18873_v11, %v9742_v27  ;;  %12862 = vmatprep.subr.bf16.mxu0 %v13282_v58  ;;  %v13286_v27 = vld [vmem:[%s19305_s12 + $0x10] sm:$0xff]  }
0x105f   : > { %v9706_v19 = vmul.f32 %v13890_v21, %v18730_v53  ;;  %v9782_v53 = vadd.f32 %v18873_v11, %v9743_v48  ;;  %v13287_v21 = vld [vmem:[%s19305_s12 + $0x8] sm:$0xff]   ;;  %v13288_v48 = vld [vmem:[%s19305_s12] sm:$0xff]  }
0x1060   : > { %v9808_v39 = vpack.c.bf16 %v9781_v41, %v9780_v10  ;;  %v9744_v55 = vmul.f32 %v18865_v29, %v9705_v2 }
0x1061   : > { %v13892_v54 = vpop.eup %13891  ;;  %v9745_v47 = vmul.f32 %v18865_v29, %v9706_v19  ;;  %12863 = vmatpush3.bf16.msra.mxu0 %v13282_v58 }
0x1062   : > { %v13894_v32 = vpop.eup %13893  ;;  %12836 = vmatprep.mubr.msk.bf16.mxu1 %vm501_vm0, %v9808_v39  ;;  %v9783_v43 = vadd.f32 %v18873_v11, %v9744_v55  ;;  %v9707_v8 = vmul.f32 %v13892_v54, %v18738_v25  ;;  %12864 = vmatprep.subr.bf16.mxu0 %v13283_v17 }
0x1063   : > { %v9708_v6 = vmul.f32 %v13894_v32, %v18741_v9  ;;  %v9784_v28 = vadd.f32 %v18873_v11, %v9745_v47  ;;  %v13284_v9 = vld [vmem:[%s19305_s12 + $0x20] sm:$0xff]  }
0x1064   : > { %v9809_v60 = vpack.c.bf16 %v9783_v43, %v9782_v53  ;;  %v9746_v14 = vmul.f32 %v18865_v29, %v9707_v8 }
0x1065   : > { %v13896_v18 = vpop.eup %13895  ;;  %v9747_v31 = vmul.f32 %v18865_v29, %v9708_v6  ;;  %12865 = vmatpush3.bf16.msra.mxu0 %v13283_v17 }
0x1066   : > { %v9709_v59 = vmul.f32 %v13896_v18, %v18747_v49  ;;  %12837 = vmatmul.mubr.msk.bf16.gmra.mxu1 %vm501_vm0, %v9809_v60  ;;  %v9785_v25 = vadd.f32 %v18873_v11, %v9746_v14  ;;  %12866 = vmatprep.subr.bf16.mxu0 %v13284_v9 }
0x1067   : > { %v9786_v15 = vadd.f32 %v18873_v11, %v9747_v31 }
0x1068   : > { %v9810_v52 = vpack.c.bf16 %v9785_v25, %v9784_v28  ;;  %v9748_v16 = vmul.f32 %v18865_v29, %v9709_v59 }
0x1069   : > { %12867 = vmatpush3.bf16.msra.mxu0 %v13284_v9 }
0x106a   : > { %12840 = vmatprep.mubr.msk.bf16.mxu1 %vm501_vm0, %v9810_v52  ;;  %v9787_v49 = vadd.f32 %v18873_v11, %v9748_v16  ;;  %12868 = vmatprep.subr.bf16.mxu0 %v13285_v56 }
0x106c   : > { %v9811_v23 = vpack.c.bf16 %v9787_v49, %v9786_v15 }
0x106d   : > { %12869 = vmatpush3.bf16.msra.mxu0 %v13285_v56 }
0x106e   : > { %12841 = vmatmul.mubr.msk.bf16.gmra.mxu1 %vm501_vm0, %v9811_v23  ;;  %12870 = vmatprep.subr.bf16.mxu0 %v13286_v27 }
0x1071   : > { %12871 = vmatpush3.bf16.msra.mxu0 %v13286_v27 }
0x1072   : > { %12872 = vmatprep.subr.bf16.mxu0 %v13287_v21 }
0x1075   : > { %12873 = vmatpush3.bf16.msra.mxu0 %v13287_v21 }
0x1076   : > { %12874 = vmatprep.subr.bf16.mxu0 %v13288_v48 }
0x1079   : > { %12875 = vmatpush3.bf16.msra.mxu0 %v13288_v48 }
0x10a1   : > { %v9552_v20 = vpop.xlane.xlu0 %9551 }
0x10a2   : > { %v9614_v2 = vmul.f32 0.03125, %v9552_v20 }
0x10a4   : > { %v9646_v10 = vadd.f32 1e-05, %v9614_v2 }
0x10a5   : > { %v9558_v41 = vpop.xlane.xlu0 %9557 }
0x10a6   : > { %13897 = vrsqrt.f32 %v9646_v10  ;;  %v9555_v19 = vpop.xlane.xlu1 %9554  ;;  %v9616_v38 = vmul.f32 0.03125, %v9558_v41 }
0x10a7   : > { %v9615_v58 = vmul.f32 0.03125, %v9555_v19 }
0x10a8   : > { %v9648_v39 = vadd.f32 1e-05, %v9616_v38 }
0x10a9   : > { %v9647_v55 = vadd.f32 1e-05, %v9615_v58 }
0x10aa   : > { %13899 = vrsqrt.f32 %v9648_v39  ;;  %v9561_v54 = vpop.xlane.xlu1 %9560 }
0x10ab   : > { %13901 = vrsqrt.f32 %v9647_v55  ;;  %v9617_v47 = vmul.f32 0.03125, %v9561_v54 }
0x10ac   : > { %v9564_v32 = vpop.xlane.xlu0 %9563 }
0x10ad   : > { %v9649_v53 = vadd.f32 1e-05, %v9617_v47  ;;  %v9618_v43 = vmul.f32 0.03125, %v9564_v32 }
0x10af   : > { %13903 = vrsqrt.f32 %v9649_v53  ;;  %v9650_v8 = vadd.f32 1e-05, %v9618_v43 }
0x10b0   : > { %v9570_v6 = vpop.xlane.xlu0 %9569  ;;  %v9567_v60 = vpop.xlane.xlu1 %9566 }
0x10b1   : > { %13905 = vrsqrt.f32 %v9650_v8  ;;  %v9620_v17 = vmul.f32 0.03125, %v9570_v6  ;;  %v9619_v18 = vmul.f32 0.03125, %v9567_v60 }
0x10b3   : > { %v13898_v14 = vpop.eup %13897  ;;  %v9652_v28 = vadd.f32 1e-05, %v9620_v17  ;;  %v9651_v25 = vadd.f32 1e-05, %v9619_v18 }
0x10b4   : > { %v9710_v59 = vmul.f32 %v13898_v14, %v18766_v0  ;;  %v9573_v31 = vpop.xlane.xlu1 %9572 }
0x10b5   : > { %13907 = vrsqrt.f32 %v9652_v28  ;;  %v9576_v9 = vpop.xlane.xlu0 %9575  ;;  %v9621_v16 = vmul.f32 0.03125, %v9573_v31 }
0x10b6   : > { %13909 = vrsqrt.f32 %v9651_v25  ;;  %v9622_v15 = vmul.f32 0.03125, %v9576_v9  ;;  %v9749_v56 = vmul.f32 %v18865_v29, %v9710_v59 }
0x10b7   : > { %v13900_v52 = vpop.eup %13899  ;;  %v9653_v23 = vadd.f32 1e-05, %v9621_v16 }
0x10b8   : > { %v13902_v49 = vpop.eup %13901  ;;  %v9654_v27 = vadd.f32 1e-05, %v9622_v15  ;;  %v9712_v21 = vmul.f32 %v13900_v52, %v18771_v1  ;;  %v9579_v2 = vpop.xlane.xlu1 %9578  ;;  %v9788_v38 = vadd.f32 %v18873_v11, %v9749_v56 }
0x10b9   : > { %v9711_v20 = vmul.f32 %v13902_v49, %v18775_v24  ;;  %v9582_v10 = vpop.xlane.xlu0 %9581  ;;  %13911 = vrsqrt.f32 %v9653_v23  ;;  %v9623_v0 = vmul.f32 0.03125, %v9579_v2 }
0x10ba   : > { %v9624_v41 = vmul.f32 0.03125, %v9582_v10  ;;  %13913 = vrsqrt.f32 %v9654_v27  ;;  %v9751_v32 = vmul.f32 %v18865_v29, %v9712_v21 }
0x10bb   : > { %v9750_v48 = vmul.f32 %v18865_v29, %v9711_v20  ;;  %v9655_v39 = vadd.f32 1e-05, %v9623_v0 }
0x10bc   : > { %v13904_v19 = vpop.eup %13903  ;;  %v9656_v55 = vadd.f32 1e-05, %v9624_v41  ;;  %v9585_v47 = vpop.xlane.xlu1 %9584  ;;  %v9790_v59 = vadd.f32 %v18873_v11, %v9751_v32 }
0x10bd   : > { %v9713_v58 = vmul.f32 %v13904_v19, %v18783_v62  ;;  %v9789_v54 = vadd.f32 %v18873_v11, %v9750_v48  ;;  %v9588_v1 = vpop.xlane.xlu0 %9587  ;;  %13915 = vrsqrt.f32 %v9655_v39  ;;  %v9625_v53 = vmul.f32 0.03125, %v9585_v47 }
0x10be   : > { %v13906_v24 = vpop.eup %13905  ;;  %v9626_v43 = vmul.f32 0.03125, %v9588_v1  ;;  %13917 = vrsqrt.f32 %v9656_v55 }
0x10bf   : > { %v9812_v8 = vpack.c.bf16 %v9789_v54, %v9788_v38  ;;  %v9752_v6 = vmul.f32 %v18865_v29, %v9713_v58  ;;  %v9714_v17 = vmul.f32 %v13906_v24, %v18787_v22  ;;  %v9657_v60 = vadd.f32 1e-05, %v9625_v53 }
0x10c0   : > { %v9658_v62 = vadd.f32 1e-05, %v9626_v43  ;;  %v9591_v18 = vpop.xlane.xlu1 %9590 }
0x10c1   : > { %12844 = vmatprep.mubr.msk.bf16.mxu1 %vm501_vm0, %v9812_v8  ;;  %v9594_v28 = vpop.xlane.xlu0 %9593  ;;  %v9791_v25 = vadd.f32 %v18873_v11, %v9752_v6  ;;  %13919 = vrsqrt.f32 %v9657_v60  ;;  %v9627_v31 = vmul.f32 0.03125, %v9591_v18  ;;  %v9753_v15 = vmul.f32 %v18865_v29, %v9714_v17 }
0x10c2   : > { %v13908_v14 = vpop.eup %13907  ;;  %v9628_v9 = vmul.f32 0.03125, %v9594_v28  ;;  %13921 = vrsqrt.f32 %v9658_v62 }
0x10c3   : > { %v13910_v52 = vpop.eup %13909  ;;  %v9813_v16 = vpack.c.bf16 %v9791_v25, %v9790_v59  ;;  %v9716_v22 = vmul.f32 %v13908_v14, %v18795_v5  ;;  %v9659_v49 = vadd.f32 1e-05, %v9627_v31  ;;  %v9792_v10 = vadd.f32 %v18873_v11, %v9753_v15 }
0x10c4   : > { %v9660_v56 = vadd.f32 1e-05, %v9628_v9  ;;  %v9715_v23 = vmul.f32 %v13910_v52, %v18799_v42  ;;  %v9597_v27 = vpop.xlane.xlu1 %9596 }
0x10c5   : > { %12845 = vmatmul.mubr.msk.bf16.gmra.mxu1 %vm501_vm0, %v9813_v16  ;;  %13923 = vrsqrt.f32 %v9659_v49  ;;  %v9629_v20 = vmul.f32 0.03125, %v9597_v27  ;;  %v9755_v19 = vmul.f32 %v18865_v29, %v9716_v22 }
0x10c6   : > { %v9754_v21 = vmul.f32 %v18865_v29, %v9715_v23  ;;  %v13912_v2 = vpop.eup %13911  ;;  %13925 = vrsqrt.f32 %v9660_v56 }
0x10c7   : > { %v13914_v0 = vpop.eup %13913  ;;  %v9717_v41 = vmul.f32 %v13912_v2, %v18807_v46  ;;  %v9661_v48 = vadd.f32 1e-05, %v9629_v20  ;;  %v9794_v54 = vadd.f32 %v18873_v11, %v9755_v19  ;;  %v19010_v20 = vld [vmem:[%s19304_s11] ss:$0 sm:$0xff] }
0x10c8   : > { %v9793_v5 = vadd.f32 %v18873_v11, %v9754_v21  ;;  %v9718_v42 = vmul.f32 %v13914_v0, %v18810_v61 }
0x10c9   : > { %13927 = vrsqrt.f32 %v9661_v48  ;;  %v9756_v58 = vmul.f32 %v18865_v29, %v9717_v41 }
0x10ca   : > { %v9814_v38 = vpack.c.bf16 %v9793_v5, %v9792_v10  ;;  %v13916_v39 = vpop.eup %13915  ;;  %v9757_v47 = vmul.f32 %v18865_v29, %v9718_v42 }
0x10cb   : > { %v13918_v55 = vpop.eup %13917  ;;  %v9795_v24 = vadd.f32 %v18873_v11, %v9756_v58  ;;  %v9719_v46 = vmul.f32 %v13916_v39, %v18821_v33  ;;  %v13981_v58 = vmov 1.0|1.0  }
0x10cc   : > { %12848 = vmatprep.mubr.msk.bf16.mxu1 %vm501_vm0, %v9814_v38  ;;  %v9720_v1 = vmul.f32 %v13918_v55, %v18818_v63  ;;  %v9796_v6 = vadd.f32 %v18873_v11, %v9757_v47 }
0x10cd   : > { %v9815_v32 = vpack.c.bf16 %v9795_v24, %v9794_v54  ;;  %v9758_v61 = vmul.f32 %v18865_v29, %v9719_v46 }
0x10ce   : > { %v13920_v53 = vpop.eup %13919  ;;  %v9759_v60 = vmul.f32 %v18865_v29, %v9720_v1 }
0x10cf   : > { %v13922_v43 = vpop.eup %13921  ;;  %v9721_v8 = vmul.f32 %v13920_v53, %v18830_v57  ;;  %12849 = vmatmul.mubr.msk.bf16.gmra.mxu1 %vm501_vm0, %v9815_v32  ;;  %v9797_v17 = vadd.f32 %v18873_v11, %v9758_v61 }
0x10d0   : > { %v9722_v33 = vmul.f32 %v13922_v43, %v18833_v30  ;;  %v9798_v28 = vadd.f32 %v18873_v11, %v9759_v60 }
0x10d1   : > { %v9816_v62 = vpack.c.bf16 %v9797_v17, %v9796_v6  ;;  %v9760_v63 = vmul.f32 %v18865_v29, %v9721_v8 }
0x10d2   : > { %v13924_v14 = vpop.eup %13923  ;;  %v9761_v25 = vmul.f32 %v18865_v29, %v9722_v33 }
0x10d3   : > { %v13926_v18 = vpop.eup %13925  ;;  %12852 = vmatprep.mubr.msk.bf16.mxu1 %vm501_vm0, %v9816_v62  ;;  %v9799_v57 = vadd.f32 %v18873_v11, %v9760_v63  ;;  %v9723_v59 = vmul.f32 %v13924_v14, %v18842_v13 }
0x10d4   : > { %v9724_v31 = vmul.f32 %v13926_v18, %v18845_v36  ;;  %v9800_v15 = vadd.f32 %v18873_v11, %v9761_v25 }
0x10d5   : > { %v9817_v9 = vpack.c.bf16 %v9799_v57, %v9798_v28  ;;  %v9762_v30 = vmul.f32 %v18865_v29, %v9723_v59 }
0x10d6   : > { %v13928_v52 = vpop.eup %13927  ;;  %v9763_v49 = vmul.f32 %v18865_v29, %v9724_v31 }
0x10d7   : > { %v9725_v16 = vmul.f32 %v13928_v52, %v18854_v3  ;;  %12853 = vmatmul.mubr.msk.bf16.gmra.mxu1 %vm501_vm0, %v9817_v9  ;;  %v9801_v22 = vadd.f32 %v18873_v11, %v9762_v30 }
0x10d8   : > { %v9802_v36 = vadd.f32 %v18873_v11, %v9763_v49 }
0x10d9   : > { %v9818_v56 = vpack.c.bf16 %v9801_v22, %v9800_v15  ;;  %v9764_v13 = vmul.f32 %v18865_v29, %v9725_v16 }
0x10db   : > { %12856 = vmatprep.mubr.msk.bf16.mxu1 %vm501_vm0, %v9818_v56  ;;  %v9803_v23 = vadd.f32 %v18873_v11, %v9764_v13 }
0x10dd   : > { %v9819_v27 = vpack.c.bf16 %v9803_v23, %v9802_v36 }
0x10df   : > { %12857 = vmatmul.mubr.msk.bf16.gmra.mxu1 %vm501_vm0, %v9819_v27 }
0x1116   : > { %v12830_v3 = vpop.f32.mrf.mxu1 }
0x1117   : > { %v9934_v2 = vadd.f32 %v12830_v3, %v19010_v20 }
0x1118   : > { %v9925_v21 = vpop.f32.mrf.mxu1 }
0x1119   : > { %v9926_v29 = vadd.f32 %v19010_v20, %v9925_v21  ;;  %vm10054_vm1 = vcmp.gt.f32.partialorder %v9934_v2, 0.5  ;;  %v10078_v32 = vmul.f32 0.25, %v9934_v2 }
0x111a   : > { %v12831_v10 = vpop.f32.mrf.mxu1  ;;  %v11329_v19 = vsel %vm10054_vm1, 1.0, %v19566_v12 }
0x111b   : > { %v9937_v0 = vadd.f32 %v12831_v10, %v19010_v20  ;;  %vm10052_vm12 = vcmp.gt.f32.partialorder %v9926_v29, 0.5  ;;  %v10086_v54 = vsub.f32 1.0, %v11329_v19  ;;  %v10076_v61 = vmul.f32 0.25, %v9926_v29 }
0x111c   : > { %v9928_v41 = vpop.f32.mrf.mxu1  ;;  %v11327_v38 = vsel %vm10052_vm12, 1.0, %v19566_v12 }
0x111d   : > { %v9929_v11 = vadd.f32 %v19010_v20, %v9928_v41  ;;  %vm10055_vm13 = vcmp.gt.f32.partialorder %v9937_v0, 0.5  ;;  %v10084_v47 = vsub.f32 1.0, %v11327_v38  ;;  %v10094_v33 = vmul.f32 %v10086_v54, %v10078_v32 }
0x111e   : > { %v12834_v48 = vpop.f32.mrf.mxu1  ;;  %vm11370_vm2 = vmpackc.low %vm10055_vm13, %vm10054_vm1  ;;  %v11330_v24 = vsel %vm10055_vm13, 1.0, %v19566_v12  ;;  %v10079_v62 = vmul.f32 0.25, %v9937_v0 }
0x111f   : > { %vm10053_vm14 = vcmp.gt.f32.partialorder %v9929_v11, 0.5  ;;  %v9950_v5 = vadd.f32 %v12834_v48, %v19010_v20  ;;  %v10087_v8 = vsub.f32 1.0, %v11330_v24  ;;  %v10092_v18 = vmul.f32 %v10084_v47, %v10076_v61 }
0x1120   : > { %v9941_v42 = vpop.f32.mrf.mxu1  ;;  %vm11368_vm15 = vmpackc.low %vm10053_vm14, %vm10052_vm12  ;;  %v11328_v53 = vsel %vm10053_vm14, 1.0, %v19566_v12  ;;  %v10077_v31 = vmul.f32 0.25, %v9929_v11 }
0x1121   : > { %12876 = vmatprep.mubr.msk.bf16.mxu0 %vm11368_vm15, %v13981_v58  ;;  %v9942_v39 = vadd.f32 %v19010_v20, %v9941_v42  ;;  %vm10058_vm5 = vcmp.gt.f32.partialorder %v9950_v5, 0.5  ;;  %v10085_v63 = vsub.f32 1.0, %v11328_v53  ;;  %v10082_v9 = vmul.f32 0.25, %v9950_v5 }
0x1122   : > { %v12835_v55 = vpop.f32.mrf.mxu1  ;;  %12877 = vmatmul.mubr.msk.bf16.vlgmr.msra.gmra.mxu0 %vm11370_vm2, %v13981_v58  ;;  %v11333_v6 = vsel %vm10058_vm5, 1.0, %v19566_v12  ;;  %v10095_v16 = vmul.f32 %v10087_v8, %v10079_v62 }
0x1123   : > { %v9953_v46 = vadd.f32 %v12835_v55, %v19010_v20  ;;  %vm10056_vm3 = vcmp.gt.f32.partialorder %v9942_v39, 0.5  ;;  %v10090_v28 = vsub.f32 1.0, %v11333_v6  ;;  %v10080_v30 = vmul.f32 0.25, %v9942_v39 }
0x1124   : > { %v9944_v1 = vpop.f32.mrf.mxu1  ;;  %v11331_v57 = vsel %vm10056_vm3, 1.0, %v19566_v12  ;;  %v10093_v27 = vmul.f32 %v10085_v63, %v10077_v31 }
0x1125   : > { %v9945_v43 = vadd.f32 %v19010_v20, %v9944_v1  ;;  %vm10059_vm4 = vcmp.gt.f32.partialorder %v9953_v46, 0.5  ;;  %v10088_v56 = vsub.f32 1.0, %v11331_v57  ;;  %v10083_v13 = vmul.f32 0.25, %v9953_v46 }
0x1126   : > { %v12838_v17 = vpop.f32.mrf.mxu1  ;;  %vm11374_vm8 = vmpackc.low %vm10059_vm4, %vm10058_vm5  ;;  %v11334_v15 = vsel %vm10059_vm4, 1.0, %v19566_v12  ;;  %v10098_v29 = vmul.f32 %v10090_v28, %v10082_v9 }
0x1127   : > { %vm10057_vm6 = vcmp.gt.f32.partialorder %v9945_v43, 0.5  ;;  %v9966_v60 = vadd.f32 %v12838_v17, %v19010_v20  ;;  %v10091_v10 = vsub.f32 1.0, %v11334_v15  ;;  %v10081_v48 = vmul.f32 0.25, %v9945_v43 }
0x1128   : > { %v9957_v14 = vpop.f32.mrf.mxu1  ;;  %vm11372_vm7 = vmpackc.low %vm10057_vm6, %vm10056_vm3  ;;  %v11332_v0 = vsel %vm10057_vm6, 1.0, %v19566_v12  ;;  %v10096_v39 = vmul.f32 %v10088_v56, %v10080_v30 }
0x1129   : > { %v10102_v59 = vadd.f32 %v10094_v33, %v9966_v60  ;;  %v9958_v25 = vadd.f32 %v19010_v20, %v9957_v14  ;;  %12880 = vmatprep.mubr.msk.bf16.mxu0 %vm11372_vm7, %v13981_v58  ;;  %v10089_v24 = vsub.f32 1.0, %v11332_v0  ;;  %v10099_v17 = vmul.f32 %v10091_v10, %v10083_v13 }
0x112a   : > { %v12839_v52 = vpop.f32.mrf.mxu1  ;;  %12881 = vmatmul.mubr.msk.bf16.gmra.mxu0 %vm11374_vm8, %v13981_v58 }
0x112b   : > { %vm10110_vm9 = vcmp.gt.f32.partialorder %v10102_v59, 0.5  ;;  %v10100_v22 = vadd.f32 %v10092_v18, %v9958_v25  ;;  %v9969_v49 = vadd.f32 %v12839_v52, %v19010_v20  ;;  %v10134_v41 = vmul.f32 0.25, %v10102_v59 }
0x112c   : > { %v11337_v36 = vsel %vm10110_vm9, 1.0, %v19566_v12  ;;  %v9960_v23 = vpop.f32.mrf.mxu1  ;;  %v10097_v9 = vmul.f32 %v10089_v24, %v10081_v48 }
0x112d   : > { %v10142_v3 = vsub.f32 1.0, %v11337_v36  ;;  %v10103_v21 = vadd.f32 %v10095_v16, %v9969_v49  ;;  %v9961_v2 = vadd.f32 %v19010_v20, %v9960_v23  ;;  %vm10108_vm10 = vcmp.gt.f32.partialorder %v10100_v22, 0.5 }
0x112e   : > { %v12842_v11 = vpop.f32.mrf.mxu1  ;;  %v11335_v55 = vsel %vm10108_vm10, 1.0, %v19566_v12  ;;  %v10132_v32 = vmul.f32 0.25, %v10100_v22 }
0x112f   : > { %vm10111_vm11 = vcmp.gt.f32.partialorder %v10103_v21, 0.5  ;;  %v10101_v5 = vadd.f32 %v10093_v27, %v9961_v2  ;;  %v9982_v19 = vadd.f32 %v12842_v11, %v19010_v20  ;;  %v10150_v54 = vmul.f32 %v10142_v3, %v10134_v41 }
0x1130   : > { %v11338_v42 = vsel %vm10111_vm11, 1.0, %v19566_v12  ;;  %v9973_v38 = vpop.f32.mrf.mxu1  ;;  %v10135_v61 = vmul.f32 0.25, %v10103_v21  ;;  %v10140_v43 = vsub.f32 1.0, %v11335_v55  ;;  %vm11378_vm14 = vmpackc.low %vm10111_vm11, %vm10110_vm9 }
0x1131   : > { %v10143_v46 = vsub.f32 1.0, %v11338_v42  ;;  %v10106_v47 = vadd.f32 %v10098_v29, %v9982_v19  ;;  %v9974_v1 = vadd.f32 %v19010_v20, %v9973_v38  ;;  %vm10109_vm1 = vcmp.gt.f32.partialorder %v10101_v5, 0.5 }
0x1132   : > { %v12843_v53 = vpop.f32.mrf.mxu1  ;;  %vm11376_vm13 = vmpackc.low %vm10109_vm1, %vm10108_vm10  ;;  %v11336_v33 = vsel %vm10109_vm1, 1.0, %v19566_v12  ;;  %v10148_v63 = vmul.f32 %v10140_v43, %v10132_v32  ;;  %v10133_v18 = vmul.f32 0.25, %v10101_v5 }
0x1133   : > { %vm10114_vm12 = vcmp.gt.f32.partialorder %v10106_v47, 0.5  ;;  %v10104_v8 = vadd.f32 %v10096_v39, %v9974_v1  ;;  %v9985_v6 = vadd.f32 %v12843_v53, %v19010_v20  ;;  %12884 = vmatprep.mubr.msk.bf16.mxu0 %vm11376_vm13, %v13981_v58  ;;  %v10151_v14 = vmul.f32 %v10143_v46, %v10135_v61 }
0x1134   : > { %v11341_v60 = vsel %vm10114_vm12, 1.0, %v19566_v12  ;;  %v9976_v62 = vpop.f32.mrf.mxu1  ;;  %v10141_v25 = vsub.f32 1.0, %v11336_v33  ;;  %12885 = vmatmul.mubr.msk.bf16.gmra.mxu0 %vm11378_vm14, %v13981_v58  ;;  %v10138_v31 = vmul.f32 0.25, %v10106_v47 }
0x1135   : > { %v10146_v28 = vsub.f32 1.0, %v11341_v60  ;;  %v10107_v57 = vadd.f32 %v10099_v17, %v9985_v6  ;;  %v9977_v59 = vadd.f32 %v19010_v20, %v9976_v62  ;;  %vm10112_vm15 = vcmp.gt.f32.partialorder %v10104_v8, 0.5 }
0x1136   : > { %v10136_v30 = vmul.f32 0.25, %v10104_v8  ;;  %v11339_v52 = vsel %vm10112_vm15, 1.0, %v19566_v12  ;;  %v10149_v16 = vmul.f32 %v10141_v25, %v10133_v18 }
0x1137   : > { %vm10115_vm2 = vcmp.gt.f32.partialorder %v10107_v57, 0.5  ;;  %v10105_v22 = vadd.f32 %v10097_v9, %v9977_v59  ;;  %v10144_v49 = vsub.f32 1.0, %v11339_v52  ;;  %v10154_v56 = vmul.f32 %v10146_v28, %v10138_v31 }
0x1138   : > { %v11342_v15 = vsel %vm10115_vm2, 1.0, %v19566_v12  ;;  %v10139_v13 = vmul.f32 0.25, %v10107_v57  ;;  %vm11382_vm4 = vmpackc.low %vm10115_vm2, %vm10114_vm12 }
0x1139   : > { %v10147_v36 = vsub.f32 1.0, %v11342_v15  ;;  %vm10113_vm5 = vcmp.gt.f32.partialorder %v10105_v22, 0.5  ;;  %v10152_v23 = vmul.f32 %v10144_v49, %v10136_v30  ;;  %v10137_v21 = vmul.f32 0.25, %v10105_v22 }
0x113a   : > { %v11340_v27 = vsel %vm10113_vm5, 1.0, %v19566_v12  ;;  %vm11380_vm3 = vmpackc.low %vm10113_vm5, %vm10112_vm15 }
0x113b   : > { %v10155_v3 = vmul.f32 %v10147_v36, %v10139_v13  ;;  %v10145_v2 = vsub.f32 1.0, %v11340_v27  ;;  %12888 = vmatprep.mubr.msk.bf16.mxu0 %vm11380_vm3, %v13981_v58 }
0x113c   : > { %12889 = vmatmul.mubr.msk.bf16.gmra.mxu0 %vm11382_vm4, %v13981_v58 }
0x113d   : > { %v10153_v29 = vmul.f32 %v10145_v2, %v10137_v21 }
0x1185   : > { %v12846_v10 = vpop.f32.mrf.mxu1 }
0x1186   : > { %v9998_v0 = vadd.f32 %v12846_v10, %v19010_v20 }
0x1187   : > { %v9989_v41 = vpop.f32.mrf.mxu1 }
0x1188   : > { %v9990_v11 = vadd.f32 %v19010_v20, %v9989_v41  ;;  %v10158_v5 = vadd.f32 %v10150_v54, %v9998_v0 }
0x1189   : > { %v12847_v48 = vpop.f32.mrf.mxu1 }
0x118a   : > { %v10001_v19 = vadd.f32 %v12847_v48, %v19010_v20  ;;  %v10156_v38 = vadd.f32 %v10148_v63, %v9990_v11  ;;  %vm10166_vm6 = vcmp.gt.f32.partialorder %v10158_v5, 0.5  ;;  %v10190_v25 = vmul.f32 0.25, %v10158_v5 }
0x118b   : > { %v9992_v42 = vpop.f32.mrf.mxu1  ;;  %v11345_v32 = vsel %vm10166_vm6, 1.0, %v19566_v12 }
0x118c   : > { %v10159_v39 = vadd.f32 %v10151_v14, %v10001_v19  ;;  %v9993_v55 = vadd.f32 %v19010_v20, %v9992_v42  ;;  %vm10164_vm9 = vcmp.gt.f32.partialorder %v10156_v38, 0.5  ;;  %v10198_v33 = vsub.f32 1.0, %v11345_v32 }
0x118d   : > { %v11343_v6 = vsel %vm10164_vm9, 1.0, %v19566_v12  ;;  %v10188_v9 = vmul.f32 0.25, %v10156_v38 }
0x118e   : > { %vm10167_vm7 = vcmp.gt.f32.partialorder %v10159_v39, 0.5  ;;  %v10157_v24 = vadd.f32 %v10149_v16, %v9993_v55  ;;  %v10196_v28 = vsub.f32 1.0, %v11343_v6  ;;  %v10191_v30 = vmul.f32 0.25, %v10159_v39 }
0x118f   : > { %vm11386_vm8 = vmpackc.low %vm10167_vm7, %vm10166_vm6  ;;  %v12850_v46 = vpop.f32.mrf.mxu1  ;;  %v11346_v43 = vsel %vm10167_vm7, 1.0, %v19566_v12  ;;  %v10206_v49 = vmul.f32 %v10198_v33, %v10190_v25 }
0x1190   : > { %vm10165_vm10 = vcmp.gt.f32.partialorder %v10157_v24, 0.5  ;;  %v10014_v47 = vadd.f32 %v12850_v46, %v19010_v20  ;;  %v10199_v14 = vsub.f32 1.0, %v11346_v43  ;;  %v10189_v13 = vmul.f32 0.25, %v10157_v24 }
0x1191   : > { %vm11384_vm11 = vmpackc.low %vm10165_vm10, %vm10164_vm9  ;;  %v10005_v1 = vpop.f32.mrf.mxu1  ;;  %v11344_v18 = vsel %vm10165_vm10, 1.0, %v19566_v12  ;;  %v10204_v36 = vmul.f32 %v10196_v28, %v10188_v9 }
0x1192   : > { %12892 = vmatprep.mubr.msk.bf16.mxu0 %vm11384_vm11, %v13981_v58  ;;  %v10006_v54 = vadd.f32 %v19010_v20, %v10005_v1  ;;  %v10162_v61 = vadd.f32 %v10154_v56, %v10014_v47  ;;  %v10197_v22 = vsub.f32 1.0, %v11344_v18  ;;  %v10207_v27 = vmul.f32 %v10199_v14, %v10191_v30 }
0x1193   : > { %12893 = vmatmul.mubr.msk.bf16.gmra.mxu0 %vm11386_vm8, %v13981_v58  ;;  %v12851_v53 = vpop.f32.mrf.mxu1 }
0x1194   : > { %v10017_v8 = vadd.f32 %v12851_v53, %v19010_v20  ;;  %v10160_v17 = vadd.f32 %v10152_v23, %v10006_v54  ;;  %vm10170_vm1 = vcmp.gt.f32.partialorder %v10162_v61, 0.5  ;;  %v10205_v5 = vmul.f32 %v10197_v22, %v10189_v13 }
0x1195   : > { %v10008_v60 = vpop.f32.mrf.mxu1  ;;  %v11349_v15 = vsel %vm10170_vm1, 1.0, %v19566_v12  ;;  %v10194_v19 = vmul.f32 0.25, %v10162_v61 }
0x1196   : > { %v10163_v62 = vadd.f32 %v10155_v3, %v10017_v8  ;;  %v10009_v63 = vadd.f32 %v19010_v20, %v10008_v60  ;;  %vm10168_vm14 = vcmp.gt.f32.partialorder %v10160_v17, 0.5  ;;  %v10202_v10 = vsub.f32 1.0, %v11349_v15 }
0x1197   : > { %v12854_v57 = vpop.f32.mrf.mxu1  ;;  %v10192_v47 = vmul.f32 0.25, %v10160_v17 }
0x1198   : > { %vm10171_vm12 = vcmp.gt.f32.partialorder %v10163_v62, 0.5  ;;  %v10161_v31 = vadd.f32 %v10153_v29, %v10009_v63  ;;  %v10030_v59 = vadd.f32 %v12854_v57, %v19010_v20  ;;  %v11347_v29 = vsel %vm10168_vm14, 1.0, %v19566_v12 }
0x1199   : > { %vm19086_vm13 = vmpackc.low %vm10171_vm12, %vm10170_vm1  ;;  %v10021_v16 = vpop.f32.mrf.mxu1  ;;  %v11350_v3 = vsel %vm10171_vm12, 1.0, %v19566_v12  ;;  %v10200_v39 = vsub.f32 1.0, %v11347_v29  ;;  %v10195_v1 = vmul.f32 0.25, %v10163_v62  ;;  %v10210_v32 = vmul.f32 %v10202_v10, %v10194_v19 }
0x119a   : > { %v10022_v56 = vadd.f32 %v19010_v20, %v10021_v16  ;;  %vm10169_vm15 = vcmp.gt.f32.partialorder %v10161_v31, 0.5  ;;  %v10214_v21 = vadd.f32 %v10206_v49, %v10030_v59  ;;  %v10203_v42 = vsub.f32 1.0, %v11350_v3 }
0x119b   : > { %v12855_v23 = vpop.f32.mrf.mxu1  ;;  %vm11388_vm2 = vmpackc.low %vm10169_vm15, %vm10168_vm14  ;;  %v11348_v38 = vsel %vm10169_vm15, 1.0, %v19566_v12  ;;  %v10193_v8 = vmul.f32 0.25, %v10161_v31  ;;  %v10208_v33 = vmul.f32 %v10200_v39, %v10192_v47 }
0x119c   : > { %v10033_v2 = vadd.f32 %v12855_v23, %v19010_v20  ;;  %12896 = vmatprep.mubr.msk.bf16.mxu0 %vm11388_vm2, %v13981_v58  ;;  %v10212_v41 = vadd.f32 %v10204_v36, %v10022_v56  ;;  %vm10222_vm5 = vcmp.gt.f32.partialorder %v10214_v21, 0.5  ;;  %v10201_v61 = vsub.f32 1.0, %v11348_v38 }
0x119d   : > { %v10024_v0 = vpop.f32.mrf.mxu1  ;;  %12897 = vmatmul.mubr.msk.bf16.gmra.mxu0 %vm19086_vm13, %v13981_v58  ;;  %v10211_v17 = vmul.f32 %v10203_v42, %v10195_v1 }
0x119e   : > { %v10215_v11 = vadd.f32 %v10207_v27, %v10033_v2  ;;  %v10025_v48 = vadd.f32 %v19010_v20, %v10024_v0  ;;  %vm10220_vm6 = vcmp.gt.f32.partialorder %v10212_v41, 0.5  ;;  %v10209_v57 = vmul.f32 %v10201_v61, %v10193_v8 }
0x119f   : > { %v12858_v55 = vpop.f32.mrf.mxu1 }
0x11a0   : > { %vm10223_vm3 = vcmp.gt.f32.partialorder %v10215_v11, 0.5  ;;  %v10213_v24 = vadd.f32 %v10205_v5, %v10025_v48  ;;  %v10046_v46 = vadd.f32 %v12858_v55, %v19010_v20 }
0x11a1   : > { %vm19105_vm4 = vmpackc.low %vm10223_vm3, %vm10222_vm5  ;;  %v10037_v53 = vpop.f32.mrf.mxu1 }
0x11a2   : > { %vm10221_vm7 = vcmp.gt.f32.partialorder %v10213_v24, 0.5  ;;  %v10038_v43 = vadd.f32 %v19010_v20, %v10037_v53  ;;  %v10218_v60 = vadd.f32 %v10210_v32, %v10046_v46 }
0x11a3   : > { %v12859_v6 = vpop.f32.mrf.mxu1  ;;  %vm11392_vm8 = vmpackc.low %vm10221_vm7, %vm10220_vm6 }
0x11a4   : > { %v10049_v63 = vadd.f32 %v12859_v6, %v19010_v20  ;;  %12900 = vmatprep.mubr.msk.bf16.mxu0 %vm11392_vm8, %v13981_v58  ;;  %v10216_v14 = vadd.f32 %v10208_v33, %v10038_v43  ;;  %vm10226_vm9 = vcmp.gt.f32.partialorder %v10218_v60, 0.5 }
0x11a5   : > { %v10040_v62 = vpop.f32.mrf.mxu1  ;;  %12901 = vmatmul.mubr.msk.bf16.gmra.mxu0 %vm19105_vm4, %v13981_v58 }
0x11a6   : > { %v10219_v18 = vadd.f32 %v10211_v17, %v10049_v63  ;;  %v10041_v28 = vadd.f32 %v19010_v20, %v10040_v62  ;;  %vm10224_vm1 = vcmp.gt.f32.partialorder %v10216_v14, 0.5  ;;  %v19121_v20 = vld [vmem:[%s19306_s13] ss:$0 sm:$0xff] }
0x11a8   : > { %vm10227_vm10 = vcmp.gt.f32.partialorder %v10219_v18, 0.5  ;;  %v10217_v25 = vadd.f32 %v10209_v57, %v10041_v28 }
0x11a9   : > { %vm11398_vm11 = vmpackc.low %vm10227_vm10, %vm10226_vm9 }
0x11aa   : > { %vm10225_vm12 = vcmp.gt.f32.partialorder %v10217_v25, 0.5 }
0x11ab   : > { %vm11396_vm13 = vmpackc.low %vm10225_vm12, %vm10224_vm1 }
0x11ac   : > { %12904 = vmatprep.mubr.msk.bf16.mxu0 %vm11396_vm13, %v13981_v58 }
0x11ad   : > { %12905 = vmatmul.mubr.msk.bf16.gmra.mxu0 %vm11398_vm11, %v13981_v58 }
0x11e2   : > { %v12878_v31 = vpop.f32.mrf.mxu0 }
0x11e3   : > { %v10374_v59 = vadd.f32 %v12878_v31, %v19121_v20 }
0x11e4   : > { %v10365_v9 = vpop.f32.mrf.mxu0 }
0x11e5   : > { %vm10494_vm14 = vcmp.gt.f32.partialorder %v10374_v59, 0.5  ;;  %v10366_v30 = vadd.f32 %v19121_v20, %v10365_v9  ;;  %v10518_v38 = vmul.f32 0.25, %v10374_v59 }
0x11e6   : > { %v11402_v58 = vsel %vm10494_vm14, 1.0, %v19566_v12  ;;  %v12879_v52 = vpop.f32.mrf.mxu0 }
0x11e7   : > { %v10686_v16 = vadd.f32 %v11402_v58, %v18391_v44  ;;  %vm10492_vm15 = vcmp.gt.f32.partialorder %v10366_v30, 0.5  ;;  %v10377_v22 = vadd.f32 %v12879_v52, %v19121_v20  ;;  %v10526_v48 = vsub.f32 1.0, %v11402_v58 }
0x11e8   : > { %v11400_v15 = vsel %vm10492_vm15, 1.0, %v19566_v12  ;;  %v10368_v49 = vpop.f32.mrf.mxu0  ;;  %v10516_v55 = vmul.f32 0.25, %v10366_v30 }
0x11e9   : > { %10718 = vst.msk [vmem:[%s19130_s25 + $0x10] sm:$0xff] %vm501_vm0, %v10686_v16  ;;  %v10684_v56 = vadd.f32 %v11400_v15, %v18335_v4  ;;  %v10369_v13 = vadd.f32 %v19121_v20, %v10368_v49  ;;  %vm10495_vm2 = vcmp.gt.f32.partialorder %v10377_v22, 0.5  ;;  %v10524_v42 = vsub.f32 1.0, %v11400_v15 }
0x11ea   : > { %v12882_v36 = vpop.f32.mrf.mxu0  ;;  %v11403_v44 = vsel %vm10495_vm2, 1.0, %v19566_v12  ;;  %v10534_v32 = vmul.f32 %v10526_v48, %v10518_v38 }
0x11eb   : > { %10716 = vst.msk [vmem:[%s19130_s25] sm:$0xff] %vm501_vm0, %v10684_v56  ;;  %vm10493_vm5 = vcmp.gt.f32.partialorder %v10369_v13, 0.5  ;;  %v10390_v23 = vadd.f32 %v12882_v36, %v19121_v20  ;;  %v10687_v27 = vadd.f32 %v11403_v44, %v18362_v34  ;;  %v10527_v24 = vsub.f32 1.0, %v11403_v44 }
0x11ec   : > { %v11401_v3 = vsel %vm10493_vm5, 1.0, %v19566_v12  ;;  %v10381_v21 = vpop.f32.mrf.mxu0  ;;  %v10517_v53 = vmul.f32 0.25, %v10369_v13  ;;  %v10532_v8 = vmul.f32 %v10524_v42, %v10516_v55  ;;  %v19834_v42 = vld [vmem:[#allocation58_spill] sm:$0xff] }
0x11ed   : > { %v10685_v4 = vadd.f32 %v11401_v3, %v18373_v50  ;;  %vm10498_vm3 = vcmp.gt.f32.partialorder %v10390_v23, 0.5  ;;  %10719 = vst.msk [vmem:[%s19130_s25 + $0x18] sm:$0xff] %vm501_vm0, %v10687_v27  ;;  %v10382_v29 = vadd.f32 %v19121_v20, %v10381_v21  ;;  %v10525_v46 = vsub.f32 1.0, %v11401_v3 }
0x11ee   : > { %v11406_v2 = vsel %vm10498_vm3, 1.0, %v19566_v12  ;;  %v12883_v10 = vpop.f32.mrf.mxu0  ;;  %v10522_v6 = vmul.f32 0.25, %v10390_v23 }
0x11ef   : > { %10717 = vst.msk [vmem:[%s19130_s25 + $0x8] sm:$0xff] %vm501_vm0, %v10685_v4  ;;  %v10690_v0 = vadd.f32 %v11406_v2, %v18426_v51  ;;  %v10393_v34 = vadd.f32 %v12883_v10, %v19121_v20  ;;  %vm10496_vm4 = vcmp.gt.f32.partialorder %v10382_v29, 0.5  ;;  %v10530_v1 = vsub.f32 1.0, %v11406_v2 }
0x11f0   : > { %v10384_v41 = vpop.f32.mrf.mxu0  ;;  %v11404_v50 = vsel %vm10496_vm4, 1.0, %v19566_v12  ;;  %v10520_v17 = vmul.f32 0.25, %v10382_v29  ;;  %v10533_v18 = vmul.f32 %v10525_v46, %v10517_v53  ;;  %v19835_v46 = vld [vmem:[#allocation62_spill] sm:$0xff] }
0x11f1   : > { %10722 = vst.msk [vmem:[%s19130_s25 + $0x30] sm:$0xff] %vm501_vm0, %v10690_v0  ;;  %vm10499_vm6 = vcmp.gt.f32.partialorder %v10393_v34, 0.5  ;;  %v10385_v11 = vadd.f32 %v19121_v20, %v10384_v41  ;;  %v10688_v5 = vadd.f32 %v11404_v50, %v18404_v26  ;;  %v10528_v61 = vsub.f32 1.0, %v11404_v50 }
0x11f2   : > { %v11407_v19 = vsel %vm10499_vm6, 1.0, %v19566_v12  ;;  %v10523_v62 = vmul.f32 0.25, %v10393_v34  ;;  %v10538_v25 = vmul.f32 %v10530_v1, %v10522_v6 }
0x11f3   : > { %v10691_v51 = vadd.f32 %v11407_v19, %v18431_v45  ;;  %vm10497_vm7 = vcmp.gt.f32.partialorder %v10385_v11, 0.5  ;;  %10720 = vst.msk [vmem:[%s19130_s25 + $0x20] sm:$0xff] %vm501_vm0, %v10688_v5  ;;  %v10519_v45 = vmul.f32 0.25, %v10377_v22  ;;  %v10531_v60 = vsub.f32 1.0, %v11407_v19 }
0x11f4   : > { %v11405_v39 = vsel %vm10497_vm7, 1.0, %v19566_v12  ;;  %v12886_v26 = vpop.f32.mrf.mxu0  ;;  %v10521_v31 = vmul.f32 0.25, %v10385_v11  ;;  %v10536_v58 = vmul.f32 %v10528_v61, %v10520_v17  ;;  %v19836_v61 = vld [vmem:[#allocation34_spill] sm:$0xff] }
0x11f5   : > { %10723 = vst.msk [vmem:[%s19130_s25 + $0x38] sm:$0xff] %vm501_vm0, %v10691_v51  ;;  %v10689_v47 = vadd.f32 %v11405_v39, %v18407_v37  ;;  %v10406_v54 = vadd.f32 %v12886_v26, %v19121_v20  ;;  %v10535_v14 = vmul.f32 %v10527_v24, %v10519_v45  ;;  %v10529_v59 = vsub.f32 1.0, %v11405_v39 }
0x11f6   : > { %v10397_v43 = vpop.f32.mrf.mxu0  ;;  %v10539_v15 = vmul.f32 %v10531_v60, %v10523_v62 }
0x11f7   : > { %10721 = vst.msk [vmem:[%s19130_s25 + $0x28] sm:$0xff] %vm501_vm0, %v10689_v47  ;;  %v10542_v33 = vadd.f32 %v10534_v32, %v10406_v54  ;;  %v10398_v63 = vadd.f32 %v19121_v20, %v10397_v43  ;;  %v10537_v50 = vmul.f32 %v10529_v59, %v10521_v31 }
0x11f8   : > { %v12887_v37 = vpop.f32.mrf.mxu0 }
0x11f9   : > { %vm10550_vm8 = vcmp.gt.f32.partialorder %v10542_v33, 0.5  ;;  %v10540_v28 = vadd.f32 %v10532_v8, %v10398_v63  ;;  %v10409_v57 = vadd.f32 %v12887_v37, %v19121_v20  ;;  %v10574_v22 = vmul.f32 0.25, %v10542_v33  ;;  %v19837_v37 = vld [vmem:[#allocation66_spill] sm:$0xff] }
0x11fa   : > { %v11410_v9 = vsel %vm10550_vm8, 1.0, %v19566_v12  ;;  %v10400_v30 = vpop.f32.mrf.mxu0 }
0x11fb   : > { %v10694_v52 = vadd.f32 %v11410_v9, %v18467_v7  ;;  %vm10548_vm9 = vcmp.gt.f32.partialorder %v10540_v28, 0.5  ;;  %v10543_v16 = vadd.f32 %v10535_v14, %v10409_v57  ;;  %v10401_v56 = vadd.f32 %v19121_v20, %v10400_v30 }
0x11fc   : > { %v11408_v49 = vsel %vm10548_vm9, 1.0, %v19566_v12  ;;  %v12890_v13 = vpop.f32.mrf.mxu0  ;;  %v10582_v36 = vsub.f32 1.0, %v11410_v9  ;;  %v10572_v44 = vmul.f32 0.25, %v10540_v28 }
0x11fd   : > { %10726 = vst.msk [vmem:[%s19130_s25 + $0x50] sm:$0xff] %vm501_vm0, %v10694_v52  ;;  %v10692_v23 = vadd.f32 %v11408_v49, %v18451_v35  ;;  %vm10551_vm10 = vcmp.gt.f32.partialorder %v10543_v16, 0.5  ;;  %v10422_v27 = vadd.f32 %v12890_v13, %v19121_v20  ;;  %v10541_v3 = vadd.f32 %v10533_v18, %v10401_v56 }
0x11fe   : > { %v11411_v7 = vsel %vm10551_vm10, 1.0, %v19566_v12  ;;  %v10413_v21 = vpop.f32.mrf.mxu0  ;;  %v10590_v4 = vmul.f32 %v10582_v36, %v10574_v22  ;;  %v10580_v2 = vsub.f32 1.0, %v11408_v49  ;;  %v10575_v41 = vmul.f32 0.25, %v10543_v16 }
0x11ff   : > { %10724 = vst.msk [vmem:[%s19130_s25 + $0x40] sm:$0xff] %vm501_vm0, %v10692_v23  ;;  %v10695_v29 = vadd.f32 %v11411_v7, %v18470_v40  ;;  %v10546_v10 = vadd.f32 %v10538_v25, %v10422_v27  ;;  %v10414_v0 = vadd.f32 %v19121_v20, %v10413_v21  ;;  %v10583_v34 = vsub.f32 1.0, %v11411_v7  ;;  %v19838_v25 = vld [vmem:[#allocation64_spill] sm:$0xff] }
0x1200   : > { %vm10549_vm11 = vcmp.gt.f32.partialorder %v10541_v3, 0.5  ;;  %v12891_v35 = vpop.f32.mrf.mxu0  ;;  %v10588_v11 = vmul.f32 %v10580_v2, %v10572_v44  ;;  %v10573_v5 = vmul.f32 0.25, %v10541_v3  ;;  %v19839_v23 = vld [vmem:[#allocation68_spill] sm:$0xff] }
0x1201   : > { %10727 = vst.msk [vmem:[%s19130_s25 + $0x58] sm:$0xff] %vm501_vm0, %v10695_v29  ;;  %v11409_v48 = vsel %vm10549_vm11, 1.0, %v19566_v12  ;;  %vm10554_vm1 = vcmp.gt.f32.partialorder %v10546_v10, 0.5  ;;  %v10544_v19 = vadd.f32 %v10536_v58, %v10414_v0  ;;  %v10425_v38 = vadd.f32 %v12891_v35, %v19121_v20  ;;  %v19841_v0 = vld [vmem:[#allocation70_spill] sm:$0xff] }
0x1202   : > { %v10693_v40 = vadd.f32 %v11409_v48, %v19834_v42  ;;  %v11414_v51 = vsel %vm10554_vm1, 1.0, %v19566_v12  ;;  %v10416_v39 = vpop.f32.mrf.mxu0  ;;  %v10591_v55 = vmul.f32 %v10583_v34, %v10575_v41  ;;  %v10578_v24 = vmul.f32 0.25, %v10546_v10 }
0x1203   : > { %v10698_v47 = vadd.f32 %v11414_v51, %v19835_v46  ;;  %vm10552_vm12 = vcmp.gt.f32.partialorder %v10544_v19, 0.5  ;;  %v10417_v26 = vadd.f32 %v19121_v20, %v10416_v39  ;;  %v10547_v54 = vadd.f32 %v10539_v15, %v10425_v38 }
0x1204   : > { %10725 = vst.msk [vmem:[%s19130_s25 + $0x48] sm:$0xff] %vm501_vm0, %v10693_v40  ;;  %v11412_v1 = vsel %vm10552_vm12, 1.0, %v19566_v12  ;;  %v10581_v32 = vsub.f32 1.0, %v11409_v48  ;;  %v10586_v45 = vsub.f32 1.0, %v11414_v51  ;;  %v10576_v53 = vmul.f32 0.25, %v10544_v19 }
0x1205   : > { %10730 = vst.msk [vmem:[%s19130_s25 + $0x70] sm:$0xff] %vm501_vm0, %v10698_v47  ;;  %v10696_v43 = vadd.f32 %v11412_v1, %v19836_v61  ;;  %v10545_v8 = vadd.f32 %v10537_v50, %v10417_v26  ;;  %v10584_v6 = vsub.f32 1.0, %v11412_v1  ;;  %vm10555_vm13 = vcmp.gt.f32.partialorder %v10547_v54, 0.5  ;;  %v19843_v26 = vld [vmem:[#allocation72_spill] sm:$0xff] }
0x1206   : > { %v10589_v60 = vmul.f32 %v10581_v32, %v10573_v5  ;;  %v10594_v33 = vmul.f32 %v10586_v45, %v10578_v24  ;;  %v11415_v63 = vsel %vm10555_vm13, 1.0, %v19566_v12  ;;  %v10579_v62 = vmul.f32 0.25, %v10547_v54 }
0x1207   : > { %10728 = vst.msk [vmem:[%s19130_s25 + $0x60] sm:$0xff] %vm501_vm0, %v10696_v43  ;;  %vm10553_vm14 = vcmp.gt.f32.partialorder %v10545_v8, 0.5  ;;  %v10592_v17 = vmul.f32 %v10584_v6, %v10576_v53  ;;  %v10699_v14 = vadd.f32 %v11415_v63, %v19837_v37  ;;  %v10587_v28 = vsub.f32 1.0, %v11415_v63  ;;  %v19844_v6 = vld [vmem:[#allocation41_spill] sm:$0xff] }
0x1208   : > { %v11413_v18 = vsel %vm10553_vm14, 1.0, %v19566_v12  ;;  %v10577_v57 = vmul.f32 0.25, %v10545_v8 }
0x1209   : > { %v10697_v31 = vadd.f32 %v11413_v18, %v19838_v25  ;;  %v10585_v59 = vsub.f32 1.0, %v11413_v18  ;;  %10731 = vst.msk [vmem:[%s19130_s25 + $0x78] sm:$0xff] %vm501_vm0, %v10699_v14  ;;  %v10595_v9 = vmul.f32 %v10587_v28, %v10579_v62  ;;  %v19845_v28 = vld [vmem:[#allocation73_spill] sm:$0xff] }
0x120b   : > { %10729 = vst.msk [vmem:[%s19130_s25 + $0x68] sm:$0xff] %vm501_vm0, %v10697_v31  ;;  %v10593_v30 = vmul.f32 %v10585_v59, %v10577_v57 }
0x1253   : > { %v12894_v58 = vpop.f32.mrf.mxu0 }
0x1254   : > { %v10438_v52 = vadd.f32 %v12894_v58, %v19121_v20 }
0x1255   : > { %v10429_v16 = vpop.f32.mrf.mxu0 }
0x1256   : > { %v10598_v15 = vadd.f32 %v10590_v4, %v10438_v52  ;;  %v10430_v22 = vadd.f32 %v19121_v20, %v10429_v16  ;;  %v19840_v4 = vld [vmem:[#allocation37_spill] sm:$0xff] }
0x1257   : > { %v12895_v49 = vpop.f32.mrf.mxu0 }
0x1258   : > { %vm10606_vm15 = vcmp.gt.f32.partialorder %v10598_v15, 0.5  ;;  %v10596_v56 = vadd.f32 %v10588_v11, %v10430_v22  ;;  %v10441_v13 = vadd.f32 %v12895_v49, %v19121_v20  ;;  %v19842_v11 = vld [vmem:[#allocation32_spill] sm:$0xff] }
0x1259   : > { %v11418_v36 = vsel %vm10606_vm15, 1.0, %v19566_v12  ;;  %v10432_v44 = vpop.f32.mrf.mxu0 }
0x125a   : > { %v10702_v27 = vadd.f32 %v11418_v36, %v19839_v23  ;;  %vm10604_vm2 = vcmp.gt.f32.partialorder %v10596_v56, 0.5  ;;  %v10599_v7 = vadd.f32 %v10591_v55, %v10441_v13  ;;  %v10433_v21 = vadd.f32 %v19121_v20, %v10432_v44 }
0x125b   : > { %v11416_v3 = vsel %vm10604_vm2, 1.0, %v19566_v12  ;;  %v10638_v39 = vsub.f32 1.0, %v11418_v36  ;;  %v10630_v55 = vmul.f32 0.25, %v10598_v15  ;;  %v10628_v24 = vmul.f32 0.25, %v10596_v56  ;;  %v19846_v56 = vld [vmem:[#allocation38_spill] sm:$0xff] }
0x125c   : > { %10734 = vst.msk [vmem:[%s19130_s25 + $0x90] sm:$0xff] %vm501_vm0, %v10702_v27  ;;  %v10700_v2 = vadd.f32 %v11416_v3, %v19840_v4  ;;  %vm10607_vm5 = vcmp.gt.f32.partialorder %v10599_v7, 0.5  ;;  %v10597_v10 = vadd.f32 %v10589_v60, %v10433_v21  ;;  %v10636_v32 = vsub.f32 1.0, %v11416_v3  ;;  %v19847_v27 = vld [vmem:[#allocation74_spill] sm:$0xff] }
0x125d   : > { %v11419_v29 = vsel %vm10607_vm5, 1.0, %v19566_v12  ;;  %v12898_v41 = vpop.f32.mrf.mxu0  ;;  %v10646_v63 = vmul.f32 %v10638_v39, %v10630_v55 }
0x125e   : > { %10732 = vst.msk [vmem:[%s19130_s25 + $0x80] sm:$0xff] %vm501_vm0, %v10700_v2  ;;  %v10703_v34 = vadd.f32 %v11419_v29, %v19841_v0  ;;  %vm10605_vm3 = vcmp.gt.f32.partialorder %v10597_v10, 0.5  ;;  %v10454_v50 = vadd.f32 %v12898_v41, %v19121_v20  ;;  %v10639_v43 = vsub.f32 1.0, %v11419_v29 }
0x125f   : > { %v11417_v35 = vsel %vm10605_vm3, 1.0, %v19566_v12  ;;  %v10445_v5 = vpop.f32.mrf.mxu0  ;;  %v10629_v62 = vmul.f32 0.25, %v10597_v10  ;;  %v10644_v59 = vmul.f32 %v10636_v32, %v10628_v24 }
0x1260   : > { %10735 = vst.msk [vmem:[%s19130_s25 + $0x98] sm:$0xff] %vm501_vm0, %v10703_v34  ;;  %v10701_v48 = vadd.f32 %v11417_v35, %v19842_v11  ;;  %v10602_v19 = vadd.f32 %v10594_v33, %v10454_v50  ;;  %v10446_v42 = vadd.f32 %v19121_v20, %v10445_v5  ;;  %v10637_v8 = vsub.f32 1.0, %v11417_v35  ;;  %v19848_v34 = vld [vmem:[#allocation49_spill] sm:$0xff] }
0x1261   : > { %v12899_v40 = vpop.f32.mrf.mxu0 }
0x1262   : > { %10733 = vst.msk [vmem:[%s19130_s25 + $0x88] sm:$0xff] %vm501_vm0, %v10701_v48  ;;  %vm10610_vm4 = vcmp.gt.f32.partialorder %v10602_v19, 0.5  ;;  %v10600_v51 = vadd.f32 %v10592_v17, %v10446_v42  ;;  %v10457_v38 = vadd.f32 %v12899_v40, %v19121_v20  ;;  %v10631_v17 = vmul.f32 0.25, %v10599_v7  ;;  %v19849_v40 = vld [vmem:[#allocation48_spill] sm:$0xff] }
0x1263   : > { %v11422_v46 = vsel %vm10610_vm4, 1.0, %v19566_v12  ;;  %v10448_v47 = vpop.f32.mrf.mxu0  ;;  %v10645_v52 = vmul.f32 %v10637_v8, %v10629_v62  ;;  %v10634_v49 = vmul.f32 0.25, %v10602_v19 }
0x1264   : > { %v10706_v1 = vadd.f32 %v11422_v46, %v19843_v26  ;;  %vm10608_vm6 = vcmp.gt.f32.partialorder %v10600_v51, 0.5  ;;  %v10603_v54 = vadd.f32 %v10595_v9, %v10457_v38  ;;  %v10449_v53 = vadd.f32 %v19121_v20, %v10448_v47  ;;  %v19850_v26 = vld [vmem:[#allocation42_spill] sm:$0xff] }
0x1265   : > { %v11420_v45 = vsel %vm10608_vm6, 1.0, %v19566_v12  ;;  %v12902_v61 = vpop.f32.mrf.mxu0  ;;  %v10647_v58 = vmul.f32 %v10639_v43, %v10631_v17  ;;  %v10642_v16 = vsub.f32 1.0, %v11422_v46  ;;  %v10632_v4 = vmul.f32 0.25, %v10600_v51  ;;  %v19851_v43 = vld [vmem:[#allocation35_spill] sm:$0xff] }
0x1266   : > { %10738 = vst.msk [vmem:[%s19130_s25 + $0xb0] sm:$0xff] %vm501_vm0, %v10706_v1  ;;  %v10704_v60 = vadd.f32 %v11420_v45, %v19844_v6  ;;  %vm10611_vm7 = vcmp.gt.f32.partialorder %v10603_v54, 0.5  ;;  %v10470_v33 = vadd.f32 %v12902_v61, %v19121_v20  ;;  %v10601_v14 = vadd.f32 %v10593_v30, %v10449_v53 }
0x1267   : > { %v11423_v37 = vsel %vm10611_vm7, 1.0, %v19566_v12  ;;  %v10461_v18 = vpop.f32.mrf.mxu0  ;;  %v10640_v23 = vsub.f32 1.0, %v11420_v45  ;;  %v10650_v10 = vmul.f32 %v10642_v16, %v10634_v49  ;;  %v10635_v11 = vmul.f32 0.25, %v10603_v54 }
0x1268   : > { %10736 = vst.msk [vmem:[%s19130_s25 + $0xa0] sm:$0xff] %vm501_vm0, %v10704_v60  ;;  %v10707_v57 = vadd.f32 %v11423_v37, %v19845_v28  ;;  %v10654_v25 = vadd.f32 %v10646_v63, %v10470_v33  ;;  %v10462_v31 = vadd.f32 %v19121_v20, %v10461_v18  ;;  %vm10609_vm8 = vcmp.gt.f32.partialorder %v10601_v14, 0.5  ;;  %v19852_v63 = vld [vmem:[#allocation76_spill] sm:$0xff] }
0x1269   : > { %v12903_v9 = vpop.f32.mrf.mxu0  ;;  %v11421_v15 = vsel %vm10609_vm8, 1.0, %v19566_v12  ;;  %v10643_v0 = vsub.f32 1.0, %v11423_v37  ;;  %v10648_v19 = vmul.f32 %v10640_v23, %v10632_v4  ;;  %v10633_v55 = vmul.f32 0.25, %v10601_v14  ;;  %v19853_v14 = vld [vmem:[#allocation78_spill] sm:$0xff] }
0x126a   : > { %10739 = vst.msk [vmem:[%s19130_s25 + $0xb8] sm:$0xff] %vm501_vm0, %v10707_v57  ;;  %vm10662_vm9 = vcmp.gt.f32.partialorder %v10654_v25, 0.5  ;;  %v10652_v30 = vadd.f32 %v10644_v59, %v10462_v31  ;;  %v10473_v22 = vadd.f32 %v12903_v9, %v19121_v20  ;;  %v10705_v13 = vadd.f32 %v11421_v15, %v19846_v56 }
0x126b   : > { %v11426_v36 = vsel %vm10662_vm9, 1.0, %v19566_v12  ;;  %v10464_v44 = vpop.f32.mrf.mxu0  ;;  %v10641_v42 = vsub.f32 1.0, %v11421_v15  ;;  %v10651_v47 = vmul.f32 %v10643_v0, %v10635_v11 }
0x126c   : > { %v10710_v7 = vadd.f32 %v11426_v36, %v19847_v27  ;;  %vm10660_vm10 = vcmp.gt.f32.partialorder %v10652_v30, 0.5  ;;  %v10655_v3 = vadd.f32 %v10647_v58, %v10473_v22  ;;  %v10465_v21 = vadd.f32 %v19121_v20, %v10464_v44  ;;  %10737 = vst.msk [vmem:[%s19130_s25 + $0xa8] sm:$0xff] %vm501_vm0, %v10705_v13 }
0x126d   : > { %v11424_v2 = vsel %vm10660_vm10, 1.0, %v19566_v12  ;;  %v12906_v29 = vpop.f32.mrf.mxu0  ;;  %v10649_v61 = vmul.f32 %v10641_v42, %v10633_v55 }
0x126e   : > { %10742 = vst.msk [vmem:[%s19130_s25 + $0xd0] sm:$0xff] %vm501_vm0, %v10710_v7  ;;  %v10708_v41 = vadd.f32 %v11424_v2, %v19848_v34  ;;  %vm10663_vm11 = vcmp.gt.f32.partialorder %v10655_v3, 0.5  ;;  %v10653_v35 = vadd.f32 %v10645_v52, %v10465_v21  ;;  %v10486_v50 = vadd.f32 %v12906_v29, %v19121_v20 }
0x126f   : > { %v11427_v48 = vsel %vm10663_vm11, 1.0, %v19566_v12  ;;  %v10477_v5 = vpop.f32.mrf.mxu0 }
0x1270   : > { %10740 = vst.msk [vmem:[%s19130_s25 + $0xc0] sm:$0xff] %vm501_vm0, %v10708_v41  ;;  %v10711_v51 = vadd.f32 %v11427_v48, %v19849_v40  ;;  %vm10661_vm1 = vcmp.gt.f32.partialorder %v10653_v35, 0.5  ;;  %v10658_v38 = vadd.f32 %v10650_v10, %v10486_v50  ;;  %v10478_v39 = vadd.f32 %v19121_v20, %v10477_v5 }
0x1271   : > { %v11425_v24 = vsel %vm10661_vm1, 1.0, %v19566_v12  ;;  %v12907_v46 = vpop.f32.mrf.mxu0 }
0x1272   : > { %10743 = vst.msk [vmem:[%s19130_s25 + $0xd8] sm:$0xff] %vm501_vm0, %v10711_v51  ;;  %v10709_v1 = vadd.f32 %v11425_v24, %v19850_v26  ;;  %vm10666_vm12 = vcmp.gt.f32.partialorder %v10658_v38, 0.5  ;;  %v10656_v54 = vadd.f32 %v10648_v19, %v10478_v39  ;;  %v10489_v32 = vadd.f32 %v12907_v46, %v19121_v20 }
0x1273   : > { %v11430_v45 = vsel %vm10666_vm12, 1.0, %v19566_v12  ;;  %v10480_v53 = vpop.f32.mrf.mxu0 }
0x1274   : > { %10741 = vst.msk [vmem:[%s19130_s25 + $0xc8] sm:$0xff] %vm501_vm0, %v10709_v1  ;;  %v10714_v8 = vadd.f32 %v11430_v45, %v19851_v43  ;;  %vm10664_vm13 = vcmp.gt.f32.partialorder %v10656_v54, 0.5  ;;  %v10659_v6 = vadd.f32 %v10651_v47, %v10489_v32  ;;  %v10481_v60 = vadd.f32 %v19121_v20, %v10480_v53  ;;  %v19854_v20 = vld [vmem:[#allocation77_spill] sm:$0xff] }
0x1275   : > { %v11428_v33 = vsel %vm10664_vm13, 1.0, %v19566_v12 }
0x1276   : > { %10746 = vst.msk [vmem:[%s19130_s25 + $0xf0] sm:$0xff] %vm501_vm0, %v10714_v8  ;;  %v10712_v17 = vadd.f32 %v11428_v33, %v19852_v63  ;;  %vm10667_vm14 = vcmp.gt.f32.partialorder %v10659_v6, 0.5  ;;  %v10657_v62 = vadd.f32 %v10649_v61, %v10481_v60 }
0x1277   : > { %v11431_v37 = vsel %vm10667_vm14, 1.0, %v19566_v12 }
0x1278   : > { %10744 = vst.msk [vmem:[%s19130_s25 + $0xe0] sm:$0xff] %vm501_vm0, %v10712_v17  ;;  %v10715_v18 = vadd.f32 %v11431_v37, %v19853_v14  ;;  %vm10665_vm15 = vcmp.gt.f32.partialorder %v10657_v62, 0.5 }
0x1279   : > { %v11429_v28 = vsel %vm10665_vm15, 1.0, %v19566_v12 }
0x127a   : > { %10747 = vst.msk [vmem:[%s19130_s25 + $0xf8] sm:$0xff] %vm501_vm0, %v10715_v18  ;;  %v10713_v57 = vadd.f32 %v11429_v28, %v19854_v20 }
0x127c   : > { %10745 = vst.msk [vmem:[%s19130_s25 + $0xe8] sm:$0xff] %vm501_vm0, %v10713_v57 }
0x127d PF: > { %s24_s29 = sadd.s32 1, %s13967_s29  }
0x127e   : > { %p21_p4 = scmp.ge.s32.totalorder %s24_s29, 4  }
0x1280   :  { %23 = sbr.rel (!%p21_p4) target bundleno = 1 (0x1), region = 109 }

</bundles_post_ra>
